<compile_context>
chip_gen: v6e
topology: v6e:2x2x1
jax: 0.10.0
libtpu: 0.0.40
codegen_flags: <defaults>
</compile_context>

<pallas_src>
import functools

import jax
import jax.numpy as jnp
from jax import lax
from jax.experimental import pallas as pl
from jax.experimental.pallas import tpu as pltpu


def _round_up(x, m):
    return (x + m - 1) // m * m


def _cparams(*sem):
    return pltpu.CompilerParams(
        dimension_semantics=sem,
        # Explicit VMEM budget: leaves headroom under v7x's 64 MiB physical VMEM.
        vmem_limit_bytes=48 * 1024 * 1024,
    )


# ------------- fused conv3x3 + bias + ReLU + maxpool2x2 as one im2col matmul kernel ------------- #
def _conv_relu_pool_kernel(x_ref, w_ref, b_ref, o_ref, s_ref):
    # x_ref: (4*Mop, K) im2col patches for ONE batch element.  Rows are ordered (r, s, i, j)
    #        where (i, j) is the pooled output pixel and (r, s) the position inside its 2x2
    #        pool window, so the four pool candidates of output row m live at rows
    #        {m, Mop+m, 2*Mop+m, 3*Mop+m}: the max-pool is four contiguous 8-aligned row-block
    #        maxes -- no reshapes, no relayouts, no loops inside the kernel.
    # w_ref: (K, Cout) f32; b_ref: (1, Cout) f32; o_ref: (Mop, Cout); s_ref: VMEM (4*Mop, Cout)
    mo = o_ref.shape[0]
    acc = jnp.dot(x_ref[...], w_ref[...], preferred_element_type=jnp.float32)   # MXU
    s_ref[...] = jnp.maximum(acc + b_ref[...], 0.0)                             # bias + ReLU
    p01 = jnp.maximum(s_ref[0 * mo:1 * mo, :], s_ref[1 * mo:2 * mo, :])
    p23 = jnp.maximum(s_ref[2 * mo:3 * mo, :], s_ref[3 * mo:4 * mo, :])
    o_ref[...] = jnp.maximum(p01, p23).astype(o_ref.dtype)                      # 2x2 max-pool


def conv3x3_relu_pool(x, w, b):
    # x: (B, H, W, Cin); w: (9, Cin, Cout) tap-major; b: (1, Cout)
    # returns maxpool2x2(relu(conv2d_3x3_pad1(x) + b)) as (B, H//2, W//2, Cout) f32.
    B, H, W, Cin = x.shape
    Cout = w.shape[-1]
    Hout, Wout = H // 2, W // 2                       # PyTorch MaxPool2d floor semantics
    Mo = Hout * Wout
    Mop = _round_up(Mo, 8)                            # 8-aligned pool blocks / matmul rows
    K = 9 * Cin

    # im2col in the wrapper: plain XLA data movement in HBM (a few hundred KiB here).
    xp = jnp.pad(x, ((0, 0), (1, 1), (1, 1), (0, 0)))
    taps = [xp[:, kh:kh + 2 * Hout, kw:kw + 2 * Wout, :]
            for kh in range(3) for kw in range(3)]                    # 9 x (B, 2Hout, 2Wout, Cin)
    pat = jnp.stack(taps, axis=3)                                     # (B, 2Hout, 2Wout, 9, Cin)
    pat = pat.reshape(B, Hout, 2, Wout, 2, K)                         # split pool cells
    pat = jnp.transpose(pat, (0, 2, 4, 1, 3, 5))                      # (B, r, s, i, j, K)
    pat = pat.reshape(B, 4, Mo, K)
    pat = jnp.pad(pat, ((0, 0), (0, 0), (0, Mop - Mo), (0, 0)))       # align each pool block
    cols = pat.reshape(B, 4 * Mop, K).astype(jnp.float32)

    w2 = w.reshape(K, Cout).astype(jnp.float32)
    b2 = b.reshape(1, Cout).astype(jnp.float32)

    out = pl.pallas_call(
        _conv_relu_pool_kernel,
        grid=(B,),
        in_specs=[
            pl.BlockSpec((None, 4 * Mop, K), lambda bi: (bi, 0, 0)),
            pl.BlockSpec((K, Cout), lambda bi: (0, 0)),
            pl.BlockSpec((1, Cout), lambda bi: (0, 0)),
        ],
        out_specs=pl.BlockSpec((None, Mop, Cout), lambda bi: (bi, 0, 0)),
        out_shape=jax.ShapeDtypeStruct((B, Mop, Cout), jnp.float32),
        scratch_shapes=[pltpu.VMEM((4 * Mop, Cout), jnp.float32)],
        compiler_params=_cparams("parallel"),
    )(cols, w2, b2)
    return out[:, :Mo].reshape(B, Hout, Wout, Cout)


# ----------------------------- tiled matmul + bias (+ ReLU) kernel ----------------------------- #
def _matmul_kernel(a_ref, w_ref, b_ref, o_ref, acc_ref, *, relu):
    k = pl.program_id(2)

    @pl.when(k == 0)
    def _init():
        acc_ref[...] = jnp.zeros_like(acc_ref)

    acc_ref[...] += jnp.dot(a_ref[...], w_ref[...], preferred_element_type=jnp.float32)

    @pl.when(k == pl.num_programs(2) - 1)
    def _finalize():
        res = acc_ref[...] + b_ref[...]
        if relu:
            res = jnp.maximum(res, 0.0)
        o_ref[...] = res.astype(o_ref.dtype)


def matmul_bias_act(a, w, b, *, relu=False, out_dtype=jnp.float32):
    # a: (M, K), w: (K, N), b: (N,) or (1, N)  ->  (M, N).
    # bf16 MXU operands, f32 accumulation; lane-dense (>=128) padded N inside the kernel,
    # sliced back here in the wrapper.
    M, K = a.shape
    N = w.shape[1]
    a = a.astype(jnp.bfloat16)
    w = w.astype(jnp.bfloat16)
    b = b.reshape(1, N).astype(jnp.float32)

    tm = min(256, _round_up(M, 8))
    tn = min(256, _round_up(N, 128))
    Kp = _round_up(K, 128)
    tk = min(512, Kp)
    while Kp % tk:                     # prefer a 128-multiple K tile with zero padding waste
        tk += 128
    Mp, Np = _round_up(M, tm), _round_up(N, tn)
    a = jnp.pad(a, ((0, Mp - M), (0, Kp - K)))
    w = jnp.pad(w, ((0, Kp - K), (0, Np - N)))
    b = jnp.pad(b, ((0, 0), (0, Np - N)))

    out = pl.pallas_call(
        functools.partial(_matmul_kernel, relu=relu),
        grid=(Mp // tm, Np // tn, Kp // tk),
        in_specs=[
            pl.BlockSpec((tm, tk), lambda i, j, k: (i, k)),
            pl.BlockSpec((tk, tn), lambda i, j, k: (k, j)),
            pl.BlockSpec((1, tn), lambda i, j, k: (0, j)),
        ],
        out_specs=pl.BlockSpec((tm, tn), lambda i, j, k: (i, j)),
        out_shape=jax.ShapeDtypeStruct((Mp, Np), out_dtype),
        scratch_shapes=[pltpu.VMEM((tm, tn), jnp.float32)],
        compiler_params=_cparams("parallel", "parallel", "arbitrary"),
    )(a, w, b)
    return out[:M, :N]


# --------------------------------------- bidirectional LSTM ------------------------------------ #
def _bilstm_recurrence_kernel(g_ref, whh_ref, o_ref):
    # g_ref:   (T, Bp, 4H) f32 precomputed x @ W_ih + (b_ih + b_hh) for THIS direction
    # whh_ref: (H, 4H) bf16 recurrent weights for this direction
    # o_ref:   (T, Bp, H) f32 -- this direction's 128-lane half of the shared output
    T, Bp, _ = g_ref.shape
    H = whh_ref.shape[0]
    d = pl.program_id(0)                  # 0 = forward, 1 = backward
    whh = whh_ref[...]                    # load recurrent weights once per kernel invocation

    def step(s, carry):
        h_prev, c_prev = carry            # (Bp, H) f32
        t = jnp.where(d == 0, s, T - 1 - s)    # reverse handled in-kernel (no flipped copies)
        gates = g_ref[t] + jnp.dot(h_prev.astype(jnp.bfloat16), whh,
                                   preferred_element_type=jnp.float32)   # (Bp, 4H)
        i_g = jax.nn.sigmoid(gates[:, 0 * H:1 * H])
        f_g = jax.nn.sigmoid(gates[:, 1 * H:2 * H])
        g_g = jnp.tanh(gates[:, 2 * H:3 * H])
        o_g = jax.nn.sigmoid(gates[:, 3 * H:4 * H])
        c_new = f_g * c_prev + i_g * g_g
        h_new = o_g * jnp.tanh(c_new)
        o_ref[t] = h_new.astype(o_ref.dtype)
        return (h_new, c_new)

    zeros = jnp.zeros((Bp, H), jnp.float32)
    lax.fori_loop(0, T, step, (zeros, zeros))


def bilstm_layer(x_tbd, wih, whh, b):
    # x_tbd: (T, Bp, Din); wih: (Din, 8H) = [fwd | bwd]; whh: (2, H, 4H); b: (1, 8H).
    # Returns (T, Bp, 2H) with the forward output in lanes [:H] and backward in [H:].
    T, Bp, Din = x_tbd.shape
    H = whh.shape[1]
    # Input projection for all timesteps & both directions as one big tiled bf16 matmul
    # (hoisted off the serial critical path of the recurrence).
    gates = matmul_bias_act(x_tbd.reshape(T * Bp, Din), wih, b,
                            relu=False, out_dtype=jnp.float32)
    gates = gates.reshape(T, Bp, 8 * H)
    whh = whh.astype(jnp.bfloat16)
    return pl.pallas_call(
        _bilstm_recurrence_kernel,
        grid=(2,),                                     # direction; both TCs on v7x
        in_specs=[
            pl.BlockSpec((T, Bp, 4 * H), lambda d: (0, 0, d)),
            pl.BlockSpec((None, H, 4 * H), lambda d: (d, 0, 0)),
        ],
        out_specs=pl.BlockSpec((T, Bp, H), lambda d: (0, 0, d)),
        out_shape=jax.ShapeDtypeStruct((T, Bp, 2 * H), jnp.float32),
        compiler_params=_cparams("parallel"),
    )(gates, whh)


# ------------------------------------------- forward ------------------------------------------- #
def asr_forward(x_nchw, p):
    B = x_nchw.shape[0]
    x = jnp.transpose(x_nchw, (0, 2, 3, 1))                        # NCHW -> NHWC (C=1)
    x = conv3x3_relu_pool(x, p["conv1_w"], p["conv1_b"])           # (B, H/2, W/2, 32)
    x = conv3x3_relu_pool(x, p["conv2_w"], p["conv2_b"])           # (B, H/4, W/4, 64)
    # dropout1(0.25): identity at inference time.
    # TODO(synk): training-mode dropout (pltpu.prng_* mask) not implemented.
    _, H4, W4, C = x.shape
    # PyTorch: permute(0,3,1,2).view(B, T, C*H) on NCHW == time-major (W4, B, C*H4) here.
    feats = jnp.transpose(x, (2, 0, 3, 1)).reshape(W4, B, C * H4)  # (T, B, 3200)
    Bp = _round_up(B, 8)                                           # >= 8 sublanes in recurrence
    feats = jnp.pad(feats, ((0, 0), (0, Bp - B), (0, 0)))
    h = bilstm_layer(feats, p["lstm0"]["wih"], p["lstm0"]["whh"], p["lstm0"]["b"])
    h = bilstm_layer(h, p["lstm1"]["wih"], p["lstm1"]["whh"], p["lstm1"]["b"])
    T, _, F = h.shape
    logits = matmul_bias_act(h.reshape(T * Bp, F), p["fc_w"], p["fc_b"], relu=False)
    logits = logits.reshape(T, Bp, -1)[:, :B]                      # drop batch padding
    return jnp.transpose(logits, (1, 0, 2))                        # (B, T, 29)


# ----------------------------------------- params init ----------------------------------------- #
def init_params(key):
    H = 128

    def nrm(k, shape, scale=0.05):
        return scale * jax.random.normal(k, shape, jnp.float32)

    ks = jax.random.split(key, 8)
    p = {
        # conv weights are tap-major: w[kh*3+kw, ci, co] == torch_w[co, ci, kh, kw]
        "conv1_w": nrm(ks[0], (9, 1, 32)),
        "conv1_b": nrm(ks[1], (1, 32)),
        "conv2_w": nrm(ks[2], (9, 32, 64)),
        "conv2_b": nrm(ks[3], (1, 64)),
        "fc_w": nrm(ks[4], (2 * H, 29)),
        "fc_b": nrm(ks[5], (29,)),
    }

    def lstm_layer_params(k, din):
        k1, k2, k3 = jax.random.split(k, 3)
        return {
            # W_ih^T for [forward | backward] stacked along the 8H axis; gate order i,f,g,o
            "wih": nrm(k1, (din, 8 * H)),
            # W_hh^T per direction
            "whh": nrm(k2, (2, H, 4 * H)),
            # combined b_ih + b_hh for [forward | backward]
            "b": nrm(k3, (1, 8 * H)),
        }

    p["lstm0"] = lstm_layer_params(ks[6], 3200)
    p["lstm1"] = lstm_layer_params(ks[7], 2 * H)
    return p


if __name__ == "__main__":
    key = jax.random.PRNGKey(0)
    pkey, xkey = jax.random.split(key)
    params = init_params(pkey)
    # Input (B, 1, n_mels, frames) = (2, 1, 200, 8): after two 2x2 pools the per-timestep
    # feature dim is 64 * (200 // 4) = 3200 (the LSTM input size hard-coded in the module);
    # T = 8 // 4 = 2.
    x = jax.random.normal(xkey, (2, 1, 200, 8), jnp.float32)
    out = jax.block_until_ready(jax.jit(asr_forward)(x, params))
    assert out.shape == (2, 2, 29), out.shape
    assert bool(jnp.all(jnp.isfinite(out)))
    print("KERNEL_OK")
</pallas_src>

<mosaic_0001>
module attributes {stable_mosaic.version = 11 : i64} {
  func.func @_conv_relu_pool_kernel(%arg0: i32, %arg1: memref<1x1600x9xf32, #tpu.memory_space<vmem>>, %arg2: memref<9x32xf32, #tpu.memory_space<vmem>>, %arg3: memref<1x32xf32, #tpu.memory_space<vmem>>, %arg4: memref<1x400x32xf32, #tpu.memory_space<vmem>>, %arg5: memref<1600x32xf32, #tpu.memory_space<vmem>>) attributes {dimension_semantics = [#tpu.dimension_semantics<parallel>], iteration_bounds = array<i64: 2>, scalar_prefetch = 0 : i64, scratch_operands = 1 : i64, tpu.core_type = #tpu.core_type<tc>, window_params = [{transform_indices = @transform_0, window_bounds = array<i64: 1, 1600, 9>}, {pipeline_mode = #tpu.pipeline_mode<synchronous>, transform_indices = @transform_1, window_bounds = array<i64: 9, 32>}, {pipeline_mode = #tpu.pipeline_mode<synchronous>, transform_indices = @transform_2, window_bounds = array<i64: 1, 32>}, {transform_indices = @transform_3, window_bounds = array<i64: 1, 400, 32>}]} {
    %c0 = arith.constant 0 : index
    %c0_0 = arith.constant 0 : index
    %c0_1 = arith.constant 0 : index
    %0 = vector.load %arg1[%c0, %c0_0, %c0_1] : memref<1x1600x9xf32, #tpu.memory_space<vmem>>, vector<1x1600x9xf32>
    %1 = vector.shape_cast %0 : vector<1x1600x9xf32> to vector<1600x9xf32>
    %c0_2 = arith.constant 0 : index
    %c0_3 = arith.constant 0 : index
    %2 = vector.load %arg2[%c0_2, %c0_3] : memref<9x32xf32, #tpu.memory_space<vmem>>, vector<9x32xf32>
    %cst = arith.constant dense<0.000000e+00> : vector<1600x32xf32>
    %3 = tpu.matmul %1, %2, %cst {dimension_numbers = #tpu.dot_dimension_numbers<[1], [0], [0], [1], [0, 0, 1, 1], [], []>} : vector<1600x9xf32>, vector<9x32xf32>, vector<1600x32xf32> -> vector<1600x32xf32>
    %c0_4 = arith.constant 0 : index
    %c0_5 = arith.constant 0 : index
    %4 = vector.load %arg3[%c0_4, %c0_5] : memref<1x32xf32, #tpu.memory_space<vmem>>, vector<1x32xf32>
    %5 = vector.broadcast %4 : vector<1x32xf32> to vector<1600x32xf32>
    %6 = arith.addf %3, %5 : vector<1600x32xf32>
    %cst_6 = arith.constant 0.000000e+00 : f32
    %7 = vector.broadcast %cst_6 : f32 to vector<1600x32xf32>
    %8 = arith.maximumf %6, %7 : vector<1600x32xf32>
    %c0_7 = arith.constant 0 : index
    %c0_8 = arith.constant 0 : index
    %9 = vector.load %arg5[%c0_7, %c0_8] : memref<1600x32xf32, #tpu.memory_space<vmem>>, vector<1600x32xf32>
    tpu.vector_store %arg5[%c0_7, %c0_8], %8 {strides = array<i32>} : memref<1600x32xf32, #tpu.memory_space<vmem>>, vector<1600x32xf32>,
    %c0_9 = arith.constant 0 : index
    %c0_10 = arith.constant 0 : index
    %10 = vector.load %arg5[%c0_9, %c0_10] : memref<1600x32xf32, #tpu.memory_space<vmem>>, vector<400x32xf32>
    %c400 = arith.constant 400 : index
    %c0_11 = arith.constant 0 : index
    %11 = vector.load %arg5[%c400, %c0_11] : memref<1600x32xf32, #tpu.memory_space<vmem>>, vector<400x32xf32>
    %12 = arith.maximumf %10, %11 : vector<400x32xf32>
    %c800 = arith.constant 800 : index
    %c0_12 = arith.constant 0 : index
    %13 = vector.load %arg5[%c800, %c0_12] : memref<1600x32xf32, #tpu.memory_space<vmem>>, vector<400x32xf32>
    %c1200 = arith.constant 1200 : index
    %c0_13 = arith.constant 0 : index
    %14 = vector.load %arg5[%c1200, %c0_13] : memref<1600x32xf32, #tpu.memory_space<vmem>>, vector<400x32xf32>
    %15 = arith.maximumf %13, %14 : vector<400x32xf32>
    %16 = arith.maximumf %12, %15 : vector<400x32xf32>
    %c0_14 = arith.constant 0 : index
    %c0_15 = arith.constant 0 : index
    %c0_16 = arith.constant 0 : index
    %17 = vector.load %arg4[%c0_14, %c0_15, %c0_16] : memref<1x400x32xf32, #tpu.memory_space<vmem>>, vector<1x400x32xf32>
    %18 = vector.shape_cast %17 : vector<1x400x32xf32> to vector<400x32xf32>
    %19 = vector.shape_cast %16 : vector<400x32xf32> to vector<1x400x32xf32>
    tpu.vector_store %arg4[%c0_14, %c0_15, %c0_16], %19 {strides = array<i32>} : memref<1x400x32xf32, #tpu.memory_space<vmem>>, vector<1x400x32xf32>,
    return
  }
  func.func @transform_0(%arg0: i32) -> (i32, i32, i32) {
    %c0_i32 = arith.constant 0 : i32
    %c0_i32_0 = arith.constant 0 : i32
    %c0_i32_1 = arith.constant 0 : i32
    return %arg0, %c0_i32, %c0_i32_0 : i32, i32, i32
  }
  func.func @transform_1(%arg0: i32) -> (i32, i32) {
    %c0_i32 = arith.constant 0 : i32
    %c0_i32_0 = arith.constant 0 : i32
    %c0_i32_1 = arith.constant 0 : i32
    return %c0_i32, %c0_i32_0 : i32, i32
  }
  func.func @transform_2(%arg0: i32) -> (i32, i32) {
    %c0_i32 = arith.constant 0 : i32
    %c0_i32_0 = arith.constant 0 : i32
    %c0_i32_1 = arith.constant 0 : i32
    return %c0_i32, %c0_i32_0 : i32, i32
  }
  func.func @transform_3(%arg0: i32) -> (i32, i32, i32) {
    %c0_i32 = arith.constant 0 : i32
    %c0_i32_0 = arith.constant 0 : i32
    %c0_i32_1 = arith.constant 0 : i32
    return %arg0, %c0_i32, %c0_i32_0 : i32, i32, i32
  }
}

module attributes {stable_mosaic.version = 11 : i64} {
  func.func @_conv_relu_pool_kernel(%arg0: i32, %arg1: memref<1x416x288xf32, #tpu.memory_space<vmem>>, %arg2: memref<288x64xf32, #tpu.memory_space<vmem>>, %arg3: memref<1x64xf32, #tpu.memory_space<vmem>>, %arg4: memref<1x104x64xf32, #tpu.memory_space<vmem>>, %arg5: memref<416x64xf32, #tpu.memory_space<vmem>>) attributes {dimension_semantics = [#tpu.dimension_semantics<parallel>], iteration_bounds = array<i64: 2>, scalar_prefetch = 0 : i64, scratch_operands = 1 : i64, tpu.core_type = #tpu.core_type<tc>, window_params = [{transform_indices = @transform_0, window_bounds = array<i64: 1, 416, 288>}, {pipeline_mode = #tpu.pipeline_mode<synchronous>, transform_indices = @transform_1, window_bounds = array<i64: 288, 64>}, {pipeline_mode = #tpu.pipeline_mode<synchronous>, transform_indices = @transform_2, window_bounds = array<i64: 1, 64>}, {transform_indices = @transform_3, window_bounds = array<i64: 1, 104, 64>}]} {
    %c0 = arith.constant 0 : index
    %c0_0 = arith.constant 0 : index
    %c0_1 = arith.constant 0 : index
    %0 = vector.load %arg1[%c0, %c0_0, %c0_1] : memref<1x416x288xf32, #tpu.memory_space<vmem>>, vector<1x416x288xf32>
    %1 = vector.shape_cast %0 : vector<1x416x288xf32> to vector<416x288xf32>
    %c0_2 = arith.constant 0 : index
    %c0_3 = arith.constant 0 : index
    %2 = vector.load %arg2[%c0_2, %c0_3] : memref<288x64xf32, #tpu.memory_space<vmem>>, vector<288x64xf32>
    %cst = arith.constant dense<0.000000e+00> : vector<416x64xf32>
    %3 = tpu.matmul %1, %2, %cst {dimension_numbers = #tpu.dot_dimension_numbers<[1], [0], [0], [1], [0, 0, 1, 1], [], []>} : vector<416x288xf32>, vector<288x64xf32>, vector<416x64xf32> -> vector<416x64xf32>
    %c0_4 = arith.constant 0 : index
    %c0_5 = arith.constant 0 : index
    %4 = vector.load %arg3[%c0_4, %c0_5] : memref<1x64xf32, #tpu.memory_space<vmem>>, vector<1x64xf32>
    %5 = vector.broadcast %4 : vector<1x64xf32> to vector<416x64xf32>
    %6 = arith.addf %3, %5 : vector<416x64xf32>
    %cst_6 = arith.constant 0.000000e+00 : f32
    %7 = vector.broadcast %cst_6 : f32 to vector<416x64xf32>
    %8 = arith.maximumf %6, %7 : vector<416x64xf32>
    %c0_7 = arith.constant 0 : index
    %c0_8 = arith.constant 0 : index
    %9 = vector.load %arg5[%c0_7, %c0_8] : memref<416x64xf32, #tpu.memory_space<vmem>>, vector<416x64xf32>
    tpu.vector_store %arg5[%c0_7, %c0_8], %8 {strides = array<i32>} : memref<416x64xf32, #tpu.memory_space<vmem>>, vector<416x64xf32>,
    %c0_9 = arith.constant 0 : index
    %c0_10 = arith.constant 0 : index
    %10 = vector.load %arg5[%c0_9, %c0_10] : memref<416x64xf32, #tpu.memory_space<vmem>>, vector<104x64xf32>
    %c104 = arith.constant 104 : index
    %c0_11 = arith.constant 0 : index
    %11 = vector.load %arg5[%c104, %c0_11] : memref<416x64xf32, #tpu.memory_space<vmem>>, vector<104x64xf32>
    %12 = arith.maximumf %10, %11 : vector<104x64xf32>
    %c208 = arith.constant 208 : index
    %c0_12 = arith.constant 0 : index
    %13 = vector.load %arg5[%c208, %c0_12] : memref<416x64xf32, #tpu.memory_space<vmem>>, vector<104x64xf32>
    %c312 = arith.constant 312 : index
    %c0_13 = arith.constant 0 : index
    %14 = vector.load %arg5[%c312, %c0_13] : memref<416x64xf32, #tpu.memory_space<vmem>>, vector<104x64xf32>
    %15 = arith.maximumf %13, %14 : vector<104x64xf32>
    %16 = arith.maximumf %12, %15 : vector<104x64xf32>
    %c0_14 = arith.constant 0 : index
    %c0_15 = arith.constant 0 : index
    %c0_16 = arith.constant 0 : index
    %17 = vector.load %arg4[%c0_14, %c0_15, %c0_16] : memref<1x104x64xf32, #tpu.memory_space<vmem>>, vector<1x104x64xf32>
    %18 = vector.shape_cast %17 : vector<1x104x64xf32> to vector<104x64xf32>
    %19 = vector.shape_cast %16 : vector<104x64xf32> to vector<1x104x64xf32>
    tpu.vector_store %arg4[%c0_14, %c0_15, %c0_16], %19 {strides = array<i32>} : memref<1x104x64xf32, #tpu.memory_space<vmem>>, vector<1x104x64xf32>,
    return
  }
  func.func @transform_0(%arg0: i32) -> (i32, i32, i32) {
    %c0_i32 = arith.constant 0 : i32
    %c0_i32_0 = arith.constant 0 : i32
    %c0_i32_1 = arith.constant 0 : i32
    return %arg0, %c0_i32, %c0_i32_0 : i32, i32, i32
  }
  func.func @transform_1(%arg0: i32) -> (i32, i32) {
    %c0_i32 = arith.constant 0 : i32
    %c0_i32_0 = arith.constant 0 : i32
    %c0_i32_1 = arith.constant 0 : i32
    return %c0_i32, %c0_i32_0 : i32, i32
  }
  func.func @transform_2(%arg0: i32) -> (i32, i32) {
    %c0_i32 = arith.constant 0 : i32
    %c0_i32_0 = arith.constant 0 : i32
    %c0_i32_1 = arith.constant 0 : i32
    return %c0_i32, %c0_i32_0 : i32, i32
  }
  func.func @transform_3(%arg0: i32) -> (i32, i32, i32) {
    %c0_i32 = arith.constant 0 : i32
    %c0_i32_0 = arith.constant 0 : i32
    %c0_i32_1 = arith.constant 0 : i32
    return %arg0, %c0_i32, %c0_i32_0 : i32, i32, i32
  }
}

module attributes {stable_mosaic.version = 11 : i64} {
  func.func @_matmul_kernel(%arg0: i32, %arg1: i32, %arg2: i32, %arg3: memref<16x640xbf16, #tpu.memory_space<vmem>>, %arg4: memref<640x256xbf16, #tpu.memory_space<vmem>>, %arg5: memref<1x256xf32, #tpu.memory_space<vmem>>, %arg6: memref<16x256xf32, #tpu.memory_space<vmem>>, %arg7: memref<16x256xf32, #tpu.memory_space<vmem>>) attributes {dimension_semantics = [#tpu.dimension_semantics<parallel>, #tpu.dimension_semantics<parallel>, #tpu.dimension_semantics<arbitrary>], iteration_bounds = array<i64: 1, 4, 5>, scalar_prefetch = 0 : i64, scratch_operands = 1 : i64, tpu.core_type = #tpu.core_type<tc>, window_params = [{transform_indices = @transform_0, window_bounds = array<i64: 16, 640>}, {transform_indices = @transform_1, window_bounds = array<i64: 640, 256>}, {transform_indices = @transform_2, window_bounds = array<i64: 1, 256>}, {transform_indices = @transform_3, window_bounds = array<i64: 16, 256>}]} {
    %c0_i32 = arith.constant 0 : i32
    %0 = arith.cmpi eq, %arg2, %c0_i32 : i32
    %1 = arith.extui %0 : i1 to i32
    %c0_i32_0 = arith.constant 0 : i32
    %2 = arith.cmpi ne, %1, %c0_i32_0 : i32
    scf.if %2 {
      %cst_9 = arith.constant 0.000000e+00 : f32
      %12 = vector.broadcast %cst_9 : f32 to vector<16x256xf32>
      %c0_10 = arith.constant 0 : index
      %c0_11 = arith.constant 0 : index
      %13 = vector.load %arg7[%c0_10, %c0_11] : memref<16x256xf32, #tpu.memory_space<vmem>>, vector<16x256xf32>
      tpu.vector_store %arg7[%c0_10, %c0_11], %12 {strides = array<i32>} : memref<16x256xf32, #tpu.memory_space<vmem>>, vector<16x256xf32>,
    } else {
    }
    %c0 = arith.constant 0 : index
    %c0_1 = arith.constant 0 : index
    %3 = vector.load %arg7[%c0, %c0_1] : memref<16x256xf32, #tpu.memory_space<vmem>>, vector<16x256xf32>
    %c0_2 = arith.constant 0 : index
    %c0_3 = arith.constant 0 : index
    %4 = vector.load %arg3[%c0_2, %c0_3] : memref<16x640xbf16, #tpu.memory_space<vmem>>, vector<16x640xbf16>
    %c0_4 = arith.constant 0 : index
    %c0_5 = arith.constant 0 : index
    %5 = vector.load %arg4[%c0_4, %c0_5] : memref<640x256xbf16, #tpu.memory_space<vmem>>, vector<640x256xbf16>
    %cst = arith.constant dense<0.000000e+00> : vector<16x256xf32>
    %6 = tpu.matmul %4, %5, %cst {dimension_numbers = #tpu.dot_dimension_numbers<[1], [0], [0], [1], [0, 0, 1, 1], [], []>} : vector<16x640xbf16>, vector<640x256xbf16>, vector<16x256xf32> -> vector<16x256xf32>
    %7 = arith.addf %3, %6 : vector<16x256xf32>
    %c0_6 = arith.constant 0 : index
    %c0_7 = arith.constant 0 : index
    %8 = vector.load %arg7[%c0_6, %c0_7] : memref<16x256xf32, #tpu.memory_space<vmem>>, vector<16x256xf32>
    tpu.vector_store %arg7[%c0_6, %c0_7], %7 {strides = array<i32>} : memref<16x256xf32, #tpu.memory_space<vmem>>, vector<16x256xf32>,
    %c4_i32 = arith.constant 4 : i32
    %9 = arith.cmpi eq, %arg2, %c4_i32 : i32
    %10 = arith.extui %9 : i1 to i32
    %c0_i32_8 = arith.constant 0 : i32
    %11 = arith.cmpi ne, %10, %c0_i32_8 : i32
    scf.if %11 {
      %c0_9 = arith.constant 0 : index
      %c0_10 = arith.constant 0 : index
      %12 = vector.load %arg7[%c0_9, %c0_10] : memref<16x256xf32, #tpu.memory_space<vmem>>, vector<16x256xf32>
      %c0_11 = arith.constant 0 : index
      %c0_12 = arith.constant 0 : index
      %13 = vector.load %arg5[%c0_11, %c0_12] : memref<1x256xf32, #tpu.memory_space<vmem>>, vector<1x256xf32>
      %14 = vector.broadcast %13 : vector<1x256xf32> to vector<16x256xf32>
      %15 = arith.addf %12, %14 : vector<16x256xf32>
      %c0_13 = arith.constant 0 : index
      %c0_14 = arith.constant 0 : index
      %16 = vector.load %arg6[%c0_13, %c0_14] : memref<16x256xf32, #tpu.memory_space<vmem>>, vector<16x256xf32>
      tpu.vector_store %arg6[%c0_13, %c0_14], %15 {strides = array<i32>} : memref<16x256xf32, #tpu.memory_space<vmem>>, vector<16x256xf32>,
    } else {
    }
    return
  }
  func.func @transform_0(%arg0: i32, %arg1: i32, %arg2: i32) -> (i32, i32) {
    %c0_i32 = arith.constant 0 : i32
    return %arg0, %arg2 : i32, i32
  }
  func.func @transform_1(%arg0: i32, %arg1: i32, %arg2: i32) -> (i32, i32) {
    %c0_i32 = arith.constant 0 : i32
    return %arg2, %arg1 : i32, i32
  }
  func.func @transform_2(%arg0: i32, %arg1: i32, %arg2: i32) -> (i32, i32) {
    %c0_i32 = arith.constant 0 : i32
    %c0_i32_0 = arith.constant 0 : i32
    return %c0_i32, %arg1 : i32, i32
  }
  func.func @transform_3(%arg0: i32, %arg1: i32, %arg2: i32) -> (i32, i32) {
    %c0_i32 = arith.constant 0 : i32
    return %arg0, %arg1 : i32, i32
  }
}

module attributes {stable_mosaic.version = 11 : i64} {
  func.func @_bilstm_recurrence_kernel(%arg0: i32, %arg1: memref<2x8x512xf32, #tpu.memory_space<vmem>>, %arg2: memref<1x128x512xbf16, #tpu.memory_space<vmem>>, %arg3: memref<2x8x128xf32, #tpu.memory_space<vmem>>) attributes {dimension_semantics = [#tpu.dimension_semantics<parallel>], iteration_bounds = array<i64: 2>, scalar_prefetch = 0 : i64, scratch_operands = 0 : i64, tpu.core_type = #tpu.core_type<tc>, window_params = [{transform_indices = @transform_0, window_bounds = array<i64: 2, 8, 512>}, {transform_indices = @transform_1, window_bounds = array<i64: 1, 128, 512>}, {transform_indices = @transform_2, window_bounds = array<i64: 2, 8, 128>}]} {
    %c0 = arith.constant 0 : index
    %c0_0 = arith.constant 0 : index
    %c0_1 = arith.constant 0 : index
    %0 = vector.load %arg2[%c0, %c0_0, %c0_1] : memref<1x128x512xbf16, #tpu.memory_space<vmem>>, vector<1x128x512xbf16>
    %1 = vector.shape_cast %0 : vector<1x128x512xbf16> to vector<128x512xbf16>
    %cst = arith.constant 0.000000e+00 : f32
    %2 = vector.broadcast %cst : f32 to vector<8x128xf32>
    %c0_i32 = arith.constant 0 : i32
    %c2_i32 = arith.constant 2 : i32
    %3 = arith.addi %c0_i32, %c2_i32 : i32
    %c1_i32 = arith.constant 1 : i32
    %4:2 = scf.for %arg4 = %c0_i32 to %3 step %c1_i32 iter_args(%arg5 = %2, %arg6 = %2) -> (vector<8x128xf32>, vector<8x128xf32>)  : i32 {
      %c0_i32_3 = arith.constant 0 : i32
      %5 = arith.cmpi eq, %arg0, %c0_i32_3 : i32
      %c1_i32_4 = arith.constant 1 : i32
      %6 = arith.subi %c1_i32_4, %arg4 : i32
      %7 = arith.select %5, %arg4, %6 : i32
      %8 = arith.index_cast %7 : i32 to index
      %c0_5 = arith.constant 0 : index
      %c0_6 = arith.constant 0 : index
      %9 = vector.load %arg1[%8, %c0_5, %c0_6] : memref<2x8x512xf32, #tpu.memory_space<vmem>>, vector<1x8x512xf32>
      %10 = vector.shape_cast %9 : vector<1x8x512xf32> to vector<8x512xf32>
      %11 = arith.truncf %arg5 : vector<8x128xf32> to vector<8x128xbf16>
      %cst_7 = arith.constant dense<0.000000e+00> : vector<8x512xf32>
      %12 = tpu.matmul %11, %1, %cst_7 {dimension_numbers = #tpu.dot_dimension_numbers<[1], [0], [0], [1], [0, 0, 1, 1], [], []>} : vector<8x128xbf16>, vector<128x512xbf16>, vector<8x512xf32> -> vector<8x512xf32>
      %13 = arith.addf %10, %12 : vector<8x512xf32>
      %14 = vector.extract_strided_slice %13 {offsets = [0, 0], sizes = [8, 128], strides = [1, 1]} : vector<8x512xf32> to vector<8x128xf32>
      %15 = arith.negf %14 : vector<8x128xf32>
      %16 = math.exp %15 : vector<8x128xf32>
      %cst_8 = arith.constant 1.000000e+00 : f32
      %17 = vector.broadcast %cst_8 : f32 to vector<8x128xf32>
      %18 = arith.addf %17, %16 : vector<8x128xf32>
      %19 = arith.divf %17, %18 : vector<8x128xf32>
      %20 = vector.extract_strided_slice %13 {offsets = [0, 128], sizes = [8, 128], strides = [1, 1]} : vector<8x512xf32> to vector<8x128xf32>
      %21 = arith.negf %20 : vector<8x128xf32>
      %22 = math.exp %21 : vector<8x128xf32>
      %cst_9 = arith.constant 1.000000e+00 : f32
      %23 = vector.broadcast %cst_9 : f32 to vector<8x128xf32>
      %24 = arith.addf %23, %22 : vector<8x128xf32>
      %25 = arith.divf %23, %24 : vector<8x128xf32>
      %26 = vector.extract_strided_slice %13 {offsets = [0, 256], sizes = [8, 128], strides = [1, 1]} : vector<8x512xf32> to vector<8x128xf32>
      %27 = math.tanh %26 : vector<8x128xf32>
      %28 = vector.extract_strided_slice %13 {offsets = [0, 384], sizes = [8, 128], strides = [1, 1]} : vector<8x512xf32> to vector<8x128xf32>
      %29 = arith.negf %28 : vector<8x128xf32>
      %30 = math.exp %29 : vector<8x128xf32>
      %cst_10 = arith.constant 1.000000e+00 : f32
      %31 = vector.broadcast %cst_10 : f32 to vector<8x128xf32>
      %32 = arith.addf %31, %30 : vector<8x128xf32>
      %33 = arith.divf %31, %32 : vector<8x128xf32>
      %34 = arith.mulf %25, %arg6 : vector<8x128xf32>
      %35 = arith.mulf %19, %27 : vector<8x128xf32>
      %36 = arith.addf %34, %35 : vector<8x128xf32>
      %37 = math.tanh %36 : vector<8x128xf32>
      %38 = arith.mulf %33, %37 : vector<8x128xf32>
      %39 = arith.index_cast %7 : i32 to index
      %c0_11 = arith.constant 0 : index
      %c0_12 = arith.constant 0 : index
      %40 = vector.load %arg3[%39, %c0_11, %c0_12] : memref<2x8x128xf32, #tpu.memory_space<vmem>>, vector<1x8x128xf32>
      %41 = vector.shape_cast %40 : vector<1x8x128xf32> to vector<8x128xf32>
      %42 = vector.shape_cast %38 : vector<8x128xf32> to vector<1x8x128xf32>
      tpu.vector_store %arg3[%39, %c0_11, %c0_12], %42 {strides = array<i32>} : memref<2x8x128xf32, #tpu.memory_space<vmem>>, vector<1x8x128xf32>,
      scf.yield %38, %36 : vector<8x128xf32>, vector<8x128xf32>
    }
    %c2_i32_2 = arith.constant 2 : i32
    return
  }
  func.func @transform_0(%arg0: i32) -> (i32, i32, i32) {
    %c0_i32 = arith.constant 0 : i32
    %c0_i32_0 = arith.constant 0 : i32
    %c0_i32_1 = arith.constant 0 : i32
    return %c0_i32, %c0_i32_0, %arg0 : i32, i32, i32
  }
  func.func @transform_1(%arg0: i32) -> (i32, i32, i32) {
    %c0_i32 = arith.constant 0 : i32
    %c0_i32_0 = arith.constant 0 : i32
    %c0_i32_1 = arith.constant 0 : i32
    return %arg0, %c0_i32, %c0_i32_0 : i32, i32, i32
  }
  func.func @transform_2(%arg0: i32) -> (i32, i32, i32) {
    %c0_i32 = arith.constant 0 : i32
    %c0_i32_0 = arith.constant 0 : i32
    %c0_i32_1 = arith.constant 0 : i32
    return %c0_i32, %c0_i32_0, %arg0 : i32, i32, i32
  }
}

module attributes {stable_mosaic.version = 11 : i64} {
  func.func @_matmul_kernel(%arg0: i32, %arg1: i32, %arg2: i32, %arg3: memref<16x256xbf16, #tpu.memory_space<vmem>>, %arg4: memref<256x256xbf16, #tpu.memory_space<vmem>>, %arg5: memref<1x256xf32, #tpu.memory_space<vmem>>, %arg6: memref<16x256xf32, #tpu.memory_space<vmem>>, %arg7: memref<16x256xf32, #tpu.memory_space<vmem>>) attributes {dimension_semantics = [#tpu.dimension_semantics<parallel>, #tpu.dimension_semantics<parallel>, #tpu.dimension_semantics<arbitrary>], iteration_bounds = array<i64: 1, 4, 1>, scalar_prefetch = 0 : i64, scratch_operands = 1 : i64, tpu.core_type = #tpu.core_type<tc>, window_params = [{transform_indices = @transform_0, window_bounds = array<i64: 16, 256>}, {transform_indices = @transform_1, window_bounds = array<i64: 256, 256>}, {transform_indices = @transform_2, window_bounds = array<i64: 1, 256>}, {transform_indices = @transform_3, window_bounds = array<i64: 16, 256>}]} {
    %c0_i32 = arith.constant 0 : i32
    %0 = arith.cmpi eq, %arg2, %c0_i32 : i32
    %1 = arith.extui %0 : i1 to i32
    %c0_i32_0 = arith.constant 0 : i32
    %2 = arith.cmpi ne, %1, %c0_i32_0 : i32
    scf.if %2 {
      %cst_10 = arith.constant 0.000000e+00 : f32
      %12 = vector.broadcast %cst_10 : f32 to vector<16x256xf32>
      %c0_11 = arith.constant 0 : index
      %c0_12 = arith.constant 0 : index
      %13 = vector.load %arg7[%c0_11, %c0_12] : memref<16x256xf32, #tpu.memory_space<vmem>>, vector<16x256xf32>
      tpu.vector_store %arg7[%c0_11, %c0_12], %12 {strides = array<i32>} : memref<16x256xf32, #tpu.memory_space<vmem>>, vector<16x256xf32>,
    } else {
    }
    %c0 = arith.constant 0 : index
    %c0_1 = arith.constant 0 : index
    %3 = vector.load %arg7[%c0, %c0_1] : memref<16x256xf32, #tpu.memory_space<vmem>>, vector<16x256xf32>
    %c0_2 = arith.constant 0 : index
    %c0_3 = arith.constant 0 : index
    %4 = vector.load %arg3[%c0_2, %c0_3] : memref<16x256xbf16, #tpu.memory_space<vmem>>, vector<16x256xbf16>
    %c0_4 = arith.constant 0 : index
    %c0_5 = arith.constant 0 : index
    %5 = vector.load %arg4[%c0_4, %c0_5] : memref<256x256xbf16, #tpu.memory_space<vmem>>, vector<256x256xbf16>
    %cst = arith.constant dense<0.000000e+00> : vector<16x256xf32>
    %6 = tpu.matmul %4, %5, %cst {dimension_numbers = #tpu.dot_dimension_numbers<[1], [0], [0], [1], [0, 0, 1, 1], [], []>} : vector<16x256xbf16>, vector<256x256xbf16>, vector<16x256xf32> -> vector<16x256xf32>
    %7 = arith.addf %3, %6 : vector<16x256xf32>
    %c0_6 = arith.constant 0 : index
    %c0_7 = arith.constant 0 : index
    %8 = vector.load %arg7[%c0_6, %c0_7] : memref<16x256xf32, #tpu.memory_space<vmem>>, vector<16x256xf32>
    tpu.vector_store %arg7[%c0_6, %c0_7], %7 {strides = array<i32>} : memref<16x256xf32, #tpu.memory_space<vmem>>, vector<16x256xf32>,
    %c0_i32_8 = arith.constant 0 : i32
    %9 = arith.cmpi eq, %arg2, %c0_i32_8 : i32
    %10 = arith.extui %9 : i1 to i32
    %c0_i32_9 = arith.constant 0 : i32
    %11 = arith.cmpi ne, %10, %c0_i32_9 : i32
    scf.if %11 {
      %c0_10 = arith.constant 0 : index
      %c0_11 = arith.constant 0 : index
      %12 = vector.load %arg7[%c0_10, %c0_11] : memref<16x256xf32, #tpu.memory_space<vmem>>, vector<16x256xf32>
      %c0_12 = arith.constant 0 : index
      %c0_13 = arith.constant 0 : index
      %13 = vector.load %arg5[%c0_12, %c0_13] : memref<1x256xf32, #tpu.memory_space<vmem>>, vector<1x256xf32>
      %14 = vector.broadcast %13 : vector<1x256xf32> to vector<16x256xf32>
      %15 = arith.addf %12, %14 : vector<16x256xf32>
      %c0_14 = arith.constant 0 : index
      %c0_15 = arith.constant 0 : index
      %16 = vector.load %arg6[%c0_14, %c0_15] : memref<16x256xf32, #tpu.memory_space<vmem>>, vector<16x256xf32>
      tpu.vector_store %arg6[%c0_14, %c0_15], %15 {strides = array<i32>} : memref<16x256xf32, #tpu.memory_space<vmem>>, vector<16x256xf32>,
    } else {
    }
    return
  }
  func.func @transform_0(%arg0: i32, %arg1: i32, %arg2: i32) -> (i32, i32) {
    %c0_i32 = arith.constant 0 : i32
    return %arg0, %arg2 : i32, i32
  }
  func.func @transform_1(%arg0: i32, %arg1: i32, %arg2: i32) -> (i32, i32) {
    %c0_i32 = arith.constant 0 : i32
    return %arg2, %arg1 : i32, i32
  }
  func.func @transform_2(%arg0: i32, %arg1: i32, %arg2: i32) -> (i32, i32) {
    %c0_i32 = arith.constant 0 : i32
    %c0_i32_0 = arith.constant 0 : i32
    return %c0_i32, %arg1 : i32, i32
  }
  func.func @transform_3(%arg0: i32, %arg1: i32, %arg2: i32) -> (i32, i32) {
    %c0_i32 = arith.constant 0 : i32
    return %arg0, %arg1 : i32, i32
  }
}

module attributes {stable_mosaic.version = 11 : i64} {
  func.func @_matmul_kernel(%arg0: i32, %arg1: i32, %arg2: i32, %arg3: memref<16x256xbf16, #tpu.memory_space<vmem>>, %arg4: memref<256x128xbf16, #tpu.memory_space<vmem>>, %arg5: memref<1x128xf32, #tpu.memory_space<vmem>>, %arg6: memref<16x128xf32, #tpu.memory_space<vmem>>, %arg7: memref<16x128xf32, #tpu.memory_space<vmem>>) attributes {dimension_semantics = [#tpu.dimension_semantics<parallel>, #tpu.dimension_semantics<parallel>, #tpu.dimension_semantics<arbitrary>], iteration_bounds = array<i64: 1, 1, 1>, scalar_prefetch = 0 : i64, scratch_operands = 1 : i64, tpu.core_type = #tpu.core_type<tc>, window_params = [{transform_indices = @transform_0, window_bounds = array<i64: 16, 256>}, {transform_indices = @transform_1, window_bounds = array<i64: 256, 128>}, {transform_indices = @transform_2, window_bounds = array<i64: 1, 128>}, {transform_indices = @transform_3, window_bounds = array<i64: 16, 128>}]} {
    %c0_i32 = arith.constant 0 : i32
    %0 = arith.cmpi eq, %arg2, %c0_i32 : i32
    %1 = arith.extui %0 : i1 to i32
    %c0_i32_0 = arith.constant 0 : i32
    %2 = arith.cmpi ne, %1, %c0_i32_0 : i32
    scf.if %2 {
      %cst_10 = arith.constant 0.000000e+00 : f32
      %12 = vector.broadcast %cst_10 : f32 to vector<16x128xf32>
      %c0_11 = arith.constant 0 : index
      %c0_12 = arith.constant 0 : index
      %13 = vector.load %arg7[%c0_11, %c0_12] : memref<16x128xf32, #tpu.memory_space<vmem>>, vector<16x128xf32>
      tpu.vector_store %arg7[%c0_11, %c0_12], %12 {strides = array<i32>} : memref<16x128xf32, #tpu.memory_space<vmem>>, vector<16x128xf32>,
    } else {
    }
    %c0 = arith.constant 0 : index
    %c0_1 = arith.constant 0 : index
    %3 = vector.load %arg7[%c0, %c0_1] : memref<16x128xf32, #tpu.memory_space<vmem>>, vector<16x128xf32>
    %c0_2 = arith.constant 0 : index
    %c0_3 = arith.constant 0 : index
    %4 = vector.load %arg3[%c0_2, %c0_3] : memref<16x256xbf16, #tpu.memory_space<vmem>>, vector<16x256xbf16>
    %c0_4 = arith.constant 0 : index
    %c0_5 = arith.constant 0 : index
    %5 = vector.load %arg4[%c0_4, %c0_5] : memref<256x128xbf16, #tpu.memory_space<vmem>>, vector<256x128xbf16>
    %cst = arith.constant dense<0.000000e+00> : vector<16x128xf32>
    %6 = tpu.matmul %4, %5, %cst {dimension_numbers = #tpu.dot_dimension_numbers<[1], [0], [0], [1], [0, 0, 1, 1], [], []>} : vector<16x256xbf16>, vector<256x128xbf16>, vector<16x128xf32> -> vector<16x128xf32>
    %7 = arith.addf %3, %6 : vector<16x128xf32>
    %c0_6 = arith.constant 0 : index
    %c0_7 = arith.constant 0 : index
    %8 = vector.load %arg7[%c0_6, %c0_7] : memref<16x128xf32, #tpu.memory_space<vmem>>, vector<16x128xf32>
    tpu.vector_store %arg7[%c0_6, %c0_7], %7 {strides = array<i32>} : memref<16x128xf32, #tpu.memory_space<vmem>>, vector<16x128xf32>,
    %c0_i32_8 = arith.constant 0 : i32
    %9 = arith.cmpi eq, %arg2, %c0_i32_8 : i32
    %10 = arith.extui %9 : i1 to i32
    %c0_i32_9 = arith.constant 0 : i32
    %11 = arith.cmpi ne, %10, %c0_i32_9 : i32
    scf.if %11 {
      %c0_10 = arith.constant 0 : index
      %c0_11 = arith.constant 0 : index
      %12 = vector.load %arg7[%c0_10, %c0_11] : memref<16x128xf32, #tpu.memory_space<vmem>>, vector<16x128xf32>
      %c0_12 = arith.constant 0 : index
      %c0_13 = arith.constant 0 : index
      %13 = vector.load %arg5[%c0_12, %c0_13] : memref<1x128xf32, #tpu.memory_space<vmem>>, vector<1x128xf32>
      %14 = vector.broadcast %13 : vector<1x128xf32> to vector<16x128xf32>
      %15 = arith.addf %12, %14 : vector<16x128xf32>
      %c0_14 = arith.constant 0 : index
      %c0_15 = arith.constant 0 : index
      %16 = vector.load %arg6[%c0_14, %c0_15] : memref<16x128xf32, #tpu.memory_space<vmem>>, vector<16x128xf32>
      tpu.vector_store %arg6[%c0_14, %c0_15], %15 {strides = array<i32>} : memref<16x128xf32, #tpu.memory_space<vmem>>, vector<16x128xf32>,
    } else {
    }
    return
  }
  func.func @transform_0(%arg0: i32, %arg1: i32, %arg2: i32) -> (i32, i32) {
    %c0_i32 = arith.constant 0 : i32
    return %arg0, %arg2 : i32, i32
  }
  func.func @transform_1(%arg0: i32, %arg1: i32, %arg2: i32) -> (i32, i32) {
    %c0_i32 = arith.constant 0 : i32
    return %arg2, %arg1 : i32, i32
  }
  func.func @transform_2(%arg0: i32, %arg1: i32, %arg2: i32) -> (i32, i32) {
    %c0_i32 = arith.constant 0 : i32
    %c0_i32_0 = arith.constant 0 : i32
    return %c0_i32, %arg1 : i32, i32
  }
  func.func @transform_3(%arg0: i32, %arg1: i32, %arg2: i32) -> (i32, i32) {
    %c0_i32 = arith.constant 0 : i32
    return %arg0, %arg1 : i32, i32
  }
}

</mosaic_0001>

<bundles_post_ra>
// kernel: asr_forward.7
= control target key start
LH: loop header
LB: loop body
LE: loop exit
PB: predicated region body
PF: predicated region fallthrough
CT: control target
= control target key end

     0   :  { %s3667_s12 = smov 0   ;;  %s4613_s0 = inlined_call_operand.vmem [shape: f32[2,1600,9], index: 0, kind: input, shape index: {}]   ;;  %s4614_s1 = inlined_call_operand.vmem [shape: f32[9,32], index: 1, kind: input, shape index: {}]   ;;  %s4615_s2 = inlined_call_operand.vmem [shape: f32[1,32], index: 2, kind: input, shape index: {}]   ;;  %s4616_s3 = inlined_call_operand.vmem [shape: f32[2,400,32], index: 3, kind: output, shape index: {}]  }
   0x1 LB: > { %s2906_s13 = sadd.s32 4294967295, %s3645_s12   ;;  %p2910_p0 = scmp.ge.s32.totalorder %s3645_s12, 1  ;;  %s3645_s12 = sphi %s3667_s12, %s13_s12  }
   0x2   : > { %p137_p1 = scmp.lt.s32.totalorder %s3645_s12, 3 }
   0x4   : > { %p138_p2 = pnand %p2910_p0, %p137_p1 }
   0x5   : > { %p161_p3 = scmp.lt.s32.totalorder (!%p138_p2), %s2906_s13, 1 }
   0x6   : > { %141 = sbr.rel (%p138_p2) target bundleno = 426 (0x1aa), region = 32 }
   0xb   : > { %v372_v0 = vld [vmem:[%s4614_s1 + $0x8] sm:$0x1]  ;;  %vm981_vm0 = vcmask 1040384   ;;  %v371_v1 = vld [vmem:[%s4614_s1] sm:$0xff]  ;;  %s4618_s13 = smov (!%p161_p3, %s2906_s13), 1  ;;  %vm380_vm1 = vcmask 72704  }
   0xc   : > { %3319 = vmatprep.subr.msk.mxu0 %vm981_vm0, %v372_v0  ;;  %3623 = vmatprep.subr.msk.mxu1 %vm981_vm0, %v372_v0  ;;  %s3627_s18 = smul.u32 1600, %s4618_s13  ;;  %vm2250_vm2 = vcmask 261120  }
   0xd   : > { %3320 = vmatpush3.msk.msra.mxu0 %vm981_vm0, %v372_v0  ;;  %3625 = vmatpush3.msk.msra.mxu1 %vm981_vm0, %v372_v0  ;;  %s3628_s24 = smul.u32 400, %s4618_s13 }
   0xe   : > { %3321 = vmatprep.subr.mxu0 %v371_v1  ;;  %3624 = vmatprep.subr.mxu1 %v371_v1  ;;  %s3687_s21 = scalar_lea.vmem %s4613_s0, %s3627_s18 }
   0xf   : > { %3322 = vmatpush3.msra.mxu0 %v371_v1  ;;  %3626 = vmatpush3.msra.mxu1 %v371_v1  ;;  %v171_v2 = vld [vmem:[%s3687_s21] sm:$0xff]  ;;  %v172_v4 = vld [vmem:[%s3687_s21 + $0x8] sm:$0xff]  ;;  %v173_v6 = vld [vmem:[%s3687_s21 + $0x10] sm:$0xff]  ;;  %s4320_s27 = scalar_lea.vmem %s4616_s3, %s3628_s24 }
  0x10   : > { %v271_v3 = vld [vmem:[%s3687_s21 + $0x320] sm:$0xff]  ;;  %3323 = vmatprep.mubr.msk.f32.mxu0 %vm380_vm1, %v171_v2  ;;  %v272_v5 = vld [vmem:[%s3687_s21 + $0x328] sm:$0xff]  ;;  %v273_v7 = vld [vmem:[%s3687_s21 + $0x330] sm:$0xff] }
  0x11   : > { %3473 = vmatprep.mubr.msk.f32.mxu1 %vm380_vm1, %v271_v3  ;;  %3324 = vmatmul.mubr.msk.f32.vlgmr.msra.gmra.mxu0 %vm380_vm1, %v172_v4  ;;  %v174_v8 = vld [vmem:[%s3687_s21 + $0x18] sm:$0xff]  ;;  %v175_v10 = vld [vmem:[%s3687_s21 + $0x20] sm:$0xff]  ;;  %v176_v12 = vld [vmem:[%s3687_s21 + $0x28] sm:$0xff] }
  0x12   : > { %3474 = vmatmul.mubr.msk.f32.vlgmr.msra.gmra.mxu1 %vm380_vm1, %v272_v5  ;;  %3326 = vmatprep.mubr.msk.f32.mxu0 %vm380_vm1, %v173_v6  ;;  %v274_v9 = vld [vmem:[%s3687_s21 + $0x338] sm:$0xff]  ;;  %v275_v11 = vld [vmem:[%s3687_s21 + $0x340] sm:$0xff]  ;;  %v276_v13 = vld [vmem:[%s3687_s21 + $0x348] sm:$0xff] }
  0x13   : > { %3476 = vmatprep.mubr.msk.f32.mxu1 %vm380_vm1, %v273_v7  ;;  %v177_v14 = vld [vmem:[%s3687_s21 + $0x30] sm:$0xff]  ;;  %v178_v16 = vld [vmem:[%s3687_s21 + $0x38] sm:$0xff]  ;;  %v179_v18 = vld [vmem:[%s3687_s21 + $0x40] sm:$0xff] }
  0x14   : > { %v277_v15 = vld [vmem:[%s3687_s21 + $0x350] sm:$0xff]  ;;  %v278_v17 = vld [vmem:[%s3687_s21 + $0x358] sm:$0xff]  ;;  %v279_v19 = vld [vmem:[%s3687_s21 + $0x360] sm:$0xff] }
  0x15   : > { %3327 = vmatmul.mubr.msk.f32.gmra.mxu0 %vm380_vm1, %v174_v8  ;;  %v180_v20 = vld [vmem:[%s3687_s21 + $0x48] sm:$0xff]  ;;  %v181_v22 = vld [vmem:[%s3687_s21 + $0x50] sm:$0xff]  ;;  %v182_v24 = vld [vmem:[%s3687_s21 + $0x58] sm:$0xff] }
  0x16   : > { %3477 = vmatmul.mubr.msk.f32.gmra.mxu1 %vm380_vm1, %v274_v9  ;;  %3329 = vmatprep.mubr.msk.f32.mxu0 %vm380_vm1, %v175_v10  ;;  %v280_v21 = vld [vmem:[%s3687_s21 + $0x368] sm:$0xff]  ;;  %v281_v23 = vld [vmem:[%s3687_s21 + $0x370] sm:$0xff]  ;;  %v282_v25 = vld [vmem:[%s3687_s21 + $0x378] sm:$0xff] }
  0x17   : > { %3479 = vmatprep.mubr.msk.f32.mxu1 %vm380_vm1, %v275_v11  ;;  %v183_v26 = vld [vmem:[%s3687_s21 + $0x60] sm:$0xff]  ;;  %v184_v28 = vld [vmem:[%s3687_s21 + $0x68] sm:$0xff]  ;;  %v185_v30 = vld [vmem:[%s3687_s21 + $0x70] sm:$0xff] }
  0x18   : > { %v283_v27 = vld [vmem:[%s3687_s21 + $0x380] sm:$0xff]  ;;  %v284_v29 = vld [vmem:[%s3687_s21 + $0x388] sm:$0xff]  ;;  %v285_v31 = vld [vmem:[%s3687_s21 + $0x390] sm:$0xff] }
  0x19   : > { %3330 = vmatmul.mubr.msk.f32.gmra.mxu0 %vm380_vm1, %v176_v12  ;;  %v186_v32 = vld [vmem:[%s3687_s21 + $0x78] sm:$0xff]  ;;  %v187_v34 = vld [vmem:[%s3687_s21 + $0x80] sm:$0xff]  ;;  %v188_v36 = vld [vmem:[%s3687_s21 + $0x88] sm:$0xff] }
  0x1a   : > { %3480 = vmatmul.mubr.msk.f32.gmra.mxu1 %vm380_vm1, %v276_v13  ;;  %3332 = vmatprep.mubr.msk.f32.mxu0 %vm380_vm1, %v177_v14  ;;  %v286_v33 = vld [vmem:[%s3687_s21 + $0x398] sm:$0xff]  ;;  %v287_v35 = vld [vmem:[%s3687_s21 + $0x3a0] sm:$0xff]  ;;  %v288_v37 = vld [vmem:[%s3687_s21 + $0x3a8] sm:$0xff] }
  0x1b   : > { %3482 = vmatprep.mubr.msk.f32.mxu1 %vm380_vm1, %v277_v15  ;;  %v189_v38 = vld [vmem:[%s3687_s21 + $0x90] sm:$0xff]  ;;  %v190_v40 = vld [vmem:[%s3687_s21 + $0x98] sm:$0xff]  ;;  %v191_v42 = vld [vmem:[%s3687_s21 + $0xa0] sm:$0xff] }
  0x1c   : > { %v289_v39 = vld [vmem:[%s3687_s21 + $0x3b0] sm:$0xff]  ;;  %v290_v41 = vld [vmem:[%s3687_s21 + $0x3b8] sm:$0xff]  ;;  %v291_v43 = vld [vmem:[%s3687_s21 + $0x3c0] sm:$0xff] }
  0x1d   : > { %3333 = vmatmul.mubr.msk.f32.gmra.mxu0 %vm380_vm1, %v178_v16  ;;  %v192_v44 = vld [vmem:[%s3687_s21 + $0xa8] sm:$0xff]  ;;  %v193_v46 = vld [vmem:[%s3687_s21 + $0xb0] sm:$0xff]  ;;  %v194_v48 = vld [vmem:[%s3687_s21 + $0xb8] sm:$0xff] }
  0x1e   : > { %3483 = vmatmul.mubr.msk.f32.gmra.mxu1 %vm380_vm1, %v278_v17  ;;  %3335 = vmatprep.mubr.msk.f32.mxu0 %vm380_vm1, %v179_v18  ;;  %v292_v45 = vld [vmem:[%s3687_s21 + $0x3c8] sm:$0xff]  ;;  %v293_v47 = vld [vmem:[%s3687_s21 + $0x3d0] sm:$0xff]  ;;  %v294_v49 = vld [vmem:[%s3687_s21 + $0x3d8] sm:$0xff] }
  0x1f   : > { %3485 = vmatprep.mubr.msk.f32.mxu1 %vm380_vm1, %v279_v19  ;;  %v195_v50 = vld [vmem:[%s3687_s21 + $0xc0] sm:$0xff]  ;;  %v196_v52 = vld [vmem:[%s3687_s21 + $0xc8] sm:$0xff]  ;;  %v197_v54 = vld [vmem:[%s3687_s21 + $0xd0] sm:$0xff] }
  0x20   : > { %v295_v51 = vld [vmem:[%s3687_s21 + $0x3e0] sm:$0xff]  ;;  %v296_v53 = vld [vmem:[%s3687_s21 + $0x3e8] sm:$0xff]  ;;  %v297_v55 = vld [vmem:[%s3687_s21 + $0x3f0] sm:$0xff] }
  0x21   : > { %3336 = vmatmul.mubr.msk.f32.gmra.mxu0 %vm380_vm1, %v180_v20  ;;  %v198_v56 = vld [vmem:[%s3687_s21 + $0xd8] sm:$0xff]  ;;  %v199_v58 = vld [vmem:[%s3687_s21 + $0xe0] sm:$0xff]  ;;  %v200_v60 = vld [vmem:[%s3687_s21 + $0xe8] sm:$0xff] }
  0x22   : > { %3486 = vmatmul.mubr.msk.f32.gmra.mxu1 %vm380_vm1, %v280_v21  ;;  %3338 = vmatprep.mubr.msk.f32.mxu0 %vm380_vm1, %v181_v22  ;;  %v298_v57 = vld [vmem:[%s3687_s21 + $0x3f8] sm:$0xff]  ;;  %v299_v59 = vld [vmem:[%s3687_s21 + $0x400] sm:$0xff]  ;;  %v300_v61 = vld [vmem:[%s3687_s21 + $0x408] sm:$0xff] }
  0x23   : > { %3488 = vmatprep.mubr.msk.f32.mxu1 %vm380_vm1, %v281_v23  ;;  %v201_v62 = vld [vmem:[%s3687_s21 + $0xf0] sm:$0xff]  ;;  %v202_v0 = vld [vmem:[%s3687_s21 + $0xf8] sm:$0xff]  ;;  %v203_v2 = vld [vmem:[%s3687_s21 + $0x100] sm:$0xff] }
  0x24   : > { %v301_v63 = vld [vmem:[%s3687_s21 + $0x410] sm:$0xff]  ;;  %v302_v1 = vld [vmem:[%s3687_s21 + $0x418] sm:$0xff]  ;;  %v303_v3 = vld [vmem:[%s3687_s21 + $0x420] sm:$0xff] }
  0x25   : > { %3339 = vmatmul.mubr.msk.f32.gmra.mxu0 %vm380_vm1, %v182_v24  ;;  %v204_v4 = vld [vmem:[%s3687_s21 + $0x108] sm:$0xff]  ;;  %v205_v6 = vld [vmem:[%s3687_s21 + $0x110] sm:$0xff]  ;;  %v206_v8 = vld [vmem:[%s3687_s21 + $0x118] sm:$0xff] }
  0x26   : > { %3489 = vmatmul.mubr.msk.f32.gmra.mxu1 %vm380_vm1, %v282_v25  ;;  %3341 = vmatprep.mubr.msk.f32.mxu0 %vm380_vm1, %v183_v26  ;;  %v304_v5 = vld [vmem:[%s3687_s21 + $0x428] sm:$0xff]  ;;  %v305_v7 = vld [vmem:[%s3687_s21 + $0x430] sm:$0xff]  ;;  %v306_v9 = vld [vmem:[%s3687_s21 + $0x438] sm:$0xff] }
  0x27   : > { %3491 = vmatprep.mubr.msk.f32.mxu1 %vm380_vm1, %v283_v27  ;;  %v207_v10 = vld [vmem:[%s3687_s21 + $0x120] sm:$0xff]  ;;  %v208_v12 = vld [vmem:[%s3687_s21 + $0x128] sm:$0xff]  ;;  %v209_v14 = vld [vmem:[%s3687_s21 + $0x130] sm:$0xff] }
  0x28   : > { %v307_v11 = vld [vmem:[%s3687_s21 + $0x440] sm:$0xff]  ;;  %v308_v13 = vld [vmem:[%s3687_s21 + $0x448] sm:$0xff]  ;;  %v309_v15 = vld [vmem:[%s3687_s21 + $0x450] sm:$0xff] }
  0x29   : > { %3342 = vmatmul.mubr.msk.f32.gmra.mxu0 %vm380_vm1, %v184_v28  ;;  %v210_v16 = vld [vmem:[%s3687_s21 + $0x138] sm:$0xff]  ;;  %v211_v18 = vld [vmem:[%s3687_s21 + $0x140] sm:$0xff]  ;;  %v212_v20 = vld [vmem:[%s3687_s21 + $0x148] sm:$0xff] }
  0x2a   : > { %3492 = vmatmul.mubr.msk.f32.gmra.mxu1 %vm380_vm1, %v284_v29  ;;  %3344 = vmatprep.mubr.msk.f32.mxu0 %vm380_vm1, %v185_v30  ;;  %v310_v17 = vld [vmem:[%s3687_s21 + $0x458] sm:$0xff]  ;;  %v311_v19 = vld [vmem:[%s3687_s21 + $0x460] sm:$0xff]  ;;  %v312_v21 = vld [vmem:[%s3687_s21 + $0x468] sm:$0xff] }
  0x2b   : > { %3494 = vmatprep.mubr.msk.f32.mxu1 %vm380_vm1, %v285_v31  ;;  %v213_v22 = vld [vmem:[%s3687_s21 + $0x150] sm:$0xff]  ;;  %v214_v24 = vld [vmem:[%s3687_s21 + $0x158] sm:$0xff]  ;;  %v215_v26 = vld [vmem:[%s3687_s21 + $0x160] sm:$0xff] }
  0x2c   : > { %v313_v23 = vld [vmem:[%s3687_s21 + $0x470] sm:$0xff]  ;;  %v314_v25 = vld [vmem:[%s3687_s21 + $0x478] sm:$0xff]  ;;  %v315_v27 = vld [vmem:[%s3687_s21 + $0x480] sm:$0xff] }
  0x2d   : > { %3345 = vmatmul.mubr.msk.f32.gmra.mxu0 %vm380_vm1, %v186_v32  ;;  %v216_v28 = vld [vmem:[%s3687_s21 + $0x168] sm:$0xff]  ;;  %v217_v30 = vld [vmem:[%s3687_s21 + $0x170] sm:$0xff]  ;;  %v218_v32 = vld [vmem:[%s3687_s21 + $0x178] sm:$0xff] }
  0x2e   : > { %3495 = vmatmul.mubr.msk.f32.gmra.mxu1 %vm380_vm1, %v286_v33  ;;  %3347 = vmatprep.mubr.msk.f32.mxu0 %vm380_vm1, %v187_v34  ;;  %v316_v29 = vld [vmem:[%s3687_s21 + $0x488] sm:$0xff]  ;;  %v317_v31 = vld [vmem:[%s3687_s21 + $0x490] sm:$0xff]  ;;  %v318_v33 = vld [vmem:[%s3687_s21 + $0x498] sm:$0xff] }
  0x2f   : > { %3497 = vmatprep.mubr.msk.f32.mxu1 %vm380_vm1, %v287_v35  ;;  %v219_v34 = vld [vmem:[%s3687_s21 + $0x180] sm:$0xff] }
  0x30   : > { %v319_v35 = vld [vmem:[%s3687_s21 + $0x4a0] sm:$0xff] }
  0x31   : > { %3348 = vmatmul.mubr.msk.f32.gmra.mxu0 %vm380_vm1, %v188_v36  ;;  %v220_v36 = vld [vmem:[%s3687_s21 + $0x188] sm:$0xff] }
  0x32   : > { %3498 = vmatmul.mubr.msk.f32.gmra.mxu1 %vm380_vm1, %v288_v37  ;;  %3350 = vmatprep.mubr.msk.f32.mxu0 %vm380_vm1, %v189_v38  ;;  %v320_v37 = vld [vmem:[%s3687_s21 + $0x4a8] sm:$0xff]  ;;  %v221_v38 = vld [vmem:[%s3687_s21 + $0x190] sm:$0xff] }
  0x33   : > { %3500 = vmatprep.mubr.msk.f32.mxu1 %vm380_vm1, %v289_v39  ;;  %v321_v39 = vld [vmem:[%s3687_s21 + $0x4b0] sm:$0xff] }
  0x35   : > { %3351 = vmatmul.mubr.msk.f32.gmra.mxu0 %vm380_vm1, %v190_v40  ;;  %v222_v40 = vld [vmem:[%s3687_s21 + $0x198] sm:$0xff] }
  0x36   : > { %3501 = vmatmul.mubr.msk.f32.gmra.mxu1 %vm380_vm1, %v290_v41  ;;  %3353 = vmatprep.mubr.msk.f32.mxu0 %vm380_vm1, %v191_v42  ;;  %v322_v41 = vld [vmem:[%s3687_s21 + $0x4b8] sm:$0xff]  ;;  %v223_v42 = vld [vmem:[%s3687_s21 + $0x1a0] sm:$0xff] }
  0x37   : > { %3503 = vmatprep.mubr.msk.f32.mxu1 %vm380_vm1, %v291_v43  ;;  %v323_v43 = vld [vmem:[%s3687_s21 + $0x4c0] sm:$0xff] }
  0x39   : > { %3354 = vmatmul.mubr.msk.f32.gmra.mxu0 %vm380_vm1, %v192_v44  ;;  %v224_v44 = vld [vmem:[%s3687_s21 + $0x1a8] sm:$0xff] }
  0x3a   : > { %3504 = vmatmul.mubr.msk.f32.gmra.mxu1 %vm380_vm1, %v292_v45  ;;  %3356 = vmatprep.mubr.msk.f32.mxu0 %vm380_vm1, %v193_v46  ;;  %v324_v45 = vld [vmem:[%s3687_s21 + $0x4c8] sm:$0xff]  ;;  %v225_v46 = vld [vmem:[%s3687_s21 + $0x1b0] sm:$0xff] }
  0x3b   : > { %3506 = vmatprep.mubr.msk.f32.mxu1 %vm380_vm1, %v293_v47  ;;  %v325_v47 = vld [vmem:[%s3687_s21 + $0x4d0] sm:$0xff] }
  0x3d   : > { %3357 = vmatmul.mubr.msk.f32.gmra.mxu0 %vm380_vm1, %v194_v48  ;;  %v226_v48 = vld [vmem:[%s3687_s21 + $0x1b8] sm:$0xff] }
  0x3e   : > { %3507 = vmatmul.mubr.msk.f32.gmra.mxu1 %vm380_vm1, %v294_v49  ;;  %3359 = vmatprep.mubr.msk.f32.mxu0 %vm380_vm1, %v195_v50  ;;  %v326_v49 = vld [vmem:[%s3687_s21 + $0x4d8] sm:$0xff]  ;;  %v227_v50 = vld [vmem:[%s3687_s21 + $0x1c0] sm:$0xff] }
  0x3f   : > { %3509 = vmatprep.mubr.msk.f32.mxu1 %vm380_vm1, %v295_v51  ;;  %v327_v51 = vld [vmem:[%s3687_s21 + $0x4e0] sm:$0xff] }
  0x41   : > { %3360 = vmatmul.mubr.msk.f32.gmra.mxu0 %vm380_vm1, %v196_v52  ;;  %v228_v52 = vld [vmem:[%s3687_s21 + $0x1c8] sm:$0xff] }
  0x42   : > { %3510 = vmatmul.mubr.msk.f32.gmra.mxu1 %vm380_vm1, %v296_v53  ;;  %3362 = vmatprep.mubr.msk.f32.mxu0 %vm380_vm1, %v197_v54  ;;  %v328_v53 = vld [vmem:[%s3687_s21 + $0x4e8] sm:$0xff]  ;;  %v229_v54 = vld [vmem:[%s3687_s21 + $0x1d0] sm:$0xff] }
  0x43   : > { %3512 = vmatprep.mubr.msk.f32.mxu1 %vm380_vm1, %v297_v55  ;;  %v329_v55 = vld [vmem:[%s3687_s21 + $0x4f0] sm:$0xff] }
  0x45   : > { %3363 = vmatmul.mubr.msk.f32.gmra.mxu0 %vm380_vm1, %v198_v56  ;;  %v230_v56 = vld [vmem:[%s3687_s21 + $0x1d8] sm:$0xff] }
  0x46   : > { %3513 = vmatmul.mubr.msk.f32.gmra.mxu1 %vm380_vm1, %v298_v57  ;;  %3365 = vmatprep.mubr.msk.f32.mxu0 %vm380_vm1, %v199_v58  ;;  %v330_v57 = vld [vmem:[%s3687_s21 + $0x4f8] sm:$0xff]  ;;  %v231_v58 = vld [vmem:[%s3687_s21 + $0x1e0] sm:$0xff] }
  0x47   : > { %3515 = vmatprep.mubr.msk.f32.mxu1 %vm380_vm1, %v299_v59  ;;  %v331_v59 = vld [vmem:[%s3687_s21 + $0x500] sm:$0xff] }
  0x49   : > { %3366 = vmatmul.mubr.msk.f32.gmra.mxu0 %vm380_vm1, %v200_v60  ;;  %v232_v60 = vld [vmem:[%s3687_s21 + $0x1e8] sm:$0xff] }
  0x4a   : > { %3516 = vmatmul.mubr.msk.f32.gmra.mxu1 %vm380_vm1, %v300_v61  ;;  %3368 = vmatprep.mubr.msk.f32.mxu0 %vm380_vm1, %v201_v62  ;;  %v332_v61 = vld [vmem:[%s3687_s21 + $0x508] sm:$0xff]  ;;  %v233_v62 = vld [vmem:[%s3687_s21 + $0x1f0] sm:$0xff] }
  0x4b   : > { %3518 = vmatprep.mubr.msk.f32.mxu1 %vm380_vm1, %v301_v63  ;;  %v333_v63 = vld [vmem:[%s3687_s21 + $0x510] sm:$0xff] }
  0x4d   : > { %3369 = vmatmul.mubr.msk.f32.gmra.mxu0 %vm380_vm1, %v202_v0  ;;  %v234_v0 = vld [vmem:[%s3687_s21 + $0x1f8] sm:$0xff] }
  0x4e   : > { %3519 = vmatmul.mubr.msk.f32.gmra.mxu1 %vm380_vm1, %v302_v1  ;;  %3371 = vmatprep.mubr.msk.f32.mxu0 %vm380_vm1, %v203_v2  ;;  %v334_v1 = vld [vmem:[%s3687_s21 + $0x518] sm:$0xff]  ;;  %v235_v2 = vld [vmem:[%s3687_s21 + $0x200] sm:$0xff] }
  0x4f   : > { %3521 = vmatprep.mubr.msk.f32.mxu1 %vm380_vm1, %v303_v3  ;;  %v335_v3 = vld [vmem:[%s3687_s21 + $0x520] sm:$0xff] }
  0x51   : > { %3372 = vmatmul.mubr.msk.f32.gmra.mxu0 %vm380_vm1, %v204_v4  ;;  %v236_v4 = vld [vmem:[%s3687_s21 + $0x208] sm:$0xff] }
  0x52   : > { %3522 = vmatmul.mubr.msk.f32.gmra.mxu1 %vm380_vm1, %v304_v5  ;;  %3374 = vmatprep.mubr.msk.f32.mxu0 %vm380_vm1, %v205_v6  ;;  %v336_v5 = vld [vmem:[%s3687_s21 + $0x528] sm:$0xff]  ;;  %v237_v6 = vld [vmem:[%s3687_s21 + $0x210] sm:$0xff] }
  0x53   : > { %3524 = vmatprep.mubr.msk.f32.mxu1 %vm380_vm1, %v305_v7  ;;  %v337_v7 = vld [vmem:[%s3687_s21 + $0x530] sm:$0xff] }
  0x55   : > { %3375 = vmatmul.mubr.msk.f32.gmra.mxu0 %vm380_vm1, %v206_v8  ;;  %v238_v8 = vld [vmem:[%s3687_s21 + $0x218] sm:$0xff] }
  0x56   : > { %3525 = vmatmul.mubr.msk.f32.gmra.mxu1 %vm380_vm1, %v306_v9  ;;  %3377 = vmatprep.mubr.msk.f32.mxu0 %vm380_vm1, %v207_v10  ;;  %v338_v9 = vld [vmem:[%s3687_s21 + $0x538] sm:$0xff]  ;;  %v239_v10 = vld [vmem:[%s3687_s21 + $0x220] sm:$0xff] }
  0x57   : > { %3527 = vmatprep.mubr.msk.f32.mxu1 %vm380_vm1, %v307_v11  ;;  %v339_v11 = vld [vmem:[%s3687_s21 + $0x540] sm:$0xff] }
  0x59   : > { %3378 = vmatmul.mubr.msk.f32.gmra.mxu0 %vm380_vm1, %v208_v12  ;;  %v240_v12 = vld [vmem:[%s3687_s21 + $0x228] sm:$0xff] }
  0x5a   : > { %3528 = vmatmul.mubr.msk.f32.gmra.mxu1 %vm380_vm1, %v308_v13  ;;  %3380 = vmatprep.mubr.msk.f32.mxu0 %vm380_vm1, %v209_v14  ;;  %v340_v13 = vld [vmem:[%s3687_s21 + $0x548] sm:$0xff]  ;;  %v241_v14 = vld [vmem:[%s3687_s21 + $0x230] sm:$0xff] }
  0x5b   : > { %3530 = vmatprep.mubr.msk.f32.mxu1 %vm380_vm1, %v309_v15  ;;  %v341_v15 = vld [vmem:[%s3687_s21 + $0x550] sm:$0xff] }
  0x5d   : > { %3381 = vmatmul.mubr.msk.f32.gmra.mxu0 %vm380_vm1, %v210_v16  ;;  %v242_v16 = vld [vmem:[%s3687_s21 + $0x238] sm:$0xff] }
  0x5e   : > { %3531 = vmatmul.mubr.msk.f32.gmra.mxu1 %vm380_vm1, %v310_v17  ;;  %3383 = vmatprep.mubr.msk.f32.mxu0 %vm380_vm1, %v211_v18  ;;  %v342_v17 = vld [vmem:[%s3687_s21 + $0x558] sm:$0xff]  ;;  %v243_v18 = vld [vmem:[%s3687_s21 + $0x240] sm:$0xff] }
  0x5f   : > { %3533 = vmatprep.mubr.msk.f32.mxu1 %vm380_vm1, %v311_v19  ;;  %v343_v19 = vld [vmem:[%s3687_s21 + $0x560] sm:$0xff] }
  0x61   : > { %3384 = vmatmul.mubr.msk.f32.gmra.mxu0 %vm380_vm1, %v212_v20  ;;  %v244_v20 = vld [vmem:[%s3687_s21 + $0x248] sm:$0xff] }
  0x62   : > { %3534 = vmatmul.mubr.msk.f32.gmra.mxu1 %vm380_vm1, %v312_v21  ;;  %3386 = vmatprep.mubr.msk.f32.mxu0 %vm380_vm1, %v213_v22  ;;  %v344_v21 = vld [vmem:[%s3687_s21 + $0x568] sm:$0xff]  ;;  %v245_v22 = vld [vmem:[%s3687_s21 + $0x250] sm:$0xff] }
  0x63   : > { %3536 = vmatprep.mubr.msk.f32.mxu1 %vm380_vm1, %v313_v23  ;;  %v345_v23 = vld [vmem:[%s3687_s21 + $0x570] sm:$0xff] }
  0x65   : > { %3387 = vmatmul.mubr.msk.f32.gmra.mxu0 %vm380_vm1, %v214_v24  ;;  %v246_v24 = vld [vmem:[%s3687_s21 + $0x258] sm:$0xff] }
  0x66   : > { %3537 = vmatmul.mubr.msk.f32.gmra.mxu1 %vm380_vm1, %v314_v25  ;;  %3389 = vmatprep.mubr.msk.f32.mxu0 %vm380_vm1, %v215_v26  ;;  %v346_v25 = vld [vmem:[%s3687_s21 + $0x578] sm:$0xff]  ;;  %v247_v26 = vld [vmem:[%s3687_s21 + $0x260] sm:$0xff] }
  0x67   : > { %3539 = vmatprep.mubr.msk.f32.mxu1 %vm380_vm1, %v315_v27  ;;  %v347_v27 = vld [vmem:[%s3687_s21 + $0x580] sm:$0xff] }
  0x69   : > { %3390 = vmatmul.mubr.msk.f32.gmra.mxu0 %vm380_vm1, %v216_v28  ;;  %v248_v28 = vld [vmem:[%s3687_s21 + $0x268] sm:$0xff] }
  0x6a   : > { %3540 = vmatmul.mubr.msk.f32.gmra.mxu1 %vm380_vm1, %v316_v29  ;;  %3392 = vmatprep.mubr.msk.f32.mxu0 %vm380_vm1, %v217_v30  ;;  %v348_v29 = vld [vmem:[%s3687_s21 + $0x588] sm:$0xff]  ;;  %v249_v30 = vld [vmem:[%s3687_s21 + $0x270] sm:$0xff] }
  0x6b   : > { %3542 = vmatprep.mubr.msk.f32.mxu1 %vm380_vm1, %v317_v31  ;;  %v349_v31 = vld [vmem:[%s3687_s21 + $0x590] sm:$0xff] }
  0x6d   : > { %3393 = vmatmul.mubr.msk.f32.gmra.mxu0 %vm380_vm1, %v218_v32  ;;  %v250_v32 = vld [vmem:[%s3687_s21 + $0x278] sm:$0xff] }
  0x6e   : > { %3543 = vmatmul.mubr.msk.f32.gmra.mxu1 %vm380_vm1, %v318_v33  ;;  %3395 = vmatprep.mubr.msk.f32.mxu0 %vm380_vm1, %v219_v34  ;;  %v350_v33 = vld [vmem:[%s3687_s21 + $0x598] sm:$0xff]  ;;  %v251_v34 = vld [vmem:[%s3687_s21 + $0x280] sm:$0xff] }
  0x6f   : > { %3545 = vmatprep.mubr.msk.f32.mxu1 %vm380_vm1, %v319_v35  ;;  %v351_v35 = vld [vmem:[%s3687_s21 + $0x5a0] sm:$0xff] }
  0x71   : > { %3396 = vmatmul.mubr.msk.f32.gmra.mxu0 %vm380_vm1, %v220_v36  ;;  %v252_v36 = vld [vmem:[%s3687_s21 + $0x288] sm:$0xff] }
  0x72   : > { %3546 = vmatmul.mubr.msk.f32.gmra.mxu1 %vm380_vm1, %v320_v37  ;;  %3398 = vmatprep.mubr.msk.f32.mxu0 %vm380_vm1, %v221_v38  ;;  %v352_v37 = vld [vmem:[%s3687_s21 + $0x5a8] sm:$0xff]  ;;  %v253_v38 = vld [vmem:[%s3687_s21 + $0x290] sm:$0xff] }
  0x73   : > { %3548 = vmatprep.mubr.msk.f32.mxu1 %vm380_vm1, %v321_v39  ;;  %v353_v39 = vld [vmem:[%s3687_s21 + $0x5b0] sm:$0xff] }
  0x75   : > { %3399 = vmatmul.mubr.msk.f32.gmra.mxu0 %vm380_vm1, %v222_v40  ;;  %v254_v40 = vld [vmem:[%s3687_s21 + $0x298] sm:$0xff] }
  0x76   : > { %3549 = vmatmul.mubr.msk.f32.gmra.mxu1 %vm380_vm1, %v322_v41  ;;  %3401 = vmatprep.mubr.msk.f32.mxu0 %vm380_vm1, %v223_v42  ;;  %v354_v41 = vld [vmem:[%s3687_s21 + $0x5b8] sm:$0xff]  ;;  %v255_v42 = vld [vmem:[%s3687_s21 + $0x2a0] sm:$0xff] }
  0x77   : > { %3551 = vmatprep.mubr.msk.f32.mxu1 %vm380_vm1, %v323_v43  ;;  %v355_v43 = vld [vmem:[%s3687_s21 + $0x5c0] sm:$0xff] }
  0x79   : > { %3402 = vmatmul.mubr.msk.f32.gmra.mxu0 %vm380_vm1, %v224_v44  ;;  %v256_v44 = vld [vmem:[%s3687_s21 + $0x2a8] sm:$0xff] }
  0x7a   : > { %3552 = vmatmul.mubr.msk.f32.gmra.mxu1 %vm380_vm1, %v324_v45  ;;  %3404 = vmatprep.mubr.msk.f32.mxu0 %vm380_vm1, %v225_v46  ;;  %v356_v45 = vld [vmem:[%s3687_s21 + $0x5c8] sm:$0xff]  ;;  %v257_v46 = vld [vmem:[%s3687_s21 + $0x2b0] sm:$0xff] }
  0x7b   : > { %3554 = vmatprep.mubr.msk.f32.mxu1 %vm380_vm1, %v325_v47  ;;  %v357_v47 = vld [vmem:[%s3687_s21 + $0x5d0] sm:$0xff] }
  0x7d   : > { %3405 = vmatmul.mubr.msk.f32.gmra.mxu0 %vm380_vm1, %v226_v48  ;;  %v258_v48 = vld [vmem:[%s3687_s21 + $0x2b8] sm:$0xff] }
  0x7e   : > { %3555 = vmatmul.mubr.msk.f32.gmra.mxu1 %vm380_vm1, %v326_v49  ;;  %3407 = vmatprep.mubr.msk.f32.mxu0 %vm380_vm1, %v227_v50  ;;  %v358_v49 = vld [vmem:[%s3687_s21 + $0x5d8] sm:$0xff]  ;;  %v259_v50 = vld [vmem:[%s3687_s21 + $0x2c0] sm:$0xff] }
  0x7f   : > { %3557 = vmatprep.mubr.msk.f32.mxu1 %vm380_vm1, %v327_v51  ;;  %v359_v51 = vld [vmem:[%s3687_s21 + $0x5e0] sm:$0xff] }
  0x81   : > { %3408 = vmatmul.mubr.msk.f32.gmra.mxu0 %vm380_vm1, %v228_v52  ;;  %v260_v52 = vld [vmem:[%s3687_s21 + $0x2c8] sm:$0xff] }
  0x82   : > { %3558 = vmatmul.mubr.msk.f32.gmra.mxu1 %vm380_vm1, %v328_v53  ;;  %3410 = vmatprep.mubr.msk.f32.mxu0 %vm380_vm1, %v229_v54  ;;  %v360_v53 = vld [vmem:[%s3687_s21 + $0x5e8] sm:$0xff]  ;;  %v261_v54 = vld [vmem:[%s3687_s21 + $0x2d0] sm:$0xff] }
  0x83   : > { %3560 = vmatprep.mubr.msk.f32.mxu1 %vm380_vm1, %v329_v55  ;;  %v361_v55 = vld [vmem:[%s3687_s21 + $0x5f0] sm:$0xff] }
  0x85   : > { %3411 = vmatmul.mubr.msk.f32.gmra.mxu0 %vm380_vm1, %v230_v56  ;;  %v262_v56 = vld [vmem:[%s3687_s21 + $0x2d8] sm:$0xff] }
  0x86   : > { %3561 = vmatmul.mubr.msk.f32.gmra.mxu1 %vm380_vm1, %v330_v57  ;;  %3413 = vmatprep.mubr.msk.f32.mxu0 %vm380_vm1, %v231_v58  ;;  %v362_v57 = vld [vmem:[%s3687_s21 + $0x5f8] sm:$0xff]  ;;  %v263_v58 = vld [vmem:[%s3687_s21 + $0x2e0] sm:$0xff] }
  0x87   : > { %3563 = vmatprep.mubr.msk.f32.mxu1 %vm380_vm1, %v331_v59  ;;  %v363_v59 = vld [vmem:[%s3687_s21 + $0x600] sm:$0xff] }
  0x89   : > { %3414 = vmatmul.mubr.msk.f32.gmra.mxu0 %vm380_vm1, %v232_v60  ;;  %v264_v60 = vld [vmem:[%s3687_s21 + $0x2e8] sm:$0xff] }
  0x8a   : > { %3564 = vmatmul.mubr.msk.f32.gmra.mxu1 %vm380_vm1, %v332_v61  ;;  %3416 = vmatprep.mubr.msk.f32.mxu0 %vm380_vm1, %v233_v62  ;;  %v364_v61 = vld [vmem:[%s3687_s21 + $0x608] sm:$0xff]  ;;  %v265_v62 = vld [vmem:[%s3687_s21 + $0x2f0] sm:$0xff] }
  0x8b   : > { %3566 = vmatprep.mubr.msk.f32.mxu1 %vm380_vm1, %v333_v63  ;;  %v365_v63 = vld [vmem:[%s3687_s21 + $0x610] sm:$0xff] }
  0x8d   : > { %3417 = vmatmul.mubr.msk.f32.gmra.mxu0 %vm380_vm1, %v234_v0  ;;  %v266_v0 = vld [vmem:[%s3687_s21 + $0x2f8] sm:$0xff] }
  0x8e   : > { %3567 = vmatmul.mubr.msk.f32.gmra.mxu1 %vm380_vm1, %v334_v1  ;;  %3419 = vmatprep.mubr.msk.f32.mxu0 %vm380_vm1, %v235_v2  ;;  %v366_v1 = vld [vmem:[%s3687_s21 + $0x618] sm:$0xff]  ;;  %v267_v2 = vld [vmem:[%s3687_s21 + $0x300] sm:$0xff] }
  0x8f   : > { %3569 = vmatprep.mubr.msk.f32.mxu1 %vm380_vm1, %v335_v3  ;;  %v367_v3 = vld [vmem:[%s3687_s21 + $0x620] sm:$0xff] }
  0x91   : > { %3420 = vmatmul.mubr.msk.f32.gmra.mxu0 %vm380_vm1, %v236_v4  ;;  %v268_v4 = vld [vmem:[%s3687_s21 + $0x308] sm:$0xff] }
  0x92   : > { %3570 = vmatmul.mubr.msk.f32.gmra.mxu1 %vm380_vm1, %v336_v5  ;;  %3422 = vmatprep.mubr.msk.f32.mxu0 %vm380_vm1, %v237_v6  ;;  %v368_v5 = vld [vmem:[%s3687_s21 + $0x628] sm:$0xff]  ;;  %v4082_v6 = vld [vmem:[%s4615_s2] ss:$0 sm:$0xff] }
  0x93   : > { %3572 = vmatprep.mubr.msk.f32.mxu1 %vm380_vm1, %v337_v7  ;;  %v269_v7 = vld [vmem:[%s3687_s21 + $0x310] sm:$0xff] }
  0x95   : > { %3423 = vmatmul.mubr.msk.f32.gmra.mxu0 %vm380_vm1, %v238_v8  ;;  %v369_v8 = vld [vmem:[%s3687_s21 + $0x630] sm:$0xff] }
  0x96   : > { %3573 = vmatmul.mubr.msk.f32.gmra.mxu1 %vm380_vm1, %v338_v9  ;;  %3425 = vmatprep.mubr.msk.f32.mxu0 %vm380_vm1, %v239_v10 }
  0x97   : > { %3575 = vmatprep.mubr.msk.f32.mxu1 %vm380_vm1, %v339_v11 }
  0x99   : > { %3426 = vmatmul.mubr.msk.f32.gmra.mxu0 %vm380_vm1, %v240_v12 }
  0x9a   : > { %3576 = vmatmul.mubr.msk.f32.gmra.mxu1 %vm380_vm1, %v340_v13  ;;  %3428 = vmatprep.mubr.msk.f32.mxu0 %vm380_vm1, %v241_v14  ;;  %v270_v13 = vld [vmem:[%s3687_s21 + $0x318] sm:$0xff] }
  0x9b   : > { %3578 = vmatprep.mubr.msk.f32.mxu1 %vm380_vm1, %v341_v15  ;;  %v370_v14 = vld [vmem:[%s3687_s21 + $0x638] sm:$0xff] }
  0x9d   : > { %3429 = vmatmul.mubr.msk.f32.gmra.mxu0 %vm380_vm1, %v242_v16 }
  0x9e   : > { %3579 = vmatmul.mubr.msk.f32.gmra.mxu1 %vm380_vm1, %v342_v17  ;;  %3431 = vmatprep.mubr.msk.f32.mxu0 %vm380_vm1, %v243_v18 }
  0x9f   : > { %3581 = vmatprep.mubr.msk.f32.mxu1 %vm380_vm1, %v343_v19 }
  0xa1   : > { %3432 = vmatmul.mubr.msk.f32.gmra.mxu0 %vm380_vm1, %v244_v20 }
  0xa2   : > { %3582 = vmatmul.mubr.msk.f32.gmra.mxu1 %vm380_vm1, %v344_v21  ;;  %3434 = vmatprep.mubr.msk.f32.mxu0 %vm380_vm1, %v245_v22 }
  0xa3   : > { %3584 = vmatprep.mubr.msk.f32.mxu1 %vm380_vm1, %v345_v23 }
  0xa5   : > { %3435 = vmatmul.mubr.msk.f32.gmra.mxu0 %vm380_vm1, %v246_v24 }
  0xa6   : > { %3585 = vmatmul.mubr.msk.f32.gmra.mxu1 %vm380_vm1, %v346_v25  ;;  %3437 = vmatprep.mubr.msk.f32.mxu0 %vm380_vm1, %v247_v26 }
  0xa7   : > { %3587 = vmatprep.mubr.msk.f32.mxu1 %vm380_vm1, %v347_v27 }
  0xa9   : > { %3438 = vmatmul.mubr.msk.f32.gmra.mxu0 %vm380_vm1, %v248_v28 }
  0xaa   : > { %3588 = vmatmul.mubr.msk.f32.gmra.mxu1 %vm380_vm1, %v348_v29  ;;  %3440 = vmatprep.mubr.msk.f32.mxu0 %vm380_vm1, %v249_v30 }
  0xab   : > { %3590 = vmatprep.mubr.msk.f32.mxu1 %vm380_vm1, %v349_v31 }
  0xad   : > { %3441 = vmatmul.mubr.msk.f32.gmra.mxu0 %vm380_vm1, %v250_v32 }
  0xae   : > { %3591 = vmatmul.mubr.msk.f32.gmra.mxu1 %vm380_vm1, %v350_v33  ;;  %3443 = vmatprep.mubr.msk.f32.mxu0 %vm380_vm1, %v251_v34 }
  0xaf   : > { %3593 = vmatprep.mubr.msk.f32.mxu1 %vm380_vm1, %v351_v35 }
  0xb1   : > { %3444 = vmatmul.mubr.msk.f32.gmra.mxu0 %vm380_vm1, %v252_v36 }
  0xb2   : > { %3594 = vmatmul.mubr.msk.f32.gmra.mxu1 %vm380_vm1, %v352_v37  ;;  %3446 = vmatprep.mubr.msk.f32.mxu0 %vm380_vm1, %v253_v38 }
  0xb3   : > { %3596 = vmatprep.mubr.msk.f32.mxu1 %vm380_vm1, %v353_v39 }
  0xb5   : > { %3447 = vmatmul.mubr.msk.f32.gmra.mxu0 %vm380_vm1, %v254_v40 }
  0xb6   : > { %3597 = vmatmul.mubr.msk.f32.gmra.mxu1 %vm380_vm1, %v354_v41  ;;  %3449 = vmatprep.mubr.msk.f32.mxu0 %vm380_vm1, %v255_v42 }
  0xb7   : > { %3599 = vmatprep.mubr.msk.f32.mxu1 %vm380_vm1, %v355_v43 }
  0xb9   : > { %3450 = vmatmul.mubr.msk.f32.gmra.mxu0 %vm380_vm1, %v256_v44 }
  0xba   : > { %3600 = vmatmul.mubr.msk.f32.gmra.mxu1 %vm380_vm1, %v356_v45  ;;  %3452 = vmatprep.mubr.msk.f32.mxu0 %vm380_vm1, %v257_v46 }
  0xbb   : > { %3602 = vmatprep.mubr.msk.f32.mxu1 %vm380_vm1, %v357_v47 }
  0xbd   : > { %3453 = vmatmul.mubr.msk.f32.gmra.mxu0 %vm380_vm1, %v258_v48 }
  0xbe   : > { %3603 = vmatmul.mubr.msk.f32.gmra.mxu1 %vm380_vm1, %v358_v49  ;;  %3455 = vmatprep.mubr.msk.f32.mxu0 %vm380_vm1, %v259_v50 }
  0xbf   : > { %3605 = vmatprep.mubr.msk.f32.mxu1 %vm380_vm1, %v359_v51 }
  0xc1   : > { %3456 = vmatmul.mubr.msk.f32.gmra.mxu0 %vm380_vm1, %v260_v52 }
  0xc2   : > { %3606 = vmatmul.mubr.msk.f32.gmra.mxu1 %vm380_vm1, %v360_v53  ;;  %3458 = vmatprep.mubr.msk.f32.mxu0 %vm380_vm1, %v261_v54 }
  0xc3   : > { %3608 = vmatprep.mubr.msk.f32.mxu1 %vm380_vm1, %v361_v55 }
  0xc5   : > { %3459 = vmatmul.mubr.msk.f32.gmra.mxu0 %vm380_vm1, %v262_v56 }
  0xc6   : > { %3609 = vmatmul.mubr.msk.f32.gmra.mxu1 %vm380_vm1, %v362_v57  ;;  %3461 = vmatprep.mubr.msk.f32.mxu0 %vm380_vm1, %v263_v58 }
  0xc7   : > { %3611 = vmatprep.mubr.msk.f32.mxu1 %vm380_vm1, %v363_v59 }
  0xc9   : > { %3462 = vmatmul.mubr.msk.f32.gmra.mxu0 %vm380_vm1, %v264_v60 }
  0xca   : > { %3612 = vmatmul.mubr.msk.f32.gmra.mxu1 %vm380_vm1, %v364_v61  ;;  %3464 = vmatprep.mubr.msk.f32.mxu0 %vm380_vm1, %v265_v62 }
  0xcb   : > { %3614 = vmatprep.mubr.msk.f32.mxu1 %vm380_vm1, %v365_v63 }
  0xcd   : > { %3465 = vmatmul.mubr.msk.f32.gmra.mxu0 %vm380_vm1, %v266_v0 }
  0xce   : > { %3615 = vmatmul.mubr.msk.f32.gmra.mxu1 %vm380_vm1, %v366_v1  ;;  %3467 = vmatprep.mubr.msk.f32.mxu0 %vm380_vm1, %v267_v2 }
  0xcf   : > { %3617 = vmatprep.mubr.msk.f32.mxu1 %vm380_vm1, %v367_v3 }
  0xd1   : > { %v3325_v9 = vpop.f32.mrf.mxu0  ;;  %3468 = vmatmul.mubr.msk.f32.gmra.mxu0 %vm380_vm1, %v268_v4 }
  0xd2   : > { %v3475_v10 = vpop.f32.mrf.mxu1  ;;  %3618 = vmatmul.mubr.msk.f32.gmra.mxu1 %vm380_vm1, %v368_v5  ;;  %v1057_v11 = vadd.f32 %v3325_v9, %v4082_v6  ;;  %3470 = vmatprep.mubr.msk.f32.mxu0 %vm380_vm1, %v269_v7 }
  0xd3   : > { %v1557_v12 = vadd.f32 %v3475_v10, %v4082_v6  ;;  %3620 = vmatprep.mubr.msk.f32.mxu1 %vm380_vm1, %v369_v8  ;;  %v1051_v15 = vpop.f32.mrf.mxu0 }
  0xd4   : > { %v1551_v16 = vpop.f32.mrf.mxu1  ;;  %v2051_v17 = vmax.f32 %v1057_v11, 0.0  ;;  %v1052_v19 = vadd.f32 %v4082_v6, %v1051_v15 }
  0xd5   : > { %v2151_v18 = vmax.f32 %v1557_v12, 0.0  ;;  %v1552_v20 = vadd.f32 %v4082_v6, %v1551_v16  ;;  %v3328_v21 = vpop.f32.mrf.mxu0  ;;  %3471 = vmatmul.mubr.msk.f32.gmra.mxu0 %vm380_vm1, %v270_v13 }
  0xd6   : > { %v3478_v22 = vpop.f32.mrf.mxu1  ;;  %3621 = vmatmul.mubr.msk.f32.gmra.mxu1 %vm380_vm1, %v370_v14  ;;  %2252 = vst.msk [vmem:[#allocation2 + $0x8] sm:$0xff] %vm2250_vm2, %v2051_v17  ;;  %v2050_v23 = vmax.f32 %v1052_v19, 0.0  ;;  %v1067_v25 = vadd.f32 %v3328_v21, %v4082_v6 }
  0xd7   : > { %2352 = vst.msk [vmem:[#allocation2 + $0x328] sm:$0xff] %vm2250_vm2, %v2151_v18  ;;  %v2150_v24 = vmax.f32 %v1552_v20, 0.0  ;;  %v1567_v26 = vadd.f32 %v3478_v22, %v4082_v6  ;;  %v1061_v27 = vpop.f32.mrf.mxu0 }
  0xd8   : > { %v1561_v28 = vpop.f32.mrf.mxu1  ;;  %2251 = vst.msk [vmem:[#allocation2] sm:$0xff] %vm2250_vm2, %v2050_v23  ;;  %v2053_v29 = vmax.f32 %v1067_v25, 0.0  ;;  %v1062_v31 = vadd.f32 %v4082_v6, %v1061_v27 }
  0xd9   : > { %2351 = vst.msk [vmem:[#allocation2 + $0x320] sm:$0xff] %vm2250_vm2, %v2150_v24  ;;  %v2153_v30 = vmax.f32 %v1567_v26, 0.0  ;;  %v1562_v32 = vadd.f32 %v4082_v6, %v1561_v28  ;;  %v3331_v33 = vpop.f32.mrf.mxu0 }
  0xda   : > { %v3481_v34 = vpop.f32.mrf.mxu1  ;;  %2254 = vst.msk [vmem:[#allocation2 + $0x18] sm:$0xff] %vm2250_vm2, %v2053_v29  ;;  %v2052_v35 = vmax.f32 %v1062_v31, 0.0  ;;  %v1077_v37 = vadd.f32 %v3331_v33, %v4082_v6 }
  0xdb   : > { %2354 = vst.msk [vmem:[#allocation2 + $0x338] sm:$0xff] %vm2250_vm2, %v2153_v30  ;;  %v2152_v36 = vmax.f32 %v1562_v32, 0.0  ;;  %v1577_v38 = vadd.f32 %v3481_v34, %v4082_v6  ;;  %v1071_v39 = vpop.f32.mrf.mxu0 }
  0xdc   : > { %v1571_v40 = vpop.f32.mrf.mxu1  ;;  %2253 = vst.msk [vmem:[#allocation2 + $0x10] sm:$0xff] %vm2250_vm2, %v2052_v35  ;;  %v2055_v41 = vmax.f32 %v1077_v37, 0.0  ;;  %v1072_v43 = vadd.f32 %v4082_v6, %v1071_v39 }
  0xdd   : > { %2353 = vst.msk [vmem:[#allocation2 + $0x330] sm:$0xff] %vm2250_vm2, %v2152_v36  ;;  %v2155_v42 = vmax.f32 %v1577_v38, 0.0  ;;  %v1572_v44 = vadd.f32 %v4082_v6, %v1571_v40  ;;  %v3334_v45 = vpop.f32.mrf.mxu0 }
  0xde   : > { %v3484_v46 = vpop.f32.mrf.mxu1  ;;  %2256 = vst.msk [vmem:[#allocation2 + $0x28] sm:$0xff] %vm2250_vm2, %v2055_v41  ;;  %v2054_v47 = vmax.f32 %v1072_v43, 0.0  ;;  %v1087_v49 = vadd.f32 %v3334_v45, %v4082_v6 }
  0xdf   : > { %2356 = vst.msk [vmem:[#allocation2 + $0x348] sm:$0xff] %vm2250_vm2, %v2155_v42  ;;  %v2154_v48 = vmax.f32 %v1572_v44, 0.0  ;;  %v1587_v50 = vadd.f32 %v3484_v46, %v4082_v6  ;;  %v1081_v51 = vpop.f32.mrf.mxu0 }
  0xe0   : > { %v1581_v52 = vpop.f32.mrf.mxu1  ;;  %2255 = vst.msk [vmem:[#allocation2 + $0x20] sm:$0xff] %vm2250_vm2, %v2054_v47  ;;  %v2057_v53 = vmax.f32 %v1087_v49, 0.0  ;;  %v1082_v55 = vadd.f32 %v4082_v6, %v1081_v51 }
  0xe1   : > { %2355 = vst.msk [vmem:[#allocation2 + $0x340] sm:$0xff] %vm2250_vm2, %v2154_v48  ;;  %v2157_v54 = vmax.f32 %v1587_v50, 0.0  ;;  %v1582_v56 = vadd.f32 %v4082_v6, %v1581_v52  ;;  %v3337_v57 = vpop.f32.mrf.mxu0 }
  0xe2   : > { %v3487_v58 = vpop.f32.mrf.mxu1  ;;  %2258 = vst.msk [vmem:[#allocation2 + $0x38] sm:$0xff] %vm2250_vm2, %v2057_v53  ;;  %v2056_v59 = vmax.f32 %v1082_v55, 0.0  ;;  %v1097_v61 = vadd.f32 %v3337_v57, %v4082_v6 }
  0xe3   : > { %2358 = vst.msk [vmem:[#allocation2 + $0x358] sm:$0xff] %vm2250_vm2, %v2157_v54  ;;  %v2156_v60 = vmax.f32 %v1582_v56, 0.0  ;;  %v1597_v62 = vadd.f32 %v3487_v58, %v4082_v6  ;;  %v1091_v63 = vpop.f32.mrf.mxu0 }
  0xe4   : > { %v1591_v0 = vpop.f32.mrf.mxu1  ;;  %2257 = vst.msk [vmem:[#allocation2 + $0x30] sm:$0xff] %vm2250_vm2, %v2056_v59  ;;  %v2059_v1 = vmax.f32 %v1097_v61, 0.0  ;;  %v1092_v3 = vadd.f32 %v4082_v6, %v1091_v63 }
  0xe5   : > { %2357 = vst.msk [vmem:[#allocation2 + $0x350] sm:$0xff] %vm2250_vm2, %v2156_v60  ;;  %v2159_v2 = vmax.f32 %v1597_v62, 0.0  ;;  %v1592_v4 = vadd.f32 %v4082_v6, %v1591_v0  ;;  %v3340_v5 = vpop.f32.mrf.mxu0 }
  0xe6   : > { %v3490_v7 = vpop.f32.mrf.mxu1  ;;  %2260 = vst.msk [vmem:[#allocation2 + $0x48] sm:$0xff] %vm2250_vm2, %v2059_v1  ;;  %v2058_v8 = vmax.f32 %v1092_v3, 0.0  ;;  %v1107_v10 = vadd.f32 %v3340_v5, %v4082_v6 }
  0xe7   : > { %2360 = vst.msk [vmem:[#allocation2 + $0x368] sm:$0xff] %vm2250_vm2, %v2159_v2  ;;  %v2158_v9 = vmax.f32 %v1592_v4, 0.0  ;;  %v1607_v11 = vadd.f32 %v3490_v7, %v4082_v6  ;;  %v1101_v12 = vpop.f32.mrf.mxu0 }
  0xe8   : > { %v1601_v13 = vpop.f32.mrf.mxu1  ;;  %2259 = vst.msk [vmem:[#allocation2 + $0x40] sm:$0xff] %vm2250_vm2, %v2058_v8  ;;  %v2061_v14 = vmax.f32 %v1107_v10, 0.0  ;;  %v1102_v16 = vadd.f32 %v4082_v6, %v1101_v12 }
  0xe9   : > { %2359 = vst.msk [vmem:[#allocation2 + $0x360] sm:$0xff] %vm2250_vm2, %v2158_v9  ;;  %v2161_v15 = vmax.f32 %v1607_v11, 0.0  ;;  %v1602_v17 = vadd.f32 %v4082_v6, %v1601_v13  ;;  %v3343_v18 = vpop.f32.mrf.mxu0 }
  0xea   : > { %v3493_v19 = vpop.f32.mrf.mxu1  ;;  %2262 = vst.msk [vmem:[#allocation2 + $0x58] sm:$0xff] %vm2250_vm2, %v2061_v14  ;;  %v2060_v20 = vmax.f32 %v1102_v16, 0.0  ;;  %v1117_v22 = vadd.f32 %v3343_v18, %v4082_v6 }
  0xeb   : > { %2362 = vst.msk [vmem:[#allocation2 + $0x378] sm:$0xff] %vm2250_vm2, %v2161_v15  ;;  %v2160_v21 = vmax.f32 %v1602_v17, 0.0  ;;  %v1617_v23 = vadd.f32 %v3493_v19, %v4082_v6  ;;  %v1111_v24 = vpop.f32.mrf.mxu0 }
  0xec   : > { %v1611_v25 = vpop.f32.mrf.mxu1  ;;  %2261 = vst.msk [vmem:[#allocation2 + $0x50] sm:$0xff] %vm2250_vm2, %v2060_v20  ;;  %v2063_v26 = vmax.f32 %v1117_v22, 0.0  ;;  %v1112_v28 = vadd.f32 %v4082_v6, %v1111_v24 }
  0xed   : > { %2361 = vst.msk [vmem:[#allocation2 + $0x370] sm:$0xff] %vm2250_vm2, %v2160_v21  ;;  %v2163_v27 = vmax.f32 %v1617_v23, 0.0  ;;  %v1612_v29 = vadd.f32 %v4082_v6, %v1611_v25  ;;  %v3346_v30 = vpop.f32.mrf.mxu0 }
  0xee   : > { %v3496_v31 = vpop.f32.mrf.mxu1  ;;  %2264 = vst.msk [vmem:[#allocation2 + $0x68] sm:$0xff] %vm2250_vm2, %v2063_v26  ;;  %v2062_v32 = vmax.f32 %v1112_v28, 0.0  ;;  %v1127_v34 = vadd.f32 %v3346_v30, %v4082_v6 }
  0xef   : > { %2364 = vst.msk [vmem:[#allocation2 + $0x388] sm:$0xff] %vm2250_vm2, %v2163_v27  ;;  %v2162_v33 = vmax.f32 %v1612_v29, 0.0  ;;  %v1627_v35 = vadd.f32 %v3496_v31, %v4082_v6  ;;  %v1121_v36 = vpop.f32.mrf.mxu0 }
  0xf0   : > { %v1621_v37 = vpop.f32.mrf.mxu1  ;;  %2263 = vst.msk [vmem:[#allocation2 + $0x60] sm:$0xff] %vm2250_vm2, %v2062_v32  ;;  %v2065_v38 = vmax.f32 %v1127_v34, 0.0  ;;  %v1122_v40 = vadd.f32 %v4082_v6, %v1121_v36 }
  0xf1   : > { %2363 = vst.msk [vmem:[#allocation2 + $0x380] sm:$0xff] %vm2250_vm2, %v2162_v33  ;;  %v2165_v39 = vmax.f32 %v1627_v35, 0.0  ;;  %v1622_v41 = vadd.f32 %v4082_v6, %v1621_v37  ;;  %v3349_v42 = vpop.f32.mrf.mxu0 }
  0xf2   : > { %v3499_v43 = vpop.f32.mrf.mxu1  ;;  %2266 = vst.msk [vmem:[#allocation2 + $0x78] sm:$0xff] %vm2250_vm2, %v2065_v38  ;;  %v2064_v44 = vmax.f32 %v1122_v40, 0.0  ;;  %v1137_v46 = vadd.f32 %v3349_v42, %v4082_v6 }
  0xf3   : > { %2366 = vst.msk [vmem:[#allocation2 + $0x398] sm:$0xff] %vm2250_vm2, %v2165_v39  ;;  %v2164_v45 = vmax.f32 %v1622_v41, 0.0  ;;  %v1637_v47 = vadd.f32 %v3499_v43, %v4082_v6  ;;  %v1131_v48 = vpop.f32.mrf.mxu0 }
  0xf4   : > { %v1631_v49 = vpop.f32.mrf.mxu1  ;;  %2265 = vst.msk [vmem:[#allocation2 + $0x70] sm:$0xff] %vm2250_vm2, %v2064_v44  ;;  %v2067_v50 = vmax.f32 %v1137_v46, 0.0  ;;  %v1132_v52 = vadd.f32 %v4082_v6, %v1131_v48 }
  0xf5   : > { %2365 = vst.msk [vmem:[#allocation2 + $0x390] sm:$0xff] %vm2250_vm2, %v2164_v45  ;;  %v2167_v51 = vmax.f32 %v1637_v47, 0.0  ;;  %v1632_v53 = vadd.f32 %v4082_v6, %v1631_v49  ;;  %v3352_v54 = vpop.f32.mrf.mxu0 }
  0xf6   : > { %v3502_v55 = vpop.f32.mrf.mxu1  ;;  %2268 = vst.msk [vmem:[#allocation2 + $0x88] sm:$0xff] %vm2250_vm2, %v2067_v50  ;;  %v2066_v56 = vmax.f32 %v1132_v52, 0.0  ;;  %v1147_v58 = vadd.f32 %v3352_v54, %v4082_v6 }
  0xf7   : > { %2368 = vst.msk [vmem:[#allocation2 + $0x3a8] sm:$0xff] %vm2250_vm2, %v2167_v51  ;;  %v2166_v57 = vmax.f32 %v1632_v53, 0.0  ;;  %v1647_v59 = vadd.f32 %v3502_v55, %v4082_v6  ;;  %v1141_v60 = vpop.f32.mrf.mxu0 }
  0xf8   : > { %v1641_v61 = vpop.f32.mrf.mxu1  ;;  %2267 = vst.msk [vmem:[#allocation2 + $0x80] sm:$0xff] %vm2250_vm2, %v2066_v56  ;;  %v2069_v62 = vmax.f32 %v1147_v58, 0.0  ;;  %v1142_v0 = vadd.f32 %v4082_v6, %v1141_v60 }
  0xf9   : > { %2367 = vst.msk [vmem:[#allocation2 + $0x3a0] sm:$0xff] %vm2250_vm2, %v2166_v57  ;;  %v2169_v63 = vmax.f32 %v1647_v59, 0.0  ;;  %v1642_v1 = vadd.f32 %v4082_v6, %v1641_v61  ;;  %v3355_v2 = vpop.f32.mrf.mxu0 }
  0xfa   : > { %v3505_v3 = vpop.f32.mrf.mxu1  ;;  %2270 = vst.msk [vmem:[#allocation2 + $0x98] sm:$0xff] %vm2250_vm2, %v2069_v62  ;;  %v2068_v4 = vmax.f32 %v1142_v0, 0.0  ;;  %v1157_v7 = vadd.f32 %v3355_v2, %v4082_v6 }
  0xfb   : > { %2370 = vst.msk [vmem:[#allocation2 + $0x3b8] sm:$0xff] %vm2250_vm2, %v2169_v63  ;;  %v2168_v5 = vmax.f32 %v1642_v1, 0.0  ;;  %v1657_v8 = vadd.f32 %v3505_v3, %v4082_v6  ;;  %v1151_v9 = vpop.f32.mrf.mxu0 }
  0xfc   : > { %v1651_v10 = vpop.f32.mrf.mxu1  ;;  %2269 = vst.msk [vmem:[#allocation2 + $0x90] sm:$0xff] %vm2250_vm2, %v2068_v4  ;;  %v2071_v11 = vmax.f32 %v1157_v7, 0.0  ;;  %v1152_v13 = vadd.f32 %v4082_v6, %v1151_v9 }
  0xfd   : > { %2369 = vst.msk [vmem:[#allocation2 + $0x3b0] sm:$0xff] %vm2250_vm2, %v2168_v5  ;;  %v2171_v12 = vmax.f32 %v1657_v8, 0.0  ;;  %v1652_v14 = vadd.f32 %v4082_v6, %v1651_v10  ;;  %v3358_v15 = vpop.f32.mrf.mxu0 }
  0xfe   : > { %v3508_v16 = vpop.f32.mrf.mxu1  ;;  %2272 = vst.msk [vmem:[#allocation2 + $0xa8] sm:$0xff] %vm2250_vm2, %v2071_v11  ;;  %v2070_v17 = vmax.f32 %v1152_v13, 0.0  ;;  %v1167_v19 = vadd.f32 %v3358_v15, %v4082_v6 }
  0xff   : > { %2372 = vst.msk [vmem:[#allocation2 + $0x3c8] sm:$0xff] %vm2250_vm2, %v2171_v12  ;;  %v2170_v18 = vmax.f32 %v1652_v14, 0.0  ;;  %v1667_v20 = vadd.f32 %v3508_v16, %v4082_v6  ;;  %v1161_v21 = vpop.f32.mrf.mxu0 }
 0x100   : > { %v1661_v22 = vpop.f32.mrf.mxu1  ;;  %2271 = vst.msk [vmem:[#allocation2 + $0xa0] sm:$0xff] %vm2250_vm2, %v2070_v17  ;;  %v2073_v23 = vmax.f32 %v1167_v19, 0.0  ;;  %v1162_v25 = vadd.f32 %v4082_v6, %v1161_v21 }
 0x101   : > { %2371 = vst.msk [vmem:[#allocation2 + $0x3c0] sm:$0xff] %vm2250_vm2, %v2170_v18  ;;  %v2173_v24 = vmax.f32 %v1667_v20, 0.0  ;;  %v1662_v26 = vadd.f32 %v4082_v6, %v1661_v22  ;;  %v3361_v27 = vpop.f32.mrf.mxu0 }
 0x102   : > { %v3511_v28 = vpop.f32.mrf.mxu1  ;;  %2274 = vst.msk [vmem:[#allocation2 + $0xb8] sm:$0xff] %vm2250_vm2, %v2073_v23  ;;  %v2072_v29 = vmax.f32 %v1162_v25, 0.0  ;;  %v1177_v31 = vadd.f32 %v3361_v27, %v4082_v6 }
 0x103   : > { %2374 = vst.msk [vmem:[#allocation2 + $0x3d8] sm:$0xff] %vm2250_vm2, %v2173_v24  ;;  %v2172_v30 = vmax.f32 %v1662_v26, 0.0  ;;  %v1677_v32 = vadd.f32 %v3511_v28, %v4082_v6  ;;  %v1171_v33 = vpop.f32.mrf.mxu0 }
 0x104   : > { %v1671_v34 = vpop.f32.mrf.mxu1  ;;  %2273 = vst.msk [vmem:[#allocation2 + $0xb0] sm:$0xff] %vm2250_vm2, %v2072_v29  ;;  %v2075_v35 = vmax.f32 %v1177_v31, 0.0  ;;  %v1172_v37 = vadd.f32 %v4082_v6, %v1171_v33 }
 0x105   : > { %2373 = vst.msk [vmem:[#allocation2 + $0x3d0] sm:$0xff] %vm2250_vm2, %v2172_v30  ;;  %v2175_v36 = vmax.f32 %v1677_v32, 0.0  ;;  %v1672_v38 = vadd.f32 %v4082_v6, %v1671_v34  ;;  %v3364_v39 = vpop.f32.mrf.mxu0 }
 0x106   : > { %v3514_v40 = vpop.f32.mrf.mxu1  ;;  %2276 = vst.msk [vmem:[#allocation2 + $0xc8] sm:$0xff] %vm2250_vm2, %v2075_v35  ;;  %v2074_v41 = vmax.f32 %v1172_v37, 0.0  ;;  %v1187_v43 = vadd.f32 %v3364_v39, %v4082_v6 }
 0x107   : > { %2376 = vst.msk [vmem:[#allocation2 + $0x3e8] sm:$0xff] %vm2250_vm2, %v2175_v36  ;;  %v2174_v42 = vmax.f32 %v1672_v38, 0.0  ;;  %v1687_v44 = vadd.f32 %v3514_v40, %v4082_v6  ;;  %v1181_v45 = vpop.f32.mrf.mxu0 }
 0x108   : > { %v1681_v46 = vpop.f32.mrf.mxu1  ;;  %2275 = vst.msk [vmem:[#allocation2 + $0xc0] sm:$0xff] %vm2250_vm2, %v2074_v41  ;;  %v2077_v47 = vmax.f32 %v1187_v43, 0.0  ;;  %v1182_v49 = vadd.f32 %v4082_v6, %v1181_v45 }
 0x109   : > { %2375 = vst.msk [vmem:[#allocation2 + $0x3e0] sm:$0xff] %vm2250_vm2, %v2174_v42  ;;  %v2177_v48 = vmax.f32 %v1687_v44, 0.0  ;;  %v1682_v50 = vadd.f32 %v4082_v6, %v1681_v46  ;;  %v3367_v51 = vpop.f32.mrf.mxu0 }
 0x10a   : > { %v3517_v52 = vpop.f32.mrf.mxu1  ;;  %2278 = vst.msk [vmem:[#allocation2 + $0xd8] sm:$0xff] %vm2250_vm2, %v2077_v47  ;;  %v2076_v53 = vmax.f32 %v1182_v49, 0.0  ;;  %v1197_v55 = vadd.f32 %v3367_v51, %v4082_v6 }
 0x10b   : > { %2378 = vst.msk [vmem:[#allocation2 + $0x3f8] sm:$0xff] %vm2250_vm2, %v2177_v48  ;;  %v2176_v54 = vmax.f32 %v1682_v50, 0.0  ;;  %v1697_v56 = vadd.f32 %v3517_v52, %v4082_v6  ;;  %v1191_v57 = vpop.f32.mrf.mxu0 }
 0x10c   : > { %v1691_v58 = vpop.f32.mrf.mxu1  ;;  %2277 = vst.msk [vmem:[#allocation2 + $0xd0] sm:$0xff] %vm2250_vm2, %v2076_v53  ;;  %v2079_v59 = vmax.f32 %v1197_v55, 0.0  ;;  %v1192_v61 = vadd.f32 %v4082_v6, %v1191_v57 }
 0x10d   : > { %2377 = vst.msk [vmem:[#allocation2 + $0x3f0] sm:$0xff] %vm2250_vm2, %v2176_v54  ;;  %v2179_v60 = vmax.f32 %v1697_v56, 0.0  ;;  %v1692_v62 = vadd.f32 %v4082_v6, %v1691_v58  ;;  %v3370_v63 = vpop.f32.mrf.mxu0 }
 0x10e   : > { %v3520_v0 = vpop.f32.mrf.mxu1  ;;  %2280 = vst.msk [vmem:[#allocation2 + $0xe8] sm:$0xff] %vm2250_vm2, %v2079_v59  ;;  %v2078_v1 = vmax.f32 %v1192_v61, 0.0  ;;  %v1207_v3 = vadd.f32 %v3370_v63, %v4082_v6 }
 0x10f   : > { %2380 = vst.msk [vmem:[#allocation2 + $0x408] sm:$0xff] %vm2250_vm2, %v2179_v60  ;;  %v2178_v2 = vmax.f32 %v1692_v62, 0.0  ;;  %v1707_v4 = vadd.f32 %v3520_v0, %v4082_v6  ;;  %v1201_v5 = vpop.f32.mrf.mxu0 }
 0x110   : > { %v1701_v7 = vpop.f32.mrf.mxu1  ;;  %2279 = vst.msk [vmem:[#allocation2 + $0xe0] sm:$0xff] %vm2250_vm2, %v2078_v1  ;;  %v2081_v8 = vmax.f32 %v1207_v3, 0.0  ;;  %v1202_v10 = vadd.f32 %v4082_v6, %v1201_v5 }
 0x111   : > { %2379 = vst.msk [vmem:[#allocation2 + $0x400] sm:$0xff] %vm2250_vm2, %v2178_v2  ;;  %v2181_v9 = vmax.f32 %v1707_v4, 0.0  ;;  %v1702_v11 = vadd.f32 %v4082_v6, %v1701_v7  ;;  %v3373_v12 = vpop.f32.mrf.mxu0 }
 0x112   : > { %v3523_v13 = vpop.f32.mrf.mxu1  ;;  %2282 = vst.msk [vmem:[#allocation2 + $0xf8] sm:$0xff] %vm2250_vm2, %v2081_v8  ;;  %v2080_v14 = vmax.f32 %v1202_v10, 0.0  ;;  %v1217_v16 = vadd.f32 %v3373_v12, %v4082_v6 }
 0x113   : > { %2382 = vst.msk [vmem:[#allocation2 + $0x418] sm:$0xff] %vm2250_vm2, %v2181_v9  ;;  %v2180_v15 = vmax.f32 %v1702_v11, 0.0  ;;  %v1717_v17 = vadd.f32 %v3523_v13, %v4082_v6  ;;  %v1211_v18 = vpop.f32.mrf.mxu0 }
 0x114   : > { %v1711_v19 = vpop.f32.mrf.mxu1  ;;  %2281 = vst.msk [vmem:[#allocation2 + $0xf0] sm:$0xff] %vm2250_vm2, %v2080_v14  ;;  %v2083_v20 = vmax.f32 %v1217_v16, 0.0  ;;  %v1212_v22 = vadd.f32 %v4082_v6, %v1211_v18 }
 0x115   : > { %2381 = vst.msk [vmem:[#allocation2 + $0x410] sm:$0xff] %vm2250_vm2, %v2180_v15  ;;  %v2183_v21 = vmax.f32 %v1717_v17, 0.0  ;;  %v1712_v23 = vadd.f32 %v4082_v6, %v1711_v19  ;;  %v3376_v24 = vpop.f32.mrf.mxu0 }
 0x116   : > { %v3526_v25 = vpop.f32.mrf.mxu1  ;;  %2284 = vst.msk [vmem:[#allocation2 + $0x108] sm:$0xff] %vm2250_vm2, %v2083_v20  ;;  %v2082_v26 = vmax.f32 %v1212_v22, 0.0  ;;  %v1227_v28 = vadd.f32 %v3376_v24, %v4082_v6 }
 0x117   : > { %2384 = vst.msk [vmem:[#allocation2 + $0x428] sm:$0xff] %vm2250_vm2, %v2183_v21  ;;  %v2182_v27 = vmax.f32 %v1712_v23, 0.0  ;;  %v1727_v29 = vadd.f32 %v3526_v25, %v4082_v6  ;;  %v1221_v30 = vpop.f32.mrf.mxu0 }
 0x118   : > { %v1721_v31 = vpop.f32.mrf.mxu1  ;;  %2283 = vst.msk [vmem:[#allocation2 + $0x100] sm:$0xff] %vm2250_vm2, %v2082_v26  ;;  %v2085_v32 = vmax.f32 %v1227_v28, 0.0  ;;  %v1222_v34 = vadd.f32 %v4082_v6, %v1221_v30 }
 0x119   : > { %2383 = vst.msk [vmem:[#allocation2 + $0x420] sm:$0xff] %vm2250_vm2, %v2182_v27  ;;  %v2185_v33 = vmax.f32 %v1727_v29, 0.0  ;;  %v1722_v35 = vadd.f32 %v4082_v6, %v1721_v31  ;;  %v3379_v36 = vpop.f32.mrf.mxu0 }
 0x11a   : > { %v3529_v37 = vpop.f32.mrf.mxu1  ;;  %2286 = vst.msk [vmem:[#allocation2 + $0x118] sm:$0xff] %vm2250_vm2, %v2085_v32  ;;  %v2084_v38 = vmax.f32 %v1222_v34, 0.0  ;;  %v1237_v40 = vadd.f32 %v3379_v36, %v4082_v6 }
 0x11b   : > { %2386 = vst.msk [vmem:[#allocation2 + $0x438] sm:$0xff] %vm2250_vm2, %v2185_v33  ;;  %v2184_v39 = vmax.f32 %v1722_v35, 0.0  ;;  %v1737_v41 = vadd.f32 %v3529_v37, %v4082_v6  ;;  %v1231_v42 = vpop.f32.mrf.mxu0 }
 0x11c   : > { %v1731_v43 = vpop.f32.mrf.mxu1  ;;  %2285 = vst.msk [vmem:[#allocation2 + $0x110] sm:$0xff] %vm2250_vm2, %v2084_v38  ;;  %v2087_v44 = vmax.f32 %v1237_v40, 0.0  ;;  %v1232_v46 = vadd.f32 %v4082_v6, %v1231_v42 }
 0x11d   : > { %2385 = vst.msk [vmem:[#allocation2 + $0x430] sm:$0xff] %vm2250_vm2, %v2184_v39  ;;  %v2187_v45 = vmax.f32 %v1737_v41, 0.0  ;;  %v1732_v47 = vadd.f32 %v4082_v6, %v1731_v43  ;;  %v3382_v48 = vpop.f32.mrf.mxu0 }
 0x11e   : > { %v3532_v49 = vpop.f32.mrf.mxu1  ;;  %2288 = vst.msk [vmem:[#allocation2 + $0x128] sm:$0xff] %vm2250_vm2, %v2087_v44  ;;  %v2086_v50 = vmax.f32 %v1232_v46, 0.0  ;;  %v1247_v52 = vadd.f32 %v3382_v48, %v4082_v6 }
 0x11f   : > { %2388 = vst.msk [vmem:[#allocation2 + $0x448] sm:$0xff] %vm2250_vm2, %v2187_v45  ;;  %v2186_v51 = vmax.f32 %v1732_v47, 0.0  ;;  %v1747_v53 = vadd.f32 %v3532_v49, %v4082_v6  ;;  %v1241_v54 = vpop.f32.mrf.mxu0 }
 0x120   : > { %v1741_v55 = vpop.f32.mrf.mxu1  ;;  %2287 = vst.msk [vmem:[#allocation2 + $0x120] sm:$0xff] %vm2250_vm2, %v2086_v50  ;;  %v2089_v56 = vmax.f32 %v1247_v52, 0.0  ;;  %v1242_v58 = vadd.f32 %v4082_v6, %v1241_v54 }
 0x121   : > { %2387 = vst.msk [vmem:[#allocation2 + $0x440] sm:$0xff] %vm2250_vm2, %v2186_v51  ;;  %v2189_v57 = vmax.f32 %v1747_v53, 0.0  ;;  %v1742_v59 = vadd.f32 %v4082_v6, %v1741_v55  ;;  %v3385_v60 = vpop.f32.mrf.mxu0 }
 0x122   : > { %v3535_v61 = vpop.f32.mrf.mxu1  ;;  %2290 = vst.msk [vmem:[#allocation2 + $0x138] sm:$0xff] %vm2250_vm2, %v2089_v56  ;;  %v2088_v62 = vmax.f32 %v1242_v58, 0.0  ;;  %v1257_v0 = vadd.f32 %v3385_v60, %v4082_v6 }
 0x123   : > { %2390 = vst.msk [vmem:[#allocation2 + $0x458] sm:$0xff] %vm2250_vm2, %v2189_v57  ;;  %v2188_v63 = vmax.f32 %v1742_v59, 0.0  ;;  %v1757_v1 = vadd.f32 %v3535_v61, %v4082_v6  ;;  %v1251_v2 = vpop.f32.mrf.mxu0 }
 0x124   : > { %v1751_v3 = vpop.f32.mrf.mxu1  ;;  %2289 = vst.msk [vmem:[#allocation2 + $0x130] sm:$0xff] %vm2250_vm2, %v2088_v62  ;;  %v2091_v4 = vmax.f32 %v1257_v0, 0.0  ;;  %v1252_v7 = vadd.f32 %v4082_v6, %v1251_v2 }
 0x125   : > { %2389 = vst.msk [vmem:[#allocation2 + $0x450] sm:$0xff] %vm2250_vm2, %v2188_v63  ;;  %v2191_v5 = vmax.f32 %v1757_v1, 0.0  ;;  %v1752_v8 = vadd.f32 %v4082_v6, %v1751_v3  ;;  %v3388_v9 = vpop.f32.mrf.mxu0 }
 0x126   : > { %v3538_v10 = vpop.f32.mrf.mxu1  ;;  %2292 = vst.msk [vmem:[#allocation2 + $0x148] sm:$0xff] %vm2250_vm2, %v2091_v4  ;;  %v2090_v11 = vmax.f32 %v1252_v7, 0.0  ;;  %v1267_v13 = vadd.f32 %v3388_v9, %v4082_v6 }
 0x127   : > { %2392 = vst.msk [vmem:[#allocation2 + $0x468] sm:$0xff] %vm2250_vm2, %v2191_v5  ;;  %v2190_v12 = vmax.f32 %v1752_v8, 0.0  ;;  %v1767_v14 = vadd.f32 %v3538_v10, %v4082_v6  ;;  %v1261_v15 = vpop.f32.mrf.mxu0 }
 0x128   : > { %v1761_v16 = vpop.f32.mrf.mxu1  ;;  %2291 = vst.msk [vmem:[#allocation2 + $0x140] sm:$0xff] %vm2250_vm2, %v2090_v11  ;;  %v2093_v17 = vmax.f32 %v1267_v13, 0.0  ;;  %v1262_v19 = vadd.f32 %v4082_v6, %v1261_v15 }
 0x129   : > { %2391 = vst.msk [vmem:[#allocation2 + $0x460] sm:$0xff] %vm2250_vm2, %v2190_v12  ;;  %v2193_v18 = vmax.f32 %v1767_v14, 0.0  ;;  %v1762_v20 = vadd.f32 %v4082_v6, %v1761_v16  ;;  %v3391_v21 = vpop.f32.mrf.mxu0 }
 0x12a   : > { %v3541_v22 = vpop.f32.mrf.mxu1  ;;  %2294 = vst.msk [vmem:[#allocation2 + $0x158] sm:$0xff] %vm2250_vm2, %v2093_v17  ;;  %v2092_v23 = vmax.f32 %v1262_v19, 0.0  ;;  %v1277_v25 = vadd.f32 %v3391_v21, %v4082_v6 }
 0x12b   : > { %2394 = vst.msk [vmem:[#allocation2 + $0x478] sm:$0xff] %vm2250_vm2, %v2193_v18  ;;  %v2192_v24 = vmax.f32 %v1762_v20, 0.0  ;;  %v1777_v26 = vadd.f32 %v3541_v22, %v4082_v6  ;;  %v1271_v27 = vpop.f32.mrf.mxu0 }
 0x12c   : > { %v1771_v28 = vpop.f32.mrf.mxu1  ;;  %2293 = vst.msk [vmem:[#allocation2 + $0x150] sm:$0xff] %vm2250_vm2, %v2092_v23  ;;  %v2095_v29 = vmax.f32 %v1277_v25, 0.0  ;;  %v1272_v31 = vadd.f32 %v4082_v6, %v1271_v27 }
 0x12d   : > { %2393 = vst.msk [vmem:[#allocation2 + $0x470] sm:$0xff] %vm2250_vm2, %v2192_v24  ;;  %v2195_v30 = vmax.f32 %v1777_v26, 0.0  ;;  %v1772_v32 = vadd.f32 %v4082_v6, %v1771_v28  ;;  %v3394_v33 = vpop.f32.mrf.mxu0  ;;  %v2452_v26 = vld [vmem:[#allocation2 + $0x8] sm:$0xff] }
 0x12e   : > { %v3544_v34 = vpop.f32.mrf.mxu1  ;;  %2296 = vst.msk [vmem:[#allocation2 + $0x168] sm:$0xff] %vm2250_vm2, %v2095_v29  ;;  %v2094_v35 = vmax.f32 %v1272_v31, 0.0  ;;  %v1287_v37 = vadd.f32 %v3394_v33, %v4082_v6  ;;  %v2602_v31 = vld [vmem:[#allocation2 + $0x328] sm:$0xff] }
 0x12f   : > { %2396 = vst.msk [vmem:[#allocation2 + $0x488] sm:$0xff] %vm2250_vm2, %v2195_v30  ;;  %v2194_v36 = vmax.f32 %v1772_v32, 0.0  ;;  %v1787_v38 = vadd.f32 %v3544_v34, %v4082_v6  ;;  %v1281_v39 = vpop.f32.mrf.mxu0 }
 0x130   : > { %v1781_v40 = vpop.f32.mrf.mxu1  ;;  %2295 = vst.msk [vmem:[#allocation2 + $0x160] sm:$0xff] %vm2250_vm2, %v2094_v35  ;;  %v2097_v41 = vmax.f32 %v1287_v37, 0.0  ;;  %v1282_v43 = vadd.f32 %v4082_v6, %v1281_v39 }
 0x131   : > { %2395 = vst.msk [vmem:[#allocation2 + $0x480] sm:$0xff] %vm2250_vm2, %v2194_v36  ;;  %v2197_v42 = vmax.f32 %v1787_v38, 0.0  ;;  %v1782_v44 = vadd.f32 %v4082_v6, %v1781_v40  ;;  %v3397_v45 = vpop.f32.mrf.mxu0  ;;  %v2451_v36 = vld [vmem:[#allocation2] sm:$0xff] }
 0x132   : > { %v3547_v46 = vpop.f32.mrf.mxu1  ;;  %2298 = vst.msk [vmem:[#allocation2 + $0x178] sm:$0xff] %vm2250_vm2, %v2097_v41  ;;  %v2096_v47 = vmax.f32 %v1282_v43, 0.0  ;;  %v1297_v49 = vadd.f32 %v3397_v45, %v4082_v6  ;;  %v2601_v41 = vld [vmem:[#allocation2 + $0x320] sm:$0xff] }
 0x133   : > { %2398 = vst.msk [vmem:[#allocation2 + $0x498] sm:$0xff] %vm2250_vm2, %v2197_v42  ;;  %v2196_v48 = vmax.f32 %v1782_v44, 0.0  ;;  %v1797_v50 = vadd.f32 %v3547_v46, %v4082_v6  ;;  %v1291_v51 = vpop.f32.mrf.mxu0 }
 0x134   : > { %v1791_v52 = vpop.f32.mrf.mxu1  ;;  %2297 = vst.msk [vmem:[#allocation2 + $0x170] sm:$0xff] %vm2250_vm2, %v2096_v47  ;;  %v2099_v53 = vmax.f32 %v1297_v49, 0.0  ;;  %v1292_v55 = vadd.f32 %v4082_v6, %v1291_v51 }
 0x135   : > { %2397 = vst.msk [vmem:[#allocation2 + $0x490] sm:$0xff] %vm2250_vm2, %v2196_v48  ;;  %v2199_v54 = vmax.f32 %v1797_v50, 0.0  ;;  %v1792_v56 = vadd.f32 %v4082_v6, %v1791_v52  ;;  %v3400_v57 = vpop.f32.mrf.mxu0  ;;  %v2454_v48 = vld [vmem:[#allocation2 + $0x18] sm:$0xff] }
 0x136   : > { %v3550_v58 = vpop.f32.mrf.mxu1  ;;  %2300 = vst.msk [vmem:[#allocation2 + $0x188] sm:$0xff] %vm2250_vm2, %v2099_v53  ;;  %v2098_v59 = vmax.f32 %v1292_v55, 0.0  ;;  %v1307_v61 = vadd.f32 %v3400_v57, %v4082_v6  ;;  %v2604_v53 = vld [vmem:[#allocation2 + $0x338] sm:$0xff] }
 0x137   : > { %2400 = vst.msk [vmem:[#allocation2 + $0x4a8] sm:$0xff] %vm2250_vm2, %v2199_v54  ;;  %v2198_v60 = vmax.f32 %v1792_v56, 0.0  ;;  %v1807_v62 = vadd.f32 %v3550_v58, %v4082_v6  ;;  %v1301_v63 = vpop.f32.mrf.mxu0 }
 0x138   : > { %v1801_v0 = vpop.f32.mrf.mxu1  ;;  %2299 = vst.msk [vmem:[#allocation2 + $0x180] sm:$0xff] %vm2250_vm2, %v2098_v59  ;;  %v2101_v1 = vmax.f32 %v1307_v61, 0.0  ;;  %v1302_v3 = vadd.f32 %v4082_v6, %v1301_v63  ;;  %v2453_v61 = vld [vmem:[#allocation2 + $0x10] sm:$0xff] }
 0x139   : > { %2399 = vst.msk [vmem:[#allocation2 + $0x4a0] sm:$0xff] %vm2250_vm2, %v2198_v60  ;;  %v2201_v2 = vmax.f32 %v1807_v62, 0.0  ;;  %v1802_v4 = vadd.f32 %v4082_v6, %v1801_v0  ;;  %v3403_v5 = vpop.f32.mrf.mxu0 }
 0x13a   : > { %v3553_v7 = vpop.f32.mrf.mxu1  ;;  %2302 = vst.msk [vmem:[#allocation2 + $0x198] sm:$0xff] %vm2250_vm2, %v2101_v1  ;;  %v2100_v8 = vmax.f32 %v1302_v3, 0.0  ;;  %v1317_v10 = vadd.f32 %v3403_v5, %v4082_v6 }
 0x13b   : > { %2402 = vst.msk [vmem:[#allocation2 + $0x4b8] sm:$0xff] %vm2250_vm2, %v2201_v2  ;;  %v2200_v9 = vmax.f32 %v1802_v4, 0.0  ;;  %v1817_v11 = vadd.f32 %v3553_v7, %v4082_v6  ;;  %v1311_v12 = vpop.f32.mrf.mxu0  ;;  %v2603_v2 = vld [vmem:[#allocation2 + $0x330] sm:$0xff] }
 0x13c   : > { %v1811_v13 = vpop.f32.mrf.mxu1  ;;  %2301 = vst.msk [vmem:[#allocation2 + $0x190] sm:$0xff] %vm2250_vm2, %v2100_v8  ;;  %v2103_v14 = vmax.f32 %v1317_v10, 0.0  ;;  %v1312_v16 = vadd.f32 %v4082_v6, %v1311_v12 }
 0x13d   : > { %2401 = vst.msk [vmem:[#allocation2 + $0x4b0] sm:$0xff] %vm2250_vm2, %v2200_v9  ;;  %v2203_v15 = vmax.f32 %v1817_v11, 0.0  ;;  %v1812_v17 = vadd.f32 %v4082_v6, %v1811_v13  ;;  %v3406_v18 = vpop.f32.mrf.mxu0  ;;  %v2456_v11 = vld [vmem:[#allocation2 + $0x28] sm:$0xff] }
 0x13e   : > { %v3556_v19 = vpop.f32.mrf.mxu1  ;;  %2304 = vst.msk [vmem:[#allocation2 + $0x1a8] sm:$0xff] %vm2250_vm2, %v2103_v14  ;;  %v2102_v20 = vmax.f32 %v1312_v16, 0.0  ;;  %v1327_v22 = vadd.f32 %v3406_v18, %v4082_v6 }
 0x13f   : > { %2404 = vst.msk [vmem:[#allocation2 + $0x4c8] sm:$0xff] %vm2250_vm2, %v2203_v15  ;;  %v2202_v21 = vmax.f32 %v1812_v17, 0.0  ;;  %v1827_v23 = vadd.f32 %v3556_v19, %v4082_v6  ;;  %v1321_v24 = vpop.f32.mrf.mxu0  ;;  %v4340_v15 = vld [vmem:[%s4615_s2] ss:$0 sm:$0xff]  ;;  %v2606_v17 = vld [vmem:[#allocation2 + $0x348] sm:$0xff] }
 0x140   : > { %v1821_v25 = vpop.f32.mrf.mxu1  ;;  %2303 = vst.msk [vmem:[#allocation2 + $0x1a0] sm:$0xff] %vm2250_vm2, %v2102_v20  ;;  %v2105_v27 = vmax.f32 %v1327_v22, 0.0  ;;  %v1322_v29 = vadd.f32 %v4082_v6, %v1321_v24  ;;  %v2455_v24 = vld [vmem:[#allocation2 + $0x20] sm:$0xff] }
 0x141   : > { %2403 = vst.msk [vmem:[#allocation2 + $0x4c0] sm:$0xff] %vm2250_vm2, %v2202_v21  ;;  %v2205_v28 = vmax.f32 %v1827_v23, 0.0  ;;  %v1822_v30 = vadd.f32 %v4082_v6, %v1821_v25  ;;  %v2502_v32 = vld [vmem:[#allocation2 + $0x198] sm:$0xff]  ;;  %v3409_v34 = vpop.f32.mrf.mxu0 }
 0x142   : > { %v2652_v33 = vld [vmem:[#allocation2 + $0x4b8] sm:$0xff]  ;;  %v3559_v35 = vpop.f32.mrf.mxu1  ;;  %v2552_v37 = vmax.f32 %v2452_v26, %v2502_v32  ;;  %2306 = vst.msk [vmem:[#allocation2 + $0x1b8] sm:$0xff] %vm2250_vm2, %v2105_v27  ;;  %v2104_v39 = vmax.f32 %v1322_v29, 0.0  ;;  %v1337_v44 = vadd.f32 %v3409_v34, %v4082_v6  ;;  %v2605_v29 = vld [vmem:[#allocation2 + $0x340] sm:$0xff] }
 0x143   : > { %v2702_v38 = vmax.f32 %v2602_v31, %v2652_v33  ;;  %2406 = vst.msk [vmem:[#allocation2 + $0x4d8] sm:$0xff] %vm2250_vm2, %v2205_v28  ;;  %v2204_v40 = vmax.f32 %v1822_v30, 0.0  ;;  %v2501_v42 = vld [vmem:[#allocation2 + $0x190] sm:$0xff]  ;;  %v1837_v45 = vadd.f32 %v3559_v35, %v4082_v6  ;;  %v1331_v46 = vpop.f32.mrf.mxu0 }
 0x144   : > { %v2651_v43 = vld [vmem:[#allocation2 + $0x4b0] sm:$0xff]  ;;  %v1831_v47 = vpop.f32.mrf.mxu1  ;;  %v2551_v50 = vmax.f32 %v2451_v36, %v2501_v42  ;;  %2305 = vst.msk [vmem:[#allocation2 + $0x1b0] sm:$0xff] %vm2250_vm2, %v2104_v39  ;;  %v1332_v52 = vadd.f32 %v4082_v6, %v1331_v46  ;;  %v2107_v56 = vmax.f32 %v1337_v44, 0.0 }
 0x145   : > { %v2752_v49 = vmax.f32 %v2552_v37, %v2702_v38  ;;  %v2701_v51 = vmax.f32 %v2601_v41, %v2651_v43  ;;  %2405 = vst.msk [vmem:[#allocation2 + $0x4d0] sm:$0xff] %vm2250_vm2, %v2204_v40  ;;  %v2504_v54 = vld [vmem:[#allocation2 + $0x1a8] sm:$0xff]  ;;  %v2207_v57 = vmax.f32 %v1837_v45, 0.0  ;;  %v1832_v58 = vadd.f32 %v4082_v6, %v1831_v47  ;;  %v3412_v59 = vpop.f32.mrf.mxu0  ;;  %v2458_v41 = vld [vmem:[#allocation2 + $0x38] sm:$0xff] }
 0x146   : > { %v2654_v55 = vld [vmem:[#allocation2 + $0x4c8] sm:$0xff]  ;;  %v3562_v60 = vpop.f32.mrf.mxu1  ;;  %v2554_v63 = vmax.f32 %v2454_v48, %v2504_v54  ;;  %v2106_v1 = vmax.f32 %v1332_v52, 0.0  ;;  %2308 = vst.msk [vmem:[#allocation2 + $0x1c8] sm:$0xff] %vm2250_vm2, %v2107_v56  ;;  %v1347_v7 = vadd.f32 %v3412_v59, %v4082_v6  ;;  %v2608_v47 = vld [vmem:[#allocation2 + $0x358] sm:$0xff]  ;;  %v2457_v54 = vld [vmem:[#allocation2 + $0x30] sm:$0xff] }
 0x147   : > { %2802 = vst.msk [vmem:[%s4320_s27 + $0x8] sm:$0xff] %vm2250_vm2, %v2752_v49  ;;  %v2751_v62 = vmax.f32 %v2551_v50, %v2701_v51  ;;  %v2704_v0 = vmax.f32 %v2604_v53, %v2654_v55  ;;  %v2503_v3 = vld [vmem:[#allocation2 + $0x1a0] sm:$0xff]  ;;  %2408 = vst.msk [vmem:[#allocation2 + $0x4e8] sm:$0xff] %vm2250_vm2, %v2207_v57  ;;  %v2206_v5 = vmax.f32 %v1832_v58, 0.0  ;;  %v1847_v8 = vadd.f32 %v3562_v60, %v4082_v6  ;;  %v1341_v9 = vpop.f32.mrf.mxu0 }
 0x148   : > { %v2653_v4 = vld [vmem:[#allocation2 + $0x4c0] sm:$0xff]  ;;  %v1841_v10 = vpop.f32.mrf.mxu1  ;;  %v2553_v13 = vmax.f32 %v2453_v61, %v2503_v3  ;;  %2307 = vst.msk [vmem:[#allocation2 + $0x1c0] sm:$0xff] %vm2250_vm2, %v2106_v1  ;;  %v1342_v16 = vadd.f32 %v4340_v15, %v1341_v9  ;;  %v2109_v19 = vmax.f32 %v1347_v7, 0.0  ;;  %v2607_v61 = vld [vmem:[#allocation2 + $0x350] sm:$0xff]  ;;  %v2460_v3 = vld [vmem:[#allocation2 + $0x48] sm:$0xff] }
 0x149   : > { %2801 = vst.msk [vmem:[%s4320_s27] sm:$0xff] %vm2250_vm2, %v2751_v62  ;;  %v2754_v12 = vmax.f32 %v2554_v63, %v2704_v0  ;;  %v2703_v14 = vmax.f32 %v2603_v2, %v2653_v4  ;;  %v2506_v6 = vld [vmem:[#allocation2 + $0x1b8] sm:$0xff]  ;;  %2407 = vst.msk [vmem:[#allocation2 + $0x4e0] sm:$0xff] %vm2250_vm2, %v2206_v5  ;;  %v2209_v20 = vmax.f32 %v1847_v8, 0.0  ;;  %v1842_v21 = vadd.f32 %v4340_v15, %v1841_v10  ;;  %v3415_v22 = vpop.f32.mrf.mxu0  ;;  %v2610_v10 = vld [vmem:[#allocation2 + $0x368] sm:$0xff] }
 0x14a   : > { %v2656_v18 = vld [vmem:[#allocation2 + $0x4d8] sm:$0xff]  ;;  %v3565_v23 = vpop.f32.mrf.mxu1  ;;  %v2556_v26 = vmax.f32 %v2456_v11, %v2506_v6  ;;  %v2108_v28 = vmax.f32 %v1342_v16, 0.0  ;;  %2310 = vst.msk [vmem:[#allocation2 + $0x1d8] sm:$0xff] %vm2250_vm2, %v2109_v19  ;;  %v1357_v33 = vadd.f32 %v4340_v15, %v3415_v22 }
 0x14b   : > { %2804 = vst.msk [vmem:[%s4320_s27 + $0x18] sm:$0xff] %vm2250_vm2, %v2754_v12  ;;  %v2753_v25 = vmax.f32 %v2553_v13, %v2703_v14  ;;  %v2706_v27 = vmax.f32 %v2606_v17, %v2656_v18  ;;  %v2505_v30 = vld [vmem:[#allocation2 + $0x1b0] sm:$0xff]  ;;  %2410 = vst.msk [vmem:[#allocation2 + $0x4f8] sm:$0xff] %vm2250_vm2, %v2209_v20  ;;  %v2208_v32 = vmax.f32 %v1842_v21, 0.0  ;;  %v1857_v34 = vadd.f32 %v4340_v15, %v3565_v23  ;;  %v1351_v35 = vpop.f32.mrf.mxu0  ;;  %v2459_v17 = vld [vmem:[#allocation2 + $0x40] sm:$0xff] }
 0x14c   : > { %v2655_v31 = vld [vmem:[#allocation2 + $0x4d0] sm:$0xff]  ;;  %v1851_v36 = vpop.f32.mrf.mxu1  ;;  %v2555_v38 = vmax.f32 %v2455_v24, %v2505_v30  ;;  %2309 = vst.msk [vmem:[#allocation2 + $0x1d0] sm:$0xff] %vm2250_vm2, %v2108_v28  ;;  %v1352_v40 = vadd.f32 %v4340_v15, %v1351_v35  ;;  %v2111_v42 = vmax.f32 %v1357_v33, 0.0  ;;  %v2609_v24 = vld [vmem:[#allocation2 + $0x360] sm:$0xff]  ;;  %v2462_v30 = vld [vmem:[#allocation2 + $0x58] sm:$0xff] }
 0x14d   : > { %2803 = vst.msk [vmem:[%s4320_s27 + $0x10] sm:$0xff] %vm2250_vm2, %v2753_v25  ;;  %v2756_v37 = vmax.f32 %v2556_v26, %v2706_v27  ;;  %v2705_v39 = vmax.f32 %v2605_v29, %v2655_v31  ;;  %2409 = vst.msk [vmem:[#allocation2 + $0x4f0] sm:$0xff] %vm2250_vm2, %v2208_v32  ;;  %v2211_v43 = vmax.f32 %v1857_v34, 0.0  ;;  %v1852_v44 = vadd.f32 %v4340_v15, %v1851_v36  ;;  %v3418_v45 = vpop.f32.mrf.mxu0  ;;  %v2508_v49 = vld [vmem:[#allocation2 + $0x1c8] sm:$0xff]  ;;  %v2612_v36 = vld [vmem:[#allocation2 + $0x378] sm:$0xff] }
 0x14e   : > { %v3568_v46 = vpop.f32.mrf.mxu1  ;;  %v2658_v50 = vld [vmem:[#allocation2 + $0x4e8] sm:$0xff]  ;;  %v2110_v51 = vmax.f32 %v1352_v40, 0.0  ;;  %v1367_v52 = vadd.f32 %v4340_v15, %v3418_v45  ;;  %v2558_v55 = vmax.f32 %v2458_v41, %v2508_v49  ;;  %2312 = vst.msk [vmem:[#allocation2 + $0x1e8] sm:$0xff] %vm2250_vm2, %v2111_v42  ;;  %v2461_v42 = vld [vmem:[#allocation2 + $0x50] sm:$0xff] }
 0x14f   : > { %2806 = vst.msk [vmem:[%s4320_s27 + $0x28] sm:$0xff] %vm2250_vm2, %v2756_v37  ;;  %v2755_v48 = vmax.f32 %v2555_v38, %v2705_v39  ;;  %v1867_v53 = vadd.f32 %v4340_v15, %v3568_v46  ;;  %v2708_v56 = vmax.f32 %v2608_v47, %v2658_v50  ;;  %v2507_v57 = vld [vmem:[#allocation2 + $0x1c0] sm:$0xff]  ;;  %2412 = vst.msk [vmem:[#allocation2 + $0x508] sm:$0xff] %vm2250_vm2, %v2211_v43  ;;  %v2210_v58 = vmax.f32 %v1852_v44, 0.0  ;;  %v1361_v59 = vpop.f32.mrf.mxu0  ;;  %v2611_v50 = vld [vmem:[#allocation2 + $0x370] sm:$0xff] }
 0x150   : > { %v1861_v60 = vpop.f32.mrf.mxu1  ;;  %v2557_v62 = vmax.f32 %v2457_v54, %v2507_v57  ;;  %v2657_v63 = vld [vmem:[#allocation2 + $0x4e0] sm:$0xff]  ;;  %2311 = vst.msk [vmem:[#allocation2 + $0x1e0] sm:$0xff] %vm2250_vm2, %v2110_v51  ;;  %v2113_v0 = vmax.f32 %v1367_v52, 0.0  ;;  %v1362_v2 = vadd.f32 %v4340_v15, %v1361_v59  ;;  %v2464_v51 = vld [vmem:[#allocation2 + $0x68] sm:$0xff] }
 0x151   : > { %2805 = vst.msk [vmem:[%s4320_s27 + $0x20] sm:$0xff] %vm2250_vm2, %v2755_v48  ;;  %v2213_v1 = vmax.f32 %v1867_v53, 0.0  ;;  %v2758_v4 = vmax.f32 %v2558_v55, %v2708_v56  ;;  %v2707_v5 = vmax.f32 %v2607_v61, %v2657_v63  ;;  %2411 = vst.msk [vmem:[#allocation2 + $0x500] sm:$0xff] %vm2250_vm2, %v2210_v58  ;;  %v1862_v7 = vadd.f32 %v4340_v15, %v1861_v60  ;;  %v3421_v8 = vpop.f32.mrf.mxu0  ;;  %v2510_v11 = vld [vmem:[#allocation2 + $0x1d8] sm:$0xff]  ;;  %v2614_v57 = vld [vmem:[#allocation2 + $0x388] sm:$0xff] }
 0x152   : > { %v3571_v9 = vpop.f32.mrf.mxu1  ;;  %v2660_v12 = vld [vmem:[#allocation2 + $0x4f8] sm:$0xff]  ;;  %2314 = vst.msk [vmem:[#allocation2 + $0x1f8] sm:$0xff] %vm2250_vm2, %v2113_v0  ;;  %v2112_v13 = vmax.f32 %v1362_v2, 0.0  ;;  %v1377_v14 = vadd.f32 %v4340_v15, %v3421_v8  ;;  %v2560_v18 = vmax.f32 %v2460_v3, %v2510_v11 }
 0x153   : > { %2414 = vst.msk [vmem:[#allocation2 + $0x518] sm:$0xff] %vm2250_vm2, %v2213_v1  ;;  %v1877_v16 = vadd.f32 %v4340_v15, %v3571_v9  ;;  %2808 = vst.msk [vmem:[%s4320_s27 + $0x38] sm:$0xff] %vm2250_vm2, %v2758_v4  ;;  %v2757_v6 = vmax.f32 %v2557_v62, %v2707_v5  ;;  %v2710_v19 = vmax.f32 %v2610_v10, %v2660_v12  ;;  %v2509_v20 = vld [vmem:[#allocation2 + $0x1d0] sm:$0xff]  ;;  %v2212_v21 = vmax.f32 %v1862_v7, 0.0  ;;  %v1371_v22 = vpop.f32.mrf.mxu0  ;;  %v2463_v5 = vld [vmem:[#allocation2 + $0x60] sm:$0xff] }
 0x154   : > { %v1871_v23 = vpop.f32.mrf.mxu1  ;;  %v2559_v25 = vmax.f32 %v2459_v17, %v2509_v20  ;;  %v2659_v26 = vld [vmem:[#allocation2 + $0x4f0] sm:$0xff]  ;;  %2313 = vst.msk [vmem:[#allocation2 + $0x1f0] sm:$0xff] %vm2250_vm2, %v2112_v13  ;;  %v2115_v27 = vmax.f32 %v1377_v14, 0.0  ;;  %v1372_v29 = vadd.f32 %v4340_v15, %v1371_v22  ;;  %v2613_v13 = vld [vmem:[#allocation2 + $0x380] sm:$0xff]  ;;  %v2466_v14 = vld [vmem:[#allocation2 + $0x78] sm:$0xff] }
 0x155   : > { %v2215_v28 = vmax.f32 %v1877_v16, 0.0  ;;  %2807 = vst.msk [vmem:[%s4320_s27 + $0x30] sm:$0xff] %vm2250_vm2, %v2757_v6  ;;  %v2760_v31 = vmax.f32 %v2560_v18, %v2710_v19  ;;  %v2709_v32 = vmax.f32 %v2609_v24, %v2659_v26  ;;  %2413 = vst.msk [vmem:[#allocation2 + $0x510] sm:$0xff] %vm2250_vm2, %v2212_v21  ;;  %v1872_v33 = vadd.f32 %v4340_v15, %v1871_v23  ;;  %v3424_v34 = vpop.f32.mrf.mxu0  ;;  %v2512_v37 = vld [vmem:[#allocation2 + $0x1e8] sm:$0xff]  ;;  %v2616_v20 = vld [vmem:[#allocation2 + $0x398] sm:$0xff] }
 0x156   : > { %v3574_v35 = vpop.f32.mrf.mxu1  ;;  %v2662_v38 = vld [vmem:[#allocation2 + $0x508] sm:$0xff]  ;;  %2316 = vst.msk [vmem:[#allocation2 + $0x208] sm:$0xff] %vm2250_vm2, %v2115_v27  ;;  %v2114_v39 = vmax.f32 %v1372_v29, 0.0  ;;  %v1387_v40 = vadd.f32 %v4340_v15, %v3424_v34  ;;  %v2562_v44 = vmax.f32 %v2462_v30, %v2512_v37 }
 0x157   : > { %2416 = vst.msk [vmem:[#allocation2 + $0x528] sm:$0xff] %vm2250_vm2, %v2215_v28  ;;  %v1887_v41 = vadd.f32 %v4340_v15, %v3574_v35  ;;  %2810 = vst.msk [vmem:[%s4320_s27 + $0x48] sm:$0xff] %vm2250_vm2, %v2760_v31  ;;  %v2759_v43 = vmax.f32 %v2559_v25, %v2709_v32  ;;  %v2712_v45 = vmax.f32 %v2612_v36, %v2662_v38  ;;  %v2511_v46 = vld [vmem:[#allocation2 + $0x1e0] sm:$0xff]  ;;  %v2214_v47 = vmax.f32 %v1872_v33, 0.0  ;;  %v1381_v48 = vpop.f32.mrf.mxu0  ;;  %v2465_v32 = vld [vmem:[#allocation2 + $0x70] sm:$0xff] }
 0x158   : > { %v1881_v49 = vpop.f32.mrf.mxu1  ;;  %v2561_v52 = vmax.f32 %v2461_v42, %v2511_v46  ;;  %v2661_v53 = vld [vmem:[#allocation2 + $0x500] sm:$0xff]  ;;  %2315 = vst.msk [vmem:[#allocation2 + $0x200] sm:$0xff] %vm2250_vm2, %v2114_v39  ;;  %v2117_v54 = vmax.f32 %v1387_v40, 0.0  ;;  %v1382_v56 = vadd.f32 %v4340_v15, %v1381_v48  ;;  %v2615_v39 = vld [vmem:[#allocation2 + $0x390] sm:$0xff]  ;;  %v2468_v40 = vld [vmem:[#allocation2 + $0x88] sm:$0xff] }
 0x159   : > { %v2217_v55 = vmax.f32 %v1887_v41, 0.0  ;;  %2809 = vst.msk [vmem:[%s4320_s27 + $0x40] sm:$0xff] %vm2250_vm2, %v2759_v43  ;;  %v2762_v58 = vmax.f32 %v2562_v44, %v2712_v45  ;;  %v2711_v59 = vmax.f32 %v2611_v50, %v2661_v53  ;;  %v2514_v60 = vld [vmem:[#allocation2 + $0x1f8] sm:$0xff]  ;;  %2415 = vst.msk [vmem:[#allocation2 + $0x520] sm:$0xff] %vm2250_vm2, %v2214_v47  ;;  %v1882_v62 = vadd.f32 %v4340_v15, %v1881_v49  ;;  %v3427_v63 = vpop.f32.mrf.mxu0  ;;  %v2618_v46 = vld [vmem:[#allocation2 + $0x3a8] sm:$0xff] }
 0x15a   : > { %v2664_v61 = vld [vmem:[#allocation2 + $0x518] sm:$0xff]  ;;  %v3577_v0 = vpop.f32.mrf.mxu1  ;;  %v2564_v1 = vmax.f32 %v2464_v51, %v2514_v60  ;;  %2318 = vst.msk [vmem:[#allocation2 + $0x218] sm:$0xff] %vm2250_vm2, %v2117_v54  ;;  %v2116_v3 = vmax.f32 %v1382_v56, 0.0  ;;  %v1397_v4 = vadd.f32 %v4340_v15, %v3427_v63 }
 0x15b   : > { %v2714_v2 = vmax.f32 %v2614_v57, %v2664_v61  ;;  %2418 = vst.msk [vmem:[#allocation2 + $0x538] sm:$0xff] %vm2250_vm2, %v2217_v55  ;;  %2812 = vst.msk [vmem:[%s4320_s27 + $0x58] sm:$0xff] %vm2250_vm2, %v2762_v58  ;;  %v2761_v7 = vmax.f32 %v2561_v52, %v2711_v59  ;;  %v2513_v8 = vld [vmem:[#allocation2 + $0x1f0] sm:$0xff]  ;;  %v2216_v9 = vmax.f32 %v1882_v62, 0.0  ;;  %v1897_v10 = vadd.f32 %v4340_v15, %v3577_v0  ;;  %v1391_v11 = vpop.f32.mrf.mxu0  ;;  %v2467_v58 = vld [vmem:[#allocation2 + $0x80] sm:$0xff] }
 0x15c   : > { %v1891_v12 = vpop.f32.mrf.mxu1  ;;  %v2563_v17 = vmax.f32 %v2463_v5, %v2513_v8  ;;  %v2663_v6 = vld [vmem:[#allocation2 + $0x510] sm:$0xff]  ;;  %2317 = vst.msk [vmem:[#allocation2 + $0x210] sm:$0xff] %vm2250_vm2, %v2116_v3  ;;  %v2119_v18 = vmax.f32 %v1397_v4, 0.0  ;;  %v1392_v19 = vadd.f32 %v4340_v15, %v1391_v11  ;;  %v2470_v8 = vld [vmem:[#allocation2 + $0x98] sm:$0xff] }
 0x15d   : > { %v2764_v16 = vmax.f32 %v2564_v1, %v2714_v2  ;;  %2811 = vst.msk [vmem:[%s4320_s27 + $0x50] sm:$0xff] %vm2250_vm2, %v2761_v7  ;;  %v2713_v21 = vmax.f32 %v2613_v13, %v2663_v6  ;;  %v2516_v22 = vld [vmem:[#allocation2 + $0x208] sm:$0xff]  ;;  %2417 = vst.msk [vmem:[#allocation2 + $0x530] sm:$0xff] %vm2250_vm2, %v2216_v9  ;;  %v2219_v24 = vmax.f32 %v1897_v10, 0.0  ;;  %v1892_v25 = vadd.f32 %v4340_v15, %v1891_v12  ;;  %v3430_v26 = vpop.f32.mrf.mxu0  ;;  %v2617_v1 = vld [vmem:[#allocation2 + $0x3a0] sm:$0xff] }
 0x15e   : > { %v2666_v23 = vld [vmem:[#allocation2 + $0x528] sm:$0xff]  ;;  %v3580_v27 = vpop.f32.mrf.mxu1  ;;  %v2566_v28 = vmax.f32 %v2466_v14, %v2516_v22  ;;  %2320 = vst.msk [vmem:[#allocation2 + $0x228] sm:$0xff] %vm2250_vm2, %v2119_v18  ;;  %v2118_v30 = vmax.f32 %v1392_v19, 0.0  ;;  %v1407_v31 = vadd.f32 %v4340_v15, %v3430_v26 }
 0x15f   : > { %2814 = vst.msk [vmem:[%s4320_s27 + $0x68] sm:$0xff] %vm2250_vm2, %v2764_v16  ;;  %v2716_v29 = vmax.f32 %v2616_v20, %v2666_v23  ;;  %v2763_v33 = vmax.f32 %v2563_v17, %v2713_v21  ;;  %v2515_v34 = vld [vmem:[#allocation2 + $0x200] sm:$0xff]  ;;  %2420 = vst.msk [vmem:[#allocation2 + $0x548] sm:$0xff] %vm2250_vm2, %v2219_v24  ;;  %v2218_v35 = vmax.f32 %v1892_v25, 0.0  ;;  %v1907_v36 = vadd.f32 %v4340_v15, %v3580_v27  ;;  %v1401_v37 = vpop.f32.mrf.mxu0  ;;  %v2620_v16 = vld [vmem:[#allocation2 + $0x3b8] sm:$0xff] }
 0x160   : > { %v1901_v38 = vpop.f32.mrf.mxu1  ;;  %v2565_v42 = vmax.f32 %v2465_v32, %v2515_v34  ;;  %v2665_v43 = vld [vmem:[#allocation2 + $0x520] sm:$0xff]  ;;  %2319 = vst.msk [vmem:[#allocation2 + $0x220] sm:$0xff] %vm2250_vm2, %v2118_v30  ;;  %v2121_v44 = vmax.f32 %v1407_v31, 0.0  ;;  %v1402_v45 = vadd.f32 %v4340_v15, %v1401_v37  ;;  %v2469_v21 = vld [vmem:[#allocation2 + $0x90] sm:$0xff]  ;;  %v2472_v34 = vld [vmem:[#allocation2 + $0xa8] sm:$0xff] }
 0x161   : > { %v2766_v41 = vmax.f32 %v2566_v28, %v2716_v29  ;;  %2813 = vst.msk [vmem:[%s4320_s27 + $0x60] sm:$0xff] %vm2250_vm2, %v2763_v33  ;;  %v2715_v47 = vmax.f32 %v2615_v39, %v2665_v43  ;;  %v2518_v48 = vld [vmem:[#allocation2 + $0x218] sm:$0xff]  ;;  %2419 = vst.msk [vmem:[#allocation2 + $0x540] sm:$0xff] %vm2250_vm2, %v2218_v35  ;;  %v2221_v50 = vmax.f32 %v1907_v36, 0.0  ;;  %v1902_v51 = vadd.f32 %v4340_v15, %v1901_v38  ;;  %v3433_v52 = vpop.f32.mrf.mxu0  ;;  %v2619_v28 = vld [vmem:[#allocation2 + $0x3b0] sm:$0xff] }
 0x162   : > { %v2668_v49 = vld [vmem:[#allocation2 + $0x538] sm:$0xff]  ;;  %v3583_v53 = vpop.f32.mrf.mxu1  ;;  %v2568_v54 = vmax.f32 %v2468_v40, %v2518_v48  ;;  %2322 = vst.msk [vmem:[#allocation2 + $0x238] sm:$0xff] %vm2250_vm2, %v2121_v44  ;;  %v2120_v56 = vmax.f32 %v1402_v45, 0.0  ;;  %v1417_v57 = vadd.f32 %v4340_v15, %v3433_v52 }
 0x163   : > { %2816 = vst.msk [vmem:[%s4320_s27 + $0x78] sm:$0xff] %vm2250_vm2, %v2766_v41  ;;  %v2718_v55 = vmax.f32 %v2618_v46, %v2668_v49  ;;  %v2765_v59 = vmax.f32 %v2565_v42, %v2715_v47  ;;  %v2517_v60 = vld [vmem:[#allocation2 + $0x210] sm:$0xff]  ;;  %2422 = vst.msk [vmem:[#allocation2 + $0x558] sm:$0xff] %vm2250_vm2, %v2221_v50  ;;  %v2220_v61 = vmax.f32 %v1902_v51, 0.0  ;;  %v1917_v62 = vadd.f32 %v4340_v15, %v3583_v53  ;;  %v1411_v63 = vpop.f32.mrf.mxu0  ;;  %v2622_v41 = vld [vmem:[#allocation2 + $0x3c8] sm:$0xff] }
 0x164   : > { %v1911_v0 = vpop.f32.mrf.mxu1  ;;  %v2567_v3 = vmax.f32 %v2467_v58, %v2517_v60  ;;  %v2667_v4 = vld [vmem:[#allocation2 + $0x530] sm:$0xff]  ;;  %2321 = vst.msk [vmem:[#allocation2 + $0x230] sm:$0xff] %vm2250_vm2, %v2120_v56  ;;  %v2123_v5 = vmax.f32 %v1417_v57, 0.0  ;;  %v1412_v7 = vadd.f32 %v4340_v15, %v1411_v63  ;;  %v2471_v47 = vld [vmem:[#allocation2 + $0xa0] sm:$0xff]  ;;  %v2474_v60 = vld [vmem:[#allocation2 + $0xb8] sm:$0xff] }
 0x165   : > { %v2768_v2 = vmax.f32 %v2568_v54, %v2718_v55  ;;  %2815 = vst.msk [vmem:[%s4320_s27 + $0x70] sm:$0xff] %vm2250_vm2, %v2765_v59  ;;  %v2717_v9 = vmax.f32 %v2617_v1, %v2667_v4  ;;  %v2520_v10 = vld [vmem:[#allocation2 + $0x228] sm:$0xff]  ;;  %2421 = vst.msk [vmem:[#allocation2 + $0x550] sm:$0xff] %vm2250_vm2, %v2220_v61  ;;  %v2223_v11 = vmax.f32 %v1917_v62, 0.0  ;;  %v1912_v12 = vadd.f32 %v4340_v15, %v1911_v0  ;;  %v3436_v13 = vpop.f32.mrf.mxu0  ;;  %v2621_v54 = vld [vmem:[#allocation2 + $0x3c0] sm:$0xff] }
 0x166   : > { %v3586_v14 = vpop.f32.mrf.mxu1  ;;  %v2570_v17 = vmax.f32 %v2470_v8, %v2520_v10  ;;  %v2670_v6 = vld [vmem:[#allocation2 + $0x548] sm:$0xff]  ;;  %2324 = vst.msk [vmem:[#allocation2 + $0x248] sm:$0xff] %vm2250_vm2, %v2123_v5  ;;  %v2122_v18 = vmax.f32 %v1412_v7, 0.0  ;;  %v1427_v19 = vadd.f32 %v4340_v15, %v3436_v13  ;;  %v2473_v10 = vld [vmem:[#allocation2 + $0xb0] sm:$0xff] }
 0x167   : > { %2818 = vst.msk [vmem:[%s4320_s27 + $0x88] sm:$0xff] %vm2250_vm2, %v2768_v2  ;;  %v1927_v20 = vadd.f32 %v4340_v15, %v3586_v14  ;;  %v2767_v22 = vmax.f32 %v2567_v3, %v2717_v9  ;;  %v2720_v23 = vmax.f32 %v2620_v16, %v2670_v6  ;;  %v2519_v24 = vld [vmem:[#allocation2 + $0x220] sm:$0xff]  ;;  %2424 = vst.msk [vmem:[#allocation2 + $0x568] sm:$0xff] %vm2250_vm2, %v2223_v11  ;;  %v2222_v25 = vmax.f32 %v1912_v12, 0.0  ;;  %v1421_v26 = vpop.f32.mrf.mxu0  ;;  %v2624_v3 = vld [vmem:[#allocation2 + $0x3d8] sm:$0xff] }
 0x168   : > { %v1921_v27 = vpop.f32.mrf.mxu1  ;;  %v2569_v29 = vmax.f32 %v2469_v21, %v2519_v24  ;;  %v2669_v30 = vld [vmem:[#allocation2 + $0x540] sm:$0xff]  ;;  %2323 = vst.msk [vmem:[#allocation2 + $0x240] sm:$0xff] %vm2250_vm2, %v2122_v18  ;;  %v2125_v31 = vmax.f32 %v1427_v19, 0.0  ;;  %v1422_v33 = vadd.f32 %v4340_v15, %v1421_v26  ;;  %v2623_v6 = vld [vmem:[#allocation2 + $0x3d0] sm:$0xff]  ;;  %v2476_v18 = vld [vmem:[#allocation2 + $0xc8] sm:$0xff] }
 0x169   : > { %v2225_v32 = vmax.f32 %v1927_v20, 0.0  ;;  %2817 = vst.msk [vmem:[%s4320_s27 + $0x80] sm:$0xff] %vm2250_vm2, %v2767_v22  ;;  %v2770_v35 = vmax.f32 %v2570_v17, %v2720_v23  ;;  %v2719_v36 = vmax.f32 %v2619_v28, %v2669_v30  ;;  %v2522_v37 = vld [vmem:[#allocation2 + $0x238] sm:$0xff]  ;;  %2423 = vst.msk [vmem:[#allocation2 + $0x560] sm:$0xff] %vm2250_vm2, %v2222_v25  ;;  %v1922_v38 = vadd.f32 %v4340_v15, %v1921_v27  ;;  %v3439_v39 = vpop.f32.mrf.mxu0  ;;  %v2626_v24 = vld [vmem:[#allocation2 + $0x3e8] sm:$0xff] }
 0x16a   : > { %v3589_v40 = vpop.f32.mrf.mxu1  ;;  %v2572_v42 = vmax.f32 %v2472_v34, %v2522_v37  ;;  %v2672_v43 = vld [vmem:[#allocation2 + $0x558] sm:$0xff]  ;;  %2326 = vst.msk [vmem:[#allocation2 + $0x258] sm:$0xff] %vm2250_vm2, %v2125_v31  ;;  %v2124_v44 = vmax.f32 %v1422_v33, 0.0  ;;  %v1437_v45 = vadd.f32 %v4340_v15, %v3439_v39 }
 0x16b   : > { %2426 = vst.msk [vmem:[#allocation2 + $0x578] sm:$0xff] %vm2250_vm2, %v2225_v32  ;;  %v1937_v46 = vadd.f32 %v4340_v15, %v3589_v40  ;;  %2820 = vst.msk [vmem:[%s4320_s27 + $0x98] sm:$0xff] %vm2250_vm2, %v2770_v35  ;;  %v2769_v48 = vmax.f32 %v2569_v29, %v2719_v36  ;;  %v2722_v49 = vmax.f32 %v2622_v41, %v2672_v43  ;;  %v2521_v50 = vld [vmem:[#allocation2 + $0x230] sm:$0xff]  ;;  %v2224_v51 = vmax.f32 %v1922_v38, 0.0  ;;  %v1431_v52 = vpop.f32.mrf.mxu0  ;;  %v2475_v36 = vld [vmem:[#allocation2 + $0xc0] sm:$0xff] }
 0x16c   : > { %v1931_v53 = vpop.f32.mrf.mxu1  ;;  %v2571_v55 = vmax.f32 %v2471_v47, %v2521_v50  ;;  %v2671_v56 = vld [vmem:[#allocation2 + $0x550] sm:$0xff]  ;;  %2325 = vst.msk [vmem:[#allocation2 + $0x250] sm:$0xff] %vm2250_vm2, %v2124_v44  ;;  %v2127_v57 = vmax.f32 %v1437_v45, 0.0  ;;  %v1432_v59 = vadd.f32 %v4340_v15, %v1431_v52  ;;  %v2625_v43 = vld [vmem:[#allocation2 + $0x3e0] sm:$0xff]  ;;  %v2478_v44 = vld [vmem:[#allocation2 + $0xd8] sm:$0xff] }
 0x16d   : > { %v2227_v58 = vmax.f32 %v1937_v46, 0.0  ;;  %2819 = vst.msk [vmem:[%s4320_s27 + $0x90] sm:$0xff] %vm2250_vm2, %v2769_v48  ;;  %v2772_v61 = vmax.f32 %v2572_v42, %v2722_v49  ;;  %v2721_v62 = vmax.f32 %v2621_v54, %v2671_v56  ;;  %v2524_v63 = vld [vmem:[#allocation2 + $0x248] sm:$0xff]  ;;  %2425 = vst.msk [vmem:[#allocation2 + $0x570] sm:$0xff] %vm2250_vm2, %v2224_v51  ;;  %v1932_v0 = vadd.f32 %v4340_v15, %v1931_v53  ;;  %v3442_v1 = vpop.f32.mrf.mxu0  ;;  %v2628_v50 = vld [vmem:[#allocation2 + $0x3f8] sm:$0xff] }
 0x16e   : > { %v3592_v2 = vpop.f32.mrf.mxu1  ;;  %v2574_v4 = vmax.f32 %v2474_v60, %v2524_v63  ;;  %v2674_v5 = vld [vmem:[#allocation2 + $0x568] sm:$0xff]  ;;  %2328 = vst.msk [vmem:[#allocation2 + $0x268] sm:$0xff] %vm2250_vm2, %v2127_v57  ;;  %v2126_v7 = vmax.f32 %v1432_v59, 0.0  ;;  %v1447_v8 = vadd.f32 %v4340_v15, %v3442_v1 }
 0x16f   : > { %2428 = vst.msk [vmem:[#allocation2 + $0x588] sm:$0xff] %vm2250_vm2, %v2227_v58  ;;  %v1947_v9 = vadd.f32 %v4340_v15, %v3592_v2  ;;  %2822 = vst.msk [vmem:[%s4320_s27 + $0xa8] sm:$0xff] %vm2250_vm2, %v2772_v61  ;;  %v2771_v11 = vmax.f32 %v2571_v55, %v2721_v62  ;;  %v2724_v12 = vmax.f32 %v2624_v3, %v2674_v5  ;;  %v2523_v13 = vld [vmem:[#allocation2 + $0x240] sm:$0xff]  ;;  %v2226_v14 = vmax.f32 %v1932_v0, 0.0  ;;  %v1441_v16 = vpop.f32.mrf.mxu0  ;;  %v2477_v62 = vld [vmem:[#allocation2 + $0xd0] sm:$0xff] }
 0x170   : > { %v1941_v17 = vpop.f32.mrf.mxu1  ;;  %v2573_v19 = vmax.f32 %v2473_v10, %v2523_v13  ;;  %v2673_v20 = vld [vmem:[#allocation2 + $0x560] sm:$0xff]  ;;  %2327 = vst.msk [vmem:[#allocation2 + $0x260] sm:$0xff] %vm2250_vm2, %v2126_v7  ;;  %v2129_v21 = vmax.f32 %v1447_v8, 0.0  ;;  %v1442_v23 = vadd.f32 %v4340_v15, %v1441_v16  ;;  %v2627_v5 = vld [vmem:[#allocation2 + $0x3f0] sm:$0xff]  ;;  %v2480_v7 = vld [vmem:[#allocation2 + $0xe8] sm:$0xff] }
 0x171   : > { %v2229_v22 = vmax.f32 %v1947_v9, 0.0  ;;  %2821 = vst.msk [vmem:[%s4320_s27 + $0xa0] sm:$0xff] %vm2250_vm2, %v2771_v11  ;;  %v2774_v25 = vmax.f32 %v2574_v4, %v2724_v12  ;;  %v2723_v26 = vmax.f32 %v2623_v6, %v2673_v20  ;;  %v2526_v27 = vld [vmem:[#allocation2 + $0x258] sm:$0xff]  ;;  %2427 = vst.msk [vmem:[#allocation2 + $0x580] sm:$0xff] %vm2250_vm2, %v2226_v14  ;;  %v1942_v29 = vadd.f32 %v4340_v15, %v1941_v17  ;;  %v3445_v30 = vpop.f32.mrf.mxu0  ;;  %v2630_v13 = vld [vmem:[#allocation2 + $0x408] sm:$0xff] }
 0x172   : > { %v2676_v28 = vld [vmem:[#allocation2 + $0x578] sm:$0xff]  ;;  %v3595_v31 = vpop.f32.mrf.mxu1  ;;  %v2576_v32 = vmax.f32 %v2476_v18, %v2526_v27  ;;  %2330 = vst.msk [vmem:[#allocation2 + $0x278] sm:$0xff] %vm2250_vm2, %v2129_v21  ;;  %v2128_v34 = vmax.f32 %v1442_v23, 0.0  ;;  %v1457_v35 = vadd.f32 %v4340_v15, %v3445_v30 }
 0x173   : > { %v2726_v33 = vmax.f32 %v2626_v24, %v2676_v28  ;;  %2430 = vst.msk [vmem:[#allocation2 + $0x598] sm:$0xff] %vm2250_vm2, %v2229_v22  ;;  %2824 = vst.msk [vmem:[%s4320_s27 + $0xb8] sm:$0xff] %vm2250_vm2, %v2774_v25  ;;  %v2773_v37 = vmax.f32 %v2573_v19, %v2723_v26  ;;  %v2525_v38 = vld [vmem:[#allocation2 + $0x250] sm:$0xff]  ;;  %v2228_v39 = vmax.f32 %v1942_v29, 0.0  ;;  %v1957_v40 = vadd.f32 %v4340_v15, %v3595_v31  ;;  %v1451_v41 = vpop.f32.mrf.mxu0  ;;  %v2479_v25 = vld [vmem:[#allocation2 + $0xe0] sm:$0xff] }
 0x174   : > { %v1951_v42 = vpop.f32.mrf.mxu1  ;;  %v2575_v46 = vmax.f32 %v2475_v36, %v2525_v38  ;;  %v2675_v47 = vld [vmem:[#allocation2 + $0x570] sm:$0xff]  ;;  %2329 = vst.msk [vmem:[#allocation2 + $0x270] sm:$0xff] %vm2250_vm2, %v2128_v34  ;;  %v2131_v48 = vmax.f32 %v1457_v35, 0.0  ;;  %v1452_v49 = vadd.f32 %v4340_v15, %v1451_v41  ;;  %v2482_v38 = vld [vmem:[#allocation2 + $0xf8] sm:$0xff] }
 0x175   : > { %v2776_v45 = vmax.f32 %v2576_v32, %v2726_v33  ;;  %2823 = vst.msk [vmem:[%s4320_s27 + $0xb0] sm:$0xff] %vm2250_vm2, %v2773_v37  ;;  %v2725_v51 = vmax.f32 %v2625_v43, %v2675_v47  ;;  %v2528_v52 = vld [vmem:[#allocation2 + $0x268] sm:$0xff]  ;;  %2429 = vst.msk [vmem:[#allocation2 + $0x590] sm:$0xff] %vm2250_vm2, %v2228_v39  ;;  %v2231_v54 = vmax.f32 %v1957_v40, 0.0  ;;  %v1952_v55 = vadd.f32 %v4340_v15, %v1951_v42  ;;  %v3448_v56 = vpop.f32.mrf.mxu0  ;;  %v2629_v32 = vld [vmem:[#allocation2 + $0x400] sm:$0xff] }
 0x176   : > { %v2678_v53 = vld [vmem:[#allocation2 + $0x588] sm:$0xff]  ;;  %v3598_v57 = vpop.f32.mrf.mxu1  ;;  %v2578_v58 = vmax.f32 %v2478_v44, %v2528_v52  ;;  %2332 = vst.msk [vmem:[#allocation2 + $0x288] sm:$0xff] %vm2250_vm2, %v2131_v48  ;;  %v2130_v60 = vmax.f32 %v1452_v49, 0.0  ;;  %v1467_v61 = vadd.f32 %v4340_v15, %v3448_v56 }
 0x177   : > { %2826 = vst.msk [vmem:[%s4320_s27 + $0xc8] sm:$0xff] %vm2250_vm2, %v2776_v45  ;;  %v2728_v59 = vmax.f32 %v2628_v50, %v2678_v53  ;;  %v2775_v63 = vmax.f32 %v2575_v46, %v2725_v51  ;;  %v2527_v0 = vld [vmem:[#allocation2 + $0x260] sm:$0xff]  ;;  %2432 = vst.msk [vmem:[#allocation2 + $0x5a8] sm:$0xff] %vm2250_vm2, %v2231_v54  ;;  %v2230_v1 = vmax.f32 %v1952_v55, 0.0  ;;  %v1967_v2 = vadd.f32 %v4340_v15, %v3598_v57  ;;  %v1461_v3 = vpop.f32.mrf.mxu0  ;;  %v2632_v45 = vld [vmem:[#allocation2 + $0x418] sm:$0xff] }
 0x178   : > { %v1961_v4 = vpop.f32.mrf.mxu1  ;;  %v2577_v9 = vmax.f32 %v2477_v62, %v2527_v0  ;;  %v2677_v10 = vld [vmem:[#allocation2 + $0x580] sm:$0xff]  ;;  %2331 = vst.msk [vmem:[#allocation2 + $0x280] sm:$0xff] %vm2250_vm2, %v2130_v60  ;;  %v2133_v11 = vmax.f32 %v1467_v61, 0.0  ;;  %v1462_v12 = vadd.f32 %v4340_v15, %v1461_v3  ;;  %v2481_v51 = vld [vmem:[#allocation2 + $0xf0] sm:$0xff]  ;;  %v2484_v0 = vld [vmem:[#allocation2 + $0x108] sm:$0xff] }
 0x179   : > { %v2778_v8 = vmax.f32 %v2578_v58, %v2728_v59  ;;  %2825 = vst.msk [vmem:[%s4320_s27 + $0xc0] sm:$0xff] %vm2250_vm2, %v2775_v63  ;;  %v2727_v14 = vmax.f32 %v2627_v5, %v2677_v10  ;;  %v2530_v16 = vld [vmem:[#allocation2 + $0x278] sm:$0xff]  ;;  %2431 = vst.msk [vmem:[#allocation2 + $0x5a0] sm:$0xff] %vm2250_vm2, %v2230_v1  ;;  %v2233_v6 = vmax.f32 %v1967_v2, 0.0  ;;  %v1962_v18 = vadd.f32 %v4340_v15, %v1961_v4  ;;  %v3451_v19 = vpop.f32.mrf.mxu0  ;;  %v2631_v58 = vld [vmem:[#allocation2 + $0x410] sm:$0xff] }
 0x17a   : > { %v2680_v17 = vld [vmem:[#allocation2 + $0x598] sm:$0xff]  ;;  %v3601_v20 = vpop.f32.mrf.mxu1  ;;  %v2580_v21 = vmax.f32 %v2480_v7, %v2530_v16  ;;  %2334 = vst.msk [vmem:[#allocation2 + $0x298] sm:$0xff] %vm2250_vm2, %v2133_v11  ;;  %v2132_v23 = vmax.f32 %v1462_v12, 0.0  ;;  %v1477_v24 = vadd.f32 %v4340_v15, %v3451_v19 }
 0x17b   : > { %2828 = vst.msk [vmem:[%s4320_s27 + $0xd8] sm:$0xff] %vm2250_vm2, %v2778_v8  ;;  %v2730_v22 = vmax.f32 %v2630_v13, %v2680_v17  ;;  %v2777_v26 = vmax.f32 %v2577_v9, %v2727_v14  ;;  %v2529_v27 = vld [vmem:[#allocation2 + $0x270] sm:$0xff]  ;;  %2434 = vst.msk [vmem:[#allocation2 + $0x5b8] sm:$0xff] %vm2250_vm2, %v2233_v6  ;;  %v2232_v28 = vmax.f32 %v1962_v18, 0.0  ;;  %v1977_v29 = vadd.f32 %v4340_v15, %v3601_v20  ;;  %v1471_v30 = vpop.f32.mrf.mxu0  ;;  %v2634_v8 = vld [vmem:[#allocation2 + $0x428] sm:$0xff] }
 0x17c   : > { %v1971_v31 = vpop.f32.mrf.mxu1  ;;  %v2579_v34 = vmax.f32 %v2479_v25, %v2529_v27  ;;  %v2679_v35 = vld [vmem:[#allocation2 + $0x590] sm:$0xff]  ;;  %2333 = vst.msk [vmem:[#allocation2 + $0x290] sm:$0xff] %vm2250_vm2, %v2132_v23  ;;  %v2135_v36 = vmax.f32 %v1477_v24, 0.0  ;;  %v1472_v37 = vadd.f32 %v4340_v15, %v1471_v30  ;;  %v2483_v14 = vld [vmem:[#allocation2 + $0x100] sm:$0xff]  ;;  %v2486_v27 = vld [vmem:[#allocation2 + $0x118] sm:$0xff] }
 0x17d   : > { %v2780_v33 = vmax.f32 %v2580_v21, %v2730_v22  ;;  %2827 = vst.msk [vmem:[%s4320_s27 + $0xd0] sm:$0xff] %vm2250_vm2, %v2777_v26  ;;  %v2729_v39 = vmax.f32 %v2629_v32, %v2679_v35  ;;  %v2532_v40 = vld [vmem:[#allocation2 + $0x288] sm:$0xff]  ;;  %2433 = vst.msk [vmem:[#allocation2 + $0x5b0] sm:$0xff] %vm2250_vm2, %v2232_v28  ;;  %v2235_v41 = vmax.f32 %v1977_v29, 0.0  ;;  %v1972_v42 = vadd.f32 %v4340_v15, %v1971_v31  ;;  %v3454_v43 = vpop.f32.mrf.mxu0  ;;  %v2633_v21 = vld [vmem:[#allocation2 + $0x420] sm:$0xff] }
 0x17e   : > { %v3604_v44 = vpop.f32.mrf.mxu1  ;;  %v2582_v46 = vmax.f32 %v2482_v38, %v2532_v40  ;;  %v2682_v47 = vld [vmem:[#allocation2 + $0x5a8] sm:$0xff]  ;;  %2336 = vst.msk [vmem:[#allocation2 + $0x2a8] sm:$0xff] %vm2250_vm2, %v2135_v36  ;;  %v2134_v48 = vmax.f32 %v1472_v37, 0.0  ;;  %v1487_v49 = vadd.f32 %v4340_v15, %v3454_v43  ;;  %v2485_v40 = vld [vmem:[#allocation2 + $0x110] sm:$0xff] }
 0x17f   : > { %2830 = vst.msk [vmem:[%s4320_s27 + $0xe8] sm:$0xff] %vm2250_vm2, %v2780_v33  ;;  %v1987_v50 = vadd.f32 %v4340_v15, %v3604_v44  ;;  %v2779_v52 = vmax.f32 %v2579_v34, %v2729_v39  ;;  %v2732_v53 = vmax.f32 %v2632_v45, %v2682_v47  ;;  %v2531_v54 = vld [vmem:[#allocation2 + $0x280] sm:$0xff]  ;;  %2436 = vst.msk [vmem:[#allocation2 + $0x5c8] sm:$0xff] %vm2250_vm2, %v2235_v41  ;;  %v2234_v55 = vmax.f32 %v1972_v42, 0.0  ;;  %v1481_v56 = vpop.f32.mrf.mxu0  ;;  %v2636_v34 = vld [vmem:[#allocation2 + $0x438] sm:$0xff] }
 0x180   : > { %v1981_v57 = vpop.f32.mrf.mxu1  ;;  %v2581_v59 = vmax.f32 %v2481_v51, %v2531_v54  ;;  %v2681_v60 = vld [vmem:[#allocation2 + $0x5a0] sm:$0xff]  ;;  %2335 = vst.msk [vmem:[#allocation2 + $0x2a0] sm:$0xff] %vm2250_vm2, %v2134_v48  ;;  %v2137_v61 = vmax.f32 %v1487_v49, 0.0  ;;  %v1482_v63 = vadd.f32 %v4340_v15, %v1481_v56  ;;  %v2635_v47 = vld [vmem:[#allocation2 + $0x430] sm:$0xff]  ;;  %v2488_v48 = vld [vmem:[#allocation2 + $0x128] sm:$0xff] }
 0x181   : > { %v2237_v62 = vmax.f32 %v1987_v50, 0.0  ;;  %2829 = vst.msk [vmem:[%s4320_s27 + $0xe0] sm:$0xff] %vm2250_vm2, %v2779_v52  ;;  %v2782_v1 = vmax.f32 %v2582_v46, %v2732_v53  ;;  %v2731_v2 = vmax.f32 %v2631_v58, %v2681_v60  ;;  %v2534_v3 = vld [vmem:[#allocation2 + $0x298] sm:$0xff]  ;;  %2435 = vst.msk [vmem:[#allocation2 + $0x5c0] sm:$0xff] %vm2250_vm2, %v2234_v55  ;;  %v1982_v4 = vadd.f32 %v4340_v15, %v1981_v57  ;;  %v3457_v5 = vpop.f32.mrf.mxu0  ;;  %v2638_v54 = vld [vmem:[#allocation2 + $0x448] sm:$0xff] }
 0x182   : > { %v3607_v7 = vpop.f32.mrf.mxu1  ;;  %v2584_v9 = vmax.f32 %v2484_v0, %v2534_v3  ;;  %v2684_v10 = vld [vmem:[#allocation2 + $0x5b8] sm:$0xff]  ;;  %2338 = vst.msk [vmem:[#allocation2 + $0x2b8] sm:$0xff] %vm2250_vm2, %v2137_v61  ;;  %v2136_v11 = vmax.f32 %v1482_v63, 0.0  ;;  %v1497_v12 = vadd.f32 %v4340_v15, %v3457_v5 }
 0x183   : > { %2438 = vst.msk [vmem:[#allocation2 + $0x5d8] sm:$0xff] %vm2250_vm2, %v2237_v62  ;;  %v1997_v13 = vadd.f32 %v4340_v15, %v3607_v7  ;;  %2832 = vst.msk [vmem:[%s4320_s27 + $0xf8] sm:$0xff] %vm2250_vm2, %v2782_v1  ;;  %v2781_v16 = vmax.f32 %v2581_v59, %v2731_v2  ;;  %v2734_v17 = vmax.f32 %v2634_v8, %v2684_v10  ;;  %v2533_v6 = vld [vmem:[#allocation2 + $0x290] sm:$0xff]  ;;  %v2236_v18 = vmax.f32 %v1982_v4, 0.0  ;;  %v1491_v19 = vpop.f32.mrf.mxu0  ;;  %v4539_v59 = vld [vmem:[%s4615_s2] ss:$0 sm:$0xff] }
 0x184   : > { %v1991_v20 = vpop.f32.mrf.mxu1  ;;  %v2583_v22 = vmax.f32 %v2483_v14, %v2533_v6  ;;  %v2683_v23 = vld [vmem:[#allocation2 + $0x5b0] sm:$0xff]  ;;  %2337 = vst.msk [vmem:[#allocation2 + $0x2b0] sm:$0xff] %vm2250_vm2, %v2136_v11  ;;  %v2139_v24 = vmax.f32 %v1497_v12, 0.0  ;;  %v1492_v26 = vadd.f32 %v4340_v15, %v1491_v19  ;;  %v2487_v2 = vld [vmem:[#allocation2 + $0x120] sm:$0xff]  ;;  %v2490_v11 = vld [vmem:[#allocation2 + $0x138] sm:$0xff] }
 0x185   : > { %v2239_v25 = vmax.f32 %v1997_v13, 0.0  ;;  %2831 = vst.msk [vmem:[%s4320_s27 + $0xf0] sm:$0xff] %vm2250_vm2, %v2781_v16  ;;  %v2784_v28 = vmax.f32 %v2584_v9, %v2734_v17  ;;  %v2733_v29 = vmax.f32 %v2633_v21, %v2683_v23  ;;  %v2536_v30 = vld [vmem:[#allocation2 + $0x2a8] sm:$0xff]  ;;  %2437 = vst.msk [vmem:[#allocation2 + $0x5d0] sm:$0xff] %vm2250_vm2, %v2236_v18  ;;  %v1992_v31 = vadd.f32 %v4340_v15, %v1991_v20  ;;  %v3460_v32 = vpop.f32.mrf.mxu0  ;;  %v2637_v10 = vld [vmem:[#allocation2 + $0x440] sm:$0xff] }
 0x186   : > { %v3610_v33 = vpop.f32.mrf.mxu1  ;;  %v2586_v35 = vmax.f32 %v2486_v27, %v2536_v30  ;;  %v2686_v36 = vld [vmem:[#allocation2 + $0x5c8] sm:$0xff]  ;;  %2340 = vst.msk [vmem:[#allocation2 + $0x2c8] sm:$0xff] %vm2250_vm2, %v2139_v24  ;;  %v2138_v37 = vmax.f32 %v1492_v26, 0.0  ;;  %v1507_v38 = vadd.f32 %v4340_v15, %v3460_v32  ;;  %v2640_v6 = vld [vmem:[#allocation2 + $0x458] sm:$0xff] }
 0x187   : > { %2440 = vst.msk [vmem:[#allocation2 + $0x5e8] sm:$0xff] %vm2250_vm2, %v2239_v25  ;;  %v2007_v39 = vadd.f32 %v4340_v15, %v3610_v33  ;;  %2834 = vst.msk [vmem:[%s4320_s27 + $0x108] sm:$0xff] %vm2250_vm2, %v2784_v28  ;;  %v2783_v41 = vmax.f32 %v2583_v22, %v2733_v29  ;;  %v2736_v42 = vmax.f32 %v2636_v34, %v2686_v36  ;;  %v2535_v43 = vld [vmem:[#allocation2 + $0x2a0] sm:$0xff]  ;;  %v2238_v44 = vmax.f32 %v1992_v31, 0.0  ;;  %v1501_v45 = vpop.f32.mrf.mxu0  ;;  %v2489_v29 = vld [vmem:[#allocation2 + $0x130] sm:$0xff] }
 0x188   : > { %v2001_v46 = vpop.f32.mrf.mxu1  ;;  %v2585_v49 = vmax.f32 %v2485_v40, %v2535_v43  ;;  %v2685_v50 = vld [vmem:[#allocation2 + $0x5c0] sm:$0xff]  ;;  %2339 = vst.msk [vmem:[#allocation2 + $0x2c0] sm:$0xff] %vm2250_vm2, %v2138_v37  ;;  %v2141_v51 = vmax.f32 %v1507_v38, 0.0  ;;  %v1502_v53 = vadd.f32 %v4340_v15, %v1501_v45  ;;  %v2639_v36 = vld [vmem:[#allocation2 + $0x450] sm:$0xff]  ;;  %v2492_v37 = vld [vmem:[#allocation2 + $0x148] sm:$0xff] }
 0x189   : > { %v2241_v52 = vmax.f32 %v2007_v39, 0.0  ;;  %2833 = vst.msk [vmem:[%s4320_s27 + $0x100] sm:$0xff] %vm2250_vm2, %v2783_v41  ;;  %v2786_v55 = vmax.f32 %v2586_v35, %v2736_v42  ;;  %v2735_v56 = vmax.f32 %v2635_v47, %v2685_v50  ;;  %v2538_v57 = vld [vmem:[#allocation2 + $0x2b8] sm:$0xff]  ;;  %2439 = vst.msk [vmem:[#allocation2 + $0x5e0] sm:$0xff] %vm2250_vm2, %v2238_v44  ;;  %v2002_v60 = vadd.f32 %v4539_v59, %v2001_v46  ;;  %v3463_v61 = vpop.f32.mrf.mxu0  ;;  %v2642_v43 = vld [vmem:[#allocation2 + $0x468] sm:$0xff] }
 0x18a   : > { %v2688_v58 = vld [vmem:[#allocation2 + $0x5d8] sm:$0xff]  ;;  %v3613_v62 = vpop.f32.mrf.mxu1  ;;  %v2588_v15 = vmax.f32 %v2488_v48, %v2538_v57  ;;  %2342 = vst.msk [vmem:[#allocation2 + $0x2d8] sm:$0xff] %vm2250_vm2, %v2141_v51  ;;  %v2140_v0 = vmax.f32 %v1502_v53, 0.0  ;;  %v1517_v1 = vadd.f32 %v4539_v59, %v3463_v61 }
 0x18b   : > { %v2738_v63 = vmax.f32 %v2638_v54, %v2688_v58  ;;  %2442 = vst.msk [vmem:[#allocation2 + $0x5f8] sm:$0xff] %vm2250_vm2, %v2241_v52  ;;  %2836 = vst.msk [vmem:[%s4320_s27 + $0x118] sm:$0xff] %vm2250_vm2, %v2786_v55  ;;  %v2785_v3 = vmax.f32 %v2585_v49, %v2735_v56  ;;  %v2537_v4 = vld [vmem:[#allocation2 + $0x2b0] sm:$0xff]  ;;  %v2240_v5 = vmax.f32 %v2002_v60, 0.0  ;;  %v2017_v7 = vadd.f32 %v4539_v59, %v3613_v62  ;;  %v1511_v8 = vpop.f32.mrf.mxu0  ;;  %v2491_v55 = vld [vmem:[#allocation2 + $0x140] sm:$0xff] }
 0x18c   : > { %v2011_v9 = vpop.f32.mrf.mxu1  ;;  %v2587_v13 = vmax.f32 %v2487_v2, %v2537_v4  ;;  %v2687_v14 = vld [vmem:[#allocation2 + $0x5d0] sm:$0xff]  ;;  %2341 = vst.msk [vmem:[#allocation2 + $0x2d0] sm:$0xff] %vm2250_vm2, %v2140_v0  ;;  %v2143_v16 = vmax.f32 %v1517_v1, 0.0  ;;  %v1512_v17 = vadd.f32 %v4539_v59, %v1511_v8  ;;  %v2494_v4 = vld [vmem:[#allocation2 + $0x158] sm:$0xff] }
 0x18d   : > { %v2788_v12 = vmax.f32 %v2588_v15, %v2738_v63  ;;  %2835 = vst.msk [vmem:[%s4320_s27 + $0x110] sm:$0xff] %vm2250_vm2, %v2785_v3  ;;  %v2737_v18 = vmax.f32 %v2637_v10, %v2687_v14  ;;  %v2540_v19 = vld [vmem:[#allocation2 + $0x2c8] sm:$0xff]  ;;  %2441 = vst.msk [vmem:[#allocation2 + $0x5f0] sm:$0xff] %vm2250_vm2, %v2240_v5  ;;  %v2243_v21 = vmax.f32 %v2017_v7, 0.0  ;;  %v2012_v22 = vadd.f32 %v4539_v59, %v2011_v9  ;;  %v3466_v23 = vpop.f32.mrf.mxu0  ;;  %v2641_v15 = vld [vmem:[#allocation2 + $0x460] sm:$0xff] }
 0x18e   : > { %v2690_v20 = vld [vmem:[#allocation2 + $0x5e8] sm:$0xff]  ;;  %v3616_v24 = vpop.f32.mrf.mxu1  ;;  %v2590_v25 = vmax.f32 %v2490_v11, %v2540_v19  ;;  %2344 = vst.msk [vmem:[#allocation2 + $0x2e8] sm:$0xff] %vm2250_vm2, %v2143_v16  ;;  %v2142_v27 = vmax.f32 %v1512_v17, 0.0  ;;  %v1527_v28 = vadd.f32 %v4539_v59, %v3466_v23 }
 0x18f   : > { %2838 = vst.msk [vmem:[%s4320_s27 + $0x128] sm:$0xff] %vm2250_vm2, %v2788_v12  ;;  %v2740_v26 = vmax.f32 %v2640_v6, %v2690_v20  ;;  %v2787_v30 = vmax.f32 %v2587_v13, %v2737_v18  ;;  %v2539_v31 = vld [vmem:[#allocation2 + $0x2c0] sm:$0xff]  ;;  %2444 = vst.msk [vmem:[#allocation2 + $0x608] sm:$0xff] %vm2250_vm2, %v2243_v21  ;;  %v2242_v32 = vmax.f32 %v2012_v22, 0.0  ;;  %v2027_v33 = vadd.f32 %v4539_v59, %v3616_v24  ;;  %v1521_v34 = vpop.f32.mrf.mxu0  ;;  %v2644_v12 = vld [vmem:[#allocation2 + $0x478] sm:$0xff] }
 0x190   : > { %v2021_v35 = vpop.f32.mrf.mxu1  ;;  %v2589_v39 = vmax.f32 %v2489_v29, %v2539_v31  ;;  %v2689_v40 = vld [vmem:[#allocation2 + $0x5e0] sm:$0xff]  ;;  %2343 = vst.msk [vmem:[#allocation2 + $0x2e0] sm:$0xff] %vm2250_vm2, %v2142_v27  ;;  %v2145_v41 = vmax.f32 %v1527_v28, 0.0  ;;  %v1522_v42 = vadd.f32 %v4539_v59, %v1521_v34  ;;  %v2493_v18 = vld [vmem:[#allocation2 + $0x150] sm:$0xff]  ;;  %v2496_v31 = vld [vmem:[#allocation2 + $0x168] sm:$0xff] }
 0x191   : > { %v2790_v38 = vmax.f32 %v2590_v25, %v2740_v26  ;;  %2837 = vst.msk [vmem:[%s4320_s27 + $0x120] sm:$0xff] %vm2250_vm2, %v2787_v30  ;;  %v2739_v44 = vmax.f32 %v2639_v36, %v2689_v40  ;;  %v2542_v45 = vld [vmem:[#allocation2 + $0x2d8] sm:$0xff]  ;;  %2443 = vst.msk [vmem:[#allocation2 + $0x600] sm:$0xff] %vm2250_vm2, %v2242_v32  ;;  %v2245_v47 = vmax.f32 %v2027_v33, 0.0  ;;  %v2022_v48 = vadd.f32 %v4539_v59, %v2021_v35  ;;  %v3469_v49 = vpop.f32.mrf.mxu0  ;;  %v2643_v25 = vld [vmem:[#allocation2 + $0x470] sm:$0xff] }
 0x192   : > { %v2692_v46 = vld [vmem:[#allocation2 + $0x5f8] sm:$0xff]  ;;  %v3619_v50 = vpop.f32.mrf.mxu1  ;;  %v2592_v51 = vmax.f32 %v2492_v37, %v2542_v45  ;;  %2346 = vst.msk [vmem:[#allocation2 + $0x2f8] sm:$0xff] %vm2250_vm2, %v2145_v41  ;;  %v2144_v53 = vmax.f32 %v1522_v42, 0.0  ;;  %v1537_v54 = vadd.f32 %v4539_v59, %v3469_v49  ;;  %v2646_v36 = vld [vmem:[#allocation2 + $0x488] sm:$0xff]  ;;  %v2495_v40 = vld [vmem:[#allocation2 + $0x160] sm:$0xff] }
 0x193   : > { %2840 = vst.msk [vmem:[%s4320_s27 + $0x138] sm:$0xff] %vm2250_vm2, %v2790_v38  ;;  %v2742_v52 = vmax.f32 %v2642_v43, %v2692_v46  ;;  %v2789_v56 = vmax.f32 %v2589_v39, %v2739_v44  ;;  %v2541_v57 = vld [vmem:[#allocation2 + $0x2d0] sm:$0xff]  ;;  %2446 = vst.msk [vmem:[#allocation2 + $0x618] sm:$0xff] %vm2250_vm2, %v2245_v47  ;;  %v2244_v58 = vmax.f32 %v2022_v48, 0.0  ;;  %v2037_v60 = vadd.f32 %v4539_v59, %v3619_v50  ;;  %v1531_v61 = vpop.f32.mrf.mxu0  ;;  %v2645_v45 = vld [vmem:[#allocation2 + $0x480] sm:$0xff] }
 0x194   : > { %v2031_v62 = vpop.f32.mrf.mxu1  ;;  %v2591_v0 = vmax.f32 %v2491_v55, %v2541_v57  ;;  %v2691_v1 = vld [vmem:[#allocation2 + $0x5f0] sm:$0xff]  ;;  %2345 = vst.msk [vmem:[#allocation2 + $0x2f0] sm:$0xff] %vm2250_vm2, %v2144_v53  ;;  %v2147_v2 = vmax.f32 %v1537_v54, 0.0  ;;  %v1532_v3 = vadd.f32 %v4539_v59, %v1531_v61  ;;  %v2498_v47 = vld [vmem:[#allocation2 + $0x178] sm:$0xff] }
 0x195   : > { %v2792_v63 = vmax.f32 %v2592_v51, %v2742_v52  ;;  %2839 = vst.msk [vmem:[%s4320_s27 + $0x130] sm:$0xff] %vm2250_vm2, %v2789_v56  ;;  %v2741_v5 = vmax.f32 %v2641_v15, %v2691_v1  ;;  %v2544_v7 = vld [vmem:[#allocation2 + $0x2e8] sm:$0xff]  ;;  %2445 = vst.msk [vmem:[#allocation2 + $0x610] sm:$0xff] %vm2250_vm2, %v2244_v58  ;;  %v2247_v8 = vmax.f32 %v2037_v60, 0.0  ;;  %v2032_v9 = vadd.f32 %v4539_v59, %v2031_v62  ;;  %v3472_v10 = vpop.f32.mrf.mxu0  ;;  %v2648_v51 = vld [vmem:[#allocation2 + $0x498] sm:$0xff] }
 0x196   : > { %v3622_v11 = vpop.f32.mrf.mxu1  ;;  %v2594_v13 = vmax.f32 %v2494_v4, %v2544_v7  ;;  %v2694_v14 = vld [vmem:[#allocation2 + $0x608] sm:$0xff]  ;;  %2348 = vst.msk [vmem:[#allocation2 + $0x308] sm:$0xff] %vm2250_vm2, %v2147_v2  ;;  %v2146_v16 = vmax.f32 %v1532_v3, 0.0  ;;  %v1547_v17 = vadd.f32 %v4539_v59, %v3472_v10  ;;  %v2497_v54 = vld [vmem:[#allocation2 + $0x170] sm:$0xff] }
 0x197   : > { %2842 = vst.msk [vmem:[%s4320_s27 + $0x148] sm:$0xff] %vm2250_vm2, %v2792_v63  ;;  %v2047_v6 = vadd.f32 %v4539_v59, %v3622_v11  ;;  %v2791_v19 = vmax.f32 %v2591_v0, %v2741_v5  ;;  %v2744_v20 = vmax.f32 %v2644_v12, %v2694_v14  ;;  %v2543_v21 = vld [vmem:[#allocation2 + $0x2e0] sm:$0xff]  ;;  %2448 = vst.msk [vmem:[#allocation2 + $0x628] sm:$0xff] %vm2250_vm2, %v2247_v8  ;;  %v2246_v22 = vmax.f32 %v2032_v9, 0.0  ;;  %v1541_v23 = vpop.f32.mrf.mxu0  ;;  %v2647_v58 = vld [vmem:[#allocation2 + $0x490] sm:$0xff] }
 0x198   : > { %v2041_v24 = vpop.f32.mrf.mxu1  ;;  %v2593_v26 = vmax.f32 %v2493_v18, %v2543_v21  ;;  %v2693_v27 = vld [vmem:[#allocation2 + $0x600] sm:$0xff]  ;;  %2347 = vst.msk [vmem:[#allocation2 + $0x300] sm:$0xff] %vm2250_vm2, %v2146_v16  ;;  %v2149_v28 = vmax.f32 %v1547_v17, 0.0  ;;  %v1542_v30 = vadd.f32 %v4539_v59, %v1541_v23  ;;  %v2500_v60 = vld [vmem:[#allocation2 + $0x188] sm:$0xff] }
 0x199   : > { %v2249_v29 = vmax.f32 %v2047_v6, 0.0  ;;  %2841 = vst.msk [vmem:[%s4320_s27 + $0x140] sm:$0xff] %vm2250_vm2, %v2791_v19  ;;  %v2794_v32 = vmax.f32 %v2594_v13, %v2744_v20  ;;  %v2743_v33 = vmax.f32 %v2643_v25, %v2693_v27  ;;  %v2546_v34 = vld [vmem:[#allocation2 + $0x2f8] sm:$0xff]  ;;  %2447 = vst.msk [vmem:[#allocation2 + $0x620] sm:$0xff] %vm2250_vm2, %v2246_v22  ;;  %v2042_v35 = vadd.f32 %v4539_v59, %v2041_v24  ;;  %v2650_v15 = vld [vmem:[#allocation2 + $0x4a8] sm:$0xff] }
 0x19a   : > { %v2596_v37 = vmax.f32 %v2496_v31, %v2546_v34  ;;  %v2696_v38 = vld [vmem:[#allocation2 + $0x618] sm:$0xff]  ;;  %2350 = vst.msk [vmem:[#allocation2 + $0x318] sm:$0xff] %vm2250_vm2, %v2149_v28  ;;  %v2148_v39 = vmax.f32 %v1542_v30, 0.0  ;;  %v2499_v5 = vld [vmem:[#allocation2 + $0x180] sm:$0xff] }
 0x19b   : > { %2450 = vst.msk [vmem:[#allocation2 + $0x638] sm:$0xff] %vm2250_vm2, %v2249_v29  ;;  %2844 = vst.msk [vmem:[%s4320_s27 + $0x158] sm:$0xff] %vm2250_vm2, %v2794_v32  ;;  %v2793_v41 = vmax.f32 %v2593_v26, %v2743_v33  ;;  %v2746_v42 = vmax.f32 %v2646_v36, %v2696_v38  ;;  %v2545_v43 = vld [vmem:[#allocation2 + $0x2f0] sm:$0xff]  ;;  %v2248_v44 = vmax.f32 %v2042_v35, 0.0  ;;  %v2649_v9 = vld [vmem:[#allocation2 + $0x4a0] sm:$0xff] }
 0x19c   : > { %v2595_v46 = vmax.f32 %v2495_v40, %v2545_v43  ;;  %v2695_v59 = vld [vmem:[#allocation2 + $0x610] sm:$0xff]  ;;  %2349 = vst.msk [vmem:[#allocation2 + $0x310] sm:$0xff] %vm2250_vm2, %v2148_v39 }
 0x19d   : > { %2843 = vst.msk [vmem:[%s4320_s27 + $0x150] sm:$0xff] %vm2250_vm2, %v2793_v41  ;;  %v2796_v48 = vmax.f32 %v2596_v37, %v2746_v42  ;;  %v2745_v49 = vmax.f32 %v2645_v45, %v2695_v59  ;;  %v2548_v50 = vld [vmem:[#allocation2 + $0x308] sm:$0xff]  ;;  %2449 = vst.msk [vmem:[#allocation2 + $0x630] sm:$0xff] %vm2250_vm2, %v2248_v44 }
 0x19e   : > { %v2598_v52 = vmax.f32 %v2498_v47, %v2548_v50  ;;  %v2698_v53 = vld [vmem:[#allocation2 + $0x628] sm:$0xff] }
 0x19f   : > { %2846 = vst.msk [vmem:[%s4320_s27 + $0x168] sm:$0xff] %vm2250_vm2, %v2796_v48  ;;  %v2795_v55 = vmax.f32 %v2595_v46, %v2745_v49  ;;  %v2748_v56 = vmax.f32 %v2648_v51, %v2698_v53  ;;  %v2547_v57 = vld [vmem:[#allocation2 + $0x300] sm:$0xff] }
 0x1a0   : > { %v2597_v61 = vmax.f32 %v2497_v54, %v2547_v57  ;;  %v2697_v62 = vld [vmem:[#allocation2 + $0x620] sm:$0xff] }
 0x1a1   : > { %2845 = vst.msk [vmem:[%s4320_s27 + $0x160] sm:$0xff] %vm2250_vm2, %v2795_v55  ;;  %v2798_v63 = vmax.f32 %v2598_v52, %v2748_v56  ;;  %v2747_v0 = vmax.f32 %v2647_v58, %v2697_v62  ;;  %v2550_v1 = vld [vmem:[#allocation2 + $0x318] sm:$0xff] }
 0x1a2   : > { %v2700_v2 = vld [vmem:[#allocation2 + $0x638] sm:$0xff]  ;;  %v2600_v3 = vmax.f32 %v2500_v60, %v2550_v1 }
 0x1a3   : > { %v2750_v4 = vmax.f32 %v2650_v15, %v2700_v2  ;;  %2848 = vst.msk [vmem:[%s4320_s27 + $0x178] sm:$0xff] %vm2250_vm2, %v2798_v63  ;;  %v2797_v7 = vmax.f32 %v2597_v61, %v2747_v0  ;;  %v2549_v8 = vld [vmem:[#allocation2 + $0x310] sm:$0xff] }
 0x1a4   : > { %v2599_v11 = vmax.f32 %v2499_v5, %v2549_v8  ;;  %v2699_v12 = vld [vmem:[#allocation2 + $0x630] sm:$0xff] }
 0x1a5   : > { %v2800_v10 = vmax.f32 %v2600_v3, %v2750_v4  ;;  %2847 = vst.msk [vmem:[%s4320_s27 + $0x170] sm:$0xff] %vm2250_vm2, %v2797_v7  ;;  %v2749_v13 = vmax.f32 %v2649_v9, %v2699_v12 }
 0x1a7   : > { %2850 = vst.msk [vmem:[%s4320_s27 + $0x188] sm:$0xff] %vm2250_vm2, %v2800_v10  ;;  %v2799_v14 = vmax.f32 %v2599_v11, %v2749_v13 }
 0x1a9   : > { %2849 = vst.msk [vmem:[%s4320_s27 + $0x180] sm:$0xff] %vm2250_vm2, %v2799_v14 }
 0x1aa PF: > { %s13_s12 = sadd.s32 1, %s3645_s12  }
 0x1ab   : > { %p10_p4 = scmp.ge.s32.totalorder %s13_s12, 4  }
 0x1ad   :  { %12 = sbr.rel (!%p10_p4) target bundleno = 1 (0x1), region = 62 }

// kernel: asr_forward.8
= control target key start
LH: loop header
LB: loop body
LE: loop exit
PB: predicated region body
PF: predicated region fallthrough
CT: control target
= control target key end

     0   :  { %s1749_s12 = smov 0   ;;  %s2365_s0 = inlined_call_operand.vmem [shape: f32[2,416,288], index: 0, kind: input, shape index: {}]   ;;  %s2366_s1 = inlined_call_operand.vmem [shape: f32[288,64], index: 1, kind: input, shape index: {}]   ;;  %s2367_s2 = inlined_call_operand.vmem [shape: f32[1,64], index: 2, kind: input, shape index: {}]   ;;  %s2368_s3 = inlined_call_operand.vmem [shape: f32[2,104,64], index: 3, kind: output, shape index: {}]  }
   0x1 LB: > { %s1441_s13 = sadd.s32 4294967295, %s1726_s12   ;;  %p1445_p0 = scmp.ge.s32.totalorder %s1726_s12, 1  ;;  %s1726_s12 = sphi %s1749_s12, %s13_s12  }
   0x2   : > { %p137_p1 = scmp.lt.s32.totalorder %s1726_s12, 3 }
   0x4   : > { %p138_p2 = pnand %p1445_p0, %p137_p1 }
   0x5   : > { %p161_p3 = scmp.lt.s32.totalorder (!%p138_p2), %s1441_s13, 1 }
   0x6   : > { %141 = sbr.rel (%p138_p2) target bundleno = 442 (0x1ba), region = 32 }
   0xb   : > { %v342_v0 = vld [vmem:[%s2366_s1 + $0x78] sm:$0xff]  ;;  %v1728_v1 = vmov 0.0   ;;  %v341_v2 = vld [vmem:[%s2366_s1 + $0x70] sm:$0xff]  ;;  %v340_v3 = vld [vmem:[%s2366_s1 + $0x68] sm:$0xff]  ;;  %s2370_s13 = smov (!%p161_p3, %s1441_s13), 1  ;;  %vm370_vm0 = vcmask 261120  }
   0xc   : > { %527 = vmatprep.subr.mxu0 %v1728_v1  ;;  %1645 = vmatprep.subr.mxu1 %v1728_v1  ;;  %v339_v4 = vld [vmem:[%s2366_s1 + $0x60] sm:$0xff]  ;;  %v338_v5 = vld [vmem:[%s2366_s1 + $0x58] sm:$0xff]  ;;  %v337_v6 = vld [vmem:[%s2366_s1 + $0x50] sm:$0xff]  ;;  %s1709_s22 = smul.u32 1248, %s2370_s13  ;;  %vm1229_vm1 = vcmask 523264  }
   0xd   : > { %528 = vmatpush1.msra.mxu0 %v342_v0  ;;  %1677 = vmatpush1.msra.mxu1 %v342_v0  ;;  %v336_v7 = vld [vmem:[%s2366_s1 + $0x48] sm:$0xff]  ;;  %v335_v8 = vld [vmem:[%s2366_s1 + $0x40] sm:$0xff]  ;;  %v334_v9 = vld [vmem:[%s2366_s1 + $0x38] sm:$0xff]  ;;  %s1710_s17 = smul.u32 104, %s2370_s13 }
   0xe   : > { %529 = vmatprep.subr.mxu0 %v1728_v1  ;;  %1646 = vmatprep.subr.mxu1 %v1728_v1  ;;  %v333_v10 = vld [vmem:[%s2366_s1 + $0x30] sm:$0xff]  ;;  %v332_v11 = vld [vmem:[%s2366_s1 + $0x28] sm:$0xff]  ;;  %v331_v12 = vld [vmem:[%s2366_s1 + $0x20] sm:$0xff]  ;;  %s1920_s29 = scalar_lea.vmem %s2365_s0, %s1709_s22 }
   0xf   : > { %530 = vmatpush1.msra.mxu0 %v341_v2  ;;  %1678 = vmatpush1.msra.mxu1 %v341_v2  ;;  %v330_v13 = vld [vmem:[%s2366_s1 + $0x18] sm:$0xff]  ;;  %v329_v14 = vld [vmem:[%s2366_s1 + $0x10] sm:$0xff]  ;;  %v328_v15 = vld [vmem:[%s2366_s1 + $0x8] sm:$0xff]  ;;  %s2301_s19 = scalar_lea.vmem %s2368_s3, %s1710_s17 }
  0x10   : > { %531 = vmatprep.subr.mxu0 %v1728_v1  ;;  %1647 = vmatprep.subr.mxu1 %v1728_v1  ;;  %v327_v16 = vld [vmem:[%s2366_s1] sm:$0xff]  ;;  %v358_v17 = vld [vmem:[%s2366_s1 + $0xf8] sm:$0xff]  ;;  %v357_v18 = vld [vmem:[%s2366_s1 + $0xf0] sm:$0xff] }
  0x11   : > { %532 = vmatpush1.msra.mxu0 %v340_v3  ;;  %1679 = vmatpush1.msra.mxu1 %v340_v3  ;;  %v356_v19 = vld [vmem:[%s2366_s1 + $0xe8] sm:$0xff]  ;;  %v355_v20 = vld [vmem:[%s2366_s1 + $0xe0] sm:$0xff]  ;;  %v354_v21 = vld [vmem:[%s2366_s1 + $0xd8] sm:$0xff] }
  0x12   : > { %533 = vmatprep.subr.mxu0 %v1728_v1  ;;  %1648 = vmatprep.subr.mxu1 %v1728_v1  ;;  %v353_v22 = vld [vmem:[%s2366_s1 + $0xd0] sm:$0xff]  ;;  %v352_v23 = vld [vmem:[%s2366_s1 + $0xc8] sm:$0xff]  ;;  %v351_v24 = vld [vmem:[%s2366_s1 + $0xc0] sm:$0xff] }
  0x13   : > { %534 = vmatpush1.msra.mxu0 %v339_v4  ;;  %1680 = vmatpush1.msra.mxu1 %v339_v4  ;;  %v350_v25 = vld [vmem:[%s2366_s1 + $0xb8] sm:$0xff]  ;;  %v349_v26 = vld [vmem:[%s2366_s1 + $0xb0] sm:$0xff]  ;;  %v348_v27 = vld [vmem:[%s2366_s1 + $0xa8] sm:$0xff] }
  0x14   : > { %535 = vmatprep.subr.mxu0 %v1728_v1  ;;  %1649 = vmatprep.subr.mxu1 %v1728_v1  ;;  %v347_v28 = vld [vmem:[%s2366_s1 + $0xa0] sm:$0xff]  ;;  %v346_v29 = vld [vmem:[%s2366_s1 + $0x98] sm:$0xff]  ;;  %v345_v30 = vld [vmem:[%s2366_s1 + $0x90] sm:$0xff] }
  0x15   : > { %536 = vmatpush1.msra.mxu0 %v338_v5  ;;  %1681 = vmatpush1.msra.mxu1 %v338_v5  ;;  %v344_v31 = vld [vmem:[%s2366_s1 + $0x88] sm:$0xff]  ;;  %v343_v32 = vld [vmem:[%s2366_s1 + $0x80] sm:$0xff]  ;;  %v289_v34 = vld [vmem:[%s1920_s29 + $0x3b0] sm:$0xff] }
  0x16   : > { %537 = vmatprep.subr.mxu0 %v1728_v1  ;;  %1650 = vmatprep.subr.mxu1 %v1728_v1  ;;  %v172_v33 = vld [vmem:[%s1920_s29 + $0x8] sm:$0xff]  ;;  %v171_v35 = vld [vmem:[%s1920_s29] sm:$0xff]  ;;  %v362_v37 = vld [vmem:[%s2366_s1 + $0x118] sm:$0xff] }
  0x17   : > { %538 = vmatpush1.msra.mxu0 %v337_v6  ;;  %1682 = vmatpush1.msra.mxu1 %v337_v6  ;;  %v288_v36 = vld [vmem:[%s1920_s29 + $0x3a8] sm:$0xff]  ;;  %v175_v38 = vld [vmem:[%s1920_s29 + $0x20] sm:$0xff]  ;;  %v361_v40 = vld [vmem:[%s2366_s1 + $0x110] sm:$0xff] }
  0x18   : > { %539 = vmatprep.subr.mxu0 %v1728_v1  ;;  %1651 = vmatprep.subr.mxu1 %v1728_v1  ;;  %v292_v39 = vld [vmem:[%s1920_s29 + $0x3c8] sm:$0xff]  ;;  %v174_v41 = vld [vmem:[%s1920_s29 + $0x18] sm:$0xff]  ;;  %v291_v42 = vld [vmem:[%s1920_s29 + $0x3c0] sm:$0xff] }
  0x19   : > { %540 = vmatpush1.msra.mxu0 %v336_v7  ;;  %1683 = vmatpush1.msra.mxu1 %v336_v7  ;;  %v178_v43 = vld [vmem:[%s1920_s29 + $0x38] sm:$0xff]  ;;  %v295_v44 = vld [vmem:[%s1920_s29 + $0x3e0] sm:$0xff]  ;;  %v360_v45 = vld [vmem:[%s2366_s1 + $0x108] sm:$0xff] }
  0x1a   : > { %541 = vmatprep.subr.mxu0 %v1728_v1  ;;  %1652 = vmatprep.subr.mxu1 %v1728_v1  ;;  %v177_v46 = vld [vmem:[%s1920_s29 + $0x30] sm:$0xff]  ;;  %v294_v47 = vld [vmem:[%s1920_s29 + $0x3d8] sm:$0xff]  ;;  %v359_v50 = vld [vmem:[%s2366_s1 + $0x100] sm:$0xff] }
  0x1b   : > { %542 = vmatpush1.msra.mxu0 %v335_v8  ;;  %1684 = vmatpush1.msra.mxu1 %v335_v8  ;;  %v181_v48 = vld [vmem:[%s1920_s29 + $0x50] sm:$0xff]  ;;  %v298_v49 = vld [vmem:[%s1920_s29 + $0x3f8] sm:$0xff]  ;;  %v180_v51 = vld [vmem:[%s1920_s29 + $0x48] sm:$0xff] }
  0x1c   : > { %543 = vmatprep.subr.mxu0 %v1728_v1  ;;  %1653 = vmatprep.subr.mxu1 %v1728_v1  ;;  %v297_v52 = vld [vmem:[%s1920_s29 + $0x3f0] sm:$0xff]  ;;  %v184_v53 = vld [vmem:[%s1920_s29 + $0x68] sm:$0xff]  ;;  %v183_v55 = vld [vmem:[%s1920_s29 + $0x60] sm:$0xff] }
  0x1d   : > { %544 = vmatpush1.msra.mxu0 %v334_v9  ;;  %1685 = vmatpush1.msra.mxu1 %v334_v9  ;;  %v301_v54 = vld [vmem:[%s1920_s29 + $0x410] sm:$0xff]  ;;  %v300_v56 = vld [vmem:[%s1920_s29 + $0x408] sm:$0xff]  ;;  %v187_v57 = vld [vmem:[%s1920_s29 + $0x80] sm:$0xff] }
  0x1e   : > { %545 = vmatprep.subr.mxu0 %v1728_v1  ;;  %1654 = vmatprep.subr.mxu1 %v1728_v1  ;;  %v304_v58 = vld [vmem:[%s1920_s29 + $0x428] sm:$0xff]  ;;  %v186_v59 = vld [vmem:[%s1920_s29 + $0x78] sm:$0xff]  ;;  %v303_v60 = vld [vmem:[%s1920_s29 + $0x420] sm:$0xff] }
  0x1f   : > { %546 = vmatpush1.msra.mxu0 %v333_v10  ;;  %1686 = vmatpush1.msra.mxu1 %v333_v10  ;;  %v190_v61 = vld [vmem:[%s1920_s29 + $0x98] sm:$0xff]  ;;  %v307_v62 = vld [vmem:[%s1920_s29 + $0x440] sm:$0xff]  ;;  %v189_v63 = vld [vmem:[%s1920_s29 + $0x90] sm:$0xff] }
  0x20   : > { %547 = vmatprep.subr.mxu0 %v1728_v1  ;;  %1655 = vmatprep.subr.mxu1 %v1728_v1  ;;  %v306_v0 = vld [vmem:[%s1920_s29 + $0x438] sm:$0xff]  ;;  %v192_v3 = vld [vmem:[%s1920_s29 + $0xa8] sm:$0xff]  ;;  %v309_v4 = vld [vmem:[%s1920_s29 + $0x450] sm:$0xff] }
  0x21   : > { %548 = vmatpush1.msra.mxu0 %v332_v11  ;;  %1687 = vmatpush1.msra.mxu1 %v332_v11  ;;  %v310_v2 = vld [vmem:[%s1920_s29 + $0x458] sm:$0xff]  ;;  %v196_v5 = vld [vmem:[%s1920_s29 + $0xc8] sm:$0xff]  ;;  %v313_v6 = vld [vmem:[%s1920_s29 + $0x470] sm:$0xff] }
  0x22   : > { %549 = vmatprep.subr.mxu0 %v1728_v1  ;;  %1656 = vmatprep.subr.mxu1 %v1728_v1  ;;  %v195_v7 = vld [vmem:[%s1920_s29 + $0xc0] sm:$0xff]  ;;  %v312_v8 = vld [vmem:[%s1920_s29 + $0x468] sm:$0xff]  ;;  %v198_v11 = vld [vmem:[%s1920_s29 + $0xd8] sm:$0xff] }
  0x23   : > { %550 = vmatpush1.msra.mxu0 %v331_v12  ;;  %1688 = vmatpush1.msra.mxu1 %v331_v12  ;;  %v199_v9 = vld [vmem:[%s1920_s29 + $0xe0] sm:$0xff]  ;;  %v316_v10 = vld [vmem:[%s1920_s29 + $0x488] sm:$0xff] }
  0x24   : > { %551 = vmatprep.subr.mxu0 %v1728_v1  ;;  %1657 = vmatprep.subr.mxu1 %v1728_v1  ;;  %v315_v12 = vld [vmem:[%s1920_s29 + $0x480] sm:$0xff] }
  0x25   : > { %552 = vmatpush1.msra.mxu0 %v330_v13  ;;  %1689 = vmatpush1.msra.mxu1 %v330_v13  ;;  %v202_v13 = vld [vmem:[%s1920_s29 + $0xf8] sm:$0xff] }
  0x26   : > { %553 = vmatprep.subr.mxu0 %v1728_v1  ;;  %1658 = vmatprep.subr.mxu1 %v1728_v1 }
  0x27   : > { %554 = vmatpush1.msra.mxu0 %v329_v14  ;;  %1690 = vmatpush1.msra.mxu1 %v329_v14  ;;  %v319_v14 = vld [vmem:[%s1920_s29 + $0x4a0] sm:$0xff] }
  0x28   : > { %555 = vmatprep.subr.mxu0 %v1728_v1  ;;  %1659 = vmatprep.subr.mxu1 %v1728_v1 }
  0x29   : > { %556 = vmatpush1.msra.mxu0 %v328_v15  ;;  %1691 = vmatpush1.msra.mxu1 %v328_v15  ;;  %v201_v15 = vld [vmem:[%s1920_s29 + $0xf0] sm:$0xff] }
  0x2a   : > { %557 = vmatprep.subr.mxu0 %v1728_v1  ;;  %1660 = vmatprep.subr.mxu1 %v1728_v1 }
  0x2b   : > { %558 = vmatpush1.msra.mxu0 %v327_v16  ;;  %1692 = vmatpush1.msra.mxu1 %v327_v16  ;;  %v318_v16 = vld [vmem:[%s1920_s29 + $0x498] sm:$0xff] }
  0x2c   : > { %559 = vmatprep.subr.mxu0 %v1728_v1  ;;  %1661 = vmatprep.subr.mxu1 %v1728_v1 }
  0x2d   : > { %560 = vmatpush2.msra.mxu0 %v358_v17  ;;  %1693 = vmatpush2.msra.mxu1 %v358_v17  ;;  %v205_v17 = vld [vmem:[%s1920_s29 + $0x110] sm:$0xff] }
  0x2e   : > { %561 = vmatprep.subr.mxu0 %v1728_v1  ;;  %1662 = vmatprep.subr.mxu1 %v1728_v1 }
  0x2f   : > { %562 = vmatpush2.msra.mxu0 %v357_v18  ;;  %1694 = vmatpush2.msra.mxu1 %v357_v18  ;;  %v322_v18 = vld [vmem:[%s1920_s29 + $0x4b8] sm:$0xff] }
  0x30   : > { %563 = vmatprep.subr.mxu0 %v1728_v1  ;;  %1663 = vmatprep.subr.mxu1 %v1728_v1 }
  0x31   : > { %564 = vmatpush2.msra.mxu0 %v356_v19  ;;  %1695 = vmatpush2.msra.mxu1 %v356_v19  ;;  %v204_v19 = vld [vmem:[%s1920_s29 + $0x108] sm:$0xff] }
  0x32   : > { %565 = vmatprep.subr.mxu0 %v1728_v1  ;;  %1664 = vmatprep.subr.mxu1 %v1728_v1 }
  0x33   : > { %566 = vmatpush2.msra.mxu0 %v355_v20  ;;  %1696 = vmatpush2.msra.mxu1 %v355_v20  ;;  %v321_v20 = vld [vmem:[%s1920_s29 + $0x4b0] sm:$0xff] }
  0x34   : > { %567 = vmatprep.subr.mxu0 %v1728_v1  ;;  %1665 = vmatprep.subr.mxu1 %v1728_v1 }
  0x35   : > { %568 = vmatpush2.msra.mxu0 %v354_v21  ;;  %1697 = vmatpush2.msra.mxu1 %v354_v21  ;;  %v208_v21 = vld [vmem:[%s1920_s29 + $0x128] sm:$0xff] }
  0x36   : > { %569 = vmatprep.subr.mxu0 %v1728_v1  ;;  %1666 = vmatprep.subr.mxu1 %v1728_v1 }
  0x37   : > { %570 = vmatpush2.msra.mxu0 %v353_v22  ;;  %1698 = vmatpush2.msra.mxu1 %v353_v22  ;;  %v325_v22 = vld [vmem:[%s1920_s29 + $0x4d0] sm:$0xff] }
  0x38   : > { %571 = vmatprep.subr.mxu0 %v1728_v1  ;;  %1667 = vmatprep.subr.mxu1 %v1728_v1 }
  0x39   : > { %572 = vmatpush2.msra.mxu0 %v352_v23  ;;  %1699 = vmatpush2.msra.mxu1 %v352_v23  ;;  %v207_v23 = vld [vmem:[%s1920_s29 + $0x120] sm:$0xff] }
  0x3a   : > { %573 = vmatprep.subr.mxu0 %v1728_v1  ;;  %1668 = vmatprep.subr.mxu1 %v1728_v1 }
  0x3b   : > { %574 = vmatpush2.msra.mxu0 %v351_v24  ;;  %1700 = vmatpush2.msra.mxu1 %v351_v24  ;;  %v324_v24 = vld [vmem:[%s1920_s29 + $0x4c8] sm:$0xff] }
  0x3c   : > { %575 = vmatprep.subr.mxu0 %v1728_v1  ;;  %1669 = vmatprep.subr.mxu1 %v1728_v1 }
  0x3d   : > { %576 = vmatpush2.msra.mxu0 %v350_v25  ;;  %1701 = vmatpush2.msra.mxu1 %v350_v25  ;;  %v211_v25 = vld [vmem:[%s1920_s29 + $0x140] sm:$0xff] }
  0x3e   : > { %577 = vmatprep.subr.mxu0 %v1728_v1  ;;  %1670 = vmatprep.subr.mxu1 %v1728_v1 }
  0x3f   : > { %578 = vmatpush2.msra.mxu0 %v349_v26  ;;  %1702 = vmatpush2.msra.mxu1 %v349_v26  ;;  %v173_v26 = vld [vmem:[%s1920_s29 + $0x10] sm:$0xff] }
  0x40   : > { %579 = vmatprep.subr.mxu0 %v1728_v1  ;;  %1671 = vmatprep.subr.mxu1 %v1728_v1 }
  0x41   : > { %580 = vmatpush2.msra.mxu0 %v348_v27  ;;  %1703 = vmatpush2.msra.mxu1 %v348_v27  ;;  %v210_v27 = vld [vmem:[%s1920_s29 + $0x138] sm:$0xff] }
  0x42   : > { %581 = vmatprep.subr.mxu0 %v1728_v1  ;;  %1672 = vmatprep.subr.mxu1 %v1728_v1 }
  0x43   : > { %582 = vmatpush2.msra.mxu0 %v347_v28  ;;  %1704 = vmatpush2.msra.mxu1 %v347_v28  ;;  %v176_v28 = vld [vmem:[%s1920_s29 + $0x28] sm:$0xff] }
  0x44   : > { %583 = vmatprep.subr.mxu0 %v1728_v1  ;;  %1673 = vmatprep.subr.mxu1 %v1728_v1 }
  0x45   : > { %584 = vmatpush2.msra.mxu0 %v346_v29  ;;  %1705 = vmatpush2.msra.mxu1 %v346_v29  ;;  %v214_v29 = vld [vmem:[%s1920_s29 + $0x158] sm:$0xff] }
  0x46   : > { %585 = vmatprep.subr.mxu0 %v1728_v1  ;;  %1674 = vmatprep.subr.mxu1 %v1728_v1 }
  0x47   : > { %586 = vmatpush2.msra.mxu0 %v345_v30  ;;  %1706 = vmatpush2.msra.mxu1 %v345_v30  ;;  %v179_v30 = vld [vmem:[%s1920_s29 + $0x40] sm:$0xff] }
  0x48   : > { %587 = vmatprep.subr.mxu0 %v1728_v1  ;;  %1675 = vmatprep.subr.mxu1 %v1728_v1 }
  0x49   : > { %588 = vmatpush2.msra.mxu0 %v344_v31  ;;  %1707 = vmatpush2.msra.mxu1 %v344_v31  ;;  %v213_v31 = vld [vmem:[%s1920_s29 + $0x150] sm:$0xff] }
  0x4a   : > { %589 = vmatprep.subr.mxu0 %v1728_v1  ;;  %1676 = vmatprep.subr.mxu1 %v1728_v1  ;;  %v193_v1 = vld [vmem:[%s1920_s29 + $0xb0] sm:$0xff] }
  0x4b   : > { %590 = vmatpush2.msra.mxu0 %v343_v32  ;;  %1708 = vmatpush2.msra.mxu1 %v343_v32  ;;  %v182_v32 = vld [vmem:[%s1920_s29 + $0x58] sm:$0xff] }
  0x4c   : > { %591 = vmatprep.mubr.f32.mxu0 %v172_v33  ;;  %786 = vmatprep.mubr.f32.mxu1 %v289_v34  ;;  %v217_v33 = vld [vmem:[%s1920_s29 + $0x170] sm:$0xff] }
  0x4d   : > { %592 = vmatmul.mubr.f32.vlgmr.msra.gmra.mxu0 %v171_v35  ;;  %787 = vmatmul.mubr.f32.vlgmr.msra.gmra.mxu1 %v288_v36  ;;  %v185_v34 = vld [vmem:[%s1920_s29 + $0x70] sm:$0xff]  ;;  %v216_v35 = vld [vmem:[%s1920_s29 + $0x168] sm:$0xff] }
  0x4e   : > { %1559 = vmatprep.subr.mxu1 %v362_v37  ;;  %596 = vmatprep.mubr.f32.mxu0 %v175_v38  ;;  %v188_v36 = vld [vmem:[%s1920_s29 + $0x88] sm:$0xff]  ;;  %v191_v38 = vld [vmem:[%s1920_s29 + $0xa0] sm:$0xff] }
  0x4f   : > { %1560 = vmatpush3.msra.mxu1 %v362_v37  ;;  %791 = vmatprep.mubr.f32.mxu1 %v292_v39  ;;  %v220_v37 = vld [vmem:[%s1920_s29 + $0x188] sm:$0xff]  ;;  %v219_v39 = vld [vmem:[%s1920_s29 + $0x180] sm:$0xff] }
  0x50   : > { %1561 = vmatprep.subr.mxu1 %v361_v40 }
  0x51   : > { %597 = vmatmul.mubr.f32.gmra.mxu0 %v174_v41  ;;  %792 = vmatmul.mubr.f32.gmra.mxu1 %v291_v42  ;;  %v223_v41 = vld [vmem:[%s1920_s29 + $0x1a0] sm:$0xff]  ;;  %v197_v42 = vld [vmem:[%s1920_s29 + $0xd0] sm:$0xff] }
  0x52   : > { %601 = vmatprep.mubr.f32.mxu0 %v178_v43  ;;  %796 = vmatprep.mubr.f32.mxu1 %v295_v44  ;;  %v222_v43 = vld [vmem:[%s1920_s29 + $0x198] sm:$0xff]  ;;  %v200_v44 = vld [vmem:[%s1920_s29 + $0xe8] sm:$0xff] }
  0x53   : > { %1562 = vmatpush3.msra.mxu1 %v361_v40  ;;  %v194_v40 = vld [vmem:[%s1920_s29 + $0xb8] sm:$0xff] }
  0x54   : > { %1563 = vmatprep.subr.mxu1 %v360_v45 }
  0x55   : > { %602 = vmatmul.mubr.f32.gmra.mxu0 %v177_v46  ;;  %797 = vmatmul.mubr.f32.gmra.mxu1 %v294_v47  ;;  %v203_v46 = vld [vmem:[%s1920_s29 + $0x100] sm:$0xff]  ;;  %v225_v47 = vld [vmem:[%s1920_s29 + $0x1b0] sm:$0xff] }
  0x56   : > { %606 = vmatprep.mubr.f32.mxu0 %v181_v48  ;;  %801 = vmatprep.mubr.f32.mxu1 %v298_v49  ;;  %v206_v48 = vld [vmem:[%s1920_s29 + $0x118] sm:$0xff]  ;;  %v229_v49 = vld [vmem:[%s1920_s29 + $0x1d0] sm:$0xff] }
  0x57   : > { %1564 = vmatpush3.msra.mxu1 %v360_v45  ;;  %v226_v45 = vld [vmem:[%s1920_s29 + $0x1b8] sm:$0xff] }
  0x58   : > { %1565 = vmatprep.subr.mxu1 %v359_v50 }
  0x59   : > { %607 = vmatmul.mubr.f32.gmra.mxu0 %v180_v51  ;;  %802 = vmatmul.mubr.f32.gmra.mxu1 %v297_v52  ;;  %v228_v51 = vld [vmem:[%s1920_s29 + $0x1c8] sm:$0xff] }
  0x5a   : > { %611 = vmatprep.mubr.f32.mxu0 %v184_v53  ;;  %806 = vmatprep.mubr.f32.mxu1 %v301_v54  ;;  %v212_v52 = vld [vmem:[%s1920_s29 + $0x148] sm:$0xff]  ;;  %v215_v54 = vld [vmem:[%s1920_s29 + $0x160] sm:$0xff] }
  0x5b   : > { %1566 = vmatpush3.msra.mxu1 %v359_v50  ;;  %v209_v50 = vld [vmem:[%s1920_s29 + $0x130] sm:$0xff]  ;;  %v232_v53 = vld [vmem:[%s1920_s29 + $0x1e8] sm:$0xff] }
  0x5d   : > { %612 = vmatmul.mubr.f32.gmra.mxu0 %v183_v55  ;;  %807 = vmatmul.mubr.f32.gmra.mxu1 %v300_v56  ;;  %v231_v55 = vld [vmem:[%s1920_s29 + $0x1e0] sm:$0xff]  ;;  %v218_v56 = vld [vmem:[%s1920_s29 + $0x178] sm:$0xff] }
  0x5e   : > { %616 = vmatprep.mubr.f32.mxu0 %v187_v57  ;;  %811 = vmatprep.mubr.f32.mxu1 %v304_v58  ;;  %v235_v57 = vld [vmem:[%s1920_s29 + $0x200] sm:$0xff]  ;;  %v221_v58 = vld [vmem:[%s1920_s29 + $0x190] sm:$0xff] }
  0x61   : > { %617 = vmatmul.mubr.f32.gmra.mxu0 %v186_v59  ;;  %812 = vmatmul.mubr.f32.gmra.mxu1 %v303_v60  ;;  %v234_v59 = vld [vmem:[%s1920_s29 + $0x1f8] sm:$0xff]  ;;  %v224_v60 = vld [vmem:[%s1920_s29 + $0x1a8] sm:$0xff] }
  0x62   : > { %621 = vmatprep.mubr.f32.mxu0 %v190_v61  ;;  %816 = vmatprep.mubr.f32.mxu1 %v307_v62  ;;  %v238_v61 = vld [vmem:[%s1920_s29 + $0x218] sm:$0xff]  ;;  %v227_v62 = vld [vmem:[%s1920_s29 + $0x1c0] sm:$0xff] }
  0x65   : > { %622 = vmatmul.mubr.f32.gmra.mxu0 %v189_v63  ;;  %817 = vmatmul.mubr.f32.gmra.mxu1 %v306_v0  ;;  %v237_v63 = vld [vmem:[%s1920_s29 + $0x210] sm:$0xff]  ;;  %v230_v0 = vld [vmem:[%s1920_s29 + $0x1d8] sm:$0xff] }
  0x66   : > { %626 = vmatprep.mubr.f32.mxu0 %v193_v1  ;;  %821 = vmatprep.mubr.f32.mxu1 %v310_v2  ;;  %v241_v1 = vld [vmem:[%s1920_s29 + $0x230] sm:$0xff] }
  0x67   : > { %v233_v2 = vld [vmem:[%s1920_s29 + $0x1f0] sm:$0xff] }
  0x69   : > { %627 = vmatmul.mubr.f32.gmra.mxu0 %v192_v3  ;;  %822 = vmatmul.mubr.f32.gmra.mxu1 %v309_v4  ;;  %v240_v3 = vld [vmem:[%s1920_s29 + $0x228] sm:$0xff] }
  0x6a   : > { %631 = vmatprep.mubr.f32.mxu0 %v196_v5  ;;  %826 = vmatprep.mubr.f32.mxu1 %v313_v6  ;;  %v236_v4 = vld [vmem:[%s1920_s29 + $0x208] sm:$0xff]  ;;  %v239_v6 = vld [vmem:[%s1920_s29 + $0x220] sm:$0xff] }
  0x6b   : > { %v244_v5 = vld [vmem:[%s1920_s29 + $0x248] sm:$0xff] }
  0x6d   : > { %632 = vmatmul.mubr.f32.gmra.mxu0 %v195_v7  ;;  %827 = vmatmul.mubr.f32.gmra.mxu1 %v312_v8  ;;  %v243_v7 = vld [vmem:[%s1920_s29 + $0x240] sm:$0xff]  ;;  %v242_v8 = vld [vmem:[%s1920_s29 + $0x238] sm:$0xff] }
  0x6e   : > { %636 = vmatprep.mubr.f32.mxu0 %v199_v9  ;;  %831 = vmatprep.mubr.f32.mxu1 %v316_v10  ;;  %v247_v9 = vld [vmem:[%s1920_s29 + $0x260] sm:$0xff]  ;;  %v245_v10 = vld [vmem:[%s1920_s29 + $0x250] sm:$0xff] }
  0x71   : > { %637 = vmatmul.mubr.f32.gmra.mxu0 %v198_v11  ;;  %832 = vmatmul.mubr.f32.gmra.mxu1 %v315_v12  ;;  %v246_v11 = vld [vmem:[%s1920_s29 + $0x258] sm:$0xff]  ;;  %v248_v12 = vld [vmem:[%s1920_s29 + $0x268] sm:$0xff] }
  0x72   : > { %641 = vmatprep.mubr.f32.mxu0 %v202_v13  ;;  %836 = vmatprep.mubr.f32.mxu1 %v319_v14  ;;  %v250_v13 = vld [vmem:[%s1920_s29 + $0x278] sm:$0xff]  ;;  %v251_v14 = vld [vmem:[%s1920_s29 + $0x280] sm:$0xff] }
  0x75   : > { %642 = vmatmul.mubr.f32.gmra.mxu0 %v201_v15  ;;  %837 = vmatmul.mubr.f32.gmra.mxu1 %v318_v16  ;;  %v249_v15 = vld [vmem:[%s1920_s29 + $0x270] sm:$0xff]  ;;  %v254_v16 = vld [vmem:[%s1920_s29 + $0x298] sm:$0xff] }
  0x76   : > { %646 = vmatprep.mubr.f32.mxu0 %v205_v17  ;;  %841 = vmatprep.mubr.f32.mxu1 %v322_v18  ;;  %v253_v17 = vld [vmem:[%s1920_s29 + $0x290] sm:$0xff] }
  0x77   : > { %v257_v18 = vld [vmem:[%s1920_s29 + $0x2b0] sm:$0xff] }
  0x79   : > { %647 = vmatmul.mubr.f32.gmra.mxu0 %v204_v19  ;;  %842 = vmatmul.mubr.f32.gmra.mxu1 %v321_v20  ;;  %v252_v19 = vld [vmem:[%s1920_s29 + $0x288] sm:$0xff] }
  0x7a   : > { %651 = vmatprep.mubr.f32.mxu0 %v208_v21  ;;  %846 = vmatprep.mubr.f32.mxu1 %v325_v22  ;;  %v260_v20 = vld [vmem:[%s1920_s29 + $0x2c8] sm:$0xff]  ;;  %v263_v22 = vld [vmem:[%s1920_s29 + $0x2e0] sm:$0xff] }
  0x7b   : > { %v256_v21 = vld [vmem:[%s1920_s29 + $0x2a8] sm:$0xff] }
  0x7d   : > { %652 = vmatmul.mubr.f32.gmra.mxu0 %v207_v23  ;;  %847 = vmatmul.mubr.f32.gmra.mxu1 %v324_v24  ;;  %v255_v23 = vld [vmem:[%s1920_s29 + $0x2a0] sm:$0xff]  ;;  %v266_v24 = vld [vmem:[%s1920_s29 + $0x2f8] sm:$0xff] }
  0x7e   : > { %656 = vmatprep.mubr.f32.mxu0 %v211_v25  ;;  %1567 = vmatprep.mubr.msk.f32.mxu1 %vm370_vm0, %v173_v26  ;;  %v259_v25 = vld [vmem:[%s1920_s29 + $0x2c0] sm:$0xff]  ;;  %v269_v26 = vld [vmem:[%s1920_s29 + $0x310] sm:$0xff] }
  0x81   : > { %657 = vmatmul.mubr.f32.gmra.mxu0 %v210_v27  ;;  %1568 = vmatmul.mubr.msk.f32.vlgmr.msra.gmra.mxu1 %vm370_vm0, %v176_v28  ;;  %v258_v27 = vld [vmem:[%s1920_s29 + $0x2b8] sm:$0xff]  ;;  %v272_v28 = vld [vmem:[%s1920_s29 + $0x328] sm:$0xff] }
  0x82   : > { %661 = vmatprep.mubr.f32.mxu0 %v214_v29  ;;  %1570 = vmatprep.mubr.msk.f32.mxu1 %vm370_vm0, %v179_v30  ;;  %v262_v29 = vld [vmem:[%s1920_s29 + $0x2d8] sm:$0xff]  ;;  %v275_v30 = vld [vmem:[%s1920_s29 + $0x340] sm:$0xff] }
  0x85   : > { %662 = vmatmul.mubr.f32.gmra.mxu0 %v213_v31  ;;  %1571 = vmatmul.mubr.msk.f32.gmra.mxu1 %vm370_vm0, %v182_v32  ;;  %v261_v31 = vld [vmem:[%s1920_s29 + $0x2d0] sm:$0xff]  ;;  %v278_v32 = vld [vmem:[%s1920_s29 + $0x358] sm:$0xff] }
  0x86   : > { %666 = vmatprep.mubr.f32.mxu0 %v217_v33  ;;  %1573 = vmatprep.mubr.msk.f32.mxu1 %vm370_vm0, %v185_v34  ;;  %v265_v33 = vld [vmem:[%s1920_s29 + $0x2f0] sm:$0xff] }
  0x87   : > { %v281_v34 = vld [vmem:[%s1920_s29 + $0x370] sm:$0xff] }
  0x89   : > { %667 = vmatmul.mubr.f32.gmra.mxu0 %v216_v35  ;;  %1574 = vmatmul.mubr.msk.f32.gmra.mxu1 %vm370_vm0, %v188_v36  ;;  %v264_v35 = vld [vmem:[%s1920_s29 + $0x2e8] sm:$0xff] }
  0x8a   : > { %671 = vmatprep.mubr.f32.mxu0 %v220_v37  ;;  %1576 = vmatprep.mubr.msk.f32.mxu1 %vm370_vm0, %v191_v38  ;;  %v284_v36 = vld [vmem:[%s1920_s29 + $0x388] sm:$0xff]  ;;  %v287_v38 = vld [vmem:[%s1920_s29 + $0x3a0] sm:$0xff] }
  0x8b   : > { %v268_v37 = vld [vmem:[%s1920_s29 + $0x308] sm:$0xff] }
  0x8d   : > { %672 = vmatmul.mubr.f32.gmra.mxu0 %v219_v39  ;;  %1577 = vmatmul.mubr.msk.f32.gmra.mxu1 %vm370_vm0, %v194_v40  ;;  %v267_v39 = vld [vmem:[%s1920_s29 + $0x300] sm:$0xff]  ;;  %v290_v40 = vld [vmem:[%s1920_s29 + $0x3b8] sm:$0xff] }
  0x8e   : > { %676 = vmatprep.mubr.f32.mxu0 %v223_v41  ;;  %1579 = vmatprep.mubr.msk.f32.mxu1 %vm370_vm0, %v197_v42  ;;  %v271_v41 = vld [vmem:[%s1920_s29 + $0x320] sm:$0xff]  ;;  %v293_v42 = vld [vmem:[%s1920_s29 + $0x3d0] sm:$0xff] }
  0x91   : > { %677 = vmatmul.mubr.f32.gmra.mxu0 %v222_v43  ;;  %1580 = vmatmul.mubr.msk.f32.gmra.mxu1 %vm370_vm0, %v200_v44  ;;  %v270_v43 = vld [vmem:[%s1920_s29 + $0x318] sm:$0xff]  ;;  %v296_v44 = vld [vmem:[%s1920_s29 + $0x3e8] sm:$0xff] }
  0x92   : > { %681 = vmatprep.mubr.f32.mxu0 %v226_v45  ;;  %1582 = vmatprep.mubr.msk.f32.mxu1 %vm370_vm0, %v203_v46  ;;  %v274_v45 = vld [vmem:[%s1920_s29 + $0x338] sm:$0xff]  ;;  %v299_v46 = vld [vmem:[%s1920_s29 + $0x400] sm:$0xff] }
  0x95   : > { %682 = vmatmul.mubr.f32.gmra.mxu0 %v225_v47  ;;  %1583 = vmatmul.mubr.msk.f32.gmra.mxu1 %vm370_vm0, %v206_v48  ;;  %v273_v47 = vld [vmem:[%s1920_s29 + $0x330] sm:$0xff]  ;;  %v302_v48 = vld [vmem:[%s1920_s29 + $0x418] sm:$0xff] }
  0x96   : > { %686 = vmatprep.mubr.f32.mxu0 %v229_v49  ;;  %1585 = vmatprep.mubr.msk.f32.mxu1 %vm370_vm0, %v209_v50  ;;  %v277_v49 = vld [vmem:[%s1920_s29 + $0x350] sm:$0xff] }
  0x97   : > { %v305_v50 = vld [vmem:[%s1920_s29 + $0x430] sm:$0xff] }
  0x99   : > { %687 = vmatmul.mubr.f32.gmra.mxu0 %v228_v51  ;;  %1586 = vmatmul.mubr.msk.f32.gmra.mxu1 %vm370_vm0, %v212_v52  ;;  %v276_v51 = vld [vmem:[%s1920_s29 + $0x348] sm:$0xff] }
  0x9a   : > { %691 = vmatprep.mubr.f32.mxu0 %v232_v53  ;;  %1588 = vmatprep.mubr.msk.f32.mxu1 %vm370_vm0, %v215_v54  ;;  %v308_v52 = vld [vmem:[%s1920_s29 + $0x448] sm:$0xff]  ;;  %v311_v54 = vld [vmem:[%s1920_s29 + $0x460] sm:$0xff] }
  0x9b   : > { %v280_v53 = vld [vmem:[%s1920_s29 + $0x368] sm:$0xff] }
  0x9d   : > { %692 = vmatmul.mubr.f32.gmra.mxu0 %v231_v55  ;;  %1589 = vmatmul.mubr.msk.f32.gmra.mxu1 %vm370_vm0, %v218_v56  ;;  %v279_v55 = vld [vmem:[%s1920_s29 + $0x360] sm:$0xff]  ;;  %v314_v56 = vld [vmem:[%s1920_s29 + $0x478] sm:$0xff] }
  0x9e   : > { %696 = vmatprep.mubr.f32.mxu0 %v235_v57  ;;  %1591 = vmatprep.mubr.msk.f32.mxu1 %vm370_vm0, %v221_v58  ;;  %v283_v57 = vld [vmem:[%s1920_s29 + $0x380] sm:$0xff]  ;;  %v317_v58 = vld [vmem:[%s1920_s29 + $0x490] sm:$0xff] }
  0xa1   : > { %697 = vmatmul.mubr.f32.gmra.mxu0 %v234_v59  ;;  %1592 = vmatmul.mubr.msk.f32.gmra.mxu1 %vm370_vm0, %v224_v60  ;;  %v282_v59 = vld [vmem:[%s1920_s29 + $0x378] sm:$0xff]  ;;  %v320_v60 = vld [vmem:[%s1920_s29 + $0x4a8] sm:$0xff] }
  0xa2   : > { %701 = vmatprep.mubr.f32.mxu0 %v238_v61  ;;  %1594 = vmatprep.mubr.msk.f32.mxu1 %vm370_vm0, %v227_v62  ;;  %v286_v61 = vld [vmem:[%s1920_s29 + $0x398] sm:$0xff]  ;;  %v323_v62 = vld [vmem:[%s1920_s29 + $0x4c0] sm:$0xff] }
  0xa5   : > { %702 = vmatmul.mubr.f32.gmra.mxu0 %v237_v63  ;;  %1595 = vmatmul.mubr.msk.f32.gmra.mxu1 %vm370_vm0, %v230_v0  ;;  %v285_v63 = vld [vmem:[%s1920_s29 + $0x390] sm:$0xff]  ;;  %v326_v0 = vld [vmem:[%s1920_s29 + $0x4d8] sm:$0xff] }
  0xa6   : > { %706 = vmatprep.mubr.f32.mxu0 %v241_v1  ;;  %1597 = vmatprep.mubr.msk.f32.mxu1 %vm370_vm0, %v233_v2 }
  0xa9   : > { %707 = vmatmul.mubr.f32.gmra.mxu0 %v240_v3  ;;  %1598 = vmatmul.mubr.msk.f32.gmra.mxu1 %vm370_vm0, %v236_v4 }
  0xaa   : > { %711 = vmatprep.mubr.f32.mxu0 %v244_v5  ;;  %1600 = vmatprep.mubr.msk.f32.mxu1 %vm370_vm0, %v239_v6 }
  0xad   : > { %712 = vmatmul.mubr.f32.gmra.mxu0 %v243_v7  ;;  %1601 = vmatmul.mubr.msk.f32.gmra.mxu1 %vm370_vm0, %v242_v8 }
  0xae   : > { %716 = vmatprep.mubr.f32.mxu0 %v247_v9  ;;  %1603 = vmatprep.mubr.msk.f32.mxu1 %vm370_vm0, %v245_v10 }
  0xb1   : > { %717 = vmatmul.mubr.f32.gmra.mxu0 %v246_v11  ;;  %1604 = vmatmul.mubr.msk.f32.gmra.mxu1 %vm370_vm0, %v248_v12 }
  0xb2   : > { %721 = vmatprep.mubr.f32.mxu0 %v250_v13  ;;  %1606 = vmatprep.mubr.msk.f32.mxu1 %vm370_vm0, %v251_v14 }
  0xb5   : > { %722 = vmatmul.mubr.f32.gmra.mxu0 %v249_v15  ;;  %1607 = vmatmul.mubr.msk.f32.gmra.mxu1 %vm370_vm0, %v254_v16 }
  0xb6   : > { %726 = vmatprep.mubr.f32.mxu0 %v253_v17  ;;  %1609 = vmatprep.mubr.msk.f32.mxu1 %vm370_vm0, %v257_v18 }
  0xb9   : > { %727 = vmatmul.mubr.f32.gmra.mxu0 %v252_v19  ;;  %1610 = vmatmul.mubr.msk.f32.gmra.mxu1 %vm370_vm0, %v260_v20 }
  0xba   : > { %731 = vmatprep.mubr.f32.mxu0 %v256_v21  ;;  %1612 = vmatprep.mubr.msk.f32.mxu1 %vm370_vm0, %v263_v22 }
  0xbd   : > { %732 = vmatmul.mubr.f32.gmra.mxu0 %v255_v23  ;;  %1613 = vmatmul.mubr.msk.f32.gmra.mxu1 %vm370_vm0, %v266_v24 }
  0xbe   : > { %736 = vmatprep.mubr.f32.mxu0 %v259_v25  ;;  %1615 = vmatprep.mubr.msk.f32.mxu1 %vm370_vm0, %v269_v26 }
  0xc1   : > { %737 = vmatmul.mubr.f32.gmra.mxu0 %v258_v27  ;;  %1616 = vmatmul.mubr.msk.f32.gmra.mxu1 %vm370_vm0, %v272_v28 }
  0xc2   : > { %741 = vmatprep.mubr.f32.mxu0 %v262_v29  ;;  %1618 = vmatprep.mubr.msk.f32.mxu1 %vm370_vm0, %v275_v30 }
  0xc5   : > { %742 = vmatmul.mubr.f32.gmra.mxu0 %v261_v31  ;;  %1619 = vmatmul.mubr.msk.f32.gmra.mxu1 %vm370_vm0, %v278_v32 }
  0xc6   : > { %746 = vmatprep.mubr.f32.mxu0 %v265_v33  ;;  %1621 = vmatprep.mubr.msk.f32.mxu1 %vm370_vm0, %v281_v34 }
  0xc9   : > { %747 = vmatmul.mubr.f32.gmra.mxu0 %v264_v35  ;;  %1622 = vmatmul.mubr.msk.f32.gmra.mxu1 %vm370_vm0, %v284_v36 }
  0xca   : > { %751 = vmatprep.mubr.f32.mxu0 %v268_v37  ;;  %1624 = vmatprep.mubr.msk.f32.mxu1 %vm370_vm0, %v287_v38 }
  0xcd   : > { %752 = vmatmul.mubr.f32.gmra.mxu0 %v267_v39  ;;  %1625 = vmatmul.mubr.msk.f32.gmra.mxu1 %vm370_vm0, %v290_v40 }
  0xce   : > { %756 = vmatprep.mubr.f32.mxu0 %v271_v41  ;;  %1627 = vmatprep.mubr.msk.f32.mxu1 %vm370_vm0, %v293_v42 }
  0xd1   : > { %757 = vmatmul.mubr.f32.gmra.mxu0 %v270_v43  ;;  %1628 = vmatmul.mubr.msk.f32.gmra.mxu1 %vm370_vm0, %v296_v44 }
  0xd2   : > { %761 = vmatprep.mubr.f32.mxu0 %v274_v45  ;;  %1630 = vmatprep.mubr.msk.f32.mxu1 %vm370_vm0, %v299_v46 }
  0xd5   : > { %762 = vmatmul.mubr.f32.gmra.mxu0 %v273_v47  ;;  %1631 = vmatmul.mubr.msk.f32.gmra.mxu1 %vm370_vm0, %v302_v48 }
  0xd6   : > { %766 = vmatprep.mubr.f32.mxu0 %v277_v49  ;;  %1633 = vmatprep.mubr.msk.f32.mxu1 %vm370_vm0, %v305_v50 }
  0xd9   : > { %767 = vmatmul.mubr.f32.gmra.mxu0 %v276_v51  ;;  %1634 = vmatmul.mubr.msk.f32.gmra.mxu1 %vm370_vm0, %v308_v52  ;;  %v2188_v51 = vld [vmem:[%s2367_s2] ss:$0 sm:$0xff] }
  0xda   : > { %771 = vmatprep.mubr.f32.mxu0 %v280_v53  ;;  %1636 = vmatprep.mubr.msk.f32.mxu1 %vm370_vm0, %v311_v54 }
  0xdd   : > { %772 = vmatmul.mubr.f32.gmra.mxu0 %v279_v55  ;;  %1637 = vmatmul.mubr.msk.f32.gmra.mxu1 %vm370_vm0, %v314_v56 }
  0xde   : > { %776 = vmatprep.mubr.f32.mxu0 %v283_v57  ;;  %1639 = vmatprep.mubr.msk.f32.mxu1 %vm370_vm0, %v317_v58 }
  0xe1   : > { %777 = vmatmul.mubr.f32.gmra.mxu0 %v282_v59  ;;  %1640 = vmatmul.mubr.msk.f32.gmra.mxu1 %vm370_vm0, %v320_v60 }
  0xe2   : > { %781 = vmatprep.mubr.f32.mxu0 %v286_v61  ;;  %1642 = vmatprep.mubr.msk.f32.mxu1 %vm370_vm0, %v323_v62 }
  0xe5   : > { %782 = vmatmul.mubr.f32.gmra.mxu0 %v285_v63  ;;  %1643 = vmatmul.mubr.msk.f32.gmra.mxu1 %vm370_vm0, %v326_v0 }
 0x10d   : > { %v593_v1 = vpop.f32.mrf.mxu0  ;;  %v2149_v2 = vpop.f32.mrf.mxu1 }
 0x10e   : > { %v594_v57 = vadd.f32 %v2188_v51, %v593_v1 }
 0x10f   : > { %v595_v3 = vpop.f32.mrf.mxu0  ;;  %v790_v4 = vpop.f32.mrf.mxu1 }
 0x111   : > { %v598_v5 = vpop.f32.mrf.mxu0  ;;  %v2151_v6 = vpop.f32.mrf.mxu1 }
 0x112   : > { %v599_v54 = vadd.f32 %v2188_v51, %v598_v5 }
 0x113   : > { %v600_v7 = vpop.f32.mrf.mxu0  ;;  %v795_v8 = vpop.f32.mrf.mxu1 }
 0x115   : > { %v603_v9 = vpop.f32.mrf.mxu0  ;;  %v2153_v10 = vpop.f32.mrf.mxu1 }
 0x116   : > { %v604_v4 = vadd.f32 %v2188_v51, %v603_v9 }
 0x117   : > { %v605_v11 = vpop.f32.mrf.mxu0  ;;  %v800_v12 = vpop.f32.mrf.mxu1 }
 0x119   : > { %v608_v13 = vpop.f32.mrf.mxu0  ;;  %v2155_v14 = vpop.f32.mrf.mxu1 }
 0x11a   : > { %v609_v61 = vadd.f32 %v2188_v51, %v608_v13 }
 0x11b   : > { %v610_v15 = vpop.f32.mrf.mxu0  ;;  %v805_v16 = vpop.f32.mrf.mxu1 }
 0x11d   : > { %v613_v17 = vpop.f32.mrf.mxu0  ;;  %v2157_v18 = vpop.f32.mrf.mxu1 }
 0x11f   : > { %v615_v19 = vpop.f32.mrf.mxu0  ;;  %v810_v20 = vpop.f32.mrf.mxu1 }
 0x120   : > { %v614_v19 = vadd.f32 %v2188_v51, %v613_v17 }
 0x121   : > { %v618_v21 = vpop.f32.mrf.mxu0  ;;  %v2159_v22 = vpop.f32.mrf.mxu1 }
 0x122   : > { %v619_v1 = vadd.f32 %v2188_v51, %v618_v21 }
 0x123   : > { %v620_v23 = vpop.f32.mrf.mxu0  ;;  %v815_v24 = vpop.f32.mrf.mxu1 }
 0x125   : > { %v2161_v25 = vpop.f32.mrf.mxu0  ;;  %v2163_v26 = vpop.f32.mrf.mxu1 }
 0x127   : > { %v625_v27 = vpop.f32.mrf.mxu0  ;;  %v820_v28 = vpop.f32.mrf.mxu1 }
 0x129   : > { %v628_v29 = vpop.f32.mrf.mxu0  ;;  %v2165_v30 = vpop.f32.mrf.mxu1 }
 0x12a   : > { %v629_v27 = vadd.f32 %v2188_v51, %v628_v29 }
 0x12b   : > { %v630_v31 = vpop.f32.mrf.mxu0  ;;  %v825_v32 = vpop.f32.mrf.mxu1 }
 0x12d   : > { %v2167_v33 = vpop.f32.mrf.mxu0  ;;  %v2169_v34 = vpop.f32.mrf.mxu1 }
 0x12f   : > { %v635_v35 = vpop.f32.mrf.mxu0  ;;  %v830_v36 = vpop.f32.mrf.mxu1 }
 0x130   : > { %v624_v35 = vadd.f32 %v2188_v51, %v2161_v25 }
 0x131   : > { %v638_v37 = vpop.f32.mrf.mxu0  ;;  %v2171_v38 = vpop.f32.mrf.mxu1 }
 0x133   : > { %v640_v39 = vpop.f32.mrf.mxu0  ;;  %v835_v40 = vpop.f32.mrf.mxu1 }
 0x135   : > { %v2173_v41 = vpop.f32.mrf.mxu0  ;;  %v2175_v42 = vpop.f32.mrf.mxu1 }
 0x137   : > { %v645_v43 = vpop.f32.mrf.mxu0  ;;  %v840_v44 = vpop.f32.mrf.mxu1 }
 0x138   : > { %v639_v43 = vadd.f32 %v2188_v51, %v638_v37 }
 0x139   : > { %v2177_v45 = vpop.f32.mrf.mxu0  ;;  %v2179_v46 = vpop.f32.mrf.mxu1 }
 0x13b   : > { %v650_v47 = vpop.f32.mrf.mxu0  ;;  %v845_v48 = vpop.f32.mrf.mxu1 }
 0x13d   : > { %v2181_v49 = vpop.f32.mrf.mxu0  ;;  %v2183_v50 = vpop.f32.mrf.mxu1 }
 0x13f   : > { %v655_v52 = vpop.f32.mrf.mxu0  ;;  %v850_v53 = vpop.f32.mrf.mxu1 }
 0x140   : > { %v634_v52 = vadd.f32 %v2188_v51, %v2167_v33 }
 0x141   : > { %v2191_v55 = vpop.f32.mrf.mxu0  ;;  %v1569_v56 = vpop.f32.mrf.mxu1 }
 0x142   : > { %v924_v58 = vadd.f32 %v1569_v56, %v599_v54 }
 0x143   : > { %v660_v59 = vpop.f32.mrf.mxu0  ;;  %v918_v60 = vpop.f32.mrf.mxu1 }
 0x144   : > { %v1178_v62 = vmax.f32 %v924_v58, 0.0  ;;  %v919_v63 = vadd.f32 %v918_v60, %v594_v57  ;;  %v649_v57 = vadd.f32 %v2188_v51, %v2177_v45 }
 0x145   : > { %v2195_v0 = vpop.f32.mrf.mxu0  ;;  %v1572_v3 = vpop.f32.mrf.mxu1 }
 0x146   : > { %1231 = vst.msk [vmem:[#allocation2 + $0x8] sm:$0xff] %vm1229_vm1, %v1178_v62  ;;  %v1177_v5 = vmax.f32 %v919_v63, 0.0  ;;  %v934_v7 = vadd.f32 %v1572_v3, %v609_v61  ;;  %v644_v61 = vadd.f32 %v2188_v51, %v2173_v41 }
 0x147   : > { %v665_v8 = vpop.f32.mrf.mxu0  ;;  %v928_v11 = vpop.f32.mrf.mxu1 }
 0x148   : > { %1230 = vst.msk [vmem:[#allocation2] sm:$0xff] %vm1229_vm1, %v1177_v5  ;;  %v1180_v12 = vmax.f32 %v934_v7, 0.0  ;;  %v929_v15 = vadd.f32 %v928_v11, %v604_v4  ;;  %v659_v4 = vadd.f32 %v2188_v51, %v2191_v55  ;;  %v654_v11 = vadd.f32 %v2188_v51, %v2181_v49 }
 0x149   : > { %v668_v13 = vpop.f32.mrf.mxu0  ;;  %v1575_v16 = vpop.f32.mrf.mxu1 }
 0x14a   : > { %1233 = vst.msk [vmem:[#allocation2 + $0x18] sm:$0xff] %vm1229_vm1, %v1180_v12  ;;  %v1179_v20 = vmax.f32 %v929_v15, 0.0  ;;  %v944_v9 = vadd.f32 %v1575_v16, %v619_v1  ;;  %v669_v16 = vadd.f32 %v2188_v51, %v668_v13 }
 0x14b   : > { %v670_v23 = vpop.f32.mrf.mxu0  ;;  %v938_v24 = vpop.f32.mrf.mxu1 }
 0x14c   : > { %1232 = vst.msk [vmem:[#allocation2 + $0x10] sm:$0xff] %vm1229_vm1, %v1179_v20  ;;  %v1182_v28 = vmax.f32 %v944_v9, 0.0  ;;  %v939_v21 = vadd.f32 %v938_v24, %v614_v19  ;;  %v664_v23 = vadd.f32 %v2188_v51, %v2195_v0 }
 0x14d   : > { %v673_v31 = vpop.f32.mrf.mxu0  ;;  %v1578_v32 = vpop.f32.mrf.mxu1 }
 0x14e   : > { %1235 = vst.msk [vmem:[#allocation2 + $0x28] sm:$0xff] %vm1229_vm1, %v1182_v28  ;;  %v1181_v17 = vmax.f32 %v939_v21, 0.0  ;;  %v954_v36 = vadd.f32 %v1578_v32, %v629_v27 }
 0x14f   : > { %v675_v39 = vpop.f32.mrf.mxu0  ;;  %v948_v40 = vpop.f32.mrf.mxu1 }
 0x150   : > { %1234 = vst.msk [vmem:[#allocation2 + $0x20] sm:$0xff] %vm1229_vm1, %v1181_v17  ;;  %v1184_v29 = vmax.f32 %v954_v36, 0.0  ;;  %v949_v44 = vadd.f32 %v948_v40, %v624_v35  ;;  %v674_v36 = vadd.f32 %v2188_v51, %v673_v31 }
 0x151   : > { %v678_v47 = vpop.f32.mrf.mxu0  ;;  %v1581_v48 = vpop.f32.mrf.mxu1 }
 0x152   : > { %1237 = vst.msk [vmem:[#allocation2 + $0x38] sm:$0xff] %vm1229_vm1, %v1184_v29  ;;  %v1183_v25 = vmax.f32 %v949_v44, 0.0  ;;  %v964_v53 = vadd.f32 %v1581_v48, %v639_v43  ;;  %v679_v21 = vadd.f32 %v2188_v51, %v678_v47 }
 0x153   : > { %v680_v54 = vpop.f32.mrf.mxu0  ;;  %v958_v56 = vpop.f32.mrf.mxu1 }
 0x154   : > { %1236 = vst.msk [vmem:[#allocation2 + $0x30] sm:$0xff] %vm1229_vm1, %v1183_v25  ;;  %v1186_v37 = vmax.f32 %v964_v53, 0.0  ;;  %v959_v58 = vadd.f32 %v958_v56, %v634_v52 }
 0x155   : > { %v683_v59 = vpop.f32.mrf.mxu0  ;;  %v1584_v60 = vpop.f32.mrf.mxu1 }
 0x156   : > { %1239 = vst.msk [vmem:[#allocation2 + $0x48] sm:$0xff] %vm1229_vm1, %v1186_v37  ;;  %v1185_v33 = vmax.f32 %v959_v58, 0.0  ;;  %v974_v62 = vadd.f32 %v1584_v60, %v649_v57  ;;  %v684_v25 = vadd.f32 %v2188_v51, %v683_v59 }
 0x157   : > { %v685_v63 = vpop.f32.mrf.mxu0  ;;  %v968_v3 = vpop.f32.mrf.mxu1 }
 0x158   : > { %1238 = vst.msk [vmem:[#allocation2 + $0x40] sm:$0xff] %vm1229_vm1, %v1185_v33  ;;  %v1188_v45 = vmax.f32 %v974_v62, 0.0  ;;  %v969_v5 = vadd.f32 %v968_v3, %v644_v61 }
 0x159   : > { %v688_v7 = vpop.f32.mrf.mxu0  ;;  %v1587_v8 = vpop.f32.mrf.mxu1 }
 0x15a   : > { %1241 = vst.msk [vmem:[#allocation2 + $0x58] sm:$0xff] %vm1229_vm1, %v1188_v45  ;;  %v1187_v41 = vmax.f32 %v969_v5, 0.0  ;;  %v984_v1 = vadd.f32 %v1587_v8, %v659_v4  ;;  %v689_v29 = vadd.f32 %v2188_v51, %v688_v7 }
 0x15b   : > { %v690_v12 = vpop.f32.mrf.mxu0  ;;  %v978_v15 = vpop.f32.mrf.mxu1 }
 0x15c   : > { %1240 = vst.msk [vmem:[#allocation2 + $0x50] sm:$0xff] %vm1229_vm1, %v1187_v41  ;;  %v1190_v55 = vmax.f32 %v984_v1, 0.0  ;;  %v979_v19 = vadd.f32 %v978_v15, %v654_v11 }
 0x15d   : > { %v693_v20 = vpop.f32.mrf.mxu0  ;;  %v1590_v9 = vpop.f32.mrf.mxu1 }
 0x15e   : > { %1243 = vst.msk [vmem:[#allocation2 + $0x68] sm:$0xff] %vm1229_vm1, %v1190_v55  ;;  %v1189_v49 = vmax.f32 %v979_v19, 0.0  ;;  %v994_v24 = vadd.f32 %v1590_v9, %v669_v16  ;;  %v694_v33 = vadd.f32 %v2188_v51, %v693_v20 }
 0x15f   : > { %v695_v27 = vpop.f32.mrf.mxu0  ;;  %v988_v28 = vpop.f32.mrf.mxu1 }
 0x160   : > { %1242 = vst.msk [vmem:[#allocation2 + $0x60] sm:$0xff] %vm1229_vm1, %v1189_v49  ;;  %v1192_v13 = vmax.f32 %v994_v24, 0.0  ;;  %v989_v32 = vadd.f32 %v988_v28, %v664_v23 }
 0x161   : > { %v698_v35 = vpop.f32.mrf.mxu0  ;;  %v1593_v17 = vpop.f32.mrf.mxu1 }
 0x162   : > { %1245 = vst.msk [vmem:[#allocation2 + $0x78] sm:$0xff] %vm1229_vm1, %v1192_v13  ;;  %v1191_v39 = vmax.f32 %v989_v32, 0.0  ;;  %v1004_v0 = vadd.f32 %v1593_v17, %v679_v21  ;;  %v699_v57 = vadd.f32 %v2188_v51, %v698_v35 }
 0x163   : > { %v700_v40 = vpop.f32.mrf.mxu0  ;;  %v998_v43 = vpop.f32.mrf.mxu1 }
 0x164   : > { %1244 = vst.msk [vmem:[#allocation2 + $0x70] sm:$0xff] %vm1229_vm1, %v1191_v39  ;;  %v1194_v44 = vmax.f32 %v1004_v0, 0.0  ;;  %v999_v47 = vadd.f32 %v998_v43, %v674_v36 }
 0x165   : > { %v703_v48 = vpop.f32.mrf.mxu0  ;;  %v1596_v52 = vpop.f32.mrf.mxu1 }
 0x166   : > { %1247 = vst.msk [vmem:[#allocation2 + $0x88] sm:$0xff] %vm1229_vm1, %v1194_v44  ;;  %v1193_v53 = vmax.f32 %v999_v47, 0.0  ;;  %v1014_v31 = vadd.f32 %v1596_v52, %v689_v29  ;;  %v704_v11 = vadd.f32 %v2188_v51, %v703_v48 }
 0x167   : > { %v705_v54 = vpop.f32.mrf.mxu0  ;;  %v1008_v56 = vpop.f32.mrf.mxu1 }
 0x168   : > { %1246 = vst.msk [vmem:[#allocation2 + $0x80] sm:$0xff] %vm1229_vm1, %v1193_v53  ;;  %v1196_v37 = vmax.f32 %v1014_v31, 0.0  ;;  %v1009_v58 = vadd.f32 %v1008_v56, %v684_v25 }
 0x169   : > { %v708_v60 = vpop.f32.mrf.mxu0  ;;  %v1599_v61 = vpop.f32.mrf.mxu1 }
 0x16a   : > { %1249 = vst.msk [vmem:[#allocation2 + $0x98] sm:$0xff] %vm1229_vm1, %v1196_v37  ;;  %v1195_v62 = vmax.f32 %v1009_v58, 0.0  ;;  %v1024_v59 = vadd.f32 %v1599_v61, %v699_v57  ;;  %v709_v4 = vadd.f32 %v2188_v51, %v708_v60 }
 0x16b   : > { %v710_v63 = vpop.f32.mrf.mxu0  ;;  %v1018_v3 = vpop.f32.mrf.mxu1 }
 0x16c   : > { %1248 = vst.msk [vmem:[#allocation2 + $0x90] sm:$0xff] %vm1229_vm1, %v1195_v62  ;;  %v1198_v45 = vmax.f32 %v1024_v59, 0.0  ;;  %v1019_v5 = vadd.f32 %v1018_v3, %v694_v33 }
 0x16d   : > { %v713_v7 = vpop.f32.mrf.mxu0  ;;  %v1602_v8 = vpop.f32.mrf.mxu1 }
 0x16e   : > { %1251 = vst.msk [vmem:[#allocation2 + $0xa8] sm:$0xff] %vm1229_vm1, %v1198_v45  ;;  %v1197_v41 = vmax.f32 %v1019_v5, 0.0  ;;  %v1034_v1 = vadd.f32 %v1602_v8, %v709_v4  ;;  %v714_v9 = vadd.f32 %v2188_v51, %v713_v7 }
 0x16f   : > { %v715_v12 = vpop.f32.mrf.mxu0  ;;  %v1028_v15 = vpop.f32.mrf.mxu1 }
 0x170   : > { %1250 = vst.msk [vmem:[#allocation2 + $0xa0] sm:$0xff] %vm1229_vm1, %v1197_v41  ;;  %v1200_v16 = vmax.f32 %v1034_v1, 0.0  ;;  %v1029_v55 = vadd.f32 %v1028_v15, %v704_v11 }
 0x171   : > { %v718_v19 = vpop.f32.mrf.mxu0  ;;  %v1605_v20 = vpop.f32.mrf.mxu1 }
 0x172   : > { %1253 = vst.msk [vmem:[#allocation2 + $0xb8] sm:$0xff] %vm1229_vm1, %v1200_v16  ;;  %v1199_v23 = vmax.f32 %v1029_v55, 0.0  ;;  %v719_v49 = vadd.f32 %v2188_v51, %v718_v19 }
 0x173   : > { %v720_v24 = vpop.f32.mrf.mxu0  ;;  %v1038_v27 = vpop.f32.mrf.mxu1 }
 0x174   : > { %1252 = vst.msk [vmem:[#allocation2 + $0xb0] sm:$0xff] %vm1229_vm1, %v1199_v23  ;;  %v1044_v28 = vadd.f32 %v1605_v20, %v719_v49  ;;  %v1039_v21 = vadd.f32 %v1038_v27, %v714_v9  ;;  %v789_v20 = vadd.f32 %v2188_v51, %v2149_v2 }
 0x175   : > { %v723_v13 = vpop.f32.mrf.mxu0  ;;  %v1608_v32 = vpop.f32.mrf.mxu1 }
 0x176   : > { %v1202_v35 = vmax.f32 %v1044_v28, 0.0  ;;  %v1201_v17 = vmax.f32 %v1039_v21, 0.0  ;;  %v724_v36 = vadd.f32 %v2188_v51, %v723_v13 }
 0x177   : > { %v725_v39 = vpop.f32.mrf.mxu0  ;;  %v1048_v0 = vpop.f32.mrf.mxu1 }
 0x178   : > { %1255 = vst.msk [vmem:[#allocation2 + $0xc8] sm:$0xff] %vm1229_vm1, %v1202_v35  ;;  %1254 = vst.msk [vmem:[#allocation2 + $0xc0] sm:$0xff] %vm1229_vm1, %v1201_v17  ;;  %v1049_v40 = vadd.f32 %v1048_v0, %v724_v36  ;;  %v794_v39 = vadd.f32 %v2188_v51, %v2151_v6  ;;  %v804_v6 = vadd.f32 %v2188_v51, %v2155_v14 }
 0x179   : > { %v728_v43 = vpop.f32.mrf.mxu0  ;;  %v1611_v29 = vpop.f32.mrf.mxu1 }
 0x17a   : > { %v1203_v44 = vmax.f32 %v1049_v40, 0.0  ;;  %v729_v47 = vadd.f32 %v2188_v51, %v728_v43 }
 0x17b   : > { %v730_v48 = vpop.f32.mrf.mxu0  ;;  %v1058_v52 = vpop.f32.mrf.mxu1 }
 0x17c   : > { %1256 = vst.msk [vmem:[#allocation2 + $0xd0] sm:$0xff] %vm1229_vm1, %v1203_v44  ;;  %v1054_v25 = vadd.f32 %v1608_v32, %v729_v47  ;;  %v799_v32 = vadd.f32 %v2188_v51, %v2153_v10  ;;  %v809_v10 = vadd.f32 %v2188_v51, %v2157_v18 }
 0x17d   : > { %v733_v53 = vpop.f32.mrf.mxu0  ;;  %v1614_v31 = vpop.f32.mrf.mxu1 }
 0x17e   : > { %v1204_v54 = vmax.f32 %v1054_v25, 0.0  ;;  %v734_v56 = vadd.f32 %v2188_v51, %v733_v53 }
 0x17f   : > { %v735_v57 = vpop.f32.mrf.mxu0  ;;  %v1068_v37 = vpop.f32.mrf.mxu1 }
 0x180   : > { %1257 = vst.msk [vmem:[#allocation2 + $0xd8] sm:$0xff] %vm1229_vm1, %v1204_v54  ;;  %v1059_v58 = vadd.f32 %v1058_v52, %v734_v56 }
 0x181   : > { %v738_v60 = vpop.f32.mrf.mxu0  ;;  %v1617_v61 = vpop.f32.mrf.mxu1 }
 0x182   : > { %v1205_v33 = vmax.f32 %v1059_v58, 0.0  ;;  %v739_v62 = vadd.f32 %v2188_v51, %v738_v60  ;;  %v1282_v60 = vld [vmem:[#allocation2] sm:$0xff] }
 0x183   : > { %v740_v59 = vpop.f32.mrf.mxu0  ;;  %v1078_v63 = vpop.f32.mrf.mxu1 }
 0x184   : > { %1258 = vst.msk [vmem:[#allocation2 + $0xe0] sm:$0xff] %vm1229_vm1, %v1205_v33  ;;  %v1064_v3 = vadd.f32 %v1611_v29, %v739_v62  ;;  %v814_v62 = vadd.f32 %v2188_v51, %v2159_v22  ;;  %v819_v59 = vadd.f32 %v2188_v51, %v2163_v26 }
 0x185   : > { %v743_v4 = vpop.f32.mrf.mxu0  ;;  %v2260_v45 = vpop.f32.mrf.mxu1 }
 0x186   : > { %v1206_v5 = vmax.f32 %v1064_v3, 0.0  ;;  %v744_v7 = vadd.f32 %v2188_v51, %v743_v4  ;;  %v1321_v3 = vld [vmem:[#allocation2 + $0xd0] sm:$0xff] }
 0x187   : > { %v745_v8 = vpop.f32.mrf.mxu0  ;;  %v1088_v11 = vpop.f32.mrf.mxu1 }
 0x188   : > { %1259 = vst.msk [vmem:[#allocation2 + $0xe8] sm:$0xff] %vm1229_vm1, %v1206_v5  ;;  %v1069_v41 = vadd.f32 %v1068_v37, %v744_v7  ;;  %v1297_v8 = vld [vmem:[#allocation2 + $0x78] sm:$0xff] }
 0x189   : > { %v748_v1 = vpop.f32.mrf.mxu0  ;;  %v2264_v12 = vpop.f32.mrf.mxu1 }
 0x18a   : > { %v1207_v15 = vmax.f32 %v1069_v41, 0.0  ;;  %v749_v16 = vadd.f32 %v2188_v51, %v748_v1 }
 0x18b   : > { %v750_v55 = vpop.f32.mrf.mxu0  ;;  %v2267_v19 = vpop.f32.mrf.mxu1 }
 0x18c   : > { %1260 = vst.msk [vmem:[#allocation2 + $0xf0] sm:$0xff] %vm1229_vm1, %v1207_v15  ;;  %v1074_v9 = vadd.f32 %v1614_v31, %v749_v16  ;;  %v1295_v31 = vld [vmem:[#allocation2 + $0x68] sm:$0xff]  ;;  %v1284_v55 = vld [vmem:[#allocation2 + $0x10] sm:$0xff] }
 0x18d   : > { %v753_v23 = vpop.f32.mrf.mxu0  ;;  %v1626_v49 = vpop.f32.mrf.mxu1 }
 0x18e   : > { %v1208_v24 = vmax.f32 %v1074_v9, 0.0  ;;  %v754_v27 = vadd.f32 %v2188_v51, %v753_v23  ;;  %v1114_v28 = vadd.f32 %v1626_v49, %v789_v20  ;;  %v1296_v20 = vld [vmem:[#allocation2 + $0x70] sm:$0xff] }
 0x18f   : > { %v755_v21 = vpop.f32.mrf.mxu0  ;;  %v2273_v13 = vpop.f32.mrf.mxu1 }
 0x190   : > { %1261 = vst.msk [vmem:[#allocation2 + $0xf8] sm:$0xff] %vm1229_vm1, %v1208_v24  ;;  %v1079_v35 = vadd.f32 %v1078_v63, %v754_v27  ;;  %v1216_v17 = vmax.f32 %v1114_v28, 0.0  ;;  %v1308_v63 = vmax.f32 %v1282_v60, %v1295_v31  ;;  %v824_v24 = vadd.f32 %v2188_v51, %v2165_v30  ;;  %v1323_v21 = vld [vmem:[#allocation2 + $0xe0] sm:$0xff]  ;;  %v1322_v30 = vld [vmem:[#allocation2 + $0xd8] sm:$0xff] }
 0x191   : > { %v758_v2 = vpop.f32.mrf.mxu0  ;;  %v1629_v36 = vpop.f32.mrf.mxu1  ;;  %v829_v27 = vadd.f32 %v2188_v51, %v2169_v34  ;;  %v1310_v28 = vmax.f32 %v1284_v55, %v1297_v8  ;;  %v834_v31 = vadd.f32 %v2188_v51, %v2171_v38  ;;  %v849_v38 = vadd.f32 %v2188_v51, %v2183_v50 }
 0x192   : > { %v1209_v0 = vmax.f32 %v1079_v35, 0.0  ;;  %1269 = vst.msk [vmem:[#allocation2 + $0x138] sm:$0xff] %vm1229_vm1, %v1216_v17  ;;  %v759_v40 = vadd.f32 %v2188_v51, %v758_v2  ;;  %v1124_v43 = vadd.f32 %v1629_v36, %v799_v32  ;;  %v1283_v36 = vld [vmem:[#allocation2 + $0x8] sm:$0xff] }
 0x193   : > { %v760_v29 = vpop.f32.mrf.mxu0  ;;  %v1118_v44 = vpop.f32.mrf.mxu1 }
 0x194   : > { %1262 = vst.msk [vmem:[#allocation2 + $0x100] sm:$0xff] %vm1229_vm1, %v1209_v0  ;;  %v1084_v47 = vadd.f32 %v1617_v61, %v759_v40  ;;  %v1218_v48 = vmax.f32 %v1124_v43, 0.0  ;;  %v1119_v52 = vadd.f32 %v1118_v44, %v794_v39  ;;  %v1299_v39 = vld [vmem:[#allocation2 + $0x88] sm:$0xff]  ;;  %v1309_v29 = vmax.f32 %v1283_v36, %v1296_v20 }
 0x195   : > { %v763_v25 = vpop.f32.mrf.mxu0  ;;  %v1632_v53 = vpop.f32.mrf.mxu1 }
 0x196   : > { %v1210_v54 = vmax.f32 %v1084_v47, 0.0  ;;  %1271 = vst.msk [vmem:[#allocation2 + $0x148] sm:$0xff] %vm1229_vm1, %v1218_v48  ;;  %v1217_v56 = vmax.f32 %v1119_v52, 0.0  ;;  %v764_v57 = vadd.f32 %v2188_v51, %v763_v25  ;;  %v1134_v37 = vadd.f32 %v1632_v53, %v809_v10  ;;  %v1286_v48 = vld [vmem:[#allocation2 + $0x20] sm:$0xff] }
 0x197   : > { %v765_v18 = vpop.f32.mrf.mxu0  ;;  %v1128_v58 = vpop.f32.mrf.mxu1 }
 0x198   : > { %1263 = vst.msk [vmem:[#allocation2 + $0x108] sm:$0xff] %vm1229_vm1, %v1210_v54  ;;  %1270 = vst.msk [vmem:[#allocation2 + $0x140] sm:$0xff] %vm1229_vm1, %v1217_v56  ;;  %v1089_v61 = vadd.f32 %v1088_v11, %v764_v57  ;;  %v1220_v14 = vmax.f32 %v1134_v37, 0.0  ;;  %v1129_v33 = vadd.f32 %v1128_v58, %v804_v6  ;;  %v839_v54 = vadd.f32 %v2188_v51, %v2175_v42  ;;  %v1298_v57 = vld [vmem:[#allocation2 + $0x80] sm:$0xff]  ;;  %v1325_v37 = vld [vmem:[#allocation2 + $0xf0] sm:$0xff] }
 0x199   : > { %v1334_v4 = vld [vmem:[#allocation2 + $0x138] sm:$0xff]  ;;  %v768_v5 = vpop.f32.mrf.mxu0  ;;  %v1635_v7 = vpop.f32.mrf.mxu1  ;;  %v1312_v56 = vmax.f32 %v1286_v48, %v1299_v39 }
 0x19a   : > { %v1347_v41 = vmax.f32 %v1321_v3, %v1334_v4  ;;  %v1211_v1 = vmax.f32 %v1089_v61, 0.0  ;;  %1273 = vst.msk [vmem:[#allocation2 + $0x158] sm:$0xff] %vm1229_vm1, %v1220_v14  ;;  %v1219_v15 = vmax.f32 %v1129_v33, 0.0  ;;  %v769_v11 = vadd.f32 %v2188_v51, %v768_v5 }
 0x19b   : > { %v1144_v22 = vadd.f32 %v1635_v7, %v819_v59  ;;  %v770_v26 = vpop.f32.mrf.mxu0  ;;  %v1138_v16 = vpop.f32.mrf.mxu1  ;;  %v1285_v59 = vld [vmem:[#allocation2 + $0x18] sm:$0xff] }
 0x19c   : > { %v1360_v9 = vmax.f32 %v1308_v63, %v1347_v41  ;;  %1264 = vst.msk [vmem:[#allocation2 + $0x110] sm:$0xff] %vm1229_vm1, %v1211_v1  ;;  %1272 = vst.msk [vmem:[#allocation2 + $0x150] sm:$0xff] %vm1229_vm1, %v1219_v15  ;;  %v1094_v23 = vadd.f32 %v2260_v45, %v769_v11  ;;  %v1139_v49 = vadd.f32 %v1138_v16, %v814_v62  ;;  %v1324_v63 = vld [vmem:[#allocation2 + $0xe8] sm:$0xff]  ;;  %v1301_v41 = vld [vmem:[#allocation2 + $0x98] sm:$0xff] }
 0x19d   : > { %v1336_v32 = vld [vmem:[#allocation2 + $0x148] sm:$0xff]  ;;  %v1222_v35 = vmax.f32 %v1144_v22, 0.0  ;;  %v773_v17 = vpop.f32.mrf.mxu0  ;;  %v1638_v2 = vpop.f32.mrf.mxu1  ;;  %v1311_v8 = vmax.f32 %v1285_v59, %v1298_v57  ;;  %v1300_v1 = vld [vmem:[#allocation2 + $0x90] sm:$0xff]  ;;  %v844_v22 = vadd.f32 %v2188_v51, %v2179_v46  ;;  %v1305_v57 = vld [vmem:[#allocation2 + $0xb8] sm:$0xff] }
 0x19e   : > { %1373 = vst.msk [vmem:[%s2301_s19] sm:$0xff] %vm1229_vm1, %v1360_v9  ;;  %v1349_v0 = vmax.f32 %v1323_v21, %v1336_v32  ;;  %v1212_v40 = vmax.f32 %v1094_v23, 0.0  ;;  %v1221_v45 = vmax.f32 %v1139_v49, 0.0  ;;  %v774_v43 = vadd.f32 %v2188_v51, %v773_v17  ;;  %v1287_v26 = vld [vmem:[#allocation2 + $0x28] sm:$0xff]  ;;  %v1288_v23 = vld [vmem:[#allocation2 + $0x30] sm:$0xff] }
 0x19f   : > { %v1335_v44 = vld [vmem:[#allocation2 + $0x140] sm:$0xff]  ;;  %1275 = vst.msk [vmem:[#allocation2 + $0x168] sm:$0xff] %vm1229_vm1, %v1222_v35  ;;  %v1154_v34 = vadd.f32 %v1638_v2, %v829_v27  ;;  %v775_v10 = vpop.f32.mrf.mxu0  ;;  %v1148_v47 = vpop.f32.mrf.mxu1  ;;  %v1314_v35 = vmax.f32 %v1288_v23, %v1301_v41  ;;  %v1313_v17 = vmax.f32 %v1287_v26, %v1300_v1  ;;  %v1326_v2 = vld [vmem:[#allocation2 + $0xf8] sm:$0xff] }
 0x1a0   : > { %v1362_v52 = vmax.f32 %v1310_v28, %v1349_v0  ;;  %v1348_v6 = vmax.f32 %v1322_v30, %v1335_v44  ;;  %1265 = vst.msk [vmem:[#allocation2 + $0x118] sm:$0xff] %vm1229_vm1, %v1212_v40  ;;  %1274 = vst.msk [vmem:[#allocation2 + $0x160] sm:$0xff] %vm1229_vm1, %v1221_v45  ;;  %v1099_v25 = vadd.f32 %v2267_v19, %v774_v43  ;;  %v1303_v40 = vld [vmem:[#allocation2 + $0xa8] sm:$0xff]  ;;  %v1302_v30 = vld [vmem:[#allocation2 + $0xa0] sm:$0xff] }
 0x1a1   : > { %v1149_v53 = vadd.f32 %v1148_v47, %v824_v24  ;;  %v1338_v18 = vld [vmem:[#allocation2 + $0x158] sm:$0xff]  ;;  %v1224_v58 = vmax.f32 %v1154_v34, 0.0  ;;  %v778_v60 = vpop.f32.mrf.mxu0  ;;  %v1641_v61 = vpop.f32.mrf.mxu1  ;;  %v1327_v24 = vld [vmem:[#allocation2 + $0x100] sm:$0xff] }
 0x1a2   : > { %1375 = vst.msk [vmem:[%s2301_s19 + $0x10] sm:$0xff] %vm1229_vm1, %v1362_v52  ;;  %v1361_v14 = vmax.f32 %v1309_v29, %v1348_v6  ;;  %v1351_v33 = vmax.f32 %v1325_v37, %v1338_v18  ;;  %v1213_v19 = vmax.f32 %v1099_v25, 0.0  ;;  %v779_v3 = vadd.f32 %v2188_v51, %v778_v60  ;;  %v1290_v34 = vld [vmem:[#allocation2 + $0x40] sm:$0xff]  ;;  %v1289_v25 = vld [vmem:[#allocation2 + $0x38] sm:$0xff]  ;;  %v1304_v18 = vld [vmem:[#allocation2 + $0xb0] sm:$0xff] }
 0x1a3   : > { %v1223_v62 = vmax.f32 %v1149_v53, 0.0  ;;  %v1337_v42 = vld [vmem:[#allocation2 + $0x150] sm:$0xff]  ;;  %1277 = vst.msk [vmem:[#allocation2 + $0x178] sm:$0xff] %vm1229_vm1, %v1224_v58  ;;  %v1164_v4 = vadd.f32 %v1641_v61, %v839_v54  ;;  %v780_v5 = vpop.f32.mrf.mxu0  ;;  %v1158_v7 = vpop.f32.mrf.mxu1  ;;  %v1316_v53 = vmax.f32 %v1290_v34, %v1303_v40  ;;  %v1294_v41 = vld [vmem:[#allocation2 + $0x60] sm:$0xff] }
 0x1a4   : > { %1374 = vst.msk [vmem:[%s2301_s19 + $0x8] sm:$0xff] %vm1229_vm1, %v1361_v14  ;;  %v1364_v15 = vmax.f32 %v1312_v56, %v1351_v33  ;;  %v1350_v11 = vmax.f32 %v1324_v63, %v1337_v42  ;;  %1266 = vst.msk [vmem:[#allocation2 + $0x120] sm:$0xff] %vm1229_vm1, %v1213_v19  ;;  %v1159_v50 = vadd.f32 %v1158_v7, %v834_v31  ;;  %v1329_v47 = vld [vmem:[#allocation2 + $0x110] sm:$0xff]  ;;  %v1328_v31 = vld [vmem:[#allocation2 + $0x108] sm:$0xff] }
 0x1a5   : > { %1276 = vst.msk [vmem:[#allocation2 + $0x170] sm:$0xff] %vm1229_vm1, %v1223_v62  ;;  %v1104_v16 = vadd.f32 %v2264_v12, %v779_v3  ;;  %v1226_v55 = vmax.f32 %v1164_v4, 0.0  ;;  %v783_v20 = vpop.f32.mrf.mxu0  ;;  %v1644_v9 = vpop.f32.mrf.mxu1  ;;  %v1315_v56 = vmax.f32 %v1289_v25, %v1302_v30  ;;  %v1292_v60 = vld [vmem:[#allocation2 + $0x50] sm:$0xff]  ;;  %v1291_v19 = vld [vmem:[#allocation2 + $0x48] sm:$0xff]  ;;  %v1306_v5 = vld [vmem:[#allocation2 + $0xc0] sm:$0xff] }
 0x1a6   : > { %1377 = vst.msk [vmem:[%s2301_s19 + $0x20] sm:$0xff] %vm1229_vm1, %v1364_v15  ;;  %v1363_v49 = vmax.f32 %v1311_v8, %v1350_v11  ;;  %v1340_v27 = vld [vmem:[#allocation2 + $0x168] sm:$0xff]  ;;  %v1225_v28 = vmax.f32 %v1159_v50, 0.0  ;;  %v784_v21 = vadd.f32 %v2188_v51, %v783_v20  ;;  %v1174_v32 = vadd.f32 %v1644_v9, %v849_v38  ;;  %v1293_v8 = vld [vmem:[#allocation2 + $0x58] sm:$0xff] }
 0x1a7   : > { %v1353_v46 = vmax.f32 %v1327_v24, %v1340_v27  ;;  %v1339_v36 = vld [vmem:[#allocation2 + $0x160] sm:$0xff]  ;;  %v1214_v12 = vmax.f32 %v1104_v16, 0.0  ;;  %1279 = vst.msk [vmem:[#allocation2 + $0x188] sm:$0xff] %vm1229_vm1, %v1226_v55  ;;  %v785_v39 = vpop.f32.mrf.mxu0  ;;  %v1168_v0 = vpop.f32.mrf.mxu1  ;;  %v1318_v62 = vmax.f32 %v1292_v60, %v1305_v57  ;;  %v1330_v59 = vld [vmem:[#allocation2 + $0x118] sm:$0xff]  ;;  %v1317_v42 = vmax.f32 %v1291_v19, %v1304_v18  ;;  %v1307_v4 = vld [vmem:[#allocation2 + $0xc8] sm:$0xff] }
 0x1a8   : > { %1376 = vst.msk [vmem:[%s2301_s19 + $0x18] sm:$0xff] %vm1229_vm1, %v1363_v49  ;;  %v1352_v45 = vmax.f32 %v1326_v2, %v1339_v36  ;;  %1278 = vst.msk [vmem:[#allocation2 + $0x180] sm:$0xff] %vm1229_vm1, %v1225_v28  ;;  %v1109_v51 = vadd.f32 %v2273_v13, %v784_v21  ;;  %v1228_v43 = vmax.f32 %v1174_v32, 0.0  ;;  %v1169_v29 = vadd.f32 %v1168_v0, %v844_v22 }
 0x1a9   : > { %v1366_v44 = vmax.f32 %v1314_v35, %v1353_v46  ;;  %1267 = vst.msk [vmem:[#allocation2 + $0x128] sm:$0xff] %vm1229_vm1, %v1214_v12  ;;  %v1320_v26 = vmax.f32 %v1294_v41, %v1307_v4  ;;  %v1319_v16 = vmax.f32 %v1293_v8, %v1306_v5 }
 0x1aa   : > { %v1365_v10 = vmax.f32 %v1313_v17, %v1352_v45  ;;  %v1342_v48 = vld [vmem:[#allocation2 + $0x178] sm:$0xff]  ;;  %v1215_v52 = vmax.f32 %v1109_v51, 0.0  ;;  %1281 = vst.msk [vmem:[#allocation2 + $0x198] sm:$0xff] %vm1229_vm1, %v1228_v43  ;;  %v1227_v6 = vmax.f32 %v1169_v29, 0.0 }
 0x1ab   : > { %1379 = vst.msk [vmem:[%s2301_s19 + $0x30] sm:$0xff] %vm1229_vm1, %v1366_v44  ;;  %v1355_v13 = vmax.f32 %v1329_v47, %v1342_v48  ;;  %v1331_v14 = vld [vmem:[#allocation2 + $0x120] sm:$0xff] }
 0x1ac   : > { %v1341_v54 = vld [vmem:[#allocation2 + $0x170] sm:$0xff]  ;;  %1378 = vst.msk [vmem:[%s2301_s19 + $0x28] sm:$0xff] %vm1229_vm1, %v1365_v10  ;;  %1268 = vst.msk [vmem:[#allocation2 + $0x130] sm:$0xff] %vm1229_vm1, %v1215_v52 }
 0x1ad   : > { %v1354_v37 = vmax.f32 %v1328_v31, %v1341_v54  ;;  %1280 = vst.msk [vmem:[#allocation2 + $0x190] sm:$0xff] %vm1229_vm1, %v1227_v6  ;;  %v1368_v58 = vmax.f32 %v1316_v53, %v1355_v13 }
 0x1ae   : > { %v1344_v33 = vld [vmem:[#allocation2 + $0x188] sm:$0xff] }
 0x1af   : > { %v1367_v61 = vmax.f32 %v1315_v56, %v1354_v37  ;;  %1381 = vst.msk [vmem:[%s2301_s19 + $0x40] sm:$0xff] %vm1229_vm1, %v1368_v58  ;;  %v1357_v38 = vmax.f32 %v1331_v14, %v1344_v33  ;;  %v1343_v63 = vld [vmem:[#allocation2 + $0x180] sm:$0xff] }
 0x1b0   : > { %v1356_v3 = vmax.f32 %v1330_v59, %v1343_v63  ;;  %v1332_v15 = vld [vmem:[#allocation2 + $0x128] sm:$0xff] }
 0x1b1   : > { %1380 = vst.msk [vmem:[%s2301_s19 + $0x38] sm:$0xff] %vm1229_vm1, %v1367_v61  ;;  %v1370_v7 = vmax.f32 %v1318_v62, %v1357_v38  ;;  %v1346_v50 = vld [vmem:[#allocation2 + $0x198] sm:$0xff] }
 0x1b2   : > { %v1369_v1 = vmax.f32 %v1317_v42, %v1356_v3 }
 0x1b3   : > { %1383 = vst.msk [vmem:[%s2301_s19 + $0x50] sm:$0xff] %vm1229_vm1, %v1370_v7  ;;  %v1333_v11 = vld [vmem:[#allocation2 + $0x130] sm:$0xff] }
 0x1b4   : > { %v1345_v22 = vld [vmem:[#allocation2 + $0x190] sm:$0xff]  ;;  %1382 = vst.msk [vmem:[%s2301_s19 + $0x48] sm:$0xff] %vm1229_vm1, %v1369_v1  ;;  %v1359_v55 = vmax.f32 %v1333_v11, %v1346_v50 }
 0x1b5   : > { %v1358_v20 = vmax.f32 %v1332_v15, %v1345_v22 }
 0x1b6   : > { %v1372_v9 = vmax.f32 %v1320_v26, %v1359_v55 }
 0x1b7   : > { %v1371_v23 = vmax.f32 %v1319_v16, %v1358_v20 }
 0x1b8   : > { %1385 = vst.msk [vmem:[%s2301_s19 + $0x60] sm:$0xff] %vm1229_vm1, %v1372_v9 }
 0x1b9   : > { %1384 = vst.msk [vmem:[%s2301_s19 + $0x58] sm:$0xff] %vm1229_vm1, %v1371_v23 }
 0x1ba PF: > { %s13_s12 = sadd.s32 1, %s1726_s12  }
 0x1bb   : > { %p10_p4 = scmp.ge.s32.totalorder %s13_s12, 4  }
 0x1bd   :  { %12 = sbr.rel (!%p10_p4) target bundleno = 1 (0x1), region = 62 }

// kernel: asr_forward.10
= control target key start
LH: loop header
LB: loop body
LE: loop exit
PB: predicated region body
PF: predicated region fallthrough
CT: control target
= control target key end

     0   :  { %s833_s9 = smov 0   ;;  %s835_s10 = smov 0   ;;  %s1105_s0 = inlined_call_operand.vmem [shape: f32[2,8,1024], index: 0, kind: input, shape index: {}]   ;;  %s1106_s1 = inlined_call_operand.vmem [shape: bf16[2,128,512], index: 1, kind: input, shape index: {}]   ;;  %s1107_s2 = inlined_call_operand.vmem [shape: f32[2,8,256], index: 2, kind: output, shape index: {}]  }
   0x1   :  { %s837_s11 = smov 0  }
   0x2 LB: > { %s849_s12 = sadd.s32 4294967295, %s803_s11   ;;  %s852_s13 = sadd.s32 1, %s803_s11   ;;  %s803_s11 = sphi %s837_s11, %s1111_s11   ;;  %s799_s10 = sphi %s835_s10, %s1110_s10   ;;  %s795_s9 = sphi %s833_s9, %s1109_s9  }
   0x3   : > { %s16_s14 = ssub.s32 %s803_s11, %s852_s13  ;;  %s19_s15 = sadd.s32 1, %s799_s10 }
   0x4   : > { %p17_p0 = scmp.eq.s32.totalorder %s16_s14, 0  ;;  %p26_p1 = scmp.ne.s32.totalorder %s799_s10, %s795_s9 }
   0x5   : > { %p27_p2 = scmp.eq.s32.totalorder %s803_s11, 0  ;;  %p82_p3 = scmp.eq.s32.totalorder %s849_s12, 1 }
   0x6   : > { %s862_s16 = scalar_select %p17_p0, %s799_s10, %s19_s15  }
   0x7   : > { %p28_p4 = por %p27_p2, %p26_p1  ;;  %p864_p5 = por %p82_p3, %p26_p1 }
   0x8   : > { %p650_p6 = scmp.ge.s32.totalorder %s803_s11, 2 }
   0xa   : > { %104 = sbr.rel (%p650_p6) target bundleno = 23 (0x17), region = 16 }
   0xf   : > { %107 = sbr.rel (!%p28_p4) target bundleno = 23 (0x17), region = 20  ;;  %s109_s18 = sand.u32 (%p28_p4), 1, %s799_s10  }
  0x10   : > { %s701_s19 = sshll.u32 (%p28_p4), %s803_s11, 5  ;;  %s651_s20 = sshll.u32 (%p28_p4), %s109_s18, 6 }
  0x11   : > { %s114_s23 = scalar_lea.vmem (%p28_p4), %s1105_s0, %s701_s19  ;;  %s111_s24 = scalar_lea.vmem (%p28_p4), [#allocation2], %s651_s20 }
  0x12   : > { %v127_v0 = vld [vmem:[%s114_s23] sm:$0xff] (%p28_p4)  ;;  %v129_v1 = vld [vmem:[%s114_s23 + $0x8] sm:$0xff] (%p28_p4)  ;;  %v131_v2 = vld [vmem:[%s114_s23 + $0x10] sm:$0xff] (%p28_p4) }
  0x13   : > { %128 = vst [vmem:[%s111_s24] sm:$0xff] (%p28_p4), %v127_v0  ;;  %130 = vst [vmem:[%s111_s24 + $0x8] sm:$0xff] (%p28_p4), %v129_v1  ;;  %v133_v3 = vld [vmem:[%s114_s23 + $0x18] sm:$0xff] (%p28_p4)  ;;  %v135_v4 = vld [vmem:[%s114_s23 + $0x40] sm:$0xff] (%p28_p4) }
  0x14   : > { %132 = vst [vmem:[%s111_s24 + $0x10] sm:$0xff] %v131_v2  ;;  %v137_v5 = vld [vmem:[%s114_s23 + $0x48] sm:$0xff]  ;;  %134 = vst [vmem:[%s111_s24 + $0x18] sm:$0xff] %v133_v3  ;;  %v139_v6 = vld [vmem:[%s114_s23 + $0x50] sm:$0xff] }
  0x15   : > { %136 = vst [vmem:[%s111_s24 + $0x20] sm:$0xff] %v135_v4  ;;  %138 = vst [vmem:[%s111_s24 + $0x28] sm:$0xff] %v137_v5  ;;  %v141_v7 = vld [vmem:[%s114_s23 + $0x58] sm:$0xff] }
  0x16   : > { %140 = vst [vmem:[%s111_s24 + $0x30] sm:$0xff] %v139_v6  ;;  %142 = vst [vmem:[%s111_s24 + $0x38] sm:$0xff] %v141_v7 }
  0x17 PF: > { %p654_p7 = scmp.ge.s32.totalorder %s803_s11, 1  ;;  %p155_p8 = scmp.lt.s32.totalorder %s803_s11, 3 }
  0x19   : > { %p156_p9 = pnand %p654_p7, %p155_p8 }
  0x1a   : > { %s162_s25 = sand.u32 (!%p156_p9), 1, %s795_s9   ;;  %p188_p10 = scmp.lt.s32.totalorder (!%p156_p9), %s849_s12, 1 }
  0x1b   : > { %159 = sbr.rel (%p156_p9) target bundleno = 339 (0x153), region = 47  ;;  %s878_s26 = sshll.u32 (!%p156_p9), %s162_s25, 6 }
  0x1c   : > { %s880_s27 = sshll.u32 (!%p156_p9), %s162_s25, 4  ;;  %s164_s5 = scalar_lea.vmem (!%p156_p9), [#allocation2], %s878_s26 }
  0x1d   : > { %s986_s6 = scalar_lea.vmem (!%p156_p9), [#allocation3], %s880_s27  ;;  %s992_s7 = smov (!%p156_p9), 0  }
  0x20   : > { %s189_s28 = scalar_select %p188_p10, %s849_s12, 1  ;;  %v988_v40 = vmov 0.0   ;;  %v990_v41 = vmov 0.0  }
  0x22   : > { %s702_s29 = sshll.u32 %s189_s28, 8 }
  0x23   : > { %s886_s4 = scalar_lea.vmem %s1106_s1, %s702_s29 }
  0x24   : > { %v889_v8 = vld [vmem:[%s886_s4] sm:$0xff]  ;;  %v892_v9 = vld [vmem:[%s886_s4 + $0x8] sm:$0xff]  ;;  %v895_v10 = vld [vmem:[%s886_s4 + $0x10] sm:$0xff] }
  0x25   : > { %v898_v11 = vld [vmem:[%s886_s4 + $0x18] sm:$0xff]  ;;  %v901_v12 = vld [vmem:[%s886_s4 + $0x20] sm:$0xff]  ;;  %v904_v13 = vld [vmem:[%s886_s4 + $0x28] sm:$0xff] }
  0x26   : > { %v907_v14 = vld [vmem:[%s886_s4 + $0x30] sm:$0xff]  ;;  %v910_v15 = vld [vmem:[%s886_s4 + $0x38] sm:$0xff]  ;;  %v913_v16 = vld [vmem:[%s886_s4 + $0x40] sm:$0xff] }
  0x27   : > { %v916_v17 = vld [vmem:[%s886_s4 + $0x48] sm:$0xff]  ;;  %v919_v18 = vld [vmem:[%s886_s4 + $0x50] sm:$0xff]  ;;  %v922_v19 = vld [vmem:[%s886_s4 + $0x58] sm:$0xff] }
  0x28   : > { %v925_v20 = vld [vmem:[%s886_s4 + $0x60] sm:$0xff]  ;;  %v928_v21 = vld [vmem:[%s886_s4 + $0x68] sm:$0xff]  ;;  %v931_v22 = vld [vmem:[%s886_s4 + $0x70] sm:$0xff] }
  0x29   : > { %v934_v23 = vld [vmem:[%s886_s4 + $0x78] sm:$0xff]  ;;  %v937_v24 = vld [vmem:[%s886_s4 + $0x80] sm:$0xff]  ;;  %v940_v25 = vld [vmem:[%s886_s4 + $0x88] sm:$0xff] }
  0x2a   : > { %v943_v26 = vld [vmem:[%s886_s4 + $0x90] sm:$0xff]  ;;  %v946_v27 = vld [vmem:[%s886_s4 + $0x98] sm:$0xff]  ;;  %v949_v28 = vld [vmem:[%s886_s4 + $0xa0] sm:$0xff] }
  0x2b   : > { %v952_v29 = vld [vmem:[%s886_s4 + $0xa8] sm:$0xff]  ;;  %v955_v30 = vld [vmem:[%s886_s4 + $0xb0] sm:$0xff]  ;;  %v958_v31 = vld [vmem:[%s886_s4 + $0xb8] sm:$0xff] }
  0x2c   : > { %v961_v32 = vld [vmem:[%s886_s4 + $0xc0] sm:$0xff]  ;;  %v964_v33 = vld [vmem:[%s886_s4 + $0xc8] sm:$0xff]  ;;  %v967_v34 = vld [vmem:[%s886_s4 + $0xd0] sm:$0xff] }
  0x2d   : > { %v970_v35 = vld [vmem:[%s886_s4 + $0xd8] sm:$0xff]  ;;  %v973_v36 = vld [vmem:[%s886_s4 + $0xe0] sm:$0xff]  ;;  %v976_v37 = vld [vmem:[%s886_s4 + $0xe8] sm:$0xff] }
  0x2e   : > { %v979_v38 = vld [vmem:[%s886_s4 + $0xf0] sm:$0xff]  ;;  %v982_v39 = vld [vmem:[%s886_s4 + $0xf8] sm:$0xff] }
  0x2f LB: >> { %v690_v42 = vcombine.high %v973_v36, %v979_v38  ;;  %v689_v43 = vcombine.low %v973_v36, %v979_v38  ;;  %v686_v44 = vcombine.high %v961_v32, %v967_v34  ;;  %v692_v45 = vcombine.high %v976_v37, %v982_v39  ;;  %p234_p11 = scmp.eq.s32.totalorder %s849_s12, 0  ;;  %s235_s8 = ssub.s32 1, %s815_s7  ;;  %s815_s7 = sphi %s992_s7, %s231_s7   ;;  %v811_v41 = vphi %v990_v41, %v514_v41   ;;  %v807_v40 = vphi %v988_v40, %v512_v40  }
  0x30   : >> { %v691_v46 = vcombine.low %v976_v37, %v982_v39  ;;  %v688_v47 = vcombine.high %v964_v33, %v970_v35  ;;  %v685_v48 = vcombine.low %v961_v32, %v967_v34  ;;  %v682_v49 = vcombine.high %v949_v28, %v955_v30 }
  0x31   : >> { %405 = vmatprep.subr.bf16.mxu0 %v690_v42  ;;  %446 = vmatprep.subr.bf16.mxu1 %v692_v45  ;;  %v687_v50 = vcombine.low %v964_v33, %v970_v35  ;;  %v684_v51 = vcombine.high %v952_v29, %v958_v31  ;;  %v817_v52 = vmov 0   ;;  %v681_v53 = vcombine.low %v949_v28, %v955_v30  ;;  %s1072_s9 = scalar_select %p234_p11, %s815_s7, %s235_s8 }
  0x32   : >> { %406 = vmatpush1.bf16.msra.mxu0 %v689_v43  ;;  %447 = vmatpush1.bf16.msra.mxu1 %v691_v46  ;;  %v678_v54 = vcombine.high %v937_v24, %v943_v26  ;;  %v683_v55 = vcombine.low %v952_v29, %v958_v31  ;;  %v680_v56 = vcombine.high %v940_v25, %v946_v27  ;;  %s231_s7 = sadd.s32 1, %s815_s7  }
  0x33   : >> { %407 = vmatprep.subr.bf16.mxu0 %v686_v44  ;;  %448 = vmatprep.subr.bf16.mxu1 %v688_v47  ;;  %v677_v57 = vcombine.low %v937_v24, %v943_v26  ;;  %v674_v58 = vcombine.high %v925_v20, %v931_v22  ;;  %v679_v59 = vcombine.low %v940_v25, %v946_v27  ;;  %s703_s11 = sshll.u32 %s1072_s9, 5  ;;  %s696_s15 = sshll.u32 %s1072_s9, 3 }
  0x34   : >> { %437 = vmatprep.mubr.bf16.mxu0 %v817_v52  ;;  %478 = vmatprep.mubr.bf16.mxu1 %v817_v52  ;;  %v676_v60 = vcombine.high %v928_v21, %v934_v23  ;;  %v673_v61 = vcombine.low %v925_v20, %v931_v22  ;;  %v670_v62 = vcombine.high %v913_v16, %v919_v18  ;;  %s239_s14 = scalar_lea.vmem %s164_s5, %s703_s11 [#allocation2]  ;;  %s516_s18 = scalar_lea.vmem %s986_s6, %s696_s15 [#allocation3] }
  0x35   : >> { %v675_v63 = vcombine.low %v928_v21, %v934_v23  ;;  %v672_v0 = vcombine.high %v916_v17, %v922_v19  ;;  %v669_v1 = vcombine.low %v913_v16, %v919_v18  ;;  %v666_v2 = vcombine.high %v901_v12, %v907_v14  ;;  %v240_v46 = vld [vmem:[%s239_s14] sm:$0xff]  ;;  %p228_p12 = scmp.ge.s32.totalorder %s231_s7, 2  }
  0x36   : >> { %408 = vmatpush1.bf16.msra.mxu0 %v685_v48  ;;  %449 = vmatpush1.bf16.msra.mxu1 %v687_v50  ;;  %v671_v3 = vcombine.low %v916_v17, %v922_v19  ;;  %v668_v4 = vcombine.high %v904_v13, %v910_v15  ;;  %v665_v5 = vcombine.low %v901_v12, %v907_v14  ;;  %v241_v48 = vld [vmem:[%s239_s14 + $0x8] sm:$0xff] }
  0x37   : >> { %409 = vmatprep.subr.bf16.mxu0 %v682_v49  ;;  %450 = vmatprep.subr.bf16.mxu1 %v684_v51  ;;  %v662_v6 = vcombine.high %v889_v8, %v895_v10  ;;  %v667_v7 = vcombine.low %v904_v13, %v910_v15  ;;  %v664_v42 = vcombine.high %v892_v9, %v898_v11 }
  0x38   : >> { %v661_v43 = vcombine.low %v889_v8, %v895_v10  ;;  %v663_v44 = vcombine.low %v892_v9, %v898_v11  ;;  %v244_v45 = vpack.c.bf16 %v811_v41, %v811_v41 }
  0x3a   : >> { %410 = vmatpush1.bf16.msra.mxu0 %v681_v53  ;;  %451 = vmatpush1.bf16.msra.mxu1 %v683_v55 }
  0x3b   : >> { %411 = vmatprep.subr.bf16.mxu0 %v678_v54  ;;  %452 = vmatprep.subr.bf16.mxu1 %v680_v56 }
  0x3e   : >> { %412 = vmatpush1.bf16.msra.mxu0 %v677_v57  ;;  %453 = vmatpush1.bf16.msra.mxu1 %v679_v59  ;;  %v243_v59 = vld [vmem:[%s239_s14 + $0x18] sm:$0xff] }
  0x3f   : >> { %413 = vmatprep.subr.bf16.mxu0 %v674_v58  ;;  %454 = vmatprep.subr.bf16.mxu1 %v676_v60  ;;  %v242_v60 = vld [vmem:[%s239_s14 + $0x10] sm:$0xff] }
  0x42   : >> { %414 = vmatpush1.bf16.msra.mxu0 %v673_v61  ;;  %455 = vmatpush1.bf16.msra.mxu1 %v675_v63 }
  0x43   : >> { %415 = vmatprep.subr.bf16.mxu0 %v670_v62  ;;  %456 = vmatprep.subr.bf16.mxu1 %v672_v0 }
  0x46   : >> { %416 = vmatpush1.bf16.msra.mxu0 %v669_v1  ;;  %457 = vmatpush1.bf16.msra.mxu1 %v671_v3 }
  0x47   : >> { %417 = vmatprep.subr.bf16.mxu0 %v666_v2  ;;  %458 = vmatprep.subr.bf16.mxu1 %v668_v4 }
  0x4a   : >> { %418 = vmatpush1.bf16.msra.mxu0 %v665_v5  ;;  %459 = vmatpush1.bf16.msra.mxu1 %v667_v7 }
  0x4b   : >> { %419 = vmatprep.subr.bf16.mxu0 %v662_v6  ;;  %460 = vmatprep.subr.bf16.mxu1 %v664_v42 }
  0x4e   : >> { %420 = vmatpush1.bf16.msra.mxu0 %v661_v43  ;;  %461 = vmatpush1.bf16.msra.mxu1 %v663_v44 }
  0x51   : >> { %438 = vmatmul.mubr.bf16.vlgmr.msra.gmra.mxu0 %v244_v45  ;;  %479 = vmatmul.mubr.bf16.vlgmr.msra.gmra.mxu1 %v244_v45 }
 0x111   : >> { %v439_v47 = vpop.f32.mrf.mxu0  ;;  %v480_v50 = vpop.f32.mrf.mxu1 }
 0x112   : >> { %v487_v49 = vadd.f32 %v439_v47, %v240_v46  ;;  %v489_v62 = vadd.f32 %v480_v50, %v242_v60 }
 0x113   : >> { %v441_v51 = vpop.f32.mrf.mxu0  ;;  %v482_v53 = vpop.f32.mrf.mxu1 }
 0x114   : >> { %v693_v52 = vmul.f32 -1.442695, %v487_v49  ;;  %v488_v41 = vadd.f32 %v441_v51, %v241_v48  ;;  %v490_v61 = vadd.f32 %v482_v53, %v243_v59 }
 0x115   : >> { %v443_v54 = vpop.f32.mrf.mxu0  ;;  %v484_v56 = vpop.f32.mrf.mxu1 }
 0x116   : >> { %753 = vpow2.f32 %v693_v52  ;;  %v694_v55 = vmul.f32 -1.442695, %v488_v41  ;;  %v695_v63 = vmul.f32 -1.442695, %v490_v61 }
 0x117   : >> { %v444_v57 = vpop.f32.mrf.mxu0  ;;  %v485_v58 = vpop.f32.mrf.mxu1 }
 0x118   : >> { %755 = vpow2.f32 %v694_v55 }
 0x119   : >> { %757 = vtanh.f32 %v489_v62 }
 0x11a   : >> { %759 = vpow2.f32 %v695_v63 }
 0x123   : >> { %v754_v0 = vpop.eup %753 }
 0x124   : >> { %v494_v1 = vadd.f32 1.0, %v754_v0 }
 0x125   : >> { %v756_v2 = vpop.eup %755 }
 0x126   : >> { %761 = vrcp.f32 %v494_v1  ;;  %v500_v3 = vadd.f32 1.0, %v756_v2  ;;  %v758_v4 = vpop.eup %757 }
 0x127   : >> { %v760_v5 = vpop.eup %759 }
 0x128   : >> { %763 = vrcp.f32 %v500_v3  ;;  %v507_v42 = vadd.f32 1.0, %v760_v5 }
 0x12a   : >> { %765 = vrcp.f32 %v507_v42 }
 0x133   : >> { %v762_v6 = vpop.eup %761 }
 0x134   : >> { %v511_v44 = vmul.f32 %v762_v6, %v758_v4 }
 0x135   : >> { %v764_v7 = vpop.eup %763 }
 0x136   : >> { %v510_v43 = vmul.f32 %v807_v40, %v764_v7 }
 0x137   : >> { %v766_v45 = vpop.eup %765 }
 0x138   : >> { %v512_v40 = vadd.f32 %v511_v44, %v510_v43  }
 0x13a   : >> { %767 = vtanh.f32 %v512_v40 }
 0x146   : > { %230 = sbr.rel (!%p228_p12) target bundleno = 47 (0x2f), region = 136 }
 0x147   : >> { %v768_v46 = vpop.eup %767 }
 0x148   : >> { %v514_v41 = vmul.f32 %v768_v46, %v766_v45  }
 0x14a   : >> { %517 = vst [vmem:[%s516_s18] sm:$0xff] %v514_v41 }
 0x14b   : > { %524 = sbr.rel (!%p864_p5) target bundleno = 339 (0x153), region = 62  ;;  %s698_s19 = sshll.u32 (%p864_p5), %s849_s12, 3 }
 0x14c   : > { %s526_s22 = scalar_lea.vmem (%p864_p5), %s1107_s2, %s698_s19 }
 0x151   : > { %v557_v47 = vld [vmem:[%s986_s6] sm:$0xff]  ;;  %v559_v48 = vld [vmem:[%s986_s6 + $0x8] sm:$0xff] }
 0x152   : > { %558 = vst [vmem:[%s526_s22] sm:$0xff] %v557_v47  ;;  %560 = vst [vmem:[%s526_s22 + $0x10] sm:$0xff] %v559_v48 }
 0x153 PF: > { %p9_p13 = scmp.ge.s32.totalorder %s852_s13, 4   ;;  %s1109_s9 = smov %s799_s10 }
 0x154   : > { %s1110_s10 = smov %s862_s16  ;;  %s1111_s11 = smov %s852_s13 }
 0x155   :  { %11 = sbr.rel (!%p9_p13) target bundleno = 2 (0x2), region = 147 }

// kernel: asr_forward.9
= control target key start
LH: loop header
LB: loop body
LE: loop exit
PB: predicated region body
PF: predicated region fallthrough
CT: control target
= control target key end

     0   :  { %s2346_s0 = inlined_call_operand.vmem [shape: bf16[16,3200], index: 0, kind: input, shape index: {}]   ;;  %s2347_s1 = inlined_call_operand.vmem [shape: bf16[3200,1024], index: 1, kind: input, shape index: {}]   ;;  %s2348_s2 = inlined_call_operand.vmem [shape: f32[1,1024], index: 2, kind: input, shape index: {}]   ;;  %s2349_s3 = inlined_call_operand.vmem [shape: f32[16,1024], index: 3, kind: output, shape index: {}]  }
   0x1   :  { %2351 = sst [smem:[#allocation7_spill]] %s2346_s0 }
   0x2   :  { %2352 = sst [smem:[#allocation8_spill]] %s2347_s1 }
   0x3   :  { %s1911_s12 = smov 0   ;;  %s1913_s13 = smov 0  }
   0x4   :  { %s1915_s14 = smov 0   ;;  %s1917_s15 = smov 0  }
   0x5   :  { %s1919_s16 = smov 0   ;;  %s1921_s17 = smov 0  }
   0x6   :  { %s1923_s18 = smov 0   ;;  %s1925_s19 = smov 0  }
   0x7   :  { %s1927_s20 = smov 0   ;;  %s1929_s21 = smov 0  }
   0x8   :  { %s1931_s22 = smov 0  }
   0x9 LB: > { %s1470_s23 = sadd.s32 4294967295, %s1887_s22   ;;  %s25_s24 = sadd.s32 1, %s1879_s20  ;;  %s1887_s22 = sphi %s1931_s22, %s13_s22   ;;  %s1883_s21 = sphi %s1929_s21, %s2369_s21   ;;  %s1879_s20 = sphi %s1927_s20, %s2368_s20   ;;  %s1875_s19 = sphi %s1925_s19, %s2367_s19   ;;  %s1871_s18 = sphi %s1923_s18, %s2366_s18   ;;  %s1867_s17 = sphi %s1921_s17, %s2365_s17   ;;  %s1863_s16 = sphi %s1919_s16, %s2364_s16   ;;  %s1859_s15 = sphi %s1917_s15, %s2363_s15   ;;  %s1855_s14 = sphi %s1915_s14, %s2362_s14   ;;  %s1851_s13 = sphi %s1913_s13, %s2361_s13   ;;  %s1847_s12 = sphi %s1911_s12, %s2360_s12  }
   0xa   : > { %p26_p0 = scmp.ge.s32.totalorder %s25_s24, 5  ;;  %s28_s25 = sadd.s32 1, %s1883_s21 }
   0xb   : > { %s41_s26 = sadd.s32 1, %s1867_s17  ;;  %p48_p1 = scmp.ne.s32.totalorder %s1867_s17, %s1863_s16 }
   0xc   : > { %s2371_s24 = smov (%p26_p0, %s25_s24), 0  ;;  %s2373_s25 = smov (!%p26_p0, %s28_s25), %s1883_s21 }
   0xd   : > { %s37_s27 = ssub.s32 %s1879_s20, %s2371_s24  ;;  %p49_p2 = scmp.eq.s32.totalorder %s1887_s22, 0 }
   0xe   : > { %p30_p3 = scmp.ge.s32.totalorder %s2373_s25, 4  ;;  %p39_p4 = scmp.eq.s32.totalorder %s37_s27, 0 }
   0xf   : > { %p1978_p5 = por %p49_p2, %p48_p1  ;;  %s69_s29 = sadd.s32 1, %s1859_s15 }
  0x10   : > { %s2375_s25 = smov (%p30_p3, %s2373_s25), 0  ;;  %p76_p6 = scmp.ne.s32.totalorder %s1859_s15, %s1855_s14 }
  0x11   : > { %2354 = sst [smem:[#allocation6_spill]] %s2375_s25  ;;  %s65_s4 = ssub.s32 %s1883_s21, %s2375_s25 }
  0x12   : > { %s1986_s30 = scalar_select %p39_p4, %s1867_s17, %s41_s26  }
  0x13   : > { %s66_s5 = sor.u32 %s65_s4, %s37_s27  ;;  %p121_p7 = scmp.eq.s32.totalorder %s65_s4, 0 }
  0x14   : > { %p67_p8 = scmp.eq.s32.totalorder %s66_s5, 0  ;;  %p1992_p9 = por %p76_p6, %p49_p2 }
  0x15   : > { %s123_s7 = sadd.s32 1, %s1851_s13  ;;  %p133_p10 = scmp.ne.s32.totalorder %s1851_s13, %s1847_s12 }
  0x16   : > { %s2000_s8 = scalar_select %p67_p8, %s1859_s15, %s69_s29  }
  0x17   : > { %s2003_s9 = scalar_select %p121_p7, %s1851_s13, %s123_s7  }
  0x18   : > { %p134_p11 = scmp.eq.s32.totalorder %s1470_s23, 19  ;;  %p1473_p13 = scmp.ge.s32.totalorder %s1887_s22, 20 }
  0x1a   : > { %p2005_p12 = por %p134_p11, %p133_p10  ;;  %156 = sbr.rel (%p1473_p13) target bundleno = 133 (0x85), region = 16 }
  0x1f   : > { %159 = sbr.rel (!%p1978_p5) target bundleno = 43 (0x2b), region = 20  ;;  %s161_s11 = sand.u32 (%p1978_p5), 1, %s1867_s17  }
  0x20   : > { %s1577_s26 = smul.u32 (%p1978_p5), 20, %s1879_s20  ;;  %s2357_s0 = sld [smem:[#allocation7_spill]] (%p1978_p5) }
  0x21   : > { %s1580_s27 = smul.u32 (%p1978_p5), 40, %s161_s11 }
  0x23   : > { %s163_s23 = scalar_lea.vmem (%p1978_p5), [#allocation3], %s1580_s27 }
  0x26   : > { %s169_s5 = scalar_lea.vmem %s2357_s0, %s1577_s26 }
  0x27   : > { %v184_v0 = vld [vmem:[%s169_s5] sm:$0xff]  ;;  %v186_v1 = vld [vmem:[%s169_s5 + $0x8] sm:$0xff]  ;;  %v1475_v4 = vld [vmem:[%s169_s5 + $0x10] sm:$0xf] }
  0x28   : > { %v188_v2 = vld [vmem:[%s169_s5 + $0x64] sm:$0xff]  ;;  %185 = vst [vmem:[%s163_s23] sm:$0xff] %v184_v0  ;;  %187 = vst [vmem:[%s163_s23 + $0x8] sm:$0xff] %v186_v1  ;;  %v190_v3 = vld [vmem:[%s169_s5 + $0x6c] sm:$0xff] }
  0x29   : > { %189 = vst [vmem:[%s163_s23 + $0x14] sm:$0xff] %v188_v2  ;;  %v1477_v5 = vld [vmem:[%s169_s5 + $0x74] sm:$0xf]  ;;  %191 = vst [vmem:[%s163_s23 + $0x1c] sm:$0xff] %v190_v3 }
  0x2a   : > { %1476 = vst [vmem:[%s163_s23 + $0x10] sm:$0xf] %v1475_v4  ;;  %1478 = vst [vmem:[%s163_s23 + $0x24] sm:$0xf] %v1477_v5 }
  0x2b PF: > { %209 = sbr.rel (!%p1992_p9) target bundleno = 133 (0x85), region = 46  ;;  %s211_s28 = sand.u32 (%p1992_p9), 1, %s1859_s15  }
  0x2c   : > { %s1581_s7 = smul.u32 (%p1992_p9), 640, %s211_s28  ;;  %s1479_s11 = sshll.u32 (%p1992_p9), %s1883_s21, 1 }
  0x2d   : > { %s1578_s26 = smul.u32 (%p1992_p9), 640, %s1879_s20  ;;  %s2358_s1 = sld [smem:[#allocation8_spill]] (%p1992_p9) }
  0x2e   : > { %s2030_s6 = scalar_lea.vmem (%p1992_p9), [#allocation4], %s1581_s7 }
  0x2f   : > { %s217_s27 = sadd.s32 (%p1992_p9), %s1578_s26, %s1479_s11 }
  0x30   : > { %s1481_s29 = sshll.u32 %s217_s27, 2 }
  0x33   : > { %s2025_s5 = scalar_lea.vmem %s2358_s1, %s1481_s29 }
  0x34   : > { %v406_v6 = vld [vmem:[%s2025_s5] sm:$0xff] }
  0x35   : > { %v408_v7 = vld [vmem:[%s2025_s5 + $0x20] sm:$0xff]  ;;  %407 = vst [vmem:[%s2030_s6] sm:$0xff] %v406_v6 }
  0x36   : > { %v410_v8 = vld [vmem:[%s2025_s5 + $0x40] sm:$0xff]  ;;  %409 = vst [vmem:[%s2030_s6 + $0x8] sm:$0xff] %v408_v7 }
  0x37   : > { %411 = vst [vmem:[%s2030_s6 + $0x10] sm:$0xff] %v410_v8  ;;  %v412_v9 = vld [vmem:[%s2025_s5 + $0x60] sm:$0xff] }
  0x38   : > { %v414_v10 = vld [vmem:[%s2025_s5 + $0x80] sm:$0xff]  ;;  %413 = vst [vmem:[%s2030_s6 + $0x18] sm:$0xff] %v412_v9 }
  0x39   : > { %v416_v11 = vld [vmem:[%s2025_s5 + $0xa0] sm:$0xff]  ;;  %415 = vst [vmem:[%s2030_s6 + $0x20] sm:$0xff] %v414_v10 }
  0x3a   : > { %417 = vst [vmem:[%s2030_s6 + $0x28] sm:$0xff] %v416_v11  ;;  %v418_v12 = vld [vmem:[%s2025_s5 + $0xc0] sm:$0xff] }
  0x3b   : > { %v420_v13 = vld [vmem:[%s2025_s5 + $0xe0] sm:$0xff]  ;;  %419 = vst [vmem:[%s2030_s6 + $0x30] sm:$0xff] %v418_v12 }
  0x3c   : > { %v422_v14 = vld [vmem:[%s2025_s5 + $0x100] sm:$0xff]  ;;  %421 = vst [vmem:[%s2030_s6 + $0x38] sm:$0xff] %v420_v13 }
  0x3d   : > { %423 = vst [vmem:[%s2030_s6 + $0x40] sm:$0xff] %v422_v14  ;;  %v424_v15 = vld [vmem:[%s2025_s5 + $0x120] sm:$0xff] }
  0x3e   : > { %v426_v16 = vld [vmem:[%s2025_s5 + $0x140] sm:$0xff]  ;;  %425 = vst [vmem:[%s2030_s6 + $0x48] sm:$0xff] %v424_v15 }
  0x3f   : > { %v428_v17 = vld [vmem:[%s2025_s5 + $0x160] sm:$0xff]  ;;  %427 = vst [vmem:[%s2030_s6 + $0x50] sm:$0xff] %v426_v16 }
  0x40   : > { %429 = vst [vmem:[%s2030_s6 + $0x58] sm:$0xff] %v428_v17  ;;  %v430_v18 = vld [vmem:[%s2025_s5 + $0x180] sm:$0xff] }
  0x41   : > { %v432_v19 = vld [vmem:[%s2025_s5 + $0x1a0] sm:$0xff]  ;;  %431 = vst [vmem:[%s2030_s6 + $0x60] sm:$0xff] %v430_v18 }
  0x42   : > { %v434_v20 = vld [vmem:[%s2025_s5 + $0x1c0] sm:$0xff]  ;;  %433 = vst [vmem:[%s2030_s6 + $0x68] sm:$0xff] %v432_v19 }
  0x43   : > { %435 = vst [vmem:[%s2030_s6 + $0x70] sm:$0xff] %v434_v20  ;;  %v436_v21 = vld [vmem:[%s2025_s5 + $0x1e0] sm:$0xff] }
  0x44   : > { %v438_v22 = vld [vmem:[%s2025_s5 + $0x200] sm:$0xff]  ;;  %437 = vst [vmem:[%s2030_s6 + $0x78] sm:$0xff] %v436_v21 }
  0x45   : > { %v440_v23 = vld [vmem:[%s2025_s5 + $0x220] sm:$0xff]  ;;  %439 = vst [vmem:[%s2030_s6 + $0x80] sm:$0xff] %v438_v22 }
  0x46   : > { %441 = vst [vmem:[%s2030_s6 + $0x88] sm:$0xff] %v440_v23  ;;  %v442_v24 = vld [vmem:[%s2025_s5 + $0x240] sm:$0xff] }
  0x47   : > { %v444_v25 = vld [vmem:[%s2025_s5 + $0x260] sm:$0xff]  ;;  %443 = vst [vmem:[%s2030_s6 + $0x90] sm:$0xff] %v442_v24 }
  0x48   : > { %v446_v26 = vld [vmem:[%s2025_s5 + $0x280] sm:$0xff]  ;;  %445 = vst [vmem:[%s2030_s6 + $0x98] sm:$0xff] %v444_v25 }
  0x49   : > { %447 = vst [vmem:[%s2030_s6 + $0xa0] sm:$0xff] %v446_v26  ;;  %v448_v27 = vld [vmem:[%s2025_s5 + $0x2a0] sm:$0xff] }
  0x4a   : > { %v450_v28 = vld [vmem:[%s2025_s5 + $0x2c0] sm:$0xff]  ;;  %449 = vst [vmem:[%s2030_s6 + $0xa8] sm:$0xff] %v448_v27 }
  0x4b   : > { %v452_v29 = vld [vmem:[%s2025_s5 + $0x2e0] sm:$0xff]  ;;  %451 = vst [vmem:[%s2030_s6 + $0xb0] sm:$0xff] %v450_v28 }
  0x4c   : > { %453 = vst [vmem:[%s2030_s6 + $0xb8] sm:$0xff] %v452_v29  ;;  %v454_v30 = vld [vmem:[%s2025_s5 + $0x300] sm:$0xff] }
  0x4d   : > { %v456_v31 = vld [vmem:[%s2025_s5 + $0x320] sm:$0xff]  ;;  %455 = vst [vmem:[%s2030_s6 + $0xc0] sm:$0xff] %v454_v30 }
  0x4e   : > { %v458_v32 = vld [vmem:[%s2025_s5 + $0x340] sm:$0xff]  ;;  %457 = vst [vmem:[%s2030_s6 + $0xc8] sm:$0xff] %v456_v31 }
  0x4f   : > { %459 = vst [vmem:[%s2030_s6 + $0xd0] sm:$0xff] %v458_v32  ;;  %v460_v33 = vld [vmem:[%s2025_s5 + $0x360] sm:$0xff] }
  0x50   : > { %v462_v34 = vld [vmem:[%s2025_s5 + $0x380] sm:$0xff]  ;;  %461 = vst [vmem:[%s2030_s6 + $0xd8] sm:$0xff] %v460_v33 }
  0x51   : > { %v464_v35 = vld [vmem:[%s2025_s5 + $0x3a0] sm:$0xff]  ;;  %463 = vst [vmem:[%s2030_s6 + $0xe0] sm:$0xff] %v462_v34 }
  0x52   : > { %465 = vst [vmem:[%s2030_s6 + $0xe8] sm:$0xff] %v464_v35  ;;  %v466_v36 = vld [vmem:[%s2025_s5 + $0x3c0] sm:$0xff] }
  0x53   : > { %v468_v37 = vld [vmem:[%s2025_s5 + $0x3e0] sm:$0xff]  ;;  %467 = vst [vmem:[%s2030_s6 + $0xf0] sm:$0xff] %v466_v36 }
  0x54   : > { %v470_v38 = vld [vmem:[%s2025_s5 + $0x400] sm:$0xff]  ;;  %469 = vst [vmem:[%s2030_s6 + $0xf8] sm:$0xff] %v468_v37 }
  0x55   : > { %471 = vst [vmem:[%s2030_s6 + $0x100] sm:$0xff] %v470_v38  ;;  %v472_v39 = vld [vmem:[%s2025_s5 + $0x420] sm:$0xff] }
  0x56   : > { %v474_v40 = vld [vmem:[%s2025_s5 + $0x440] sm:$0xff]  ;;  %473 = vst [vmem:[%s2030_s6 + $0x108] sm:$0xff] %v472_v39 }
  0x57   : > { %v476_v41 = vld [vmem:[%s2025_s5 + $0x460] sm:$0xff]  ;;  %475 = vst [vmem:[%s2030_s6 + $0x110] sm:$0xff] %v474_v40 }
  0x58   : > { %477 = vst [vmem:[%s2030_s6 + $0x118] sm:$0xff] %v476_v41  ;;  %v478_v42 = vld [vmem:[%s2025_s5 + $0x480] sm:$0xff] }
  0x59   : > { %v480_v43 = vld [vmem:[%s2025_s5 + $0x4a0] sm:$0xff]  ;;  %479 = vst [vmem:[%s2030_s6 + $0x120] sm:$0xff] %v478_v42 }
  0x5a   : > { %v482_v44 = vld [vmem:[%s2025_s5 + $0x4c0] sm:$0xff]  ;;  %481 = vst [vmem:[%s2030_s6 + $0x128] sm:$0xff] %v480_v43 }
  0x5b   : > { %483 = vst [vmem:[%s2030_s6 + $0x130] sm:$0xff] %v482_v44  ;;  %v484_v45 = vld [vmem:[%s2025_s5 + $0x4e0] sm:$0xff] }
  0x5c   : > { %v486_v46 = vld [vmem:[%s2025_s5 + $0x500] sm:$0xff]  ;;  %485 = vst [vmem:[%s2030_s6 + $0x138] sm:$0xff] %v484_v45 }
  0x5d   : > { %v488_v47 = vld [vmem:[%s2025_s5 + $0x520] sm:$0xff]  ;;  %487 = vst [vmem:[%s2030_s6 + $0x140] sm:$0xff] %v486_v46 }
  0x5e   : > { %489 = vst [vmem:[%s2030_s6 + $0x148] sm:$0xff] %v488_v47  ;;  %v490_v48 = vld [vmem:[%s2025_s5 + $0x540] sm:$0xff] }
  0x5f   : > { %v492_v49 = vld [vmem:[%s2025_s5 + $0x560] sm:$0xff]  ;;  %491 = vst [vmem:[%s2030_s6 + $0x150] sm:$0xff] %v490_v48 }
  0x60   : > { %v494_v50 = vld [vmem:[%s2025_s5 + $0x580] sm:$0xff]  ;;  %493 = vst [vmem:[%s2030_s6 + $0x158] sm:$0xff] %v492_v49 }
  0x61   : > { %495 = vst [vmem:[%s2030_s6 + $0x160] sm:$0xff] %v494_v50  ;;  %v496_v51 = vld [vmem:[%s2025_s5 + $0x5a0] sm:$0xff] }
  0x62   : > { %v498_v52 = vld [vmem:[%s2025_s5 + $0x5c0] sm:$0xff]  ;;  %497 = vst [vmem:[%s2030_s6 + $0x168] sm:$0xff] %v496_v51 }
  0x63   : > { %v500_v53 = vld [vmem:[%s2025_s5 + $0x5e0] sm:$0xff]  ;;  %499 = vst [vmem:[%s2030_s6 + $0x170] sm:$0xff] %v498_v52 }
  0x64   : > { %501 = vst [vmem:[%s2030_s6 + $0x178] sm:$0xff] %v500_v53  ;;  %v502_v54 = vld [vmem:[%s2025_s5 + $0x600] sm:$0xff] }
  0x65   : > { %v504_v55 = vld [vmem:[%s2025_s5 + $0x620] sm:$0xff]  ;;  %503 = vst [vmem:[%s2030_s6 + $0x180] sm:$0xff] %v502_v54 }
  0x66   : > { %v506_v56 = vld [vmem:[%s2025_s5 + $0x640] sm:$0xff]  ;;  %505 = vst [vmem:[%s2030_s6 + $0x188] sm:$0xff] %v504_v55 }
  0x67   : > { %507 = vst [vmem:[%s2030_s6 + $0x190] sm:$0xff] %v506_v56  ;;  %v508_v57 = vld [vmem:[%s2025_s5 + $0x660] sm:$0xff] }
  0x68   : > { %v510_v58 = vld [vmem:[%s2025_s5 + $0x680] sm:$0xff]  ;;  %509 = vst [vmem:[%s2030_s6 + $0x198] sm:$0xff] %v508_v57 }
  0x69   : > { %v512_v59 = vld [vmem:[%s2025_s5 + $0x6a0] sm:$0xff]  ;;  %511 = vst [vmem:[%s2030_s6 + $0x1a0] sm:$0xff] %v510_v58 }
  0x6a   : > { %513 = vst [vmem:[%s2030_s6 + $0x1a8] sm:$0xff] %v512_v59  ;;  %v514_v60 = vld [vmem:[%s2025_s5 + $0x6c0] sm:$0xff] }
  0x6b   : > { %v516_v61 = vld [vmem:[%s2025_s5 + $0x6e0] sm:$0xff]  ;;  %515 = vst [vmem:[%s2030_s6 + $0x1b0] sm:$0xff] %v514_v60 }
  0x6c   : > { %v518_v62 = vld [vmem:[%s2025_s5 + $0x700] sm:$0xff]  ;;  %517 = vst [vmem:[%s2030_s6 + $0x1b8] sm:$0xff] %v516_v61 }
  0x6d   : > { %519 = vst [vmem:[%s2030_s6 + $0x1c0] sm:$0xff] %v518_v62  ;;  %v520_v63 = vld [vmem:[%s2025_s5 + $0x720] sm:$0xff] }
  0x6e   : > { %v522_v0 = vld [vmem:[%s2025_s5 + $0x740] sm:$0xff]  ;;  %521 = vst [vmem:[%s2030_s6 + $0x1c8] sm:$0xff] %v520_v63 }
  0x6f   : > { %v524_v1 = vld [vmem:[%s2025_s5 + $0x760] sm:$0xff]  ;;  %523 = vst [vmem:[%s2030_s6 + $0x1d0] sm:$0xff] %v522_v0 }
  0x70   : > { %525 = vst [vmem:[%s2030_s6 + $0x1d8] sm:$0xff] %v524_v1  ;;  %v526_v2 = vld [vmem:[%s2025_s5 + $0x780] sm:$0xff] }
  0x71   : > { %v528_v3 = vld [vmem:[%s2025_s5 + $0x7a0] sm:$0xff]  ;;  %527 = vst [vmem:[%s2030_s6 + $0x1e0] sm:$0xff] %v526_v2 }
  0x72   : > { %v530_v4 = vld [vmem:[%s2025_s5 + $0x7c0] sm:$0xff]  ;;  %529 = vst [vmem:[%s2030_s6 + $0x1e8] sm:$0xff] %v528_v3 }
  0x73   : > { %531 = vst [vmem:[%s2030_s6 + $0x1f0] sm:$0xff] %v530_v4  ;;  %v532_v5 = vld [vmem:[%s2025_s5 + $0x7e0] sm:$0xff] }
  0x74   : > { %v534_v6 = vld [vmem:[%s2025_s5 + $0x800] sm:$0xff]  ;;  %533 = vst [vmem:[%s2030_s6 + $0x1f8] sm:$0xff] %v532_v5 }
  0x75   : > { %v536_v7 = vld [vmem:[%s2025_s5 + $0x820] sm:$0xff]  ;;  %535 = vst [vmem:[%s2030_s6 + $0x200] sm:$0xff] %v534_v6 }
  0x76   : > { %537 = vst [vmem:[%s2030_s6 + $0x208] sm:$0xff] %v536_v7  ;;  %v538_v8 = vld [vmem:[%s2025_s5 + $0x840] sm:$0xff] }
  0x77   : > { %v540_v9 = vld [vmem:[%s2025_s5 + $0x860] sm:$0xff]  ;;  %539 = vst [vmem:[%s2030_s6 + $0x210] sm:$0xff] %v538_v8 }
  0x78   : > { %v542_v10 = vld [vmem:[%s2025_s5 + $0x880] sm:$0xff]  ;;  %541 = vst [vmem:[%s2030_s6 + $0x218] sm:$0xff] %v540_v9 }
  0x79   : > { %543 = vst [vmem:[%s2030_s6 + $0x220] sm:$0xff] %v542_v10  ;;  %v544_v11 = vld [vmem:[%s2025_s5 + $0x8a0] sm:$0xff] }
  0x7a   : > { %v546_v12 = vld [vmem:[%s2025_s5 + $0x8c0] sm:$0xff]  ;;  %545 = vst [vmem:[%s2030_s6 + $0x228] sm:$0xff] %v544_v11 }
  0x7b   : > { %v548_v13 = vld [vmem:[%s2025_s5 + $0x8e0] sm:$0xff]  ;;  %547 = vst [vmem:[%s2030_s6 + $0x230] sm:$0xff] %v546_v12 }
  0x7c   : > { %549 = vst [vmem:[%s2030_s6 + $0x238] sm:$0xff] %v548_v13  ;;  %v550_v14 = vld [vmem:[%s2025_s5 + $0x900] sm:$0xff] }
  0x7d   : > { %v552_v15 = vld [vmem:[%s2025_s5 + $0x920] sm:$0xff]  ;;  %551 = vst [vmem:[%s2030_s6 + $0x240] sm:$0xff] %v550_v14 }
  0x7e   : > { %v554_v16 = vld [vmem:[%s2025_s5 + $0x940] sm:$0xff]  ;;  %553 = vst [vmem:[%s2030_s6 + $0x248] sm:$0xff] %v552_v15 }
  0x7f   : > { %555 = vst [vmem:[%s2030_s6 + $0x250] sm:$0xff] %v554_v16  ;;  %v556_v17 = vld [vmem:[%s2025_s5 + $0x960] sm:$0xff] }
  0x80   : > { %v558_v18 = vld [vmem:[%s2025_s5 + $0x980] sm:$0xff]  ;;  %557 = vst [vmem:[%s2030_s6 + $0x258] sm:$0xff] %v556_v17 }
  0x81   : > { %v560_v19 = vld [vmem:[%s2025_s5 + $0x9a0] sm:$0xff]  ;;  %559 = vst [vmem:[%s2030_s6 + $0x260] sm:$0xff] %v558_v18 }
  0x82   : > { %561 = vst [vmem:[%s2030_s6 + $0x268] sm:$0xff] %v560_v19  ;;  %v562_v20 = vld [vmem:[%s2025_s5 + $0x9c0] sm:$0xff] }
  0x83   : > { %v564_v21 = vld [vmem:[%s2025_s5 + $0x9e0] sm:$0xff]  ;;  %563 = vst [vmem:[%s2030_s6 + $0x270] sm:$0xff] %v562_v20 }
  0x84   : > { %565 = vst [vmem:[%s2030_s6 + $0x278] sm:$0xff] %v564_v21 }
  0x85 PF: > { %p1482_p0 = scmp.ge.s32.totalorder %s1887_s22, 1  ;;  %p578_p1 = scmp.lt.s32.totalorder %s1887_s22, 21 }
  0x87   : > { %p579_p2 = pnand %p1482_p0, %p578_p1 }
  0x88   : > { %s585_s0 = sand.u32 (!%p579_p2), 1, %s1863_s16   ;;  %s592_s23 = sand.u32 (!%p579_p2), 1, %s1855_s14  }
  0x89   : > { %582 = sbr.rel (%p579_p2) target bundleno = 473 (0x1d9), region = 88  ;;  %s619_s7 = sand.u32 (!%p579_p2), 1, %s1847_s12  }
  0x8a   : > { %s1582_s28 = smul.u32 (!%p579_p2), 40, %s585_s0  ;;  %s1483_s26 = sshll.u32 (!%p579_p2), %s619_s7, 5 }
  0x8b   : > { %s1583_s11 = smul.u32 (!%p579_p2), 640, %s592_s23  ;;  %s1484_s27 = sshll.u32 (!%p579_p2), %s1875_s19, 1 }
  0x8c   : > { %p627_p3 = scmp.lt.s32.totalorder (!%p579_p2), %s1484_s27, 7  ;;  %s2201_s6 = scalar_lea.vmem (!%p579_p2), [#allocation3], %s1582_s28 }
  0x8d   : > { %s2203_s1 = scalar_lea.vmem (!%p579_p2), [#allocation4], %s1583_s11  ;;  %s2205_s25 = scalar_lea.vmem (!%p579_p2), [#allocation5], %s1483_s26 }
  0x8e   : > { %s2377_s27 = smov (!%p627_p3, %s1484_s27), 7  ;;  %p1485_p4 = scmp.ne.s32.totalorder %s1871_s18, 0 }
  0x8f   : > { %s629_s5 = scalar_lea.vmem %s2348_s2, %s2377_s27 }
  0x90   : > { %637 = sbr.rel (%p1485_p4) target bundleno = 152 (0x98), region = 100 }
  0x95   : > { %v1889_v22 = vmov 0.0  }
  0x96   : > { %638 = vst [vmem:[#allocation2 + $0x10] sm:$0xff] %v1889_v22  ;;  %639 = vst [vmem:[#allocation2] sm:$0xff] %v1889_v22 }
  0x97   : > { %640 = vst [vmem:[#allocation2 + $0x18] sm:$0xff] %v1889_v22  ;;  %641 = vst [vmem:[#allocation2 + $0x8] sm:$0xff] %v1889_v22 }
  0x98 PF: > { %v1674_v23 = vld [vmem:[%s2203_s1 + $0x74] ss:$8 sps:$4 sm:$0xff]   ;;  %v1678_v25 = vld [vmem:[%s2203_s1 + $0x70] ss:$8 sps:$4 sm:$0xff]   ;;  %v1680_v27 = vld [vmem:[%s2203_s1 + $0x64] ss:$8 sps:$4 sm:$0xff]  }
  0x99   : > { %v1676_v24 = vld [vmem:[%s2203_s1 + $0x174] ss:$8 sps:$4 sm:$0xff]   ;;  %1158 = vmatprep.subr.bf16.mxu0 %v1674_v23  ;;  %v1679_v26 = vld [vmem:[%s2203_s1 + $0x170] ss:$8 sps:$4 sm:$0xff]   ;;  %v1682_v28 = vld [vmem:[%s2203_s1 + $0x164] ss:$8 sps:$4 sm:$0xff]  }
  0x9a   : > { %1201 = vmatprep.subr.bf16.mxu1 %v1676_v24  ;;  %1159 = vmatpush1.bf16.msra.mxu0 %v1678_v25  ;;  %v1684_v29 = vld [vmem:[%s2203_s1 + $0x60] ss:$8 sps:$4 sm:$0xff]   ;;  %v1686_v31 = vld [vmem:[%s2203_s1 + $0x54] ss:$8 sps:$4 sm:$0xff]   ;;  %v1690_v33 = vld [vmem:[%s2203_s1 + $0x50] ss:$8 sps:$4 sm:$0xff]  }
  0x9b   : > { %1202 = vmatpush1.bf16.msra.mxu1 %v1679_v26  ;;  %1160 = vmatprep.subr.bf16.mxu0 %v1680_v27  ;;  %v1685_v30 = vld [vmem:[%s2203_s1 + $0x160] ss:$8 sps:$4 sm:$0xff]   ;;  %v1688_v32 = vld [vmem:[%s2203_s1 + $0x154] ss:$8 sps:$4 sm:$0xff]   ;;  %v1691_v34 = vld [vmem:[%s2203_s1 + $0x150] ss:$8 sps:$4 sm:$0xff]  }
  0x9c   : > { %1203 = vmatprep.subr.bf16.mxu1 %v1682_v28  ;;  %v1692_v35 = vld [vmem:[%s2203_s1 + $0x44] ss:$8 sps:$4 sm:$0xff]   ;;  %v1696_v37 = vld [vmem:[%s2203_s1 + $0x40] ss:$8 sps:$4 sm:$0xff]   ;;  %v1698_v39 = vld [vmem:[%s2203_s1 + $0x34] ss:$8 sps:$4 sm:$0xff]  }
  0x9d   : > { %v1694_v36 = vld [vmem:[%s2203_s1 + $0x144] ss:$8 sps:$4 sm:$0xff]   ;;  %v1697_v38 = vld [vmem:[%s2203_s1 + $0x140] ss:$8 sps:$4 sm:$0xff]   ;;  %v1700_v40 = vld [vmem:[%s2203_s1 + $0x134] ss:$8 sps:$4 sm:$0xff]  }
  0x9e   : > { %1161 = vmatpush1.bf16.msra.mxu0 %v1684_v29  ;;  %v1702_v41 = vld [vmem:[%s2203_s1 + $0x30] ss:$8 sps:$4 sm:$0xff]   ;;  %v1704_v43 = vld [vmem:[%s2203_s1 + $0x24] ss:$8 sps:$4 sm:$0xff]   ;;  %v1708_v45 = vld [vmem:[%s2203_s1 + $0x20] ss:$8 sps:$4 sm:$0xff]  }
  0x9f   : > { %1204 = vmatpush1.bf16.msra.mxu1 %v1685_v30  ;;  %1162 = vmatprep.subr.bf16.mxu0 %v1686_v31  ;;  %v1703_v42 = vld [vmem:[%s2203_s1 + $0x130] ss:$8 sps:$4 sm:$0xff]   ;;  %v1706_v44 = vld [vmem:[%s2203_s1 + $0x124] ss:$8 sps:$4 sm:$0xff]   ;;  %v1709_v46 = vld [vmem:[%s2203_s1 + $0x120] ss:$8 sps:$4 sm:$0xff]  }
  0xa0   : > { %1205 = vmatprep.subr.bf16.mxu1 %v1688_v32  ;;  %v1710_v47 = vld [vmem:[%s2203_s1 + $0x14] ss:$8 sps:$4 sm:$0xff]   ;;  %v1714_v49 = vld [vmem:[%s2203_s1 + $0x10] ss:$8 sps:$4 sm:$0xff]   ;;  %v1716_v51 = vld [vmem:[%s2203_s1 + $0x4] ss:$8 sps:$4 sm:$0xff]  }
  0xa1   : > { %v1712_v48 = vld [vmem:[%s2203_s1 + $0x114] ss:$8 sps:$4 sm:$0xff]   ;;  %v1715_v50 = vld [vmem:[%s2203_s1 + $0x110] ss:$8 sps:$4 sm:$0xff]   ;;  %v1718_v52 = vld [vmem:[%s2203_s1 + $0x104] ss:$8 sps:$4 sm:$0xff]  }
  0xa2   : > { %1163 = vmatpush1.bf16.msra.mxu0 %v1690_v33  ;;  %v1720_v53 = vld [vmem:[%s2203_s1] ss:$8 sps:$4 sm:$0xff]   ;;  %v1722_v55 = vld [vmem:[%s2203_s1 + $0xf4] ss:$8 sps:$4 sm:$0xff]   ;;  %v1726_v57 = vld [vmem:[%s2203_s1 + $0xf0] ss:$8 sps:$4 sm:$0xff]  }
  0xa3   : > { %1206 = vmatpush1.bf16.msra.mxu1 %v1691_v34  ;;  %1164 = vmatprep.subr.bf16.mxu0 %v1692_v35  ;;  %v1721_v54 = vld [vmem:[%s2203_s1 + $0x100] ss:$8 sps:$4 sm:$0xff]   ;;  %v1724_v56 = vld [vmem:[%s2203_s1 + $0x1f4] ss:$8 sps:$4 sm:$0xff]   ;;  %v1727_v58 = vld [vmem:[%s2203_s1 + $0x1f0] ss:$8 sps:$4 sm:$0xff]  }
  0xa4   : > { %1207 = vmatprep.subr.bf16.mxu1 %v1694_v36  ;;  %v1728_v59 = vld [vmem:[%s2203_s1 + $0xe4] ss:$8 sps:$4 sm:$0xff]   ;;  %v1732_v61 = vld [vmem:[%s2203_s1 + $0xe0] ss:$8 sps:$4 sm:$0xff]   ;;  %v1734_v63 = vld [vmem:[%s2203_s1 + $0xd4] ss:$8 sps:$4 sm:$0xff]  }
  0xa5   : > { %v1730_v60 = vld [vmem:[%s2203_s1 + $0x1e4] ss:$8 sps:$4 sm:$0xff]   ;;  %v1733_v62 = vld [vmem:[%s2203_s1 + $0x1e0] ss:$8 sps:$4 sm:$0xff]   ;;  %v1736_v0 = vld [vmem:[%s2203_s1 + $0x1d4] ss:$8 sps:$4 sm:$0xff]  }
  0xa6   : > { %1165 = vmatpush1.bf16.msra.mxu0 %v1696_v37  ;;  %v1738_v1 = vld [vmem:[%s2203_s1 + $0xd0] ss:$8 sps:$4 sm:$0xff]   ;;  %v1740_v3 = vld [vmem:[%s2203_s1 + $0xc4] ss:$8 sps:$4 sm:$0xff]   ;;  %v1744_v5 = vld [vmem:[%s2203_s1 + $0xc0] ss:$8 sps:$4 sm:$0xff]  }
  0xa7   : > { %1208 = vmatpush1.bf16.msra.mxu1 %v1697_v38  ;;  %1166 = vmatprep.subr.bf16.mxu0 %v1698_v39  ;;  %v1739_v2 = vld [vmem:[%s2203_s1 + $0x1d0] ss:$8 sps:$4 sm:$0xff]   ;;  %v1742_v4 = vld [vmem:[%s2203_s1 + $0x1c4] ss:$8 sps:$4 sm:$0xff]   ;;  %v1745_v6 = vld [vmem:[%s2203_s1 + $0x1c0] ss:$8 sps:$4 sm:$0xff]  }
  0xa8   : > { %1209 = vmatprep.subr.bf16.mxu1 %v1700_v40  ;;  %v1746_v7 = vld [vmem:[%s2203_s1 + $0xb4] ss:$8 sps:$4 sm:$0xff]   ;;  %v1750_v11 = vld [vmem:[%s2203_s1 + $0xb0] ss:$8 sps:$4 sm:$0xff]   ;;  %v1752_v13 = vld [vmem:[%s2203_s1 + $0xa4] ss:$8 sps:$4 sm:$0xff]  }
  0xa9   : > { %v1772_v8 = vld [vmem:[%s2201_s6 + $0x4] ss:$20 sps:$4 sm:$0xff]   ;;  %v1775_v10 = vld [vmem:[%s2201_s6 + $0xc] ss:$20 sps:$4 sm:$0xff]   ;;  %v1773_v27 = vld [vmem:[%s2201_s6 + $0x8] ss:$20 sps:$4 sm:$0xff]  }
  0xaa   : > { %1167 = vmatpush1.bf16.msra.mxu0 %v1702_v41  ;;  %v1748_v9 = vld [vmem:[%s2203_s1 + $0x1b4] ss:$8 sps:$4 sm:$0xff]   ;;  %1190 = vmatprep.mubr.bf16.mxu0 %v1772_v8  ;;  %v1751_v12 = vld [vmem:[%s2203_s1 + $0x1b0] ss:$8 sps:$4 sm:$0xff]   ;;  %v1754_v14 = vld [vmem:[%s2203_s1 + $0x1a4] ss:$8 sps:$4 sm:$0xff]  }
  0xab   : > { %1210 = vmatpush1.bf16.msra.mxu1 %v1703_v42  ;;  %1168 = vmatprep.subr.bf16.mxu0 %v1704_v43  ;;  %v1756_v15 = vld [vmem:[%s2203_s1 + $0xa0] ss:$8 sps:$4 sm:$0xff]   ;;  %v1758_v17 = vld [vmem:[%s2203_s1 + $0x94] ss:$8 sps:$4 sm:$0xff]   ;;  %v1762_v19 = vld [vmem:[%s2203_s1 + $0x90] ss:$8 sps:$4 sm:$0xff]  }
  0xac   : > { %1211 = vmatprep.subr.bf16.mxu1 %v1706_v44  ;;  %1233 = vmatprep.mubr.bf16.mxu1 %v1775_v10  ;;  %v1757_v16 = vld [vmem:[%s2203_s1 + $0x1a0] ss:$8 sps:$4 sm:$0xff]   ;;  %v1760_v18 = vld [vmem:[%s2203_s1 + $0x194] ss:$8 sps:$4 sm:$0xff]   ;;  %v1763_v20 = vld [vmem:[%s2203_s1 + $0x190] ss:$8 sps:$4 sm:$0xff]  }
  0xad   : > { %v1764_v21 = vld [vmem:[%s2203_s1 + $0x84] ss:$8 sps:$4 sm:$0xff]   ;;  %v1768_v23 = vld [vmem:[%s2203_s1 + $0x80] ss:$8 sps:$4 sm:$0xff]   ;;  %v1778_v25 = vld [vmem:[%s2203_s1 + $0x274] ss:$8 sps:$4 sm:$0xff]  }
  0xae   : > { %1169 = vmatpush1.bf16.msra.mxu0 %v1708_v45  ;;  %v1766_v22 = vld [vmem:[%s2203_s1 + $0x184] ss:$8 sps:$4 sm:$0xff]   ;;  %v1769_v24 = vld [vmem:[%s2203_s1 + $0x180] ss:$8 sps:$4 sm:$0xff]   ;;  %v1776_v28 = vld [vmem:[%s2203_s1 + $0x270] ss:$8 sps:$4 sm:$0xff]  }
  0xaf   : > { %1212 = vmatpush1.bf16.msra.mxu1 %v1709_v46  ;;  %1170 = vmatprep.subr.bf16.mxu0 %v1710_v47  ;;  %v1770_v26 = vld [vmem:[%s2201_s6] ss:$20 sps:$4 sm:$0xff]   ;;  %v1779_v30 = vld [vmem:[%s2203_s1 + $0x260] ss:$8 sps:$4 sm:$0xff]   ;;  %v1890_v31 = vmov 0   ;;  %p1571_p5 = scmp.ne.s32.totalorder %s1871_s18, 4 }
  0xb0   : > { %1213 = vmatprep.subr.bf16.mxu1 %v1712_v48  ;;  %v1781_v29 = vld [vmem:[%s2203_s1 + $0x264] ss:$8 sps:$4 sm:$0xff]   ;;  %v1784_v32 = vld [vmem:[%s2203_s1 + $0x254] ss:$8 sps:$4 sm:$0xff]   ;;  %v1782_v33 = vld [vmem:[%s2203_s1 + $0x250] ss:$8 sps:$4 sm:$0xff]  }
  0xb1   : > { %v1787_v34 = vld [vmem:[%s2203_s1 + $0x244] ss:$8 sps:$4 sm:$0xff]   ;;  %v1785_v35 = vld [vmem:[%s2203_s1 + $0x240] ss:$8 sps:$4 sm:$0xff]   ;;  %v1790_v36 = vld [vmem:[%s2203_s1 + $0x234] ss:$8 sps:$4 sm:$0xff]  }
  0xb2   : > { %1171 = vmatpush1.bf16.msra.mxu0 %v1714_v49  ;;  %v1788_v37 = vld [vmem:[%s2203_s1 + $0x230] ss:$8 sps:$4 sm:$0xff]   ;;  %v1793_v38 = vld [vmem:[%s2203_s1 + $0x224] ss:$8 sps:$4 sm:$0xff]   ;;  %v1791_v39 = vld [vmem:[%s2203_s1 + $0x220] ss:$8 sps:$4 sm:$0xff]  }
  0xb3   : > { %1214 = vmatpush1.bf16.msra.mxu1 %v1715_v50  ;;  %1172 = vmatprep.subr.bf16.mxu0 %v1716_v51  ;;  %v1796_v40 = vld [vmem:[%s2203_s1 + $0x214] ss:$8 sps:$4 sm:$0xff]   ;;  %v1794_v41 = vld [vmem:[%s2203_s1 + $0x210] ss:$8 sps:$4 sm:$0xff]   ;;  %v1799_v42 = vld [vmem:[%s2203_s1 + $0x204] ss:$8 sps:$4 sm:$0xff]  }
  0xb4   : > { %1215 = vmatprep.subr.bf16.mxu1 %v1718_v52  ;;  %v1797_v43 = vld [vmem:[%s2203_s1 + $0x200] ss:$8 sps:$4 sm:$0xff]  }
  0xb5   : > { %v1800_v44 = vld [vmem:[%s2201_s6 + $0x10] ss:$20 sps:$4 sm:$0xff]  }
  0xb6   : > { %1173 = vmatpush1.bf16.msra.mxu0 %v1720_v53  ;;  %v642_v53 = vld [vmem:[#allocation2 + $0x10] sm:$0xff] }
  0xb7   : > { %1216 = vmatpush1.bf16.msra.mxu1 %v1721_v54  ;;  %1174 = vmatprep.subr.bf16.mxu0 %v1722_v55 }
  0xb8   : > { %1217 = vmatprep.subr.bf16.mxu1 %v1724_v56 }
  0xba   : > { %1175 = vmatpush2.bf16.msra.mxu0 %v1726_v57 }
  0xbb   : > { %1218 = vmatpush2.bf16.msra.mxu1 %v1727_v58  ;;  %1176 = vmatprep.subr.bf16.mxu0 %v1728_v59  ;;  %v643_v58 = vld [vmem:[#allocation2] sm:$0xff] }
  0xbc   : > { %1219 = vmatprep.subr.bf16.mxu1 %v1730_v60 }
  0xbe   : > { %1177 = vmatpush2.bf16.msra.mxu0 %v1732_v61 }
  0xbf   : > { %1220 = vmatpush2.bf16.msra.mxu1 %v1733_v62  ;;  %1178 = vmatprep.subr.bf16.mxu0 %v1734_v63  ;;  %v644_v63 = vld [vmem:[#allocation2 + $0x18] sm:$0xff] }
  0xc0   : > { %1221 = vmatprep.subr.bf16.mxu1 %v1736_v0 }
  0xc2   : > { %1179 = vmatpush2.bf16.msra.mxu0 %v1738_v1 }
  0xc3   : > { %1222 = vmatpush2.bf16.msra.mxu1 %v1739_v2  ;;  %1180 = vmatprep.subr.bf16.mxu0 %v1740_v3 }
  0xc4   : > { %1223 = vmatprep.subr.bf16.mxu1 %v1742_v4  ;;  %v645_v4 = vld [vmem:[#allocation2 + $0x8] sm:$0xff] }
  0xc6   : > { %1181 = vmatpush2.bf16.msra.mxu0 %v1744_v5 }
  0xc7   : > { %1224 = vmatpush2.bf16.msra.mxu1 %v1745_v6  ;;  %1182 = vmatprep.subr.bf16.mxu0 %v1746_v7 }
  0xc8   : > { %1225 = vmatprep.subr.bf16.mxu1 %v1748_v9 }
  0xca   : > { %1183 = vmatpush2.bf16.msra.mxu0 %v1750_v11 }
  0xcb   : > { %1226 = vmatpush2.bf16.msra.mxu1 %v1751_v12  ;;  %1184 = vmatprep.subr.bf16.mxu0 %v1752_v13 }
  0xcc   : > { %1227 = vmatprep.subr.bf16.mxu1 %v1754_v14 }
  0xce   : > { %1185 = vmatpush2.bf16.msra.mxu0 %v1756_v15 }
  0xcf   : > { %1228 = vmatpush2.bf16.msra.mxu1 %v1757_v16  ;;  %1186 = vmatprep.subr.bf16.mxu0 %v1758_v17 }
  0xd0   : > { %1229 = vmatprep.subr.bf16.mxu1 %v1760_v18 }
  0xd2   : > { %1187 = vmatpush2.bf16.msra.mxu0 %v1762_v19 }
  0xd3   : > { %1230 = vmatpush2.bf16.msra.mxu1 %v1763_v20  ;;  %1188 = vmatprep.subr.bf16.mxu0 %v1764_v21 }
  0xd4   : > { %1231 = vmatprep.subr.bf16.mxu1 %v1766_v22 }
  0xd6   : > { %1189 = vmatpush2.bf16.msra.mxu0 %v1768_v23 }
  0xd7   : > { %1232 = vmatpush2.bf16.msra.mxu1 %v1769_v24  ;;  %1244 = vmatprep.subr.bf16.mxu0 %v1778_v25 }
  0xd9   : > { %1191 = vmatmul.mubr.bf16.vlgmr.msra.gmra.mxu0 %v1770_v26 }
  0xda   : > { %1234 = vmatmul.mubr.bf16.vlgmr.msra.gmra.mxu1 %v1773_v27  ;;  %1245 = vmatpush1.bf16.msra.mxu0 %v1776_v28 }
  0xdb   : > { %1276 = vmatprep.mubr.bf16.mxu0 %v1890_v31  ;;  %1246 = vmatprep.subr.bf16.mxu0 %v1781_v29 }
  0xde   : > { %1247 = vmatpush1.bf16.msra.mxu0 %v1779_v30 }
  0xdf   : > { %1248 = vmatprep.subr.bf16.mxu0 %v1784_v32 }
  0xe2   : > { %1249 = vmatpush1.bf16.msra.mxu0 %v1782_v33 }
  0xe3   : > { %1250 = vmatprep.subr.bf16.mxu0 %v1787_v34 }
  0xe6   : > { %1251 = vmatpush1.bf16.msra.mxu0 %v1785_v35 }
  0xe7   : > { %1252 = vmatprep.subr.bf16.mxu0 %v1790_v36 }
  0xea   : > { %1253 = vmatpush1.bf16.msra.mxu0 %v1788_v37 }
  0xeb   : > { %1254 = vmatprep.subr.bf16.mxu0 %v1793_v38 }
  0xee   : > { %1255 = vmatpush1.bf16.msra.mxu0 %v1791_v39 }
  0xef   : > { %1256 = vmatprep.subr.bf16.mxu0 %v1796_v40 }
  0xf2   : > { %1257 = vmatpush1.bf16.msra.mxu0 %v1794_v41 }
  0xf3   : > { %1258 = vmatprep.subr.bf16.mxu0 %v1799_v42 }
  0xf6   : > { %1259 = vmatpush1.bf16.msra.mxu0 %v1797_v43 }
  0xf9   : > { %1277 = vmatmul.mubr.bf16.vlgmr.msra.gmra.mxu0 %v1800_v44 }
 0x199   : > { %v1192_v45 = vpop.f32.mrf.mxu0 }
 0x19a   : > { %v1235_v46 = vpop.f32.mrf.mxu1 }
 0x19b   : > { %v1194_v47 = vpop.f32.mrf.mxu0  ;;  %v1236_v52 = vadd.f32 %v1235_v46, %v1192_v45 }
 0x19c   : > { %v1237_v48 = vpop.f32.mrf.mxu1 }
 0x19d   : > { %v1196_v49 = vpop.f32.mrf.mxu0  ;;  %v1238_v55 = vadd.f32 %v1237_v48, %v1194_v47 }
 0x19e   : > { %v1239_v50 = vpop.f32.mrf.mxu1 }
 0x19f   : > { %v1198_v51 = vpop.f32.mrf.mxu0  ;;  %v1240_v60 = vadd.f32 %v1239_v50, %v1196_v49 }
 0x1a0   : > { %v1241_v57 = vpop.f32.mrf.mxu1 }
 0x1a1   : > { %v1242_v1 = vadd.f32 %v1241_v57, %v1198_v51 }
 0x1b9   : > { %v1278_v54 = vpop.f32.mrf.mxu0 }
 0x1ba   : > { %v1279_v56 = vadd.f32 %v1278_v54, %v1236_v52 }
 0x1bb   : > { %v1280_v59 = vpop.f32.mrf.mxu0 }
 0x1bc   : > { %v1287_v61 = vadd.f32 %v1279_v56, %v642_v53  ;;  %v1281_v62 = vadd.f32 %v1280_v59, %v1238_v55 }
 0x1bd   : > { %v1282_v0 = vpop.f32.mrf.mxu0 }
 0x1be   : > { %1291 = vst [vmem:[#allocation2 + $0x10] sm:$0xff] %v1287_v61  ;;  %v1288_v2 = vadd.f32 %v1281_v62, %v643_v58  ;;  %v1283_v3 = vadd.f32 %v1282_v0, %v1240_v60 }
 0x1bf   : > { %v1284_v5 = vpop.f32.mrf.mxu0 }
 0x1c0   : > { %1292 = vst [vmem:[#allocation2] sm:$0xff] %v1288_v2  ;;  %v1289_v6 = vadd.f32 %v1283_v3, %v644_v63  ;;  %v1285_v7 = vadd.f32 %v1284_v5, %v1242_v1  ;;  %1298 = sbr.rel (%p1571_p5) target bundleno = 465 (0x1d1), region = 104 }
 0x1c2   : > { %1293 = vst [vmem:[#allocation2 + $0x18] sm:$0xff] %v1289_v6  ;;  %v1290_v8 = vadd.f32 %v1285_v7, %v645_v4 }
 0x1c4   : > { %1294 = vst [vmem:[#allocation2 + $0x8] sm:$0xff] %v1290_v8 }
 0x1c5   : > { %v1305_v9 = vlaneseq  ;;  %v1303_v11 = vld [vmem:[%s629_s5] sm:$0x3]  ;;  %v1299_v12 = vld [vmem:[#allocation2 + $0x10] sm:$0xff] }
 0x1c7   : > { %v1306_v10 = vshrl.u32 %v1305_v9, 7  ;;  %v1300_v15 = vld [vmem:[#allocation2] sm:$0xff] }
 0x1c9   : > { %v1307_v13 = vsub.s32 0, %v1306_v10  ;;  %v1311_v14 = vsub.s32 1, %v1306_v10  ;;  %v1301_v16 = vld [vmem:[#allocation2 + $0x18] sm:$0xff] }
 0x1cb   : > { %v1302_v17 = vld [vmem:[#allocation2 + $0x8] sm:$0xff]  ;;  %v1308_v18 = vrot.slane %v1303_v11, %v1307_v13  ;;  %v1312_v19 = vrot.slane %v1303_v11, %v1311_v14 }
 0x1cd   : > { %v1315_v20 = vadd.f32 %v1308_v18, %v1299_v12  ;;  %v1316_v21 = vadd.f32 %v1312_v19, %v1300_v15  ;;  %v1317_v22 = vadd.f32 %v1308_v18, %v1301_v16  ;;  %v1318_v23 = vadd.f32 %v1312_v19, %v1302_v17 }
 0x1cf   : > { %1319 = vst [vmem:[%s2205_s25] sm:$0xff] %v1315_v20  ;;  %1320 = vst [vmem:[%s2205_s25 + $0x8] sm:$0xff] %v1316_v21 }
 0x1d0   : > { %1321 = vst [vmem:[%s2205_s25 + $0x10] sm:$0xff] %v1317_v22  ;;  %1322 = vst [vmem:[%s2205_s25 + $0x18] sm:$0xff] %v1318_v23 }
 0x1d1 PF: > { %1329 = sbr.rel (!%p2005_p12) target bundleno = 473 (0x1d9), region = 108  ;;  %s1579_s14 = sshll.u32 (%p2005_p12), %s1875_s19, 4 }
 0x1d2   : > { %s1335_s0 = scalar_lea.vmem (%p2005_p12), %s2349_s3, %s1579_s14 }
 0x1d6   : > { %v1348_v24 = vld [vmem:[%s2205_s25] sm:$0xff]  ;;  %v1350_v25 = vld [vmem:[%s2205_s25 + $0x8] sm:$0xff] }
 0x1d7   : > { %v1352_v26 = vld [vmem:[%s2205_s25 + $0x10] sm:$0xff]  ;;  %v1354_v27 = vld [vmem:[%s2205_s25 + $0x18] sm:$0xff]  ;;  %1349 = vst [vmem:[%s1335_s0] sm:$0xff] %v1348_v24  ;;  %1351 = vst [vmem:[%s1335_s0 + $0x8] sm:$0xff] %v1350_v25 }
 0x1d8   : > { %1353 = vst [vmem:[%s1335_s0 + $0x40] sm:$0xff] %v1352_v26  ;;  %1355 = vst [vmem:[%s1335_s0 + $0x48] sm:$0xff] %v1354_v27 }
 0x1d9 PF: > { %s13_s22 = sadd.s32 1, %s1887_s22   ;;  %s2359_s10 = sld [smem:[#allocation6_spill]] }
 0x1da   : > { %p10_p6 = scmp.ge.s32.totalorder %s13_s22, 22   ;;  %s2360_s12 = smov %s1851_s13 }
 0x1db   : > { %s2361_s13 = smov %s2003_s9  ;;  %s2362_s14 = smov %s1859_s15 }
 0x1dc   : > { %s2363_s15 = smov %s2000_s8  ;;  %s2364_s16 = smov %s1867_s17 }
 0x1dd   : > { %s2365_s17 = smov %s1986_s30  ;;  %s2366_s18 = smov %s1879_s20 }
 0x1de   : > { %s2367_s19 = smov %s1883_s21  ;;  %s2368_s20 = smov %s2371_s24 }
 0x1df   : > { %s2369_s21 = smov %s2359_s10  ;;  %12 = sbr.rel (!%p10_p6) target bundleno = 9 (0x9), region = 179 }

// kernel: asr_forward.11
= control target key start
LH: loop header
LB: loop body
LE: loop exit
PB: predicated region body
PF: predicated region fallthrough
CT: control target
= control target key end

     0   :  { %s1053_s12 = smov 0   ;;  %s1055_s13 = smov 0   ;;  %s1241_s0 = inlined_call_operand.vmem [shape: bf16[16,256], index: 0, kind: input, shape index: {}]   ;;  %s1242_s1 = inlined_call_operand.vmem [shape: bf16[256,1024], index: 1, kind: input, shape index: {}]   ;;  %s1243_s2 = inlined_call_operand.vmem [shape: f32[1,1024], index: 2, kind: input, shape index: {}]   ;;  %s1244_s3 = inlined_call_operand.vmem [shape: f32[16,1024], index: 3, kind: output, shape index: {}]  }
   0x1   :  { %s1057_s14 = smov 0   ;;  %s1059_s15 = smov 0  }
   0x2   :  { %s1061_s16 = smov 0  }
   0x3 LB: > { %s28_s17 = sadd.s32 1, %s1027_s15  ;;  %s849_s18 = sadd.s32 4294967295, %s1031_s16   ;;  %s1031_s16 = sphi %s1061_s16, %s13_s16   ;;  %s1027_s15 = sphi %s1059_s15, %s1249_s15   ;;  %s1023_s14 = sphi %s1057_s14, %s1248_s14   ;;  %s1019_s13 = sphi %s1055_s13, %s1247_s13   ;;  %s1015_s12 = sphi %s1053_s12, %s1246_s12  }
   0x4   : > { %p30_p0 = scmp.ge.s32.totalorder %s28_s17, 4  ;;  %p76_p1 = scmp.ne.s32.totalorder %s1019_s13, %s1015_s12 }
   0x5   : > { %p77_p2 = scmp.eq.s32.totalorder %s1031_s16, 0  ;;  %p134_p4 = scmp.eq.s32.totalorder %s849_s18, 3 }
   0x6   : > { %s1251_s17 = smov (%p30_p0, %s28_s17), 0  ;;  %s69_s20 = sadd.s32 1, %s1019_s13 }
   0x7   : > { %p78_p3 = por %p77_p2, %p76_p1  ;;  %s65_s19 = ssub.s32 %s1027_s15, %s1251_s17 }
   0x8   : > { %p67_p5 = scmp.eq.s32.totalorder %s65_s19, 0  ;;  %p1088_p6 = por %p134_p4, %p76_p1 }
   0x9   : > { %p853_p7 = scmp.ge.s32.totalorder %s1031_s16, 4 }
   0xa   : > { %s1093_s22 = scalar_select %p67_p5, %s1019_s13, %s69_s20  }
   0xb   : > { %171 = sbr.rel (%p853_p7) target bundleno = 52 (0x34), region = 20 }
  0x10   : > { %174 = sbr.rel (!%p78_p3) target bundleno = 52 (0x34), region = 24  ;;  %s176_s23 = sand.u32 (%p78_p3), 1, %s1019_s13  }
  0x11   : > { %s900_s24 = sshll.u32 (%p78_p3), %s1027_s15, 3  ;;  %s854_s25 = sshll.u32 (%p78_p3), %s176_s23, 8 }
  0x12   : > { %s1101_s28 = scalar_lea.vmem (%p78_p3), %s1242_s1, %s900_s24  ;;  %s1106_s29 = scalar_lea.vmem (%p78_p3), [#allocation3], %s854_s25 }
  0x13   : > { %v275_v0 = vld [vmem:[%s1101_s28] sm:$0xff] (%p78_p3) }
  0x14   : > { %v277_v1 = vld [vmem:[%s1101_s28 + $0x20] sm:$0xff] (%p78_p3)  ;;  %276 = vst [vmem:[%s1106_s29] sm:$0xff] (%p78_p3), %v275_v0 }
  0x15   : > { %v279_v2 = vld [vmem:[%s1101_s28 + $0x40] sm:$0xff]  ;;  %278 = vst [vmem:[%s1106_s29 + $0x8] sm:$0xff] %v277_v1 }
  0x16   : > { %280 = vst [vmem:[%s1106_s29 + $0x10] sm:$0xff] %v279_v2  ;;  %v281_v3 = vld [vmem:[%s1101_s28 + $0x60] sm:$0xff] }
  0x17   : > { %v283_v4 = vld [vmem:[%s1101_s28 + $0x80] sm:$0xff]  ;;  %282 = vst [vmem:[%s1106_s29 + $0x18] sm:$0xff] %v281_v3 }
  0x18   : > { %v285_v5 = vld [vmem:[%s1101_s28 + $0xa0] sm:$0xff]  ;;  %284 = vst [vmem:[%s1106_s29 + $0x20] sm:$0xff] %v283_v4 }
  0x19   : > { %286 = vst [vmem:[%s1106_s29 + $0x28] sm:$0xff] %v285_v5  ;;  %v287_v6 = vld [vmem:[%s1101_s28 + $0xc0] sm:$0xff] }
  0x1a   : > { %v289_v7 = vld [vmem:[%s1101_s28 + $0xe0] sm:$0xff]  ;;  %288 = vst [vmem:[%s1106_s29 + $0x30] sm:$0xff] %v287_v6 }
  0x1b   : > { %v291_v8 = vld [vmem:[%s1101_s28 + $0x100] sm:$0xff]  ;;  %290 = vst [vmem:[%s1106_s29 + $0x38] sm:$0xff] %v289_v7 }
  0x1c   : > { %292 = vst [vmem:[%s1106_s29 + $0x40] sm:$0xff] %v291_v8  ;;  %v293_v9 = vld [vmem:[%s1101_s28 + $0x120] sm:$0xff] }
  0x1d   : > { %v295_v10 = vld [vmem:[%s1101_s28 + $0x140] sm:$0xff]  ;;  %294 = vst [vmem:[%s1106_s29 + $0x48] sm:$0xff] %v293_v9 }
  0x1e   : > { %v297_v11 = vld [vmem:[%s1101_s28 + $0x160] sm:$0xff]  ;;  %296 = vst [vmem:[%s1106_s29 + $0x50] sm:$0xff] %v295_v10 }
  0x1f   : > { %298 = vst [vmem:[%s1106_s29 + $0x58] sm:$0xff] %v297_v11  ;;  %v299_v12 = vld [vmem:[%s1101_s28 + $0x180] sm:$0xff] }
  0x20   : > { %v301_v13 = vld [vmem:[%s1101_s28 + $0x1a0] sm:$0xff]  ;;  %300 = vst [vmem:[%s1106_s29 + $0x60] sm:$0xff] %v299_v12 }
  0x21   : > { %v303_v14 = vld [vmem:[%s1101_s28 + $0x1c0] sm:$0xff]  ;;  %302 = vst [vmem:[%s1106_s29 + $0x68] sm:$0xff] %v301_v13 }
  0x22   : > { %304 = vst [vmem:[%s1106_s29 + $0x70] sm:$0xff] %v303_v14  ;;  %v305_v15 = vld [vmem:[%s1101_s28 + $0x1e0] sm:$0xff] }
  0x23   : > { %v307_v16 = vld [vmem:[%s1101_s28 + $0x200] sm:$0xff]  ;;  %306 = vst [vmem:[%s1106_s29 + $0x78] sm:$0xff] %v305_v15 }
  0x24   : > { %v309_v17 = vld [vmem:[%s1101_s28 + $0x220] sm:$0xff]  ;;  %308 = vst [vmem:[%s1106_s29 + $0x80] sm:$0xff] %v307_v16 }
  0x25   : > { %310 = vst [vmem:[%s1106_s29 + $0x88] sm:$0xff] %v309_v17  ;;  %v311_v18 = vld [vmem:[%s1101_s28 + $0x240] sm:$0xff] }
  0x26   : > { %v313_v19 = vld [vmem:[%s1101_s28 + $0x260] sm:$0xff]  ;;  %312 = vst [vmem:[%s1106_s29 + $0x90] sm:$0xff] %v311_v18 }
  0x27   : > { %v315_v20 = vld [vmem:[%s1101_s28 + $0x280] sm:$0xff]  ;;  %314 = vst [vmem:[%s1106_s29 + $0x98] sm:$0xff] %v313_v19 }
  0x28   : > { %316 = vst [vmem:[%s1106_s29 + $0xa0] sm:$0xff] %v315_v20  ;;  %v317_v21 = vld [vmem:[%s1101_s28 + $0x2a0] sm:$0xff] }
  0x29   : > { %v319_v22 = vld [vmem:[%s1101_s28 + $0x2c0] sm:$0xff]  ;;  %318 = vst [vmem:[%s1106_s29 + $0xa8] sm:$0xff] %v317_v21 }
  0x2a   : > { %v321_v23 = vld [vmem:[%s1101_s28 + $0x2e0] sm:$0xff]  ;;  %320 = vst [vmem:[%s1106_s29 + $0xb0] sm:$0xff] %v319_v22 }
  0x2b   : > { %322 = vst [vmem:[%s1106_s29 + $0xb8] sm:$0xff] %v321_v23  ;;  %v323_v24 = vld [vmem:[%s1101_s28 + $0x300] sm:$0xff] }
  0x2c   : > { %v325_v25 = vld [vmem:[%s1101_s28 + $0x320] sm:$0xff]  ;;  %324 = vst [vmem:[%s1106_s29 + $0xc0] sm:$0xff] %v323_v24 }
  0x2d   : > { %v327_v26 = vld [vmem:[%s1101_s28 + $0x340] sm:$0xff]  ;;  %326 = vst [vmem:[%s1106_s29 + $0xc8] sm:$0xff] %v325_v25 }
  0x2e   : > { %328 = vst [vmem:[%s1106_s29 + $0xd0] sm:$0xff] %v327_v26  ;;  %v329_v27 = vld [vmem:[%s1101_s28 + $0x360] sm:$0xff] }
  0x2f   : > { %v331_v28 = vld [vmem:[%s1101_s28 + $0x380] sm:$0xff]  ;;  %330 = vst [vmem:[%s1106_s29 + $0xd8] sm:$0xff] %v329_v27 }
  0x30   : > { %v333_v29 = vld [vmem:[%s1101_s28 + $0x3a0] sm:$0xff]  ;;  %332 = vst [vmem:[%s1106_s29 + $0xe0] sm:$0xff] %v331_v28 }
  0x31   : > { %334 = vst [vmem:[%s1106_s29 + $0xe8] sm:$0xff] %v333_v29  ;;  %v335_v30 = vld [vmem:[%s1101_s28 + $0x3c0] sm:$0xff] }
  0x32   : > { %v337_v31 = vld [vmem:[%s1101_s28 + $0x3e0] sm:$0xff]  ;;  %336 = vst [vmem:[%s1106_s29 + $0xf0] sm:$0xff] %v335_v30 }
  0x33   : > { %338 = vst [vmem:[%s1106_s29 + $0xf8] sm:$0xff] %v337_v31 }
  0x34 PF: > { %p857_p8 = scmp.ge.s32.totalorder %s1031_s16, 1  ;;  %p351_p9 = scmp.lt.s32.totalorder %s1031_s16, 5 }
  0x36   : > { %p352_p10 = pnand %p857_p8, %p351_p9 }
  0x37   : > { %s358_s30 = sand.u32 (!%p352_p10), 1, %s1015_s12   ;;  %s860_s10 = sshll.u32 (!%p352_p10), %s1023_s14, 1 }
  0x38   : > { %355 = sbr.rel (%p352_p10) target bundleno = 336 (0x150), region = 66  ;;  %s858_s4 = sshll.u32 (!%p352_p10), %s358_s30, 8 }
  0x39   : > { %s1177_s7 = scalar_lea.vmem (!%p352_p10), [#allocation3], %s858_s4  ;;  %p409_p11 = scmp.lt.s32.totalorder (!%p352_p10), %s860_s10, 7 }
  0x3a   : > { %s859_s20 = sshll.u32 (!%p352_p10), %s358_s30, 5 }
  0x3b   : > { %s393_s23 = scalar_lea.vmem (!%p352_p10), [#allocation4], %s859_s20 }
  0x3d   : > { %v992_v32 = vld [vmem:[%s1241_s0 + $0x4] ss:$8 sps:$4 sm:$0xff]   ;;  %v942_v33 = vld [vmem:[%s1177_s7 + $0x74] ss:$8 sps:$4 sm:$0xff]   ;;  %v944_v34 = vld [vmem:[%s1177_s7 + $0x70] ss:$8 sps:$4 sm:$0xff]   ;;  %v691_v2 = vlaneseq }
  0x3e   : > { %663 = vmatprep.mubr.bf16.mxu0 %v992_v32  ;;  %631 = vmatprep.subr.bf16.mxu0 %v942_v33  ;;  %v945_v35 = vld [vmem:[%s1177_s7 + $0x64] ss:$8 sps:$4 sm:$0xff]   ;;  %v947_v36 = vld [vmem:[%s1177_s7 + $0x60] ss:$8 sps:$4 sm:$0xff]   ;;  %v948_v37 = vld [vmem:[%s1177_s7 + $0x54] ss:$8 sps:$4 sm:$0xff]  }
  0x3f   : > { %632 = vmatpush1.bf16.msra.mxu0 %v944_v34  ;;  %v950_v38 = vld [vmem:[%s1177_s7 + $0x50] ss:$8 sps:$4 sm:$0xff]   ;;  %v951_v39 = vld [vmem:[%s1177_s7 + $0x44] ss:$8 sps:$4 sm:$0xff]   ;;  %v953_v40 = vld [vmem:[%s1177_s7 + $0x40] ss:$8 sps:$4 sm:$0xff]  }
  0x40   : > { %633 = vmatprep.subr.bf16.mxu0 %v945_v35  ;;  %v954_v41 = vld [vmem:[%s1177_s7 + $0x34] ss:$8 sps:$4 sm:$0xff]   ;;  %v956_v42 = vld [vmem:[%s1177_s7 + $0x30] ss:$8 sps:$4 sm:$0xff]   ;;  %v957_v43 = vld [vmem:[%s1177_s7 + $0x24] ss:$8 sps:$4 sm:$0xff]  }
  0x41   : > { %v959_v44 = vld [vmem:[%s1177_s7 + $0x20] ss:$8 sps:$4 sm:$0xff]   ;;  %v960_v45 = vld [vmem:[%s1177_s7 + $0x14] ss:$8 sps:$4 sm:$0xff]   ;;  %v962_v46 = vld [vmem:[%s1177_s7 + $0x10] ss:$8 sps:$4 sm:$0xff]  }
  0x42   : > { %v963_v47 = vld [vmem:[%s1177_s7 + $0x4] ss:$8 sps:$4 sm:$0xff]   ;;  %v965_v48 = vld [vmem:[%s1177_s7] ss:$8 sps:$4 sm:$0xff]   ;;  %v966_v49 = vld [vmem:[%s1177_s7 + $0xf4] ss:$8 sps:$4 sm:$0xff]  }
  0x43   : > { %634 = vmatpush1.bf16.msra.mxu0 %v947_v36  ;;  %v968_v50 = vld [vmem:[%s1177_s7 + $0xf0] ss:$8 sps:$4 sm:$0xff]   ;;  %v969_v51 = vld [vmem:[%s1177_s7 + $0xe4] ss:$8 sps:$4 sm:$0xff]   ;;  %v971_v52 = vld [vmem:[%s1177_s7 + $0xe0] ss:$8 sps:$4 sm:$0xff]  }
  0x44   : > { %635 = vmatprep.subr.bf16.mxu0 %v948_v37  ;;  %v972_v53 = vld [vmem:[%s1177_s7 + $0xd4] ss:$8 sps:$4 sm:$0xff]   ;;  %v974_v54 = vld [vmem:[%s1177_s7 + $0xd0] ss:$8 sps:$4 sm:$0xff]   ;;  %v975_v55 = vld [vmem:[%s1177_s7 + $0xc4] ss:$8 sps:$4 sm:$0xff]  }
  0x45   : > { %v977_v56 = vld [vmem:[%s1177_s7 + $0xc0] ss:$8 sps:$4 sm:$0xff]   ;;  %v978_v57 = vld [vmem:[%s1177_s7 + $0xb4] ss:$8 sps:$4 sm:$0xff]   ;;  %v980_v58 = vld [vmem:[%s1177_s7 + $0xb0] ss:$8 sps:$4 sm:$0xff]  }
  0x46   : > { %v981_v59 = vld [vmem:[%s1177_s7 + $0xa4] ss:$8 sps:$4 sm:$0xff]   ;;  %v983_v60 = vld [vmem:[%s1177_s7 + $0xa0] ss:$8 sps:$4 sm:$0xff]   ;;  %v984_v61 = vld [vmem:[%s1177_s7 + $0x94] ss:$8 sps:$4 sm:$0xff]  }
  0x47   : > { %636 = vmatpush1.bf16.msra.mxu0 %v950_v38  ;;  %v986_v62 = vld [vmem:[%s1177_s7 + $0x90] ss:$8 sps:$4 sm:$0xff]   ;;  %v987_v63 = vld [vmem:[%s1177_s7 + $0x84] ss:$8 sps:$4 sm:$0xff]   ;;  %v989_v0 = vld [vmem:[%s1177_s7 + $0x80] ss:$8 sps:$4 sm:$0xff]  }
  0x48   : > { %637 = vmatprep.subr.bf16.mxu0 %v951_v39  ;;  %v990_v1 = vld [vmem:[%s1241_s0] ss:$8 sps:$4 sm:$0xff]   ;;  %s1253_s10 = smov (!%p409_p11, %s860_s10), 7  ;;  %v692_v3 = vshrl.u32 %v691_v2, 7  ;;  %s901_s12 = sshll.u32 (%p1088_p6), %s1023_s14, 4 }
  0x49   : > { %s411_s19 = scalar_lea.vmem %s1243_s2, %s1253_s10  ;;  %s721_s26 = scalar_lea.vmem (%p1088_p6), %s1244_s3, %s901_s12 }
  0x4a   : > { %v693_v4 = vsub.s32 0, %v692_v3  ;;  %v689_v5 = vld [vmem:[%s411_s19] sm:$0x3]  ;;  %v697_v6 = vsub.s32 1, %v692_v3 }
  0x4b   : > { %638 = vmatpush1.bf16.msra.mxu0 %v953_v40 }
  0x4c   : > { %639 = vmatprep.subr.bf16.mxu0 %v954_v41  ;;  %v694_v7 = vrot.slane %v689_v5, %v693_v4  ;;  %v698_v8 = vrot.slane %v689_v5, %v697_v6 }
  0x4f   : > { %640 = vmatpush1.bf16.msra.mxu0 %v956_v42 }
  0x50   : > { %641 = vmatprep.subr.bf16.mxu0 %v957_v43 }
  0x53   : > { %642 = vmatpush1.bf16.msra.mxu0 %v959_v44 }
  0x54   : > { %643 = vmatprep.subr.bf16.mxu0 %v960_v45 }
  0x57   : > { %644 = vmatpush1.bf16.msra.mxu0 %v962_v46 }
  0x58   : > { %645 = vmatprep.subr.bf16.mxu0 %v963_v47 }
  0x5b   : > { %646 = vmatpush1.bf16.msra.mxu0 %v965_v48 }
  0x5c   : > { %647 = vmatprep.subr.bf16.mxu0 %v966_v49 }
  0x5f   : > { %648 = vmatpush2.bf16.msra.mxu0 %v968_v50 }
  0x60   : > { %649 = vmatprep.subr.bf16.mxu0 %v969_v51 }
  0x63   : > { %650 = vmatpush2.bf16.msra.mxu0 %v971_v52 }
  0x64   : > { %651 = vmatprep.subr.bf16.mxu0 %v972_v53 }
  0x67   : > { %652 = vmatpush2.bf16.msra.mxu0 %v974_v54 }
  0x68   : > { %653 = vmatprep.subr.bf16.mxu0 %v975_v55 }
  0x6b   : > { %654 = vmatpush2.bf16.msra.mxu0 %v977_v56 }
  0x6c   : > { %655 = vmatprep.subr.bf16.mxu0 %v978_v57 }
  0x6f   : > { %656 = vmatpush2.bf16.msra.mxu0 %v980_v58 }
  0x70   : > { %657 = vmatprep.subr.bf16.mxu0 %v981_v59 }
  0x73   : > { %658 = vmatpush2.bf16.msra.mxu0 %v983_v60 }
  0x74   : > { %659 = vmatprep.subr.bf16.mxu0 %v984_v61 }
  0x77   : > { %660 = vmatpush2.bf16.msra.mxu0 %v986_v62 }
  0x78   : > { %661 = vmatprep.subr.bf16.mxu0 %v987_v63 }
  0x7b   : > { %662 = vmatpush2.bf16.msra.mxu0 %v989_v0 }
  0x7e   : > { %664 = vmatmul.mubr.bf16.vlgmr.msra.gmra.mxu0 %v990_v1 }
 0x13e   : > { %v665_v9 = vpop.f32.mrf.mxu0 }
 0x13f   : > { %v701_v10 = vadd.f32 %v694_v7, %v665_v9 }
 0x140   : > { %v667_v11 = vpop.f32.mrf.mxu0 }
 0x141   : > { %705 = vst [vmem:[%s393_s23] sm:$0xff] %v701_v10  ;;  %v702_v12 = vadd.f32 %v698_v8, %v667_v11 }
 0x142   : > { %v669_v13 = vpop.f32.mrf.mxu0 }
 0x143   : > { %706 = vst [vmem:[%s393_s23 + $0x8] sm:$0xff] %v702_v12  ;;  %v703_v14 = vadd.f32 %v694_v7, %v669_v13  ;;  %715 = sbr.rel (!%p1088_p6) target bundleno = 336 (0x150), region = 82 }
 0x144   : > { %v671_v15 = vpop.f32.mrf.mxu0 }
 0x145   : > { %707 = vst [vmem:[%s393_s23 + $0x10] sm:$0xff] %v703_v14  ;;  %v704_v16 = vadd.f32 %v698_v8, %v671_v15 }
 0x147   : > { %708 = vst [vmem:[%s393_s23 + $0x18] sm:$0xff] %v704_v16 }
 0x148   : > { %v734_v17 = vld [vmem:[%s393_s23] sm:$0xff] }
 0x149   : > { %735 = vst [vmem:[%s721_s26] sm:$0xff] %v734_v17 }
 0x14a   : > { %v736_v18 = vld [vmem:[%s393_s23 + $0x8] sm:$0xff] }
 0x14b   : > { %737 = vst [vmem:[%s721_s26 + $0x8] sm:$0xff] %v736_v18 }
 0x14c   : > { %v738_v19 = vld [vmem:[%s393_s23 + $0x10] sm:$0xff] }
 0x14d   : > { %739 = vst [vmem:[%s721_s26 + $0x40] sm:$0xff] %v738_v19 }
 0x14e   : > { %v740_v20 = vld [vmem:[%s393_s23 + $0x18] sm:$0xff] }
 0x14f   : > { %741 = vst [vmem:[%s721_s26 + $0x48] sm:$0xff] %v740_v20 }
 0x150 PF: > { %s13_s16 = sadd.s32 1, %s1031_s16   ;;  %s1246_s12 = smov %s1019_s13 }
 0x151   : > { %p10_p12 = scmp.ge.s32.totalorder %s13_s16, 6   ;;  %s1247_s13 = smov %s1093_s22 }
 0x152   : > { %s1248_s14 = smov %s1027_s15  ;;  %s1249_s15 = smov %s1251_s17 }
 0x153   :  { %12 = sbr.rel (!%p10_p12) target bundleno = 3 (0x3), region = 142 }

// kernel: asr_forward.13
= control target key start
LH: loop header
LB: loop body
LE: loop exit
PB: predicated region body
PF: predicated region fallthrough
CT: control target
= control target key end

     0   :  { %s371_s1 = inlined_call_operand.vmem [shape: bf16[256,128], index: 1, kind: input, shape index: {}]   ;;  %s372_s0 = inlined_call_operand.vmem [shape: bf16[16,256], index: 0, kind: input, shape index: {}]   ;;  %s373_s2 = inlined_call_operand.vmem [shape: f32[1,128], index: 2, kind: input, shape index: {}]   ;;  %s374_s3 = inlined_call_operand.vmem [shape: f32[16,128], index: 3, kind: output, shape index: {}]  }
   0x1   :  { %v269_v0 = vld [vmem:[%s371_s1 + $0x78] sm:$0xff]   ;;  %v271_v2 = vld [vmem:[%s371_s1 + $0x70] sm:$0xff]   ;;  %v273_v4 = vld [vmem:[%s371_s1 + $0x68] sm:$0xff]  }
   0x2   :  { %v270_v1 = vld [vmem:[%s371_s1 + $0x38] sm:$0xff]   ;;  %247 = vmatprep.subr.bf16.mxu0 %v269_v0  ;;  %v272_v3 = vld [vmem:[%s371_s1 + $0x30] sm:$0xff]   ;;  %v274_v5 = vld [vmem:[%s371_s1 + $0x28] sm:$0xff]  }
   0x3   :  { %248 = vmatpush3.bf16.msra.mxu0 %v270_v1  ;;  %v275_v6 = vld [vmem:[%s371_s1 + $0x60] sm:$0xff]   ;;  %v277_v8 = vld [vmem:[%s371_s1 + $0x58] sm:$0xff]   ;;  %v279_v10 = vld [vmem:[%s371_s1 + $0x50] sm:$0xff]  }
   0x4   :  { %249 = vmatprep.subr.bf16.mxu0 %v271_v2  ;;  %v276_v7 = vld [vmem:[%s371_s1 + $0x20] sm:$0xff]   ;;  %v278_v9 = vld [vmem:[%s371_s1 + $0x18] sm:$0xff]   ;;  %v280_v12 = vld [vmem:[%s371_s1 + $0x10] sm:$0xff]  }
   0x5   :  { %v287_v11 = vld [vmem:[%s372_s0 + $0x4] ss:$8 sps:$4 sm:$0xff]   ;;  %v285_v17 = vld [vmem:[%s372_s0] ss:$8 sps:$4 sm:$0xff]  }
   0x6   :  { %195 = vmatprep.mubr.bf16.mxu0 %v287_v11  ;;  %v281_v13 = vld [vmem:[%s371_s1 + $0x48] sm:$0xff]   ;;  %v283_v15 = vld [vmem:[%s371_s1 + $0x40] sm:$0xff]  }
   0x7   :  { %250 = vmatpush3.bf16.msra.mxu0 %v272_v3  ;;  %v282_v14 = vld [vmem:[%s371_s1 + $0x8] sm:$0xff]   ;;  %v284_v16 = vld [vmem:[%s371_s1] sm:$0xff]  }
   0x8   :  { %251 = vmatprep.subr.bf16.mxu0 %v273_v4  ;;  %v246_v20 = vld [vmem:[%s373_s2] ss:$0 sm:$0xff] }
   0xb   :  { %252 = vmatpush3.bf16.msra.mxu0 %v274_v5 }
   0xc   :  { %253 = vmatprep.subr.bf16.mxu0 %v275_v6 }
   0xf   :  { %254 = vmatpush3.bf16.msra.mxu0 %v276_v7 }
  0x10   :  { %255 = vmatprep.subr.bf16.mxu0 %v277_v8 }
  0x13   :  { %256 = vmatpush3.bf16.msra.mxu0 %v278_v9 }
  0x14   :  { %257 = vmatprep.subr.bf16.mxu0 %v279_v10 }
  0x17   :  { %258 = vmatpush3.bf16.msra.mxu0 %v280_v12 }
  0x18   :  { %259 = vmatprep.subr.bf16.mxu0 %v281_v13 }
  0x1b   :  { %260 = vmatpush3.bf16.msra.mxu0 %v282_v14 }
  0x1c   :  { %261 = vmatprep.subr.bf16.mxu0 %v283_v15 }
  0x1f   :  { %262 = vmatpush3.bf16.msra.mxu0 %v284_v16 }
  0x22   :  { %196 = vmatmul.mubr.bf16.vlgmr.msra.gmra.mxu0 %v285_v17 }
  0xe2   :  { %v263_v18 = vpop.f32.mrf.mxu0 }
  0xe4   :  { %v264_v19 = vpop.f32.mrf.mxu0 }
  0xe5   :  { %v265_v21 = vadd.f32 %v264_v19, %v263_v18 }
  0xe6   :  { %v266_v22 = vpop.f32.mrf.mxu0 }
  0xe7   :  { %v220_v23 = vadd.f32 %v265_v21, %v246_v20 }
  0xe8   :  { %v267_v24 = vpop.f32.mrf.mxu0 }
  0xe9   :  { %222 = vst [vmem:[%s374_s3] sm:$0xff] %v220_v23  ;;  %v268_v25 = vadd.f32 %v267_v24, %v266_v22 }
  0xeb   :  { %v221_v26 = vadd.f32 %v268_v25, %v246_v20 }
  0xed   :  { %223 = vst [vmem:[%s374_s3 + $0x8] sm:$0xff] %v221_v26 }

</bundles_post_ra>
